<compile_context>
chip_gen: v7x
topology: tpu7x:2x2x1
jax: 0.10.0
libtpu: 0.0.40
codegen_flags: <defaults>
</compile_context>

<pallas_src>
import functools

import numpy as np
import jax
import jax.numpy as jnp
from jax.experimental import pallas as pl
from jax.experimental.pallas import tpu as pltpu

_vmem = functools.partial(pl.BlockSpec, memory_space=pltpu.MemorySpace.VMEM)

DEFAULT_ARCH = ((3, 10, 1), (3, 15, 2), (3, 20, 1))
NUM_CLASSES = 2
FLAT_FEATURES_LEN = 20 * 6 * 6          # 720 (32x32 input, default arch)
_BLK = 256                              # per-sample 16x16 block in flat layout
_TAIL = 64                              # lane tail so shifted tap reads stay in-bounds
_EPS = 1e-5


# ------------------------------ Pallas kernel -------------------------------

def _net_kernel(n,
                xph_ref,
                w1_ref, s1_ref, t1_ref,
                w2_ref, s2_ref, t2_ref,
                w3_ref, s3_ref, t3_ref,
                wf1_ref, bf1_ref, wf2_ref, bf2_ref, wf3_ref, bf3_ref,
                out_ref,
                p00, p01, p10, p11, h2_ref, h3_ref, fcin_ref):
    L = n * _BLK
    c1 = w1_ref.shape[1]   # 10
    c2 = w2_ref.shape[1]   # 15
    c3 = w3_ref.shape[1]   # 20

    # Scratch is read beyond the freshly written region (shifted taps, tails),
    # so zero it once to keep every lane finite.
    for ref in (p00, p01, p10, p11, h2_ref, h3_ref, fcin_ref):
        ref[...] = jnp.zeros_like(ref)

    # Validity mask of a 16x16 block: row 15 / col 15 hold conv "wrap" garbage.
    lane = jax.lax.broadcasted_iota(jnp.int32, (1, L), 1)
    blk = lane & (_BLK - 1)
    valid15 = ((blk >> 4) < 15) & ((blk & 15) < 15)

    # ---- conv1 (3->10, k3, s1, p0) + BN + ReLU, as 4 stride-2 phase outputs.
    # Phase (pa,pb)[a,b] = conv1_out[2a+pa, 2b+pb]; after masking + a shifted
    # store it becomes conv2's zero-padded input phase Q_{1-pa,1-pb}.
    xplanes = [xph_ref[i] for i in range(4)]          # X[q::2, r::2], (3, L+T)
    s1, t1 = s1_ref[...], t1_ref[...]
    dst_of_phase = {(0, 0): (p11, 0), (0, 1): (p10, 1),
                    (1, 0): (p01, 16), (1, 1): (p00, 17)}
    for pa in (0, 1):
        for pb in (0, 1):
            acc = jnp.zeros((c1, L), jnp.float32)
            for ki in range(3):
                for kj in range(3):
                    q, du = (pa + ki) % 2, (pa + ki) // 2
                    r_, dv = (pb + kj) % 2, (pb + kj) // 2
                    d = du * 16 + dv
                    acc = acc + jnp.dot(
                        w1_ref[ki * 3 + kj], xplanes[2 * q + r_][:, d:d + L],
                        preferred_element_type=jnp.float32)
            h = jnp.maximum(acc * s1 + t1, 0.0)
            h = jnp.where(valid15, h, 0.0)
            dst, off = dst_of_phase[(pa, pb)]
            dst[:, off:off + L] = h

    # ---- conv2 (10->15, k3, s2, p1) + BN + ReLU on the phase-decomposed,
    # already zero-padded input: every tap is a contiguous slice.
    phase_in = {(0, 0): p00, (0, 1): p01, (1, 0): p10, (1, 1): p11}
    acc = jnp.zeros((c2, L), jnp.float32)
    for ki in range(3):
        for kj in range(3):
            d = (ki // 2) * 16 + (kj // 2)
            acc = acc + jnp.dot(
                w2_ref[ki * 3 + kj], phase_in[(ki % 2, kj % 2)][:, d:d + L],
                preferred_element_type=jnp.float32)
    h2_ref[:, 0:L] = jnp.maximum(acc * s2_ref[...] + t2_ref[...], 0.0)

    # ---- conv3 (15->20, k3, s1, p0) + BN + ReLU.
    acc = jnp.zeros((c3, L), jnp.float32)
    for ki in range(3):
        for kj in range(3):
            d = ki * 16 + kj
            acc = acc + jnp.dot(
                w3_ref[ki * 3 + kj], h2_ref[:, d:d + L],
                preferred_element_type=jnp.float32)
    h3_ref[:, 0:L] = jnp.maximum(acc * s3_ref[...] + t3_ref[...], 0.0)

    # ---- 2x2 / stride-2 max pool at full resolution (max of 4 shifted
    # slices); the stride-2 / flatten selection lives in the fc1 weight.
    pooled = jnp.maximum(
        jnp.maximum(h3_ref[:, 0:L], h3_ref[:, 1:1 + L]),
        jnp.maximum(h3_ref[:, 16:16 + L], h3_ref[:, 17:17 + L]))

    # ---- regroup (C, N*256) -> (N, C*256) rows for the MLP: n*c3 small
    # lane-aligned copies (trivial at this size, avoids any relayout op).
    for ni in range(n):
        for c in range(c3):
            fcin_ref[ni:ni + 1, c * _BLK:(c + 1) * _BLK] = (
                pooled[c:c + 1, ni * _BLK:(ni + 1) * _BLK])

    # ---- fc1 -> fc2 -> fc3 (hidden dims padded to 128, bf16 MXU operands,
    # f32 accumulation / epilogues).
    # TODO(synk): training-mode Dropout(0.5) not implemented; eval-mode
    # identity (standard inference semantics) is used.
    xf = fcin_ref[...].astype(jnp.bfloat16)
    h = jnp.maximum(
        jnp.dot(xf, wf1_ref[...], preferred_element_type=jnp.float32)
        + bf1_ref[...], 0.0)
    h = jnp.maximum(
        jnp.dot(h.astype(jnp.bfloat16), wf2_ref[...],
                preferred_element_type=jnp.float32) + bf2_ref[...], 0.0)
    out_ref[...] = (
        jnp.dot(h.astype(jnp.bfloat16), wf3_ref[...],
                preferred_element_type=jnp.float32) + bf3_ref[...])


# -------------------------------- Wrapper ------------------------------------

def _fold_bn(b, gamma, beta, mean, var):
    inv_std = gamma / jnp.sqrt(var + _EPS)
    scale = inv_std
    shift = (b - mean) * inv_std + beta
    return scale.reshape(-1, 1), shift.reshape(-1, 1)


def net_forward(x_nchw, params):
    """Single fused pallas_call for the whole network."""
    n = x_nchw.shape[0]
    assert x_nchw.shape[1:] == (3, 32, 32), "kernel is built for 3x32x32 input"
    L = n * _BLK
    c1 = params["convs"][0][0].shape[-1]
    c2 = params["convs"][1][0].shape[-1]
    c3 = params["convs"][2][0].shape[-1]

    # Input phase planes X[:, :, q::2, r::2] in channel-major flat layout
    # (3, n*16*16): one-time layout plumbing on the tiny network input.
    planes = []
    for q in (0, 1):
        for r in (0, 1):
            xp = x_nchw[:, :, q::2, r::2]                        # (n,3,16,16)
            planes.append(jnp.transpose(xp, (1, 0, 2, 3)).reshape(3, L))
    xph = jnp.pad(jnp.stack(planes, 0), ((0, 0), (0, 0), (0, _TAIL)))

    # Conv weights as 9 (Cout, Cin) tap matrices + BN folded to scale/shift.
    conv_args = []
    for (w, b, gamma, beta, mean, var, _stride, _padding) in params["convs"]:
        k, _, cin, cout = w.shape
        taps = jnp.transpose(w, (0, 1, 3, 2)).reshape(k * k, cout, cin)
        scale, shift = _fold_bn(b, gamma, beta, mean, var)
        conv_args += [taps, scale, shift]

    # fc1 weight scattered onto the pooled buffer's lanes: torch flatten index
    # c*36 + po*6 + qo  ->  lane  c*256 + 32*po + 2*qo.  Garbage lanes hit
    # zero rows; hidden dims padded to 128; fc weights shipped as bf16.
    (w1, b1), (w2, b2), (w3, b3) = params["fc"]
    i = np.arange(FLAT_FEATURES_LEN)
    rows = (i // 36) * _BLK + ((i // 6) % 6) * 32 + (i % 6) * 2
    wf1 = jnp.zeros((c3 * _BLK, 120), jnp.float32).at[rows].set(w1)
    wf1 = jnp.pad(wf1, ((0, 0), (0, 8)))                 # (5120, 128)
    bf1 = jnp.pad(b1.reshape(1, -1), ((0, 0), (0, 8)))
    wf2 = jnp.pad(w2, ((0, 8), (0, 44)))                 # (128, 128)
    bf2 = jnp.pad(b2.reshape(1, -1), ((0, 0), (0, 44)))
    wf3 = jnp.pad(w3, ((0, 44), (0, 0)))                 # (128, num_classes)
    bf3 = b3.reshape(1, -1)

    return pl.pallas_call(
        functools.partial(_net_kernel, n),
        out_shape=jax.ShapeDtypeStruct((n, w3.shape[1]), jnp.float32),
        in_specs=[_vmem()] * 16,
        out_specs=_vmem(),
        scratch_shapes=[
            pltpu.VMEM((c1, L + _TAIL), jnp.float32),   # conv2 input phase 00
            pltpu.VMEM((c1, L + _TAIL), jnp.float32),   # phase 01
            pltpu.VMEM((c1, L + _TAIL), jnp.float32),   # phase 10
            pltpu.VMEM((c1, L + _TAIL), jnp.float32),   # phase 11
            pltpu.VMEM((c2, L + _TAIL), jnp.float32),   # conv3 input
            pltpu.VMEM((c3, L + _TAIL), jnp.float32),   # conv3 output
            pltpu.VMEM((n, c3 * _BLK), jnp.float32),    # fc input rows
        ],
    )(xph, *conv_args,
      wf1.astype(jnp.bfloat16), bf1,
      wf2.astype(jnp.bfloat16), bf2,
      wf3.astype(jnp.bfloat16), bf3)


# --------------------------- Parameters / reference --------------------------

def init_params(key, conv_layers=DEFAULT_ARCH, num_classes=NUM_CLASSES):
    convs = []
    cin = 3
    for (k, cout, stride) in conv_layers:
        key, kw, kb, kg, kbe, km, kv = jax.random.split(key, 7)
        fan_in = cin * k * k
        w = jax.random.normal(kw, (k, k, cin, cout), jnp.float32) / jnp.sqrt(
            jnp.float32(fan_in))
        b = 0.05 * jax.random.normal(kb, (cout,), jnp.float32)
        gamma = 1.0 + 0.1 * jax.random.normal(kg, (cout,), jnp.float32)
        beta = 0.05 * jax.random.normal(kbe, (cout,), jnp.float32)
        mean = 0.05 * jax.random.normal(km, (cout,), jnp.float32)
        var = 1.0 + 0.1 * jnp.abs(jax.random.normal(kv, (cout,), jnp.float32))
        padding = k // 2 if stride > 1 else 0
        convs.append((w, b, gamma, beta, mean, var, stride, padding))
        cin = cout

    dims = [FLAT_FEATURES_LEN, 120, 84, num_classes]
    fc = []
    for i in range(3):
        key, kw, kb = jax.random.split(key, 3)
        w = jax.random.normal(kw, (dims[i], dims[i + 1]),
                              jnp.float32) / jnp.sqrt(jnp.float32(dims[i]))
        b = 0.05 * jax.random.normal(kb, (dims[i + 1],), jnp.float32)
        fc.append((w, b))
    return {"convs": convs, "fc": fc}


def net_reference(x_nchw, params):
    """Pure-JAX reference (XLA conv/matmul) mirroring the kernel's bf16 fc."""
    h = x_nchw
    for (w, b, gamma, beta, mean, var, stride, padding) in params["convs"]:
        h = jax.lax.conv_general_dilated(
            h, w, window_strides=(stride, stride),
            padding=((padding, padding), (padding, padding)),
            dimension_numbers=("NCHW", "HWIO", "NCHW"),
            precision=jax.lax.Precision.HIGHEST)
        h = h + b.reshape(1, -1, 1, 1)
        h = (h - mean.reshape(1, -1, 1, 1)) * (
            gamma.reshape(1, -1, 1, 1) /
            jnp.sqrt(var.reshape(1, -1, 1, 1) + _EPS)) + beta.reshape(1, -1, 1, 1)
        h = jnp.maximum(h, 0.0)
    hh, ww = h.shape[2] // 2 * 2, h.shape[3] // 2 * 2
    h = h[:, :, :hh, :ww]
    h = jnp.maximum(jnp.maximum(h[:, :, 0::2, 0::2], h[:, :, 0::2, 1::2]),
                    jnp.maximum(h[:, :, 1::2, 0::2], h[:, :, 1::2, 1::2]))
    h = h.reshape(h.shape[0], -1)

    def bf(v):
        return v.astype(jnp.bfloat16).astype(jnp.float32)

    (w1, b1), (w2, b2), (w3, b3) = params["fc"]
    hp = jax.lax.Precision.HIGHEST
    h = jnp.maximum(jnp.dot(bf(h), bf(w1), precision=hp) + b1, 0.0)
    h = jnp.maximum(jnp.dot(bf(h), bf(w2), precision=hp) + b2, 0.0)
    return jnp.dot(bf(h), bf(w3), precision=hp) + b3


if __name__ == "__main__":
    key = jax.random.PRNGKey(0)
    kparam, kx = jax.random.split(key)
    params = init_params(kparam)
    x = jax.random.normal(kx, (2, 3, 32, 32), jnp.float32)   # NCHW like torch

    out = jax.block_until_ready(jax.jit(net_forward)(x, params))
    assert out.shape == (2, NUM_CLASSES) and out.dtype == jnp.float32

    ref = net_reference(x, params)
    assert jnp.allclose(out, ref, atol=5e-2, rtol=5e-2), (
        "max abs err %.4f" % float(jnp.max(jnp.abs(out - ref))))
    print("KERNEL_OK")
</pallas_src>

<mosaic_0001>
module attributes {stable_mosaic.version = 11 : i64} {
  func.func @_net_kernel(%arg0: memref<4x3x576xf32, #tpu.memory_space<vmem>>, %arg1: memref<9x10x3xf32, #tpu.memory_space<vmem>>, %arg2: memref<10x1xf32, #tpu.memory_space<vmem>>, %arg3: memref<10x1xf32, #tpu.memory_space<vmem>>, %arg4: memref<9x15x10xf32, #tpu.memory_space<vmem>>, %arg5: memref<15x1xf32, #tpu.memory_space<vmem>>, %arg6: memref<15x1xf32, #tpu.memory_space<vmem>>, %arg7: memref<9x20x15xf32, #tpu.memory_space<vmem>>, %arg8: memref<20x1xf32, #tpu.memory_space<vmem>>, %arg9: memref<20x1xf32, #tpu.memory_space<vmem>>, %arg10: memref<5120x128xbf16, #tpu.memory_space<vmem>>, %arg11: memref<1x128xf32, #tpu.memory_space<vmem>>, %arg12: memref<128x128xbf16, #tpu.memory_space<vmem>>, %arg13: memref<1x128xf32, #tpu.memory_space<vmem>>, %arg14: memref<128x2xbf16, #tpu.memory_space<vmem>>, %arg15: memref<1x2xf32, #tpu.memory_space<vmem>>, %arg16: memref<2x2xf32, #tpu.memory_space<vmem>>, %arg17: memref<10x576xf32, #tpu.memory_space<vmem>>, %arg18: memref<10x576xf32, #tpu.memory_space<vmem>>, %arg19: memref<10x576xf32, #tpu.memory_space<vmem>>, %arg20: memref<10x576xf32, #tpu.memory_space<vmem>>, %arg21: memref<15x576xf32, #tpu.memory_space<vmem>>, %arg22: memref<20x576xf32, #tpu.memory_space<vmem>>, %arg23: memref<2x5120xf32, #tpu.memory_space<vmem>>) attributes {dimension_semantics = [], scalar_prefetch = 0 : i64, scratch_operands = 7 : i64, tpu.core_type = #tpu.core_type<tc>} {
    %cst = arith.constant 0.000000e+00 : f32
    %0 = vector.broadcast %cst : f32 to vector<10x576xf32>
    %c0 = arith.constant 0 : index
    %c0_0 = arith.constant 0 : index
    %1 = vector.load %arg17[%c0, %c0_0] : memref<10x576xf32, #tpu.memory_space<vmem>>, vector<10x576xf32>
    tpu.vector_store %arg17[%c0, %c0_0], %0 {strides = array<i32>} : memref<10x576xf32, #tpu.memory_space<vmem>>, vector<10x576xf32>,
    %cst_1 = arith.constant 0.000000e+00 : f32
    %2 = vector.broadcast %cst_1 : f32 to vector<10x576xf32>
    %c0_2 = arith.constant 0 : index
    %c0_3 = arith.constant 0 : index
    %3 = vector.load %arg18[%c0_2, %c0_3] : memref<10x576xf32, #tpu.memory_space<vmem>>, vector<10x576xf32>
    tpu.vector_store %arg18[%c0_2, %c0_3], %2 {strides = array<i32>} : memref<10x576xf32, #tpu.memory_space<vmem>>, vector<10x576xf32>,
    %cst_4 = arith.constant 0.000000e+00 : f32
    %4 = vector.broadcast %cst_4 : f32 to vector<10x576xf32>
    %c0_5 = arith.constant 0 : index
    %c0_6 = arith.constant 0 : index
    %5 = vector.load %arg19[%c0_5, %c0_6] : memref<10x576xf32, #tpu.memory_space<vmem>>, vector<10x576xf32>
    tpu.vector_store %arg19[%c0_5, %c0_6], %4 {strides = array<i32>} : memref<10x576xf32, #tpu.memory_space<vmem>>, vector<10x576xf32>,
    %cst_7 = arith.constant 0.000000e+00 : f32
    %6 = vector.broadcast %cst_7 : f32 to vector<10x576xf32>
    %c0_8 = arith.constant 0 : index
    %c0_9 = arith.constant 0 : index
    %7 = vector.load %arg20[%c0_8, %c0_9] : memref<10x576xf32, #tpu.memory_space<vmem>>, vector<10x576xf32>
    tpu.vector_store %arg20[%c0_8, %c0_9], %6 {strides = array<i32>} : memref<10x576xf32, #tpu.memory_space<vmem>>, vector<10x576xf32>,
    %cst_10 = arith.constant 0.000000e+00 : f32
    %8 = vector.broadcast %cst_10 : f32 to vector<15x576xf32>
    %c0_11 = arith.constant 0 : index
    %c0_12 = arith.constant 0 : index
    %9 = vector.load %arg21[%c0_11, %c0_12] : memref<15x576xf32, #tpu.memory_space<vmem>>, vector<15x576xf32>
    tpu.vector_store %arg21[%c0_11, %c0_12], %8 {strides = array<i32>} : memref<15x576xf32, #tpu.memory_space<vmem>>, vector<15x576xf32>,
    %cst_13 = arith.constant 0.000000e+00 : f32
    %10 = vector.broadcast %cst_13 : f32 to vector<20x576xf32>
    %c0_14 = arith.constant 0 : index
    %c0_15 = arith.constant 0 : index
    %11 = vector.load %arg22[%c0_14, %c0_15] : memref<20x576xf32, #tpu.memory_space<vmem>>, vector<20x576xf32>
    tpu.vector_store %arg22[%c0_14, %c0_15], %10 {strides = array<i32>} : memref<20x576xf32, #tpu.memory_space<vmem>>, vector<20x576xf32>,
    %cst_16 = arith.constant 0.000000e+00 : f32
    %12 = vector.broadcast %cst_16 : f32 to vector<2x5120xf32>
    %c0_17 = arith.constant 0 : index
    %c0_18 = arith.constant 0 : index
    %13 = vector.load %arg23[%c0_17, %c0_18] : memref<2x5120xf32, #tpu.memory_space<vmem>>, vector<2x5120xf32>
    tpu.vector_store %arg23[%c0_17, %c0_18], %12 {strides = array<i32>} : memref<2x5120xf32, #tpu.memory_space<vmem>>, vector<2x5120xf32>,
    %14 = tpu.iota {dimensions = array<i32: 1>} : vector<1x512xi32>
    %c255_i32 = arith.constant 255 : i32
    %15 = vector.broadcast %c255_i32 : i32 to vector<1x512xi32>
    %16 = arith.andi %14, %15 : vector<1x512xi32>
    %c4_i32 = arith.constant 4 : i32
    %17 = vector.broadcast %c4_i32 : i32 to vector<1x512xi32>
    %18 = arith.shrsi %16, %17 : vector<1x512xi32>
    %c15_i32 = arith.constant 15 : i32
    %19 = vector.broadcast %c15_i32 : i32 to vector<1x512xi32>
    %20 = arith.cmpi slt, %18, %19 : vector<1x512xi32>
    %c15_i32_19 = arith.constant 15 : i32
    %21 = vector.broadcast %c15_i32_19 : i32 to vector<1x512xi32>
    %22 = arith.andi %16, %21 : vector<1x512xi32>
    %c15_i32_20 = arith.constant 15 : i32
    %23 = vector.broadcast %c15_i32_20 : i32 to vector<1x512xi32>
    %24 = arith.cmpi slt, %22, %23 : vector<1x512xi32>
    %25 = arith.andi %20, %24 : vector<1x512xi1>
    %c0_21 = arith.constant 0 : index
    %c0_22 = arith.constant 0 : index
    %c0_23 = arith.constant 0 : index
    %26 = vector.load %arg0[%c0_21, %c0_22, %c0_23] : memref<4x3x576xf32, #tpu.memory_space<vmem>>, vector<1x3x576xf32>
    %27 = vector.shape_cast %26 : vector<1x3x576xf32> to vector<3x576xf32>
    %c1 = arith.constant 1 : index
    %c0_24 = arith.constant 0 : index
    %c0_25 = arith.constant 0 : index
    %28 = vector.load %arg0[%c1, %c0_24, %c0_25] : memref<4x3x576xf32, #tpu.memory_space<vmem>>, vector<1x3x576xf32>
    %29 = vector.shape_cast %28 : vector<1x3x576xf32> to vector<3x576xf32>
    %c2 = arith.constant 2 : index
    %c0_26 = arith.constant 0 : index
    %c0_27 = arith.constant 0 : index
    %30 = vector.load %arg0[%c2, %c0_26, %c0_27] : memref<4x3x576xf32, #tpu.memory_space<vmem>>, vector<1x3x576xf32>
    %31 = vector.shape_cast %30 : vector<1x3x576xf32> to vector<3x576xf32>
    %c3 = arith.constant 3 : index
    %c0_28 = arith.constant 0 : index
    %c0_29 = arith.constant 0 : index
    %32 = vector.load %arg0[%c3, %c0_28, %c0_29] : memref<4x3x576xf32, #tpu.memory_space<vmem>>, vector<1x3x576xf32>
    %33 = vector.shape_cast %32 : vector<1x3x576xf32> to vector<3x576xf32>
    %c0_30 = arith.constant 0 : index
    %c0_31 = arith.constant 0 : index
    %34 = vector.load %arg2[%c0_30, %c0_31] : memref<10x1xf32, #tpu.memory_space<vmem>>, vector<10x1xf32>
    %c0_32 = arith.constant 0 : index
    %c0_33 = arith.constant 0 : index
    %35 = vector.load %arg3[%c0_32, %c0_33] : memref<10x1xf32, #tpu.memory_space<vmem>>, vector<10x1xf32>
    %cst_34 = arith.constant 0.000000e+00 : f32
    %36 = vector.broadcast %cst_34 : f32 to vector<10x512xf32>
    %c0_35 = arith.constant 0 : index
    %c0_36 = arith.constant 0 : index
    %c0_37 = arith.constant 0 : index
    %37 = vector.load %arg1[%c0_35, %c0_36, %c0_37] : memref<9x10x3xf32, #tpu.memory_space<vmem>>, vector<1x10x3xf32>
    %38 = vector.shape_cast %37 : vector<1x10x3xf32> to vector<10x3xf32>
    %39 = vector.extract_strided_slice %27 {offsets = [0, 0], sizes = [3, 512], strides = [1, 1]} : vector<3x576xf32> to vector<3x512xf32>
    %cst_38 = arith.constant dense<0.000000e+00> : vector<10x512xf32>
    %40 = tpu.matmul %38, %39, %cst_38 {dimension_numbers = #tpu.dot_dimension_numbers<[1], [0], [0], [1], [0, 0, 1, 1], [], []>} : vector<10x3xf32>, vector<3x512xf32>, vector<10x512xf32> -> vector<10x512xf32>
    %41 = arith.addf %36, %40 : vector<10x512xf32>
    %c1_39 = arith.constant 1 : index
    %c0_40 = arith.constant 0 : index
    %c0_41 = arith.constant 0 : index
    %42 = vector.load %arg1[%c1_39, %c0_40, %c0_41] : memref<9x10x3xf32, #tpu.memory_space<vmem>>, vector<1x10x3xf32>
    %43 = vector.shape_cast %42 : vector<1x10x3xf32> to vector<10x3xf32>
    %44 = vector.extract_strided_slice %29 {offsets = [0, 0], sizes = [3, 512], strides = [1, 1]} : vector<3x576xf32> to vector<3x512xf32>
    %cst_42 = arith.constant dense<0.000000e+00> : vector<10x512xf32>
    %45 = tpu.matmul %43, %44, %cst_42 {dimension_numbers = #tpu.dot_dimension_numbers<[1], [0], [0], [1], [0, 0, 1, 1], [], []>} : vector<10x3xf32>, vector<3x512xf32>, vector<10x512xf32> -> vector<10x512xf32>
    %46 = arith.addf %41, %45 : vector<10x512xf32>
    %c2_43 = arith.constant 2 : index
    %c0_44 = arith.constant 0 : index
    %c0_45 = arith.constant 0 : index
    %47 = vector.load %arg1[%c2_43, %c0_44, %c0_45] : memref<9x10x3xf32, #tpu.memory_space<vmem>>, vector<1x10x3xf32>
    %48 = vector.shape_cast %47 : vector<1x10x3xf32> to vector<10x3xf32>
    %49 = vector.extract_strided_slice %27 {offsets = [0, 1], sizes = [3, 512], strides = [1, 1]} : vector<3x576xf32> to vector<3x512xf32>
    %cst_46 = arith.constant dense<0.000000e+00> : vector<10x512xf32>
    %50 = tpu.matmul %48, %49, %cst_46 {dimension_numbers = #tpu.dot_dimension_numbers<[1], [0], [0], [1], [0, 0, 1, 1], [], []>} : vector<10x3xf32>, vector<3x512xf32>, vector<10x512xf32> -> vector<10x512xf32>
    %51 = arith.addf %46, %50 : vector<10x512xf32>
    %c3_47 = arith.constant 3 : index
    %c0_48 = arith.constant 0 : index
    %c0_49 = arith.constant 0 : index
    %52 = vector.load %arg1[%c3_47, %c0_48, %c0_49] : memref<9x10x3xf32, #tpu.memory_space<vmem>>, vector<1x10x3xf32>
    %53 = vector.shape_cast %52 : vector<1x10x3xf32> to vector<10x3xf32>
    %54 = vector.extract_strided_slice %31 {offsets = [0, 0], sizes = [3, 512], strides = [1, 1]} : vector<3x576xf32> to vector<3x512xf32>
    %cst_50 = arith.constant dense<0.000000e+00> : vector<10x512xf32>
    %55 = tpu.matmul %53, %54, %cst_50 {dimension_numbers = #tpu.dot_dimension_numbers<[1], [0], [0], [1], [0, 0, 1, 1], [], []>} : vector<10x3xf32>, vector<3x512xf32>, vector<10x512xf32> -> vector<10x512xf32>
    %56 = arith.addf %51, %55 : vector<10x512xf32>
    %c4 = arith.constant 4 : index
    %c0_51 = arith.constant 0 : index
    %c0_52 = arith.constant 0 : index
    %57 = vector.load %arg1[%c4, %c0_51, %c0_52] : memref<9x10x3xf32, #tpu.memory_space<vmem>>, vector<1x10x3xf32>
    %58 = vector.shape_cast %57 : vector<1x10x3xf32> to vector<10x3xf32>
    %59 = vector.extract_strided_slice %33 {offsets = [0, 0], sizes = [3, 512], strides = [1, 1]} : vector<3x576xf32> to vector<3x512xf32>
    %cst_53 = arith.constant dense<0.000000e+00> : vector<10x512xf32>
    %60 = tpu.matmul %58, %59, %cst_53 {dimension_numbers = #tpu.dot_dimension_numbers<[1], [0], [0], [1], [0, 0, 1, 1], [], []>} : vector<10x3xf32>, vector<3x512xf32>, vector<10x512xf32> -> vector<10x512xf32>
    %61 = arith.addf %56, %60 : vector<10x512xf32>
    %c5 = arith.constant 5 : index
    %c0_54 = arith.constant 0 : index
    %c0_55 = arith.constant 0 : index
    %62 = vector.load %arg1[%c5, %c0_54, %c0_55] : memref<9x10x3xf32, #tpu.memory_space<vmem>>, vector<1x10x3xf32>
    %63 = vector.shape_cast %62 : vector<1x10x3xf32> to vector<10x3xf32>
    %64 = vector.extract_strided_slice %31 {offsets = [0, 1], sizes = [3, 512], strides = [1, 1]} : vector<3x576xf32> to vector<3x512xf32>
    %cst_56 = arith.constant dense<0.000000e+00> : vector<10x512xf32>
    %65 = tpu.matmul %63, %64, %cst_56 {dimension_numbers = #tpu.dot_dimension_numbers<[1], [0], [0], [1], [0, 0, 1, 1], [], []>} : vector<10x3xf32>, vector<3x512xf32>, vector<10x512xf32> -> vector<10x512xf32>
    %66 = arith.addf %61, %65 : vector<10x512xf32>
    %c6 = arith.constant 6 : index
    %c0_57 = arith.constant 0 : index
    %c0_58 = arith.constant 0 : index
    %67 = vector.load %arg1[%c6, %c0_57, %c0_58] : memref<9x10x3xf32, #tpu.memory_space<vmem>>, vector<1x10x3xf32>
    %68 = vector.shape_cast %67 : vector<1x10x3xf32> to vector<10x3xf32>
    %69 = vector.extract_strided_slice %27 {offsets = [0, 16], sizes = [3, 512], strides = [1, 1]} : vector<3x576xf32> to vector<3x512xf32>
    %cst_59 = arith.constant dense<0.000000e+00> : vector<10x512xf32>
    %70 = tpu.matmul %68, %69, %cst_59 {dimension_numbers = #tpu.dot_dimension_numbers<[1], [0], [0], [1], [0, 0, 1, 1], [], []>} : vector<10x3xf32>, vector<3x512xf32>, vector<10x512xf32> -> vector<10x512xf32>
    %71 = arith.addf %66, %70 : vector<10x512xf32>
    %c7 = arith.constant 7 : index
    %c0_60 = arith.constant 0 : index
    %c0_61 = arith.constant 0 : index
    %72 = vector.load %arg1[%c7, %c0_60, %c0_61] : memref<9x10x3xf32, #tpu.memory_space<vmem>>, vector<1x10x3xf32>
    %73 = vector.shape_cast %72 : vector<1x10x3xf32> to vector<10x3xf32>
    %74 = vector.extract_strided_slice %29 {offsets = [0, 16], sizes = [3, 512], strides = [1, 1]} : vector<3x576xf32> to vector<3x512xf32>
    %cst_62 = arith.constant dense<0.000000e+00> : vector<10x512xf32>
    %75 = tpu.matmul %73, %74, %cst_62 {dimension_numbers = #tpu.dot_dimension_numbers<[1], [0], [0], [1], [0, 0, 1, 1], [], []>} : vector<10x3xf32>, vector<3x512xf32>, vector<10x512xf32> -> vector<10x512xf32>
    %76 = arith.addf %71, %75 : vector<10x512xf32>
    %c8 = arith.constant 8 : index
    %c0_63 = arith.constant 0 : index
    %c0_64 = arith.constant 0 : index
    %77 = vector.load %arg1[%c8, %c0_63, %c0_64] : memref<9x10x3xf32, #tpu.memory_space<vmem>>, vector<1x10x3xf32>
    %78 = vector.shape_cast %77 : vector<1x10x3xf32> to vector<10x3xf32>
    %79 = vector.extract_strided_slice %27 {offsets = [0, 17], sizes = [3, 512], strides = [1, 1]} : vector<3x576xf32> to vector<3x512xf32>
    %cst_65 = arith.constant dense<0.000000e+00> : vector<10x512xf32>
    %80 = tpu.matmul %78, %79, %cst_65 {dimension_numbers = #tpu.dot_dimension_numbers<[1], [0], [0], [1], [0, 0, 1, 1], [], []>} : vector<10x3xf32>, vector<3x512xf32>, vector<10x512xf32> -> vector<10x512xf32>
    %81 = arith.addf %76, %80 : vector<10x512xf32>
    %82 = vector.broadcast %34 : vector<10x1xf32> to vector<10x512xf32>
    %83 = arith.mulf %81, %82 : vector<10x512xf32>
    %84 = vector.broadcast %35 : vector<10x1xf32> to vector<10x512xf32>
    %85 = arith.addf %83, %84 : vector<10x512xf32>
    %cst_66 = arith.constant 0.000000e+00 : f32
    %86 = vector.broadcast %cst_66 : f32 to vector<10x512xf32>
    %87 = arith.maximumf %85, %86 : vector<10x512xf32>
    %cst_67 = arith.constant 0.000000e+00 : f32
    %88 = vector.shape_cast %25 : vector<1x512xi1> to vector<1x512xi1>
    %89 = vector.broadcast %88 : vector<1x512xi1> to vector<10x512xi1>
    %90 = vector.broadcast %cst_67 : f32 to vector<10x512xf32>
    %91 = arith.select %89, %87, %90 : vector<10x512xi1>, vector<10x512xf32>
    %c0_68 = arith.constant 0 : index
    %c0_69 = arith.constant 0 : index
    %92 = vector.load %arg20[%c0_68, %c0_69] : memref<10x576xf32, #tpu.memory_space<vmem>>, vector<10x512xf32>
    tpu.vector_store %arg20[%c0_68, %c0_69], %91 {strides = array<i32>} : memref<10x576xf32, #tpu.memory_space<vmem>>, vector<10x512xf32>,
    %cst_70 = arith.constant 0.000000e+00 : f32
    %93 = vector.broadcast %cst_70 : f32 to vector<10x512xf32>
    %c0_71 = arith.constant 0 : index
    %c0_72 = arith.constant 0 : index
    %c0_73 = arith.constant 0 : index
    %94 = vector.load %arg1[%c0_71, %c0_72, %c0_73] : memref<9x10x3xf32, #tpu.memory_space<vmem>>, vector<1x10x3xf32>
    %95 = vector.shape_cast %94 : vector<1x10x3xf32> to vector<10x3xf32>
    %96 = vector.extract_strided_slice %29 {offsets = [0, 0], sizes = [3, 512], strides = [1, 1]} : vector<3x576xf32> to vector<3x512xf32>
    %cst_74 = arith.constant dense<0.000000e+00> : vector<10x512xf32>
    %97 = tpu.matmul %95, %96, %cst_74 {dimension_numbers = #tpu.dot_dimension_numbers<[1], [0], [0], [1], [0, 0, 1, 1], [], []>} : vector<10x3xf32>, vector<3x512xf32>, vector<10x512xf32> -> vector<10x512xf32>
    %98 = arith.addf %93, %97 : vector<10x512xf32>
    %c1_75 = arith.constant 1 : index
    %c0_76 = arith.constant 0 : index
    %c0_77 = arith.constant 0 : index
    %99 = vector.load %arg1[%c1_75, %c0_76, %c0_77] : memref<9x10x3xf32, #tpu.memory_space<vmem>>, vector<1x10x3xf32>
    %100 = vector.shape_cast %99 : vector<1x10x3xf32> to vector<10x3xf32>
    %101 = vector.extract_strided_slice %27 {offsets = [0, 1], sizes = [3, 512], strides = [1, 1]} : vector<3x576xf32> to vector<3x512xf32>
    %cst_78 = arith.constant dense<0.000000e+00> : vector<10x512xf32>
    %102 = tpu.matmul %100, %101, %cst_78 {dimension_numbers = #tpu.dot_dimension_numbers<[1], [0], [0], [1], [0, 0, 1, 1], [], []>} : vector<10x3xf32>, vector<3x512xf32>, vector<10x512xf32> -> vector<10x512xf32>
    %103 = arith.addf %98, %102 : vector<10x512xf32>
    %c2_79 = arith.constant 2 : index
    %c0_80 = arith.constant 0 : index
    %c0_81 = arith.constant 0 : index
    %104 = vector.load %arg1[%c2_79, %c0_80, %c0_81] : memref<9x10x3xf32, #tpu.memory_space<vmem>>, vector<1x10x3xf32>
    %105 = vector.shape_cast %104 : vector<1x10x3xf32> to vector<10x3xf32>
    %106 = vector.extract_strided_slice %29 {offsets = [0, 1], sizes = [3, 512], strides = [1, 1]} : vector<3x576xf32> to vector<3x512xf32>
    %cst_82 = arith.constant dense<0.000000e+00> : vector<10x512xf32>
    %107 = tpu.matmul %105, %106, %cst_82 {dimension_numbers = #tpu.dot_dimension_numbers<[1], [0], [0], [1], [0, 0, 1, 1], [], []>} : vector<10x3xf32>, vector<3x512xf32>, vector<10x512xf32> -> vector<10x512xf32>
    %108 = arith.addf %103, %107 : vector<10x512xf32>
    %c3_83 = arith.constant 3 : index
    %c0_84 = arith.constant 0 : index
    %c0_85 = arith.constant 0 : index
    %109 = vector.load %arg1[%c3_83, %c0_84, %c0_85] : memref<9x10x3xf32, #tpu.memory_space<vmem>>, vector<1x10x3xf32>
    %110 = vector.shape_cast %109 : vector<1x10x3xf32> to vector<10x3xf32>
    %111 = vector.extract_strided_slice %33 {offsets = [0, 0], sizes = [3, 512], strides = [1, 1]} : vector<3x576xf32> to vector<3x512xf32>
    %cst_86 = arith.constant dense<0.000000e+00> : vector<10x512xf32>
    %112 = tpu.matmul %110, %111, %cst_86 {dimension_numbers = #tpu.dot_dimension_numbers<[1], [0], [0], [1], [0, 0, 1, 1], [], []>} : vector<10x3xf32>, vector<3x512xf32>, vector<10x512xf32> -> vector<10x512xf32>
    %113 = arith.addf %108, %112 : vector<10x512xf32>
    %c4_87 = arith.constant 4 : index
    %c0_88 = arith.constant 0 : index
    %c0_89 = arith.constant 0 : index
    %114 = vector.load %arg1[%c4_87, %c0_88, %c0_89] : memref<9x10x3xf32, #tpu.memory_space<vmem>>, vector<1x10x3xf32>
    %115 = vector.shape_cast %114 : vector<1x10x3xf32> to vector<10x3xf32>
    %116 = vector.extract_strided_slice %31 {offsets = [0, 1], sizes = [3, 512], strides = [1, 1]} : vector<3x576xf32> to vector<3x512xf32>
    %cst_90 = arith.constant dense<0.000000e+00> : vector<10x512xf32>
    %117 = tpu.matmul %115, %116, %cst_90 {dimension_numbers = #tpu.dot_dimension_numbers<[1], [0], [0], [1], [0, 0, 1, 1], [], []>} : vector<10x3xf32>, vector<3x512xf32>, vector<10x512xf32> -> vector<10x512xf32>
    %118 = arith.addf %113, %117 : vector<10x512xf32>
    %c5_91 = arith.constant 5 : index
    %c0_92 = arith.constant 0 : index
    %c0_93 = arith.constant 0 : index
    %119 = vector.load %arg1[%c5_91, %c0_92, %c0_93] : memref<9x10x3xf32, #tpu.memory_space<vmem>>, vector<1x10x3xf32>
    %120 = vector.shape_cast %119 : vector<1x10x3xf32> to vector<10x3xf32>
    %121 = vector.extract_strided_slice %33 {offsets = [0, 1], sizes = [3, 512], strides = [1, 1]} : vector<3x576xf32> to vector<3x512xf32>
    %cst_94 = arith.constant dense<0.000000e+00> : vector<10x512xf32>
    %122 = tpu.matmul %120, %121, %cst_94 {dimension_numbers = #tpu.dot_dimension_numbers<[1], [0], [0], [1], [0, 0, 1, 1], [], []>} : vector<10x3xf32>, vector<3x512xf32>, vector<10x512xf32> -> vector<10x512xf32>
    %123 = arith.addf %118, %122 : vector<10x512xf32>
    %c6_95 = arith.constant 6 : index
    %c0_96 = arith.constant 0 : index
    %c0_97 = arith.constant 0 : index
    %124 = vector.load %arg1[%c6_95, %c0_96, %c0_97] : memref<9x10x3xf32, #tpu.memory_space<vmem>>, vector<1x10x3xf32>
    %125 = vector.shape_cast %124 : vector<1x10x3xf32> to vector<10x3xf32>
    %126 = vector.extract_strided_slice %29 {offsets = [0, 16], sizes = [3, 512], strides = [1, 1]} : vector<3x576xf32> to vector<3x512xf32>
    %cst_98 = arith.constant dense<0.000000e+00> : vector<10x512xf32>
    %127 = tpu.matmul %125, %126, %cst_98 {dimension_numbers = #tpu.dot_dimension_numbers<[1], [0], [0], [1], [0, 0, 1, 1], [], []>} : vector<10x3xf32>, vector<3x512xf32>, vector<10x512xf32> -> vector<10x512xf32>
    %128 = arith.addf %123, %127 : vector<10x512xf32>
    %c7_99 = arith.constant 7 : index
    %c0_100 = arith.constant 0 : index
    %c0_101 = arith.constant 0 : index
    %129 = vector.load %arg1[%c7_99, %c0_100, %c0_101] : memref<9x10x3xf32, #tpu.memory_space<vmem>>, vector<1x10x3xf32>
    %130 = vector.shape_cast %129 : vector<1x10x3xf32> to vector<10x3xf32>
    %131 = vector.extract_strided_slice %27 {offsets = [0, 17], sizes = [3, 512], strides = [1, 1]} : vector<3x576xf32> to vector<3x512xf32>
    %cst_102 = arith.constant dense<0.000000e+00> : vector<10x512xf32>
    %132 = tpu.matmul %130, %131, %cst_102 {dimension_numbers = #tpu.dot_dimension_numbers<[1], [0], [0], [1], [0, 0, 1, 1], [], []>} : vector<10x3xf32>, vector<3x512xf32>, vector<10x512xf32> -> vector<10x512xf32>
    %133 = arith.addf %128, %132 : vector<10x512xf32>
    %c8_103 = arith.constant 8 : index
    %c0_104 = arith.constant 0 : index
    %c0_105 = arith.constant 0 : index
    %134 = vector.load %arg1[%c8_103, %c0_104, %c0_105] : memref<9x10x3xf32, #tpu.memory_space<vmem>>, vector<1x10x3xf32>
    %135 = vector.shape_cast %134 : vector<1x10x3xf32> to vector<10x3xf32>
    %136 = vector.extract_strided_slice %29 {offsets = [0, 17], sizes = [3, 512], strides = [1, 1]} : vector<3x576xf32> to vector<3x512xf32>
    %cst_106 = arith.constant dense<0.000000e+00> : vector<10x512xf32>
    %137 = tpu.matmul %135, %136, %cst_106 {dimension_numbers = #tpu.dot_dimension_numbers<[1], [0], [0], [1], [0, 0, 1, 1], [], []>} : vector<10x3xf32>, vector<3x512xf32>, vector<10x512xf32> -> vector<10x512xf32>
    %138 = arith.addf %133, %137 : vector<10x512xf32>
    %139 = vector.broadcast %34 : vector<10x1xf32> to vector<10x512xf32>
    %140 = arith.mulf %138, %139 : vector<10x512xf32>
    %141 = vector.broadcast %35 : vector<10x1xf32> to vector<10x512xf32>
    %142 = arith.addf %140, %141 : vector<10x512xf32>
    %cst_107 = arith.constant 0.000000e+00 : f32
    %143 = vector.broadcast %cst_107 : f32 to vector<10x512xf32>
    %144 = arith.maximumf %142, %143 : vector<10x512xf32>
    %cst_108 = arith.constant 0.000000e+00 : f32
    %145 = vector.shape_cast %25 : vector<1x512xi1> to vector<1x512xi1>
    %146 = vector.broadcast %145 : vector<1x512xi1> to vector<10x512xi1>
    %147 = vector.broadcast %cst_108 : f32 to vector<10x512xf32>
    %148 = arith.select %146, %144, %147 : vector<10x512xi1>, vector<10x512xf32>
    %c0_109 = arith.constant 0 : index
    %c1_110 = arith.constant 1 : index
    %149 = vector.load %arg19[%c0_109, %c1_110] : memref<10x576xf32, #tpu.memory_space<vmem>>, vector<10x512xf32>
    tpu.vector_store %arg19[%c0_109, %c1_110], %148 {strides = array<i32>} : memref<10x576xf32, #tpu.memory_space<vmem>>, vector<10x512xf32>,
    %cst_111 = arith.constant 0.000000e+00 : f32
    %150 = vector.broadcast %cst_111 : f32 to vector<10x512xf32>
    %c0_112 = arith.constant 0 : index
    %c0_113 = arith.constant 0 : index
    %c0_114 = arith.constant 0 : index
    %151 = vector.load %arg1[%c0_112, %c0_113, %c0_114] : memref<9x10x3xf32, #tpu.memory_space<vmem>>, vector<1x10x3xf32>
    %152 = vector.shape_cast %151 : vector<1x10x3xf32> to vector<10x3xf32>
    %153 = vector.extract_strided_slice %31 {offsets = [0, 0], sizes = [3, 512], strides = [1, 1]} : vector<3x576xf32> to vector<3x512xf32>
    %cst_115 = arith.constant dense<0.000000e+00> : vector<10x512xf32>
    %154 = tpu.matmul %152, %153, %cst_115 {dimension_numbers = #tpu.dot_dimension_numbers<[1], [0], [0], [1], [0, 0, 1, 1], [], []>} : vector<10x3xf32>, vector<3x512xf32>, vector<10x512xf32> -> vector<10x512xf32>
    %155 = arith.addf %150, %154 : vector<10x512xf32>
    %c1_116 = arith.constant 1 : index
    %c0_117 = arith.constant 0 : index
    %c0_118 = arith.constant 0 : index
    %156 = vector.load %arg1[%c1_116, %c0_117, %c0_118] : memref<9x10x3xf32, #tpu.memory_space<vmem>>, vector<1x10x3xf32>
    %157 = vector.shape_cast %156 : vector<1x10x3xf32> to vector<10x3xf32>
    %158 = vector.extract_strided_slice %33 {offsets = [0, 0], sizes = [3, 512], strides = [1, 1]} : vector<3x576xf32> to vector<3x512xf32>
    %cst_119 = arith.constant dense<0.000000e+00> : vector<10x512xf32>
    %159 = tpu.matmul %157, %158, %cst_119 {dimension_numbers = #tpu.dot_dimension_numbers<[1], [0], [0], [1], [0, 0, 1, 1], [], []>} : vector<10x3xf32>, vector<3x512xf32>, vector<10x512xf32> -> vector<10x512xf32>
    %160 = arith.addf %155, %159 : vector<10x512xf32>
    %c2_120 = arith.constant 2 : index
    %c0_121 = arith.constant 0 : index
    %c0_122 = arith.constant 0 : index
    %161 = vector.load %arg1[%c2_120, %c0_121, %c0_122] : memref<9x10x3xf32, #tpu.memory_space<vmem>>, vector<1x10x3xf32>
    %162 = vector.shape_cast %161 : vector<1x10x3xf32> to vector<10x3xf32>
    %163 = vector.extract_strided_slice %31 {offsets = [0, 1], sizes = [3, 512], strides = [1, 1]} : vector<3x576xf32> to vector<3x512xf32>
    %cst_123 = arith.constant dense<0.000000e+00> : vector<10x512xf32>
    %164 = tpu.matmul %162, %163, %cst_123 {dimension_numbers = #tpu.dot_dimension_numbers<[1], [0], [0], [1], [0, 0, 1, 1], [], []>} : vector<10x3xf32>, vector<3x512xf32>, vector<10x512xf32> -> vector<10x512xf32>
    %165 = arith.addf %160, %164 : vector<10x512xf32>
    %c3_124 = arith.constant 3 : index
    %c0_125 = arith.constant 0 : index
    %c0_126 = arith.constant 0 : index
    %166 = vector.load %arg1[%c3_124, %c0_125, %c0_126] : memref<9x10x3xf32, #tpu.memory_space<vmem>>, vector<1x10x3xf32>
    %167 = vector.shape_cast %166 : vector<1x10x3xf32> to vector<10x3xf32>
    %168 = vector.extract_strided_slice %27 {offsets = [0, 16], sizes = [3, 512], strides = [1, 1]} : vector<3x576xf32> to vector<3x512xf32>
    %cst_127 = arith.constant dense<0.000000e+00> : vector<10x512xf32>
    %169 = tpu.matmul %167, %168, %cst_127 {dimension_numbers = #tpu.dot_dimension_numbers<[1], [0], [0], [1], [0, 0, 1, 1], [], []>} : vector<10x3xf32>, vector<3x512xf32>, vector<10x512xf32> -> vector<10x512xf32>
    %170 = arith.addf %165, %169 : vector<10x512xf32>
    %c4_128 = arith.constant 4 : index
    %c0_129 = arith.constant 0 : index
    %c0_130 = arith.constant 0 : index
    %171 = vector.load %arg1[%c4_128, %c0_129, %c0_130] : memref<9x10x3xf32, #tpu.memory_space<vmem>>, vector<1x10x3xf32>
    %172 = vector.shape_cast %171 : vector<1x10x3xf32> to vector<10x3xf32>
    %173 = vector.extract_strided_slice %29 {offsets = [0, 16], sizes = [3, 512], strides = [1, 1]} : vector<3x576xf32> to vector<3x512xf32>
    %cst_131 = arith.constant dense<0.000000e+00> : vector<10x512xf32>
    %174 = tpu.matmul %172, %173, %cst_131 {dimension_numbers = #tpu.dot_dimension_numbers<[1], [0], [0], [1], [0, 0, 1, 1], [], []>} : vector<10x3xf32>, vector<3x512xf32>, vector<10x512xf32> -> vector<10x512xf32>
    %175 = arith.addf %170, %174 : vector<10x512xf32>
    %c5_132 = arith.constant 5 : index
    %c0_133 = arith.constant 0 : index
    %c0_134 = arith.constant 0 : index
    %176 = vector.load %arg1[%c5_132, %c0_133, %c0_134] : memref<9x10x3xf32, #tpu.memory_space<vmem>>, vector<1x10x3xf32>
    %177 = vector.shape_cast %176 : vector<1x10x3xf32> to vector<10x3xf32>
    %178 = vector.extract_strided_slice %27 {offsets = [0, 17], sizes = [3, 512], strides = [1, 1]} : vector<3x576xf32> to vector<3x512xf32>
    %cst_135 = arith.constant dense<0.000000e+00> : vector<10x512xf32>
    %179 = tpu.matmul %177, %178, %cst_135 {dimension_numbers = #tpu.dot_dimension_numbers<[1], [0], [0], [1], [0, 0, 1, 1], [], []>} : vector<10x3xf32>, vector<3x512xf32>, vector<10x512xf32> -> vector<10x512xf32>
    %180 = arith.addf %175, %179 : vector<10x512xf32>
    %c6_136 = arith.constant 6 : index
    %c0_137 = arith.constant 0 : index
    %c0_138 = arith.constant 0 : index
    %181 = vector.load %arg1[%c6_136, %c0_137, %c0_138] : memref<9x10x3xf32, #tpu.memory_space<vmem>>, vector<1x10x3xf32>
    %182 = vector.shape_cast %181 : vector<1x10x3xf32> to vector<10x3xf32>
    %183 = vector.extract_strided_slice %31 {offsets = [0, 16], sizes = [3, 512], strides = [1, 1]} : vector<3x576xf32> to vector<3x512xf32>
    %cst_139 = arith.constant dense<0.000000e+00> : vector<10x512xf32>
    %184 = tpu.matmul %182, %183, %cst_139 {dimension_numbers = #tpu.dot_dimension_numbers<[1], [0], [0], [1], [0, 0, 1, 1], [], []>} : vector<10x3xf32>, vector<3x512xf32>, vector<10x512xf32> -> vector<10x512xf32>
    %185 = arith.addf %180, %184 : vector<10x512xf32>
    %c7_140 = arith.constant 7 : index
    %c0_141 = arith.constant 0 : index
    %c0_142 = arith.constant 0 : index
    %186 = vector.load %arg1[%c7_140, %c0_141, %c0_142] : memref<9x10x3xf32, #tpu.memory_space<vmem>>, vector<1x10x3xf32>
    %187 = vector.shape_cast %186 : vector<1x10x3xf32> to vector<10x3xf32>
    %188 = vector.extract_strided_slice %33 {offsets = [0, 16], sizes = [3, 512], strides = [1, 1]} : vector<3x576xf32> to vector<3x512xf32>
    %cst_143 = arith.constant dense<0.000000e+00> : vector<10x512xf32>
    %189 = tpu.matmul %187, %188, %cst_143 {dimension_numbers = #tpu.dot_dimension_numbers<[1], [0], [0], [1], [0, 0, 1, 1], [], []>} : vector<10x3xf32>, vector<3x512xf32>, vector<10x512xf32> -> vector<10x512xf32>
    %190 = arith.addf %185, %189 : vector<10x512xf32>
    %c8_144 = arith.constant 8 : index
    %c0_145 = arith.constant 0 : index
    %c0_146 = arith.constant 0 : index
    %191 = vector.load %arg1[%c8_144, %c0_145, %c0_146] : memref<9x10x3xf32, #tpu.memory_space<vmem>>, vector<1x10x3xf32>
    %192 = vector.shape_cast %191 : vector<1x10x3xf32> to vector<10x3xf32>
    %193 = vector.extract_strided_slice %31 {offsets = [0, 17], sizes = [3, 512], strides = [1, 1]} : vector<3x576xf32> to vector<3x512xf32>
    %cst_147 = arith.constant dense<0.000000e+00> : vector<10x512xf32>
    %194 = tpu.matmul %192, %193, %cst_147 {dimension_numbers = #tpu.dot_dimension_numbers<[1], [0], [0], [1], [0, 0, 1, 1], [], []>} : vector<10x3xf32>, vector<3x512xf32>, vector<10x512xf32> -> vector<10x512xf32>
    %195 = arith.addf %190, %194 : vector<10x512xf32>
    %196 = vector.broadcast %34 : vector<10x1xf32> to vector<10x512xf32>
    %197 = arith.mulf %195, %196 : vector<10x512xf32>
    %198 = vector.broadcast %35 : vector<10x1xf32> to vector<10x512xf32>
    %199 = arith.addf %197, %198 : vector<10x512xf32>
    %cst_148 = arith.constant 0.000000e+00 : f32
    %200 = vector.broadcast %cst_148 : f32 to vector<10x512xf32>
    %201 = arith.maximumf %199, %200 : vector<10x512xf32>
    %cst_149 = arith.constant 0.000000e+00 : f32
    %202 = vector.shape_cast %25 : vector<1x512xi1> to vector<1x512xi1>
    %203 = vector.broadcast %202 : vector<1x512xi1> to vector<10x512xi1>
    %204 = vector.broadcast %cst_149 : f32 to vector<10x512xf32>
    %205 = arith.select %203, %201, %204 : vector<10x512xi1>, vector<10x512xf32>
    %c0_150 = arith.constant 0 : index
    %c16 = arith.constant 16 : index
    %206 = vector.load %arg18[%c0_150, %c16] : memref<10x576xf32, #tpu.memory_space<vmem>>, vector<10x512xf32>
    tpu.vector_store %arg18[%c0_150, %c16], %205 {strides = array<i32>} : memref<10x576xf32, #tpu.memory_space<vmem>>, vector<10x512xf32>,
    %cst_151 = arith.constant 0.000000e+00 : f32
    %207 = vector.broadcast %cst_151 : f32 to vector<10x512xf32>
    %c0_152 = arith.constant 0 : index
    %c0_153 = arith.constant 0 : index
    %c0_154 = arith.constant 0 : index
    %208 = vector.load %arg1[%c0_152, %c0_153, %c0_154] : memref<9x10x3xf32, #tpu.memory_space<vmem>>, vector<1x10x3xf32>
    %209 = vector.shape_cast %208 : vector<1x10x3xf32> to vector<10x3xf32>
    %210 = vector.extract_strided_slice %33 {offsets = [0, 0], sizes = [3, 512], strides = [1, 1]} : vector<3x576xf32> to vector<3x512xf32>
    %cst_155 = arith.constant dense<0.000000e+00> : vector<10x512xf32>
    %211 = tpu.matmul %209, %210, %cst_155 {dimension_numbers = #tpu.dot_dimension_numbers<[1], [0], [0], [1], [0, 0, 1, 1], [], []>} : vector<10x3xf32>, vector<3x512xf32>, vector<10x512xf32> -> vector<10x512xf32>
    %212 = arith.addf %207, %211 : vector<10x512xf32>
    %c1_156 = arith.constant 1 : index
    %c0_157 = arith.constant 0 : index
    %c0_158 = arith.constant 0 : index
    %213 = vector.load %arg1[%c1_156, %c0_157, %c0_158] : memref<9x10x3xf32, #tpu.memory_space<vmem>>, vector<1x10x3xf32>
    %214 = vector.shape_cast %213 : vector<1x10x3xf32> to vector<10x3xf32>
    %215 = vector.extract_strided_slice %31 {offsets = [0, 1], sizes = [3, 512], strides = [1, 1]} : vector<3x576xf32> to vector<3x512xf32>
    %cst_159 = arith.constant dense<0.000000e+00> : vector<10x512xf32>
    %216 = tpu.matmul %214, %215, %cst_159 {dimension_numbers = #tpu.dot_dimension_numbers<[1], [0], [0], [1], [0, 0, 1, 1], [], []>} : vector<10x3xf32>, vector<3x512xf32>, vector<10x512xf32> -> vector<10x512xf32>
    %217 = arith.addf %212, %216 : vector<10x512xf32>
    %c2_160 = arith.constant 2 : index
    %c0_161 = arith.constant 0 : index
    %c0_162 = arith.constant 0 : index
    %218 = vector.load %arg1[%c2_160, %c0_161, %c0_162] : memref<9x10x3xf32, #tpu.memory_space<vmem>>, vector<1x10x3xf32>
    %219 = vector.shape_cast %218 : vector<1x10x3xf32> to vector<10x3xf32>
    %220 = vector.extract_strided_slice %33 {offsets = [0, 1], sizes = [3, 512], strides = [1, 1]} : vector<3x576xf32> to vector<3x512xf32>
    %cst_163 = arith.constant dense<0.000000e+00> : vector<10x512xf32>
    %221 = tpu.matmul %219, %220, %cst_163 {dimension_numbers = #tpu.dot_dimension_numbers<[1], [0], [0], [1], [0, 0, 1, 1], [], []>} : vector<10x3xf32>, vector<3x512xf32>, vector<10x512xf32> -> vector<10x512xf32>
    %222 = arith.addf %217, %221 : vector<10x512xf32>
    %c3_164 = arith.constant 3 : index
    %c0_165 = arith.constant 0 : index
    %c0_166 = arith.constant 0 : index
    %223 = vector.load %arg1[%c3_164, %c0_165, %c0_166] : memref<9x10x3xf32, #tpu.memory_space<vmem>>, vector<1x10x3xf32>
    %224 = vector.shape_cast %223 : vector<1x10x3xf32> to vector<10x3xf32>
    %225 = vector.extract_strided_slice %29 {offsets = [0, 16], sizes = [3, 512], strides = [1, 1]} : vector<3x576xf32> to vector<3x512xf32>
    %cst_167 = arith.constant dense<0.000000e+00> : vector<10x512xf32>
    %226 = tpu.matmul %224, %225, %cst_167 {dimension_numbers = #tpu.dot_dimension_numbers<[1], [0], [0], [1], [0, 0, 1, 1], [], []>} : vector<10x3xf32>, vector<3x512xf32>, vector<10x512xf32> -> vector<10x512xf32>
    %227 = arith.addf %222, %226 : vector<10x512xf32>
    %c4_168 = arith.constant 4 : index
    %c0_169 = arith.constant 0 : index
    %c0_170 = arith.constant 0 : index
    %228 = vector.load %arg1[%c4_168, %c0_169, %c0_170] : memref<9x10x3xf32, #tpu.memory_space<vmem>>, vector<1x10x3xf32>
    %229 = vector.shape_cast %228 : vector<1x10x3xf32> to vector<10x3xf32>
    %230 = vector.extract_strided_slice %27 {offsets = [0, 17], sizes = [3, 512], strides = [1, 1]} : vector<3x576xf32> to vector<3x512xf32>
    %cst_171 = arith.constant dense<0.000000e+00> : vector<10x512xf32>
    %231 = tpu.matmul %229, %230, %cst_171 {dimension_numbers = #tpu.dot_dimension_numbers<[1], [0], [0], [1], [0, 0, 1, 1], [], []>} : vector<10x3xf32>, vector<3x512xf32>, vector<10x512xf32> -> vector<10x512xf32>
    %232 = arith.addf %227, %231 : vector<10x512xf32>
    %c5_172 = arith.constant 5 : index
    %c0_173 = arith.constant 0 : index
    %c0_174 = arith.constant 0 : index
    %233 = vector.load %arg1[%c5_172, %c0_173, %c0_174] : memref<9x10x3xf32, #tpu.memory_space<vmem>>, vector<1x10x3xf32>
    %234 = vector.shape_cast %233 : vector<1x10x3xf32> to vector<10x3xf32>
    %235 = vector.extract_strided_slice %29 {offsets = [0, 17], sizes = [3, 512], strides = [1, 1]} : vector<3x576xf32> to vector<3x512xf32>
    %cst_175 = arith.constant dense<0.000000e+00> : vector<10x512xf32>
    %236 = tpu.matmul %234, %235, %cst_175 {dimension_numbers = #tpu.dot_dimension_numbers<[1], [0], [0], [1], [0, 0, 1, 1], [], []>} : vector<10x3xf32>, vector<3x512xf32>, vector<10x512xf32> -> vector<10x512xf32>
    %237 = arith.addf %232, %236 : vector<10x512xf32>
    %c6_176 = arith.constant 6 : index
    %c0_177 = arith.constant 0 : index
    %c0_178 = arith.constant 0 : index
    %238 = vector.load %arg1[%c6_176, %c0_177, %c0_178] : memref<9x10x3xf32, #tpu.memory_space<vmem>>, vector<1x10x3xf32>
    %239 = vector.shape_cast %238 : vector<1x10x3xf32> to vector<10x3xf32>
    %240 = vector.extract_strided_slice %33 {offsets = [0, 16], sizes = [3, 512], strides = [1, 1]} : vector<3x576xf32> to vector<3x512xf32>
    %cst_179 = arith.constant dense<0.000000e+00> : vector<10x512xf32>
    %241 = tpu.matmul %239, %240, %cst_179 {dimension_numbers = #tpu.dot_dimension_numbers<[1], [0], [0], [1], [0, 0, 1, 1], [], []>} : vector<10x3xf32>, vector<3x512xf32>, vector<10x512xf32> -> vector<10x512xf32>
    %242 = arith.addf %237, %241 : vector<10x512xf32>
    %c7_180 = arith.constant 7 : index
    %c0_181 = arith.constant 0 : index
    %c0_182 = arith.constant 0 : index
    %243 = vector.load %arg1[%c7_180, %c0_181, %c0_182] : memref<9x10x3xf32, #tpu.memory_space<vmem>>, vector<1x10x3xf32>
    %244 = vector.shape_cast %243 : vector<1x10x3xf32> to vector<10x3xf32>
    %245 = vector.extract_strided_slice %31 {offsets = [0, 17], sizes = [3, 512], strides = [1, 1]} : vector<3x576xf32> to vector<3x512xf32>
    %cst_183 = arith.constant dense<0.000000e+00> : vector<10x512xf32>
    %246 = tpu.matmul %244, %245, %cst_183 {dimension_numbers = #tpu.dot_dimension_numbers<[1], [0], [0], [1], [0, 0, 1, 1], [], []>} : vector<10x3xf32>, vector<3x512xf32>, vector<10x512xf32> -> vector<10x512xf32>
    %247 = arith.addf %242, %246 : vector<10x512xf32>
    %c8_184 = arith.constant 8 : index
    %c0_185 = arith.constant 0 : index
    %c0_186 = arith.constant 0 : index
    %248 = vector.load %arg1[%c8_184, %c0_185, %c0_186] : memref<9x10x3xf32, #tpu.memory_space<vmem>>, vector<1x10x3xf32>
    %249 = vector.shape_cast %248 : vector<1x10x3xf32> to vector<10x3xf32>
    %250 = vector.extract_strided_slice %33 {offsets = [0, 17], sizes = [3, 512], strides = [1, 1]} : vector<3x576xf32> to vector<3x512xf32>
    %cst_187 = arith.constant dense<0.000000e+00> : vector<10x512xf32>
    %251 = tpu.matmul %249, %250, %cst_187 {dimension_numbers = #tpu.dot_dimension_numbers<[1], [0], [0], [1], [0, 0, 1, 1], [], []>} : vector<10x3xf32>, vector<3x512xf32>, vector<10x512xf32> -> vector<10x512xf32>
    %252 = arith.addf %247, %251 : vector<10x512xf32>
    %253 = vector.broadcast %34 : vector<10x1xf32> to vector<10x512xf32>
    %254 = arith.mulf %252, %253 : vector<10x512xf32>
    %255 = vector.broadcast %35 : vector<10x1xf32> to vector<10x512xf32>
    %256 = arith.addf %254, %255 : vector<10x512xf32>
    %cst_188 = arith.constant 0.000000e+00 : f32
    %257 = vector.broadcast %cst_188 : f32 to vector<10x512xf32>
    %258 = arith.maximumf %256, %257 : vector<10x512xf32>
    %cst_189 = arith.constant 0.000000e+00 : f32
    %259 = vector.shape_cast %25 : vector<1x512xi1> to vector<1x512xi1>
    %260 = vector.broadcast %259 : vector<1x512xi1> to vector<10x512xi1>
    %261 = vector.broadcast %cst_189 : f32 to vector<10x512xf32>
    %262 = arith.select %260, %258, %261 : vector<10x512xi1>, vector<10x512xf32>
    %c0_190 = arith.constant 0 : index
    %c17 = arith.constant 17 : index
    %263 = vector.load %arg17[%c0_190, %c17] : memref<10x576xf32, #tpu.memory_space<vmem>>, vector<10x512xf32>
    tpu.vector_store %arg17[%c0_190, %c17], %262 {strides = array<i32>} : memref<10x576xf32, #tpu.memory_space<vmem>>, vector<10x512xf32>,
    %cst_191 = arith.constant 0.000000e+00 : f32
    %264 = vector.broadcast %cst_191 : f32 to vector<15x512xf32>
    %c0_192 = arith.constant 0 : index
    %c0_193 = arith.constant 0 : index
    %c0_194 = arith.constant 0 : index
    %265 = vector.load %arg4[%c0_192, %c0_193, %c0_194] : memref<9x15x10xf32, #tpu.memory_space<vmem>>, vector<1x15x10xf32>
    %266 = vector.shape_cast %265 : vector<1x15x10xf32> to vector<15x10xf32>
    %c0_195 = arith.constant 0 : index
    %c0_196 = arith.constant 0 : index
    %267 = vector.load %arg17[%c0_195, %c0_196] : memref<10x576xf32, #tpu.memory_space<vmem>>, vector<10x512xf32>
    %cst_197 = arith.constant dense<0.000000e+00> : vector<15x512xf32>
    %268 = tpu.matmul %266, %267, %cst_197 {dimension_numbers = #tpu.dot_dimension_numbers<[1], [0], [0], [1], [0, 0, 1, 1], [], []>} : vector<15x10xf32>, vector<10x512xf32>, vector<15x512xf32> -> vector<15x512xf32>
    %269 = arith.addf %264, %268 : vector<15x512xf32>
    %c1_198 = arith.constant 1 : index
    %c0_199 = arith.constant 0 : index
    %c0_200 = arith.constant 0 : index
    %270 = vector.load %arg4[%c1_198, %c0_199, %c0_200] : memref<9x15x10xf32, #tpu.memory_space<vmem>>, vector<1x15x10xf32>
    %271 = vector.shape_cast %270 : vector<1x15x10xf32> to vector<15x10xf32>
    %c0_201 = arith.constant 0 : index
    %c0_202 = arith.constant 0 : index
    %272 = vector.load %arg18[%c0_201, %c0_202] : memref<10x576xf32, #tpu.memory_space<vmem>>, vector<10x512xf32>
    %cst_203 = arith.constant dense<0.000000e+00> : vector<15x512xf32>
    %273 = tpu.matmul %271, %272, %cst_203 {dimension_numbers = #tpu.dot_dimension_numbers<[1], [0], [0], [1], [0, 0, 1, 1], [], []>} : vector<15x10xf32>, vector<10x512xf32>, vector<15x512xf32> -> vector<15x512xf32>
    %274 = arith.addf %269, %273 : vector<15x512xf32>
    %c2_204 = arith.constant 2 : index
    %c0_205 = arith.constant 0 : index
    %c0_206 = arith.constant 0 : index
    %275 = vector.load %arg4[%c2_204, %c0_205, %c0_206] : memref<9x15x10xf32, #tpu.memory_space<vmem>>, vector<1x15x10xf32>
    %276 = vector.shape_cast %275 : vector<1x15x10xf32> to vector<15x10xf32>
    %c0_207 = arith.constant 0 : index
    %c1_208 = arith.constant 1 : index
    %277 = vector.load %arg17[%c0_207, %c1_208] : memref<10x576xf32, #tpu.memory_space<vmem>>, vector<10x512xf32>
    %cst_209 = arith.constant dense<0.000000e+00> : vector<15x512xf32>
    %278 = tpu.matmul %276, %277, %cst_209 {dimension_numbers = #tpu.dot_dimension_numbers<[1], [0], [0], [1], [0, 0, 1, 1], [], []>} : vector<15x10xf32>, vector<10x512xf32>, vector<15x512xf32> -> vector<15x512xf32>
    %279 = arith.addf %274, %278 : vector<15x512xf32>
    %c3_210 = arith.constant 3 : index
    %c0_211 = arith.constant 0 : index
    %c0_212 = arith.constant 0 : index
    %280 = vector.load %arg4[%c3_210, %c0_211, %c0_212] : memref<9x15x10xf32, #tpu.memory_space<vmem>>, vector<1x15x10xf32>
    %281 = vector.shape_cast %280 : vector<1x15x10xf32> to vector<15x10xf32>
    %c0_213 = arith.constant 0 : index
    %c0_214 = arith.constant 0 : index
    %282 = vector.load %arg19[%c0_213, %c0_214] : memref<10x576xf32, #tpu.memory_space<vmem>>, vector<10x512xf32>
    %cst_215 = arith.constant dense<0.000000e+00> : vector<15x512xf32>
    %283 = tpu.matmul %281, %282, %cst_215 {dimension_numbers = #tpu.dot_dimension_numbers<[1], [0], [0], [1], [0, 0, 1, 1], [], []>} : vector<15x10xf32>, vector<10x512xf32>, vector<15x512xf32> -> vector<15x512xf32>
    %284 = arith.addf %279, %283 : vector<15x512xf32>
    %c4_216 = arith.constant 4 : index
    %c0_217 = arith.constant 0 : index
    %c0_218 = arith.constant 0 : index
    %285 = vector.load %arg4[%c4_216, %c0_217, %c0_218] : memref<9x15x10xf32, #tpu.memory_space<vmem>>, vector<1x15x10xf32>
    %286 = vector.shape_cast %285 : vector<1x15x10xf32> to vector<15x10xf32>
    %c0_219 = arith.constant 0 : index
    %c0_220 = arith.constant 0 : index
    %287 = vector.load %arg20[%c0_219, %c0_220] : memref<10x576xf32, #tpu.memory_space<vmem>>, vector<10x512xf32>
    %cst_221 = arith.constant dense<0.000000e+00> : vector<15x512xf32>
    %288 = tpu.matmul %286, %287, %cst_221 {dimension_numbers = #tpu.dot_dimension_numbers<[1], [0], [0], [1], [0, 0, 1, 1], [], []>} : vector<15x10xf32>, vector<10x512xf32>, vector<15x512xf32> -> vector<15x512xf32>
    %289 = arith.addf %284, %288 : vector<15x512xf32>
    %c5_222 = arith.constant 5 : index
    %c0_223 = arith.constant 0 : index
    %c0_224 = arith.constant 0 : index
    %290 = vector.load %arg4[%c5_222, %c0_223, %c0_224] : memref<9x15x10xf32, #tpu.memory_space<vmem>>, vector<1x15x10xf32>
    %291 = vector.shape_cast %290 : vector<1x15x10xf32> to vector<15x10xf32>
    %c0_225 = arith.constant 0 : index
    %c1_226 = arith.constant 1 : index
    %292 = vector.load %arg19[%c0_225, %c1_226] : memref<10x576xf32, #tpu.memory_space<vmem>>, vector<10x512xf32>
    %cst_227 = arith.constant dense<0.000000e+00> : vector<15x512xf32>
    %293 = tpu.matmul %291, %292, %cst_227 {dimension_numbers = #tpu.dot_dimension_numbers<[1], [0], [0], [1], [0, 0, 1, 1], [], []>} : vector<15x10xf32>, vector<10x512xf32>, vector<15x512xf32> -> vector<15x512xf32>
    %294 = arith.addf %289, %293 : vector<15x512xf32>
    %c6_228 = arith.constant 6 : index
    %c0_229 = arith.constant 0 : index
    %c0_230 = arith.constant 0 : index
    %295 = vector.load %arg4[%c6_228, %c0_229, %c0_230] : memref<9x15x10xf32, #tpu.memory_space<vmem>>, vector<1x15x10xf32>
    %296 = vector.shape_cast %295 : vector<1x15x10xf32> to vector<15x10xf32>
    %c0_231 = arith.constant 0 : index
    %c16_232 = arith.constant 16 : index
    %297 = vector.load %arg17[%c0_231, %c16_232] : memref<10x576xf32, #tpu.memory_space<vmem>>, vector<10x512xf32>
    %cst_233 = arith.constant dense<0.000000e+00> : vector<15x512xf32>
    %298 = tpu.matmul %296, %297, %cst_233 {dimension_numbers = #tpu.dot_dimension_numbers<[1], [0], [0], [1], [0, 0, 1, 1], [], []>} : vector<15x10xf32>, vector<10x512xf32>, vector<15x512xf32> -> vector<15x512xf32>
    %299 = arith.addf %294, %298 : vector<15x512xf32>
    %c7_234 = arith.constant 7 : index
    %c0_235 = arith.constant 0 : index
    %c0_236 = arith.constant 0 : index
    %300 = vector.load %arg4[%c7_234, %c0_235, %c0_236] : memref<9x15x10xf32, #tpu.memory_space<vmem>>, vector<1x15x10xf32>
    %301 = vector.shape_cast %300 : vector<1x15x10xf32> to vector<15x10xf32>
    %c0_237 = arith.constant 0 : index
    %c16_238 = arith.constant 16 : index
    %302 = vector.load %arg18[%c0_237, %c16_238] : memref<10x576xf32, #tpu.memory_space<vmem>>, vector<10x512xf32>
    %cst_239 = arith.constant dense<0.000000e+00> : vector<15x512xf32>
    %303 = tpu.matmul %301, %302, %cst_239 {dimension_numbers = #tpu.dot_dimension_numbers<[1], [0], [0], [1], [0, 0, 1, 1], [], []>} : vector<15x10xf32>, vector<10x512xf32>, vector<15x512xf32> -> vector<15x512xf32>
    %304 = arith.addf %299, %303 : vector<15x512xf32>
    %c8_240 = arith.constant 8 : index
    %c0_241 = arith.constant 0 : index
    %c0_242 = arith.constant 0 : index
    %305 = vector.load %arg4[%c8_240, %c0_241, %c0_242] : memref<9x15x10xf32, #tpu.memory_space<vmem>>, vector<1x15x10xf32>
    %306 = vector.shape_cast %305 : vector<1x15x10xf32> to vector<15x10xf32>
    %c0_243 = arith.constant 0 : index
    %c17_244 = arith.constant 17 : index
    %307 = vector.load %arg17[%c0_243, %c17_244] : memref<10x576xf32, #tpu.memory_space<vmem>>, vector<10x512xf32>
    %cst_245 = arith.constant dense<0.000000e+00> : vector<15x512xf32>
    %308 = tpu.matmul %306, %307, %cst_245 {dimension_numbers = #tpu.dot_dimension_numbers<[1], [0], [0], [1], [0, 0, 1, 1], [], []>} : vector<15x10xf32>, vector<10x512xf32>, vector<15x512xf32> -> vector<15x512xf32>
    %309 = arith.addf %304, %308 : vector<15x512xf32>
    %c0_246 = arith.constant 0 : index
    %c0_247 = arith.constant 0 : index
    %310 = vector.load %arg5[%c0_246, %c0_247] : memref<15x1xf32, #tpu.memory_space<vmem>>, vector<15x1xf32>
    %311 = vector.broadcast %310 : vector<15x1xf32> to vector<15x512xf32>
    %312 = arith.mulf %309, %311 : vector<15x512xf32>
    %c0_248 = arith.constant 0 : index
    %c0_249 = arith.constant 0 : index
    %313 = vector.load %arg6[%c0_248, %c0_249] : memref<15x1xf32, #tpu.memory_space<vmem>>, vector<15x1xf32>
    %314 = vector.broadcast %313 : vector<15x1xf32> to vector<15x512xf32>
    %315 = arith.addf %312, %314 : vector<15x512xf32>
    %cst_250 = arith.constant 0.000000e+00 : f32
    %316 = vector.broadcast %cst_250 : f32 to vector<15x512xf32>
    %317 = arith.maximumf %315, %316 : vector<15x512xf32>
    %c0_251 = arith.constant 0 : index
    %c0_252 = arith.constant 0 : index
    %318 = vector.load %arg21[%c0_251, %c0_252] : memref<15x576xf32, #tpu.memory_space<vmem>>, vector<15x512xf32>
    tpu.vector_store %arg21[%c0_251, %c0_252], %317 {strides = array<i32>} : memref<15x576xf32, #tpu.memory_space<vmem>>, vector<15x512xf32>,
    %cst_253 = arith.constant 0.000000e+00 : f32
    %319 = vector.broadcast %cst_253 : f32 to vector<20x512xf32>
    %c0_254 = arith.constant 0 : index
    %c0_255 = arith.constant 0 : index
    %c0_256 = arith.constant 0 : index
    %320 = vector.load %arg7[%c0_254, %c0_255, %c0_256] : memref<9x20x15xf32, #tpu.memory_space<vmem>>, vector<1x20x15xf32>
    %321 = vector.shape_cast %320 : vector<1x20x15xf32> to vector<20x15xf32>
    %c0_257 = arith.constant 0 : index
    %c0_258 = arith.constant 0 : index
    %322 = vector.load %arg21[%c0_257, %c0_258] : memref<15x576xf32, #tpu.memory_space<vmem>>, vector<15x512xf32>
    %cst_259 = arith.constant dense<0.000000e+00> : vector<20x512xf32>
    %323 = tpu.matmul %321, %322, %cst_259 {dimension_numbers = #tpu.dot_dimension_numbers<[1], [0], [0], [1], [0, 0, 1, 1], [], []>} : vector<20x15xf32>, vector<15x512xf32>, vector<20x512xf32> -> vector<20x512xf32>
    %324 = arith.addf %319, %323 : vector<20x512xf32>
    %c1_260 = arith.constant 1 : index
    %c0_261 = arith.constant 0 : index
    %c0_262 = arith.constant 0 : index
    %325 = vector.load %arg7[%c1_260, %c0_261, %c0_262] : memref<9x20x15xf32, #tpu.memory_space<vmem>>, vector<1x20x15xf32>
    %326 = vector.shape_cast %325 : vector<1x20x15xf32> to vector<20x15xf32>
    %c0_263 = arith.constant 0 : index
    %c1_264 = arith.constant 1 : index
    %327 = vector.load %arg21[%c0_263, %c1_264] : memref<15x576xf32, #tpu.memory_space<vmem>>, vector<15x512xf32>
    %cst_265 = arith.constant dense<0.000000e+00> : vector<20x512xf32>
    %328 = tpu.matmul %326, %327, %cst_265 {dimension_numbers = #tpu.dot_dimension_numbers<[1], [0], [0], [1], [0, 0, 1, 1], [], []>} : vector<20x15xf32>, vector<15x512xf32>, vector<20x512xf32> -> vector<20x512xf32>
    %329 = arith.addf %324, %328 : vector<20x512xf32>
    %c2_266 = arith.constant 2 : index
    %c0_267 = arith.constant 0 : index
    %c0_268 = arith.constant 0 : index
    %330 = vector.load %arg7[%c2_266, %c0_267, %c0_268] : memref<9x20x15xf32, #tpu.memory_space<vmem>>, vector<1x20x15xf32>
    %331 = vector.shape_cast %330 : vector<1x20x15xf32> to vector<20x15xf32>
    %c0_269 = arith.constant 0 : index
    %c2_270 = arith.constant 2 : index
    %332 = vector.load %arg21[%c0_269, %c2_270] : memref<15x576xf32, #tpu.memory_space<vmem>>, vector<15x512xf32>
    %cst_271 = arith.constant dense<0.000000e+00> : vector<20x512xf32>
    %333 = tpu.matmul %331, %332, %cst_271 {dimension_numbers = #tpu.dot_dimension_numbers<[1], [0], [0], [1], [0, 0, 1, 1], [], []>} : vector<20x15xf32>, vector<15x512xf32>, vector<20x512xf32> -> vector<20x512xf32>
    %334 = arith.addf %329, %333 : vector<20x512xf32>
    %c3_272 = arith.constant 3 : index
    %c0_273 = arith.constant 0 : index
    %c0_274 = arith.constant 0 : index
    %335 = vector.load %arg7[%c3_272, %c0_273, %c0_274] : memref<9x20x15xf32, #tpu.memory_space<vmem>>, vector<1x20x15xf32>
    %336 = vector.shape_cast %335 : vector<1x20x15xf32> to vector<20x15xf32>
    %c0_275 = arith.constant 0 : index
    %c16_276 = arith.constant 16 : index
    %337 = vector.load %arg21[%c0_275, %c16_276] : memref<15x576xf32, #tpu.memory_space<vmem>>, vector<15x512xf32>
    %cst_277 = arith.constant dense<0.000000e+00> : vector<20x512xf32>
    %338 = tpu.matmul %336, %337, %cst_277 {dimension_numbers = #tpu.dot_dimension_numbers<[1], [0], [0], [1], [0, 0, 1, 1], [], []>} : vector<20x15xf32>, vector<15x512xf32>, vector<20x512xf32> -> vector<20x512xf32>
    %339 = arith.addf %334, %338 : vector<20x512xf32>
    %c4_278 = arith.constant 4 : index
    %c0_279 = arith.constant 0 : index
    %c0_280 = arith.constant 0 : index
    %340 = vector.load %arg7[%c4_278, %c0_279, %c0_280] : memref<9x20x15xf32, #tpu.memory_space<vmem>>, vector<1x20x15xf32>
    %341 = vector.shape_cast %340 : vector<1x20x15xf32> to vector<20x15xf32>
    %c0_281 = arith.constant 0 : index
    %c17_282 = arith.constant 17 : index
    %342 = vector.load %arg21[%c0_281, %c17_282] : memref<15x576xf32, #tpu.memory_space<vmem>>, vector<15x512xf32>
    %cst_283 = arith.constant dense<0.000000e+00> : vector<20x512xf32>
    %343 = tpu.matmul %341, %342, %cst_283 {dimension_numbers = #tpu.dot_dimension_numbers<[1], [0], [0], [1], [0, 0, 1, 1], [], []>} : vector<20x15xf32>, vector<15x512xf32>, vector<20x512xf32> -> vector<20x512xf32>
    %344 = arith.addf %339, %343 : vector<20x512xf32>
    %c5_284 = arith.constant 5 : index
    %c0_285 = arith.constant 0 : index
    %c0_286 = arith.constant 0 : index
    %345 = vector.load %arg7[%c5_284, %c0_285, %c0_286] : memref<9x20x15xf32, #tpu.memory_space<vmem>>, vector<1x20x15xf32>
    %346 = vector.shape_cast %345 : vector<1x20x15xf32> to vector<20x15xf32>
    %c0_287 = arith.constant 0 : index
    %c18 = arith.constant 18 : index
    %347 = vector.load %arg21[%c0_287, %c18] : memref<15x576xf32, #tpu.memory_space<vmem>>, vector<15x512xf32>
    %cst_288 = arith.constant dense<0.000000e+00> : vector<20x512xf32>
    %348 = tpu.matmul %346, %347, %cst_288 {dimension_numbers = #tpu.dot_dimension_numbers<[1], [0], [0], [1], [0, 0, 1, 1], [], []>} : vector<20x15xf32>, vector<15x512xf32>, vector<20x512xf32> -> vector<20x512xf32>
    %349 = arith.addf %344, %348 : vector<20x512xf32>
    %c6_289 = arith.constant 6 : index
    %c0_290 = arith.constant 0 : index
    %c0_291 = arith.constant 0 : index
    %350 = vector.load %arg7[%c6_289, %c0_290, %c0_291] : memref<9x20x15xf32, #tpu.memory_space<vmem>>, vector<1x20x15xf32>
    %351 = vector.shape_cast %350 : vector<1x20x15xf32> to vector<20x15xf32>
    %c0_292 = arith.constant 0 : index
    %c32 = arith.constant 32 : index
    %352 = vector.load %arg21[%c0_292, %c32] : memref<15x576xf32, #tpu.memory_space<vmem>>, vector<15x512xf32>
    %cst_293 = arith.constant dense<0.000000e+00> : vector<20x512xf32>
    %353 = tpu.matmul %351, %352, %cst_293 {dimension_numbers = #tpu.dot_dimension_numbers<[1], [0], [0], [1], [0, 0, 1, 1], [], []>} : vector<20x15xf32>, vector<15x512xf32>, vector<20x512xf32> -> vector<20x512xf32>
    %354 = arith.addf %349, %353 : vector<20x512xf32>
    %c7_294 = arith.constant 7 : index
    %c0_295 = arith.constant 0 : index
    %c0_296 = arith.constant 0 : index
    %355 = vector.load %arg7[%c7_294, %c0_295, %c0_296] : memref<9x20x15xf32, #tpu.memory_space<vmem>>, vector<1x20x15xf32>
    %356 = vector.shape_cast %355 : vector<1x20x15xf32> to vector<20x15xf32>
    %c0_297 = arith.constant 0 : index
    %c33 = arith.constant 33 : index
    %357 = vector.load %arg21[%c0_297, %c33] : memref<15x576xf32, #tpu.memory_space<vmem>>, vector<15x512xf32>
    %cst_298 = arith.constant dense<0.000000e+00> : vector<20x512xf32>
    %358 = tpu.matmul %356, %357, %cst_298 {dimension_numbers = #tpu.dot_dimension_numbers<[1], [0], [0], [1], [0, 0, 1, 1], [], []>} : vector<20x15xf32>, vector<15x512xf32>, vector<20x512xf32> -> vector<20x512xf32>
    %359 = arith.addf %354, %358 : vector<20x512xf32>
    %c8_299 = arith.constant 8 : index
    %c0_300 = arith.constant 0 : index
    %c0_301 = arith.constant 0 : index
    %360 = vector.load %arg7[%c8_299, %c0_300, %c0_301] : memref<9x20x15xf32, #tpu.memory_space<vmem>>, vector<1x20x15xf32>
    %361 = vector.shape_cast %360 : vector<1x20x15xf32> to vector<20x15xf32>
    %c0_302 = arith.constant 0 : index
    %c34 = arith.constant 34 : index
    %362 = vector.load %arg21[%c0_302, %c34] : memref<15x576xf32, #tpu.memory_space<vmem>>, vector<15x512xf32>
    %cst_303 = arith.constant dense<0.000000e+00> : vector<20x512xf32>
    %363 = tpu.matmul %361, %362, %cst_303 {dimension_numbers = #tpu.dot_dimension_numbers<[1], [0], [0], [1], [0, 0, 1, 1], [], []>} : vector<20x15xf32>, vector<15x512xf32>, vector<20x512xf32> -> vector<20x512xf32>
    %364 = arith.addf %359, %363 : vector<20x512xf32>
    %c0_304 = arith.constant 0 : index
    %c0_305 = arith.constant 0 : index
    %365 = vector.load %arg8[%c0_304, %c0_305] : memref<20x1xf32, #tpu.memory_space<vmem>>, vector<20x1xf32>
    %366 = vector.broadcast %365 : vector<20x1xf32> to vector<20x512xf32>
    %367 = arith.mulf %364, %366 : vector<20x512xf32>
    %c0_306 = arith.constant 0 : index
    %c0_307 = arith.constant 0 : index
    %368 = vector.load %arg9[%c0_306, %c0_307] : memref<20x1xf32, #tpu.memory_space<vmem>>, vector<20x1xf32>
    %369 = vector.broadcast %368 : vector<20x1xf32> to vector<20x512xf32>
    %370 = arith.addf %367, %369 : vector<20x512xf32>
    %cst_308 = arith.constant 0.000000e+00 : f32
    %371 = vector.broadcast %cst_308 : f32 to vector<20x512xf32>
    %372 = arith.maximumf %370, %371 : vector<20x512xf32>
    %c0_309 = arith.constant 0 : index
    %c0_310 = arith.constant 0 : index
    %373 = vector.load %arg22[%c0_309, %c0_310] : memref<20x576xf32, #tpu.memory_space<vmem>>, vector<20x512xf32>
    tpu.vector_store %arg22[%c0_309, %c0_310], %372 {strides = array<i32>} : memref<20x576xf32, #tpu.memory_space<vmem>>, vector<20x512xf32>,
    %c0_311 = arith.constant 0 : index
    %c0_312 = arith.constant 0 : index
    %374 = vector.load %arg22[%c0_311, %c0_312] : memref<20x576xf32, #tpu.memory_space<vmem>>, vector<20x512xf32>
    %c0_313 = arith.constant 0 : index
    %c1_314 = arith.constant 1 : index
    %375 = vector.load %arg22[%c0_313, %c1_314] : memref<20x576xf32, #tpu.memory_space<vmem>>, vector<20x512xf32>
    %376 = arith.maximumf %374, %375 : vector<20x512xf32>
    %c0_315 = arith.constant 0 : index
    %c16_316 = arith.constant 16 : index
    %377 = vector.load %arg22[%c0_315, %c16_316] : memref<20x576xf32, #tpu.memory_space<vmem>>, vector<20x512xf32>
    %c0_317 = arith.constant 0 : index
    %c17_318 = arith.constant 17 : index
    %378 = vector.load %arg22[%c0_317, %c17_318] : memref<20x576xf32, #tpu.memory_space<vmem>>, vector<20x512xf32>
    %379 = arith.maximumf %377, %378 : vector<20x512xf32>
    %380 = arith.maximumf %376, %379 : vector<20x512xf32>
    %381 = vector.extract_strided_slice %380 {offsets = [0, 0], sizes = [1, 256], strides = [1, 1]} : vector<20x512xf32> to vector<1x256xf32>
    %c0_319 = arith.constant 0 : index
    %c0_320 = arith.constant 0 : index
    %382 = vector.load %arg23[%c0_319, %c0_320] : memref<2x5120xf32, #tpu.memory_space<vmem>>, vector<1x256xf32>
    tpu.vector_store %arg23[%c0_319, %c0_320], %381 {strides = array<i32>} : memref<2x5120xf32, #tpu.memory_space<vmem>>, vector<1x256xf32>,
    %383 = vector.extract_strided_slice %380 {offsets = [1, 0], sizes = [1, 256], strides = [1, 1]} : vector<20x512xf32> to vector<1x256xf32>
    %c0_321 = arith.constant 0 : index
    %c256 = arith.constant 256 : index
    %384 = vector.load %arg23[%c0_321, %c256] : memref<2x5120xf32, #tpu.memory_space<vmem>>, vector<1x256xf32>
    tpu.vector_store %arg23[%c0_321, %c256], %383 {strides = array<i32>} : memref<2x5120xf32, #tpu.memory_space<vmem>>, vector<1x256xf32>,
    %385 = vector.extract_strided_slice %380 {offsets = [2, 0], sizes = [1, 256], strides = [1, 1]} : vector<20x512xf32> to vector<1x256xf32>
    %c0_322 = arith.constant 0 : index
    %c512 = arith.constant 512 : index
    %386 = vector.load %arg23[%c0_322, %c512] : memref<2x5120xf32, #tpu.memory_space<vmem>>, vector<1x256xf32>
    tpu.vector_store %arg23[%c0_322, %c512], %385 {strides = array<i32>} : memref<2x5120xf32, #tpu.memory_space<vmem>>, vector<1x256xf32>,
    %387 = vector.extract_strided_slice %380 {offsets = [3, 0], sizes = [1, 256], strides = [1, 1]} : vector<20x512xf32> to vector<1x256xf32>
    %c0_323 = arith.constant 0 : index
    %c768 = arith.constant 768 : index
    %388 = vector.load %arg23[%c0_323, %c768] : memref<2x5120xf32, #tpu.memory_space<vmem>>, vector<1x256xf32>
    tpu.vector_store %arg23[%c0_323, %c768], %387 {strides = array<i32>} : memref<2x5120xf32, #tpu.memory_space<vmem>>, vector<1x256xf32>,
    %389 = vector.extract_strided_slice %380 {offsets = [4, 0], sizes = [1, 256], strides = [1, 1]} : vector<20x512xf32> to vector<1x256xf32>
    %c0_324 = arith.constant 0 : index
    %c1024 = arith.constant 1024 : index
    %390 = vector.load %arg23[%c0_324, %c1024] : memref<2x5120xf32, #tpu.memory_space<vmem>>, vector<1x256xf32>
    tpu.vector_store %arg23[%c0_324, %c1024], %389 {strides = array<i32>} : memref<2x5120xf32, #tpu.memory_space<vmem>>, vector<1x256xf32>,
    %391 = vector.extract_strided_slice %380 {offsets = [5, 0], sizes = [1, 256], strides = [1, 1]} : vector<20x512xf32> to vector<1x256xf32>
    %c0_325 = arith.constant 0 : index
    %c1280 = arith.constant 1280 : index
    %392 = vector.load %arg23[%c0_325, %c1280] : memref<2x5120xf32, #tpu.memory_space<vmem>>, vector<1x256xf32>
    tpu.vector_store %arg23[%c0_325, %c1280], %391 {strides = array<i32>} : memref<2x5120xf32, #tpu.memory_space<vmem>>, vector<1x256xf32>,
    %393 = vector.extract_strided_slice %380 {offsets = [6, 0], sizes = [1, 256], strides = [1, 1]} : vector<20x512xf32> to vector<1x256xf32>
    %c0_326 = arith.constant 0 : index
    %c1536 = arith.constant 1536 : index
    %394 = vector.load %arg23[%c0_326, %c1536] : memref<2x5120xf32, #tpu.memory_space<vmem>>, vector<1x256xf32>
    tpu.vector_store %arg23[%c0_326, %c1536], %393 {strides = array<i32>} : memref<2x5120xf32, #tpu.memory_space<vmem>>, vector<1x256xf32>,
    %395 = vector.extract_strided_slice %380 {offsets = [7, 0], sizes = [1, 256], strides = [1, 1]} : vector<20x512xf32> to vector<1x256xf32>
    %c0_327 = arith.constant 0 : index
    %c1792 = arith.constant 1792 : index
    %396 = vector.load %arg23[%c0_327, %c1792] : memref<2x5120xf32, #tpu.memory_space<vmem>>, vector<1x256xf32>
    tpu.vector_store %arg23[%c0_327, %c1792], %395 {strides = array<i32>} : memref<2x5120xf32, #tpu.memory_space<vmem>>, vector<1x256xf32>,
    %397 = vector.extract_strided_slice %380 {offsets = [8, 0], sizes = [1, 256], strides = [1, 1]} : vector<20x512xf32> to vector<1x256xf32>
    %c0_328 = arith.constant 0 : index
    %c2048 = arith.constant 2048 : index
    %398 = vector.load %arg23[%c0_328, %c2048] : memref<2x5120xf32, #tpu.memory_space<vmem>>, vector<1x256xf32>
    tpu.vector_store %arg23[%c0_328, %c2048], %397 {strides = array<i32>} : memref<2x5120xf32, #tpu.memory_space<vmem>>, vector<1x256xf32>,
    %399 = vector.extract_strided_slice %380 {offsets = [9, 0], sizes = [1, 256], strides = [1, 1]} : vector<20x512xf32> to vector<1x256xf32>
    %c0_329 = arith.constant 0 : index
    %c2304 = arith.constant 2304 : index
    %400 = vector.load %arg23[%c0_329, %c2304] : memref<2x5120xf32, #tpu.memory_space<vmem>>, vector<1x256xf32>
    tpu.vector_store %arg23[%c0_329, %c2304], %399 {strides = array<i32>} : memref<2x5120xf32, #tpu.memory_space<vmem>>, vector<1x256xf32>,
    %401 = vector.extract_strided_slice %380 {offsets = [10, 0], sizes = [1, 256], strides = [1, 1]} : vector<20x512xf32> to vector<1x256xf32>
    %c0_330 = arith.constant 0 : index
    %c2560 = arith.constant 2560 : index
    %402 = vector.load %arg23[%c0_330, %c2560] : memref<2x5120xf32, #tpu.memory_space<vmem>>, vector<1x256xf32>
    tpu.vector_store %arg23[%c0_330, %c2560], %401 {strides = array<i32>} : memref<2x5120xf32, #tpu.memory_space<vmem>>, vector<1x256xf32>,
    %403 = vector.extract_strided_slice %380 {offsets = [11, 0], sizes = [1, 256], strides = [1, 1]} : vector<20x512xf32> to vector<1x256xf32>
    %c0_331 = arith.constant 0 : index
    %c2816 = arith.constant 2816 : index
    %404 = vector.load %arg23[%c0_331, %c2816] : memref<2x5120xf32, #tpu.memory_space<vmem>>, vector<1x256xf32>
    tpu.vector_store %arg23[%c0_331, %c2816], %403 {strides = array<i32>} : memref<2x5120xf32, #tpu.memory_space<vmem>>, vector<1x256xf32>,
    %405 = vector.extract_strided_slice %380 {offsets = [12, 0], sizes = [1, 256], strides = [1, 1]} : vector<20x512xf32> to vector<1x256xf32>
    %c0_332 = arith.constant 0 : index
    %c3072 = arith.constant 3072 : index
    %406 = vector.load %arg23[%c0_332, %c3072] : memref<2x5120xf32, #tpu.memory_space<vmem>>, vector<1x256xf32>
    tpu.vector_store %arg23[%c0_332, %c3072], %405 {strides = array<i32>} : memref<2x5120xf32, #tpu.memory_space<vmem>>, vector<1x256xf32>,
    %407 = vector.extract_strided_slice %380 {offsets = [13, 0], sizes = [1, 256], strides = [1, 1]} : vector<20x512xf32> to vector<1x256xf32>
    %c0_333 = arith.constant 0 : index
    %c3328 = arith.constant 3328 : index
    %408 = vector.load %arg23[%c0_333, %c3328] : memref<2x5120xf32, #tpu.memory_space<vmem>>, vector<1x256xf32>
    tpu.vector_store %arg23[%c0_333, %c3328], %407 {strides = array<i32>} : memref<2x5120xf32, #tpu.memory_space<vmem>>, vector<1x256xf32>,
    %409 = vector.extract_strided_slice %380 {offsets = [14, 0], sizes = [1, 256], strides = [1, 1]} : vector<20x512xf32> to vector<1x256xf32>
    %c0_334 = arith.constant 0 : index
    %c3584 = arith.constant 3584 : index
    %410 = vector.load %arg23[%c0_334, %c3584] : memref<2x5120xf32, #tpu.memory_space<vmem>>, vector<1x256xf32>
    tpu.vector_store %arg23[%c0_334, %c3584], %409 {strides = array<i32>} : memref<2x5120xf32, #tpu.memory_space<vmem>>, vector<1x256xf32>,
    %411 = vector.extract_strided_slice %380 {offsets = [15, 0], sizes = [1, 256], strides = [1, 1]} : vector<20x512xf32> to vector<1x256xf32>
    %c0_335 = arith.constant 0 : index
    %c3840 = arith.constant 3840 : index
    %412 = vector.load %arg23[%c0_335, %c3840] : memref<2x5120xf32, #tpu.memory_space<vmem>>, vector<1x256xf32>
    tpu.vector_store %arg23[%c0_335, %c3840], %411 {strides = array<i32>} : memref<2x5120xf32, #tpu.memory_space<vmem>>, vector<1x256xf32>,
    %413 = vector.extract_strided_slice %380 {offsets = [16, 0], sizes = [1, 256], strides = [1, 1]} : vector<20x512xf32> to vector<1x256xf32>
    %c0_336 = arith.constant 0 : index
    %c4096 = arith.constant 4096 : index
    %414 = vector.load %arg23[%c0_336, %c4096] : memref<2x5120xf32, #tpu.memory_space<vmem>>, vector<1x256xf32>
    tpu.vector_store %arg23[%c0_336, %c4096], %413 {strides = array<i32>} : memref<2x5120xf32, #tpu.memory_space<vmem>>, vector<1x256xf32>,
    %415 = vector.extract_strided_slice %380 {offsets = [17, 0], sizes = [1, 256], strides = [1, 1]} : vector<20x512xf32> to vector<1x256xf32>
    %c0_337 = arith.constant 0 : index
    %c4352 = arith.constant 4352 : index
    %416 = vector.load %arg23[%c0_337, %c4352] : memref<2x5120xf32, #tpu.memory_space<vmem>>, vector<1x256xf32>
    tpu.vector_store %arg23[%c0_337, %c4352], %415 {strides = array<i32>} : memref<2x5120xf32, #tpu.memory_space<vmem>>, vector<1x256xf32>,
    %417 = vector.extract_strided_slice %380 {offsets = [18, 0], sizes = [1, 256], strides = [1, 1]} : vector<20x512xf32> to vector<1x256xf32>
    %c0_338 = arith.constant 0 : index
    %c4608 = arith.constant 4608 : index
    %418 = vector.load %arg23[%c0_338, %c4608] : memref<2x5120xf32, #tpu.memory_space<vmem>>, vector<1x256xf32>
    tpu.vector_store %arg23[%c0_338, %c4608], %417 {strides = array<i32>} : memref<2x5120xf32, #tpu.memory_space<vmem>>, vector<1x256xf32>,
    %419 = vector.extract_strided_slice %380 {offsets = [19, 0], sizes = [1, 256], strides = [1, 1]} : vector<20x512xf32> to vector<1x256xf32>
    %c0_339 = arith.constant 0 : index
    %c4864 = arith.constant 4864 : index
    %420 = vector.load %arg23[%c0_339, %c4864] : memref<2x5120xf32, #tpu.memory_space<vmem>>, vector<1x256xf32>
    tpu.vector_store %arg23[%c0_339, %c4864], %419 {strides = array<i32>} : memref<2x5120xf32, #tpu.memory_space<vmem>>, vector<1x256xf32>,
    %421 = vector.extract_strided_slice %380 {offsets = [0, 256], sizes = [1, 256], strides = [1, 1]} : vector<20x512xf32> to vector<1x256xf32>
    %c1_340 = arith.constant 1 : index
    %c0_341 = arith.constant 0 : index
    %422 = vector.load %arg23[%c1_340, %c0_341] : memref<2x5120xf32, #tpu.memory_space<vmem>>, vector<1x256xf32>
    tpu.vector_store %arg23[%c1_340, %c0_341], %421 {strides = array<i32>} : memref<2x5120xf32, #tpu.memory_space<vmem>>, vector<1x256xf32>,
    %423 = vector.extract_strided_slice %380 {offsets = [1, 256], sizes = [1, 256], strides = [1, 1]} : vector<20x512xf32> to vector<1x256xf32>
    %c1_342 = arith.constant 1 : index
    %c256_343 = arith.constant 256 : index
    %424 = vector.load %arg23[%c1_342, %c256_343] : memref<2x5120xf32, #tpu.memory_space<vmem>>, vector<1x256xf32>
    tpu.vector_store %arg23[%c1_342, %c256_343], %423 {strides = array<i32>} : memref<2x5120xf32, #tpu.memory_space<vmem>>, vector<1x256xf32>,
    %425 = vector.extract_strided_slice %380 {offsets = [2, 256], sizes = [1, 256], strides = [1, 1]} : vector<20x512xf32> to vector<1x256xf32>
    %c1_344 = arith.constant 1 : index
    %c512_345 = arith.constant 512 : index
    %426 = vector.load %arg23[%c1_344, %c512_345] : memref<2x5120xf32, #tpu.memory_space<vmem>>, vector<1x256xf32>
    tpu.vector_store %arg23[%c1_344, %c512_345], %425 {strides = array<i32>} : memref<2x5120xf32, #tpu.memory_space<vmem>>, vector<1x256xf32>,
    %427 = vector.extract_strided_slice %380 {offsets = [3, 256], sizes = [1, 256], strides = [1, 1]} : vector<20x512xf32> to vector<1x256xf32>
    %c1_346 = arith.constant 1 : index
    %c768_347 = arith.constant 768 : index
    %428 = vector.load %arg23[%c1_346, %c768_347] : memref<2x5120xf32, #tpu.memory_space<vmem>>, vector<1x256xf32>
    tpu.vector_store %arg23[%c1_346, %c768_347], %427 {strides = array<i32>} : memref<2x5120xf32, #tpu.memory_space<vmem>>, vector<1x256xf32>,
    %429 = vector.extract_strided_slice %380 {offsets = [4, 256], sizes = [1, 256], strides = [1, 1]} : vector<20x512xf32> to vector<1x256xf32>
    %c1_348 = arith.constant 1 : index
    %c1024_349 = arith.constant 1024 : index
    %430 = vector.load %arg23[%c1_348, %c1024_349] : memref<2x5120xf32, #tpu.memory_space<vmem>>, vector<1x256xf32>
    tpu.vector_store %arg23[%c1_348, %c1024_349], %429 {strides = array<i32>} : memref<2x5120xf32, #tpu.memory_space<vmem>>, vector<1x256xf32>,
    %431 = vector.extract_strided_slice %380 {offsets = [5, 256], sizes = [1, 256], strides = [1, 1]} : vector<20x512xf32> to vector<1x256xf32>
    %c1_350 = arith.constant 1 : index
    %c1280_351 = arith.constant 1280 : index
    %432 = vector.load %arg23[%c1_350, %c1280_351] : memref<2x5120xf32, #tpu.memory_space<vmem>>, vector<1x256xf32>
    tpu.vector_store %arg23[%c1_350, %c1280_351], %431 {strides = array<i32>} : memref<2x5120xf32, #tpu.memory_space<vmem>>, vector<1x256xf32>,
    %433 = vector.extract_strided_slice %380 {offsets = [6, 256], sizes = [1, 256], strides = [1, 1]} : vector<20x512xf32> to vector<1x256xf32>
    %c1_352 = arith.constant 1 : index
    %c1536_353 = arith.constant 1536 : index
    %434 = vector.load %arg23[%c1_352, %c1536_353] : memref<2x5120xf32, #tpu.memory_space<vmem>>, vector<1x256xf32>
    tpu.vector_store %arg23[%c1_352, %c1536_353], %433 {strides = array<i32>} : memref<2x5120xf32, #tpu.memory_space<vmem>>, vector<1x256xf32>,
    %435 = vector.extract_strided_slice %380 {offsets = [7, 256], sizes = [1, 256], strides = [1, 1]} : vector<20x512xf32> to vector<1x256xf32>
    %c1_354 = arith.constant 1 : index
    %c1792_355 = arith.constant 1792 : index
    %436 = vector.load %arg23[%c1_354, %c1792_355] : memref<2x5120xf32, #tpu.memory_space<vmem>>, vector<1x256xf32>
    tpu.vector_store %arg23[%c1_354, %c1792_355], %435 {strides = array<i32>} : memref<2x5120xf32, #tpu.memory_space<vmem>>, vector<1x256xf32>,
    %437 = vector.extract_strided_slice %380 {offsets = [8, 256], sizes = [1, 256], strides = [1, 1]} : vector<20x512xf32> to vector<1x256xf32>
    %c1_356 = arith.constant 1 : index
    %c2048_357 = arith.constant 2048 : index
    %438 = vector.load %arg23[%c1_356, %c2048_357] : memref<2x5120xf32, #tpu.memory_space<vmem>>, vector<1x256xf32>
    tpu.vector_store %arg23[%c1_356, %c2048_357], %437 {strides = array<i32>} : memref<2x5120xf32, #tpu.memory_space<vmem>>, vector<1x256xf32>,
    %439 = vector.extract_strided_slice %380 {offsets = [9, 256], sizes = [1, 256], strides = [1, 1]} : vector<20x512xf32> to vector<1x256xf32>
    %c1_358 = arith.constant 1 : index
    %c2304_359 = arith.constant 2304 : index
    %440 = vector.load %arg23[%c1_358, %c2304_359] : memref<2x5120xf32, #tpu.memory_space<vmem>>, vector<1x256xf32>
    tpu.vector_store %arg23[%c1_358, %c2304_359], %439 {strides = array<i32>} : memref<2x5120xf32, #tpu.memory_space<vmem>>, vector<1x256xf32>,
    %441 = vector.extract_strided_slice %380 {offsets = [10, 256], sizes = [1, 256], strides = [1, 1]} : vector<20x512xf32> to vector<1x256xf32>
    %c1_360 = arith.constant 1 : index
    %c2560_361 = arith.constant 2560 : index
    %442 = vector.load %arg23[%c1_360, %c2560_361] : memref<2x5120xf32, #tpu.memory_space<vmem>>, vector<1x256xf32>
    tpu.vector_store %arg23[%c1_360, %c2560_361], %441 {strides = array<i32>} : memref<2x5120xf32, #tpu.memory_space<vmem>>, vector<1x256xf32>,
    %443 = vector.extract_strided_slice %380 {offsets = [11, 256], sizes = [1, 256], strides = [1, 1]} : vector<20x512xf32> to vector<1x256xf32>
    %c1_362 = arith.constant 1 : index
    %c2816_363 = arith.constant 2816 : index
    %444 = vector.load %arg23[%c1_362, %c2816_363] : memref<2x5120xf32, #tpu.memory_space<vmem>>, vector<1x256xf32>
    tpu.vector_store %arg23[%c1_362, %c2816_363], %443 {strides = array<i32>} : memref<2x5120xf32, #tpu.memory_space<vmem>>, vector<1x256xf32>,
    %445 = vector.extract_strided_slice %380 {offsets = [12, 256], sizes = [1, 256], strides = [1, 1]} : vector<20x512xf32> to vector<1x256xf32>
    %c1_364 = arith.constant 1 : index
    %c3072_365 = arith.constant 3072 : index
    %446 = vector.load %arg23[%c1_364, %c3072_365] : memref<2x5120xf32, #tpu.memory_space<vmem>>, vector<1x256xf32>
    tpu.vector_store %arg23[%c1_364, %c3072_365], %445 {strides = array<i32>} : memref<2x5120xf32, #tpu.memory_space<vmem>>, vector<1x256xf32>,
    %447 = vector.extract_strided_slice %380 {offsets = [13, 256], sizes = [1, 256], strides = [1, 1]} : vector<20x512xf32> to vector<1x256xf32>
    %c1_366 = arith.constant 1 : index
    %c3328_367 = arith.constant 3328 : index
    %448 = vector.load %arg23[%c1_366, %c3328_367] : memref<2x5120xf32, #tpu.memory_space<vmem>>, vector<1x256xf32>
    tpu.vector_store %arg23[%c1_366, %c3328_367], %447 {strides = array<i32>} : memref<2x5120xf32, #tpu.memory_space<vmem>>, vector<1x256xf32>,
    %449 = vector.extract_strided_slice %380 {offsets = [14, 256], sizes = [1, 256], strides = [1, 1]} : vector<20x512xf32> to vector<1x256xf32>
    %c1_368 = arith.constant 1 : index
    %c3584_369 = arith.constant 3584 : index
    %450 = vector.load %arg23[%c1_368, %c3584_369] : memref<2x5120xf32, #tpu.memory_space<vmem>>, vector<1x256xf32>
    tpu.vector_store %arg23[%c1_368, %c3584_369], %449 {strides = array<i32>} : memref<2x5120xf32, #tpu.memory_space<vmem>>, vector<1x256xf32>,
    %451 = vector.extract_strided_slice %380 {offsets = [15, 256], sizes = [1, 256], strides = [1, 1]} : vector<20x512xf32> to vector<1x256xf32>
    %c1_370 = arith.constant 1 : index
    %c3840_371 = arith.constant 3840 : index
    %452 = vector.load %arg23[%c1_370, %c3840_371] : memref<2x5120xf32, #tpu.memory_space<vmem>>, vector<1x256xf32>
    tpu.vector_store %arg23[%c1_370, %c3840_371], %451 {strides = array<i32>} : memref<2x5120xf32, #tpu.memory_space<vmem>>, vector<1x256xf32>,
    %453 = vector.extract_strided_slice %380 {offsets = [16, 256], sizes = [1, 256], strides = [1, 1]} : vector<20x512xf32> to vector<1x256xf32>
    %c1_372 = arith.constant 1 : index
    %c4096_373 = arith.constant 4096 : index
    %454 = vector.load %arg23[%c1_372, %c4096_373] : memref<2x5120xf32, #tpu.memory_space<vmem>>, vector<1x256xf32>
    tpu.vector_store %arg23[%c1_372, %c4096_373], %453 {strides = array<i32>} : memref<2x5120xf32, #tpu.memory_space<vmem>>, vector<1x256xf32>,
    %455 = vector.extract_strided_slice %380 {offsets = [17, 256], sizes = [1, 256], strides = [1, 1]} : vector<20x512xf32> to vector<1x256xf32>
    %c1_374 = arith.constant 1 : index
    %c4352_375 = arith.constant 4352 : index
    %456 = vector.load %arg23[%c1_374, %c4352_375] : memref<2x5120xf32, #tpu.memory_space<vmem>>, vector<1x256xf32>
    tpu.vector_store %arg23[%c1_374, %c4352_375], %455 {strides = array<i32>} : memref<2x5120xf32, #tpu.memory_space<vmem>>, vector<1x256xf32>,
    %457 = vector.extract_strided_slice %380 {offsets = [18, 256], sizes = [1, 256], strides = [1, 1]} : vector<20x512xf32> to vector<1x256xf32>
    %c1_376 = arith.constant 1 : index
    %c4608_377 = arith.constant 4608 : index
    %458 = vector.load %arg23[%c1_376, %c4608_377] : memref<2x5120xf32, #tpu.memory_space<vmem>>, vector<1x256xf32>
    tpu.vector_store %arg23[%c1_376, %c4608_377], %457 {strides = array<i32>} : memref<2x5120xf32, #tpu.memory_space<vmem>>, vector<1x256xf32>,
    %459 = vector.extract_strided_slice %380 {offsets = [19, 256], sizes = [1, 256], strides = [1, 1]} : vector<20x512xf32> to vector<1x256xf32>
    %c1_378 = arith.constant 1 : index
    %c4864_379 = arith.constant 4864 : index
    %460 = vector.load %arg23[%c1_378, %c4864_379] : memref<2x5120xf32, #tpu.memory_space<vmem>>, vector<1x256xf32>
    tpu.vector_store %arg23[%c1_378, %c4864_379], %459 {strides = array<i32>} : memref<2x5120xf32, #tpu.memory_space<vmem>>, vector<1x256xf32>,
    %c0_380 = arith.constant 0 : index
    %c0_381 = arith.constant 0 : index
    %461 = vector.load %arg23[%c0_380, %c0_381] : memref<2x5120xf32, #tpu.memory_space<vmem>>, vector<2x5120xf32>
    %462 = arith.truncf %461 : vector<2x5120xf32> to vector<2x5120xbf16>
    %c0_382 = arith.constant 0 : index
    %c0_383 = arith.constant 0 : index
    %463 = vector.load %arg10[%c0_382, %c0_383] : memref<5120x128xbf16, #tpu.memory_space<vmem>>, vector<5120x128xbf16>
    %cst_384 = arith.constant dense<0.000000e+00> : vector<2x128xf32>
    %464 = tpu.matmul %462, %463, %cst_384 {dimension_numbers = #tpu.dot_dimension_numbers<[1], [0], [0], [1], [0, 0, 1, 1], [], []>} : vector<2x5120xbf16>, vector<5120x128xbf16>, vector<2x128xf32> -> vector<2x128xf32>
    %c0_385 = arith.constant 0 : index
    %c0_386 = arith.constant 0 : index
    %465 = vector.load %arg11[%c0_385, %c0_386] : memref<1x128xf32, #tpu.memory_space<vmem>>, vector<1x128xf32>
    %466 = vector.broadcast %465 : vector<1x128xf32> to vector<2x128xf32>
    %467 = arith.addf %464, %466 : vector<2x128xf32>
    %cst_387 = arith.constant 0.000000e+00 : f32
    %468 = vector.broadcast %cst_387 : f32 to vector<2x128xf32>
    %469 = arith.maximumf %467, %468 : vector<2x128xf32>
    %470 = arith.truncf %469 : vector<2x128xf32> to vector<2x128xbf16>
    %c0_388 = arith.constant 0 : index
    %c0_389 = arith.constant 0 : index
    %471 = vector.load %arg12[%c0_388, %c0_389] : memref<128x128xbf16, #tpu.memory_space<vmem>>, vector<128x128xbf16>
    %cst_390 = arith.constant dense<0.000000e+00> : vector<2x128xf32>
    %472 = tpu.matmul %470, %471, %cst_390 {dimension_numbers = #tpu.dot_dimension_numbers<[1], [0], [0], [1], [0, 0, 1, 1], [], []>} : vector<2x128xbf16>, vector<128x128xbf16>, vector<2x128xf32> -> vector<2x128xf32>
    %c0_391 = arith.constant 0 : index
    %c0_392 = arith.constant 0 : index
    %473 = vector.load %arg13[%c0_391, %c0_392] : memref<1x128xf32, #tpu.memory_space<vmem>>, vector<1x128xf32>
    %474 = vector.broadcast %473 : vector<1x128xf32> to vector<2x128xf32>
    %475 = arith.addf %472, %474 : vector<2x128xf32>
    %cst_393 = arith.constant 0.000000e+00 : f32
    %476 = vector.broadcast %cst_393 : f32 to vector<2x128xf32>
    %477 = arith.maximumf %475, %476 : vector<2x128xf32>
    %478 = arith.truncf %477 : vector<2x128xf32> to vector<2x128xbf16>
    %c0_394 = arith.constant 0 : index
    %c0_395 = arith.constant 0 : index
    %479 = vector.load %arg14[%c0_394, %c0_395] : memref<128x2xbf16, #tpu.memory_space<vmem>>, vector<128x2xbf16>
    %cst_396 = arith.constant dense<0.000000e+00> : vector<2x2xf32>
    %480 = tpu.matmul %478, %479, %cst_396 {dimension_numbers = #tpu.dot_dimension_numbers<[1], [0], [0], [1], [0, 0, 1, 1], [], []>} : vector<2x128xbf16>, vector<128x2xbf16>, vector<2x2xf32> -> vector<2x2xf32>
    %c0_397 = arith.constant 0 : index
    %c0_398 = arith.constant 0 : index
    %481 = vector.load %arg15[%c0_397, %c0_398] : memref<1x2xf32, #tpu.memory_space<vmem>>, vector<1x2xf32>
    %482 = vector.broadcast %481 : vector<1x2xf32> to vector<2x2xf32>
    %483 = arith.addf %480, %482 : vector<2x2xf32>
    %c0_399 = arith.constant 0 : index
    %c0_400 = arith.constant 0 : index
    %484 = vector.load %arg16[%c0_399, %c0_400] : memref<2x2xf32, #tpu.memory_space<vmem>>, vector<2x2xf32>
    tpu.vector_store %arg16[%c0_399, %c0_400], %483 {strides = array<i32>} : memref<2x2xf32, #tpu.memory_space<vmem>>, vector<2x2xf32>,
    return
  }
}

</mosaic_0001>

<bundles_post_ra>
// kernel: net_forward.1
= control target key start
LH: loop header
LB: loop body
LE: loop exit
PB: predicated region body
PF: predicated region fallthrough
CT: control target
= control target key end

     0   :  { %s22059_s0 = inlined_call_operand.vmem [shape: f32[4,3,576], index: 0, kind: input, shape index: {}]   ;;  %s22060_s1 = inlined_call_operand.vmem [shape: f32[9,10,3], index: 1, kind: input, shape index: {}]   ;;  %s22061_s2 = inlined_call_operand.vmem [shape: f32[10,1], index: 2, kind: input, shape index: {}]   ;;  %s22062_s3 = inlined_call_operand.vmem [shape: f32[10,1], index: 3, kind: input, shape index: {}]   ;;  %s22063_s4 = inlined_call_operand.vmem [shape: f32[9,15,10], index: 4, kind: input, shape index: {}]   ;;  %s22064_s5 = inlined_call_operand.vmem [shape: f32[15,1], index: 5, kind: input, shape index: {}]   ;;  %s22065_s6 = inlined_call_operand.vmem [shape: f32[15,1], index: 6, kind: input, shape index: {}]   ;;  %s22066_s7 = inlined_call_operand.vmem [shape: f32[9,20,15], index: 7, kind: input, shape index: {}]   ;;  %s22067_s8 = inlined_call_operand.vmem [shape: f32[20,1], index: 8, kind: input, shape index: {}]   ;;  %s22068_s9 = inlined_call_operand.vmem [shape: f32[20,1], index: 9, kind: input, shape index: {}]   ;;  %s22069_s10 = inlined_call_operand.vmem [shape: bf16[5120,128], index: 10, kind: input, shape index: {}]   ;;  %s22070_s11 = inlined_call_operand.vmem [shape: f32[1,128], index: 11, kind: input, shape index: {}]   ;;  %s22071_s12 = inlined_call_operand.vmem [shape: bf16[128,128], index: 12, kind: input, shape index: {}]   ;;  %s22072_s13 = inlined_call_operand.vmem [shape: f32[1,128], index: 13, kind: input, shape index: {}]   ;;  %s22073_s14 = inlined_call_operand.vmem [shape: bf16[128,2], index: 14, kind: input, shape index: {}]   ;;  %s22074_s15 = inlined_call_operand.vmem [shape: f32[1,2], index: 15, kind: input, shape index: {}]   ;;  %s22075_s16 = inlined_call_operand.hbm [shape: f32[2,2], index: 16, kind: output, shape index: {}]  }
   0x1   :  { %22077 = sst [smem:[#allocation12_spill]] %s22059_s0 }
   0x2   :  { %s22078_s23 = sld [smem:[#allocation12_spill]]  ;;  %s18167_s30 = smov 127   ;;  %vm198_vm0 = vcmask 1042432   ;;  %v18168_v10 = vmov 0.0   ;;  %v15402_v11 = vld [vmem:[%s22060_s1 + $0x10] sm:$0xff]  ;;  %vm191_vm1 = vcmask 23552  }
   0x3   :  { %348 = vmatprep.mubr.f32.mxu1 %v18168_v10  ;;  %55 = vst [vmem:[#allocation2] sm:$0xff] %v18168_v10  ;;  %61 = vst [vmem:[#allocation2 + $0x28] sm:$0x3] %v18168_v10  ;;  %v15403_v14 = vld [vmem:[%s22060_s1 + $0x18] sm:$0x3]  ;;  %271 = vmatprep.mubr.f32.mxu0 %v18168_v10  ;;  %v182_v16 = vld [vmem:[%s22060_s1] sm:$0xff] }
   0x4   :  { %62 = vst [vmem:[#allocation2 + $0x30] sm:$0x3] %v18168_v10  ;;  %63 = vst [vmem:[#allocation2 + $0x38] sm:$0x3] %v18168_v10  ;;  %v183_v18 = vld [vmem:[%s22060_s1 + $0x8] sm:$0x3] }
   0x5   :  { %64 = vst [vmem:[#allocation2 + $0x40] sm:$0x3] %v18168_v10  ;;  %67 = vst [vmem:[#allocation3] sm:$0xff] %v18168_v10  ;;  %s18169_s19 = smov 112   ;;  %s18170_s22 = smov 111   ;;  %vm547_vm2 = vcmask 1039360  }
   0x6   :  { %72 = vst [vmem:[#allocation3 + $0x28] sm:$0x3] %v18168_v10  ;;  %73 = vst [vmem:[#allocation3 + $0x30] sm:$0x3] %v18168_v10  ;;  %v18558_v27 = vld [vmem:[%s22060_s1 + $0x20] sm:$0xff]  ;;  %v18607_v40 = vld [vmem:[%s22060_s1 + $0x30] sm:$0xff] }
   0x7   :  { %74 = vst [vmem:[#allocation3 + $0x38] sm:$0x3] %v18168_v10  ;;  %75 = vst [vmem:[#allocation3 + $0x40] sm:$0x3] %v18168_v10  ;;  %v15421_v36 = vld [vmem:[%s22060_s1 + $0x28] sm:$0x3] }
   0x8   :  { %v18273_v0 = vld [vmem:[%s22078_s23 + $0x8] sm:$0x77]  ;;  %v18278_v1 = vld [vmem:[%s22078_s23] sm:$0x77]  ;;  %v18291_v4 = vld [vmem:[%s22078_s23 + $0x14] sm:$0x77] }
   0x9   :  { %v18282_v2 = vcombine.high %v18273_v0, %v18273_v0  ;;  %v18286_v3 = vcombine.high %v18278_v1, %v18278_v1  ;;  %v18296_v5 = vld [vmem:[%s22078_s23 + $0x1c] sm:$0x77]  ;;  %v18309_v7 = vld [vmem:[%s22078_s23 + $0x10] sm:$0x7]  ;;  %v18314_v8 = vld [vmem:[%s22078_s23 + $0x28] sm:$0x77]  ;;  %v18318_v9 = vcombine.high %v18291_v4, %v18291_v4 }
   0xa   :  { %v18304_v6 = vcombine.high %v18296_v5, %v18296_v5  ;;  %77 = vst [vmem:[#allocation4] sm:$0xff] %v18168_v10  ;;  %82 = vst [vmem:[#allocation4 + $0x28] sm:$0x3] %v18168_v10  ;;  %v18366_v12 = vld [vmem:[%s22078_s23 + $0x30] sm:$0x77]  ;;  %v18378_v13 = vcombine.high %v18314_v8, %v18314_v8  ;;  %v18171_v41 = vmov 0  }
   0xb   :  { %543 = vrot.lane.b32.xlu1 %v18282_v2, %s18167_s30  ;;  %539 = vrot.lane.b32.xlu0 %v18286_v3, %s18167_s30  ;;  %83 = vst [vmem:[#allocation4 + $0x30] sm:$0x3] %v18168_v10  ;;  %84 = vst [vmem:[#allocation4 + $0x38] sm:$0x3] %v18168_v10  ;;  %v18397_v15 = vcombine.high %v18366_v12, %v18366_v12  ;;  %v18410_v17 = vld [vmem:[%s22078_s23 + $0x38] sm:$0x7] }
   0xc   :  { %15408 = vmatprep.subr.msk.mxu1 %vm198_vm0, %v18304_v6  ;;  %85 = vst [vmem:[#allocation4 + $0x40] sm:$0x3] %v18168_v10  ;;  %92 = vst [vmem:[#allocation5 + $0x28] sm:$0x3] %v18168_v10  ;;  %15404 = vmatprep.subr.msk.mxu0 %vm198_vm0, %v18318_v9  ;;  %v15395_v19 = vld [vmem:[%s22078_s23 + $0x24] sm:$0x7] }
   0xd   :  { %93 = vst [vmem:[#allocation5 + $0x30] sm:$0x3] %v18168_v10  ;;  %94 = vst [vmem:[#allocation5 + $0x38] sm:$0x3] %v18168_v10  ;;  %15409 = vmatpush1.msk.msra.mxu1 %vm198_vm0, %v18296_v5  ;;  %15405 = vmatpush1.msk.msra.mxu0 %vm198_vm0, %v18291_v4  ;;  %v18478_v20 = vld [vmem:[%s22078_s23 + $0x3c] sm:$0x77] }
   0xe   :  { %95 = vst [vmem:[#allocation5 + $0x40] sm:$0x3] %v18168_v10  ;;  %102 = vst [vmem:[#allocation6 + $0x28] sm:$0x7f] %v18168_v10  ;;  %15410 = vmatmul.mubr.msk.f32.vlgmr.msra.gmra.mrb[0].mxu1 %vm191_vm1, %v15402_v11  ;;  %15406 = vmatmul.mubr.msk.f32.vlgmr.msra.gmra.mrb[0].mxu0 %vm191_vm1, %v15402_v11  ;;  %v18483_v21 = vld [vmem:[%s22078_s23 + $0x44] sm:$0x77]  ;;  %v18490_v22 = vcombine.high %v18478_v20, %v18478_v20 }
   0xf   :  { %103 = vst [vmem:[#allocation6 + $0x30] sm:$0x7f] %v18168_v10  ;;  %104 = vst [vmem:[#allocation6 + $0x38] sm:$0x7f] %v18168_v10  ;;  %545 = vrot.lane.b32.xlu1 %v18309_v7, %s18167_s30  ;;  %541 = vrot.lane.b32.xlu0 %v18273_v0, %s18167_s30  ;;  %v15401_v23 = vld [vmem:[%s22078_s23 + $0x4c] sm:$0x7]  ;;  %v18501_v24 = vcombine.high %v18483_v21, %v18483_v21 }
  0x10   :  { %105 = vst [vmem:[#allocation6 + $0x40] sm:$0x7f] %v18168_v10  ;;  %118 = vst [vmem:[#allocation7 + $0x50] sm:$0xf] %v18168_v10  ;;  %354 = vmatprep.mubr.f32.mxu1 %v18168_v10  ;;  %15416 = vmatprep.subr.msk.mxu1 %vm198_vm0, %v18282_v2  ;;  %v179_v39 = vld [vmem:[%s22061_s2 + $0x8] sm:$0x3] }
  0x11   :  { %119 = vst [vmem:[#allocation7 + $0x58] sm:$0xf] %v18168_v10  ;;  %120 = vst [vmem:[#allocation7 + $0x60] sm:$0xf] %v18168_v10  ;;  %277 = vmatprep.mubr.f32.mxu0 %v18168_v10  ;;  %15417 = vmatpush1.msk.msra.mxu1 %vm198_vm0, %v18273_v0  ;;  %v178_v42 = vld [vmem:[%s22061_s2] sm:$0xff]  ;;  %vm1301_vm3 = vcmask 916480  }
  0x12   :  { %121 = vst [vmem:[#allocation7 + $0x68] sm:$0xf] %v18168_v10  ;;  %124 = vst [vmem:[#allocation8] sm:$0xff] %v18168_v10  ;;  %15411 = vmatmul.mubr.msk.f32.gmra.mrb[2].mxu1 %vm191_vm1, %v15403_v14  ;;  %15407 = vmatmul.mubr.msk.f32.gmra.mrb[2].mxu0 %vm191_vm1, %v15403_v14  ;;  %v15431_v43 = vld [vmem:[%s22060_s1 + $0x38] sm:$0x3]  ;;  %v180_v48 = vld [vmem:[%s22062_s3] sm:$0xff] }
  0x13   :  { %125 = vst [vmem:[#allocation8 + $0x8] sm:$0xff] %v18168_v10  ;;  %126 = vst [vmem:[#allocation8 + $0x10] sm:$0xff] %v18168_v10  ;;  %537 = vrot.lane.b32.xlu0 %v18278_v1, %s18167_s30  ;;  %1100 = vrot.lane.b32.xlu1 %v18378_v13, %s18167_s30  ;;  %v18643_v49 = vld [vmem:[%s22060_s1 + $0x40] sm:$0xff]  ;;  %v181_v52 = vld [vmem:[%s22062_s3 + $0x8] sm:$0x3]  ;;  %vm1689_vm4 = vcmask 908288  }
  0x14   :  { %127 = vst [vmem:[#allocation8 + $0x18] sm:$0xff] %v18168_v10  ;;  %128 = vst [vmem:[#allocation8 + $0x20] sm:$0xff] %v18168_v10  ;;  %520 = vmatprep.mubr.f32.mxu1 %v18168_v10  ;;  %15412 = vmatprep.subr.msk.mxu0 %vm198_vm0, %v18286_v3  ;;  %v18651_v53 = vld [vmem:[#allocation2] sm:$0xff]  ;;  %v15441_v54 = vld [vmem:[%s22060_s1 + $0x48] sm:$0x3] }
  0x15   :  { %129 = vst [vmem:[#allocation8 + $0x28] sm:$0xff] %v18168_v10  ;;  %130 = vst [vmem:[#allocation8 + $0x30] sm:$0xff] %v18168_v10  ;;  %15413 = vmatpush1.msk.msra.mxu0 %vm198_vm0, %v18278_v1  ;;  %443 = vmatprep.mubr.f32.mxu0 %v18168_v10  ;;  %v18690_v63 = vld [vmem:[%s22060_s1 + $0x50] sm:$0xff]  ;;  %v15461_v14 = vld [vmem:[%s22060_s1 + $0x68] sm:$0x3] }
  0x16   :  { %131 = vst [vmem:[#allocation8 + $0x38] sm:$0xff] %v18168_v10  ;;  %132 = vst [vmem:[#allocation8 + $0x40] sm:$0xff] %v18168_v10  ;;  %15418 = vmatmul.mubr.msk.f32.vlgmr.msra.gmra.mrb[0].mxu1 %vm191_vm1, %v182_v16  ;;  %15414 = vmatmul.mubr.msk.f32.vlgmr.msra.gmra.mrb[0].mxu0 %vm191_vm1, %v182_v16 }
  0x17   :  { %133 = vst [vmem:[#allocation8 + $0x48] sm:$0xff] %v18168_v10  ;;  %1102 = vrot.lane.b32.xlu0 %v18366_v12, %s18167_s30  ;;  %1104 = vrot.lane.b32.xlu1 %v18397_v15, %s18167_s30 }
  0x18   :  { %526 = vmatprep.mubr.f32.mxu1 %v18168_v10  ;;  %449 = vmatprep.mubr.f32.mxu0 %v18168_v10 }
  0x19   :  { %17444 = vset.pattern.permute.xlu1 %v18171_v41  ;;  %17443 = vset.pattern.permute.xlu0 %v18171_v41  ;;  %v18127_v41 = vld [vmem:[%s22078_s23 + $0x14] sm:$0x77] }
  0x1a   :  { %15419 = vmatmul.mubr.msk.f32.gmra.mrb[2].mxu1 %vm191_vm1, %v183_v18  ;;  %15415 = vmatmul.mubr.msk.f32.gmra.mrb[2].mxu0 %vm191_vm1, %v183_v18 }
  0x1b   :  { %1106 = vrot.lane.b32.xlu0 %v18410_v17, %s18167_s30  ;;  %1098 = vrot.lane.b32.xlu1 %v18314_v8, %s18167_s30 }
  0x1c   :  { %707 = vmatprep.mubr.f32.mxu1 %v18168_v10  ;;  %630 = vmatprep.mubr.f32.mxu0 %v18168_v10 }
  0x1f   :  { %1293 = vrot.lane.b32.xlu0 %v18286_v3, %s18169_s19  ;;  %1295 = vrot.lane.b32.xlu1 %v18273_v0, %s18169_s19 }
  0x23   :  { %1297 = vrot.lane.b32.xlu0 %v18282_v2, %s18169_s19  ;;  %1299 = vrot.lane.b32.xlu1 %v18309_v7, %s18169_s19 }
  0x27   :  { %1291 = vrot.lane.b32.xlu0 %v18278_v1, %s18169_s19  ;;  %1488 = vrot.lane.b32.xlu1 %v18318_v9, %s18169_s19 }
  0x2b   :  { %1490 = vrot.lane.b32.xlu0 %v18296_v5, %s18169_s19  ;;  %1492 = vrot.lane.b32.xlu1 %v18304_v6, %s18169_s19 }
  0x2f   :  { %1494 = vrot.lane.b32.xlu0 %v15395_v19, %s18169_s19  ;;  %1486 = vrot.lane.b32.xlu1 %v18291_v4, %s18169_s19 }
  0x33   :  { %1681 = vrot.lane.b32.xlu0 %v18286_v3, %s18170_s22  ;;  %1683 = vrot.lane.b32.xlu1 %v18273_v0, %s18170_s22 }
  0x37   :  { %1685 = vrot.lane.b32.xlu0 %v18282_v2, %s18170_s22  ;;  %1687 = vrot.lane.b32.xlu1 %v18309_v7, %s18170_s22 }
  0x3b   :  { %1679 = vrot.lane.b32.xlu0 %v18278_v1, %s18170_s22  ;;  %2266 = vrot.lane.b32.xlu1 %v18318_v9, %s18167_s30  ;;  %v15451_v1 = vld [vmem:[%s22060_s1 + $0x58] sm:$0x3] }
  0x3f   :  { %2270 = vrot.lane.b32.xlu1 %v18304_v6, %s18167_s30  ;;  %2268 = vrot.lane.b32.xlu0 %v18296_v5, %s18167_s30 }
  0x43   :  { %2264 = vrot.lane.b32.xlu1 %v18291_v4, %s18167_s30  ;;  %2272 = vrot.lane.b32.xlu0 %v15395_v19, %s18167_s30 }
  0x47   :  { %2799 = vrot.lane.b32.xlu0 %v18490_v22, %s18167_s30  ;;  %2801 = vrot.lane.b32.xlu1 %v18483_v21, %s18167_s30 }
  0x4b   :  { %2803 = vrot.lane.b32.xlu0 %v18501_v24, %s18167_s30  ;;  %2805 = vrot.lane.b32.xlu1 %v15401_v23, %s18167_s30 }
  0x4f   :  { %2797 = vrot.lane.b32.xlu0 %v18478_v20, %s18167_s30  ;;  %3331 = vrot.lane.b32.xlu1 %v18318_v9, %s18170_s22 }
  0x53   :  { %3335 = vrot.lane.b32.xlu1 %v18304_v6, %s18170_s22  ;;  %3333 = vrot.lane.b32.xlu0 %v18296_v5, %s18170_s22 }
  0x57   :  { %3329 = vrot.lane.b32.xlu1 %v18291_v4, %s18170_s22  ;;  %3337 = vrot.lane.b32.xlu0 %v15395_v19, %s18170_s22 }
  0x5b   :  { %4613 = vrot.lane.b32.xlu0 %v18378_v13, %s18169_s19  ;;  %4615 = vrot.lane.b32.xlu1 %v18366_v12, %s18169_s19 }
  0x5f   :  { %4617 = vrot.lane.b32.xlu0 %v18397_v15, %s18169_s19  ;;  %4619 = vrot.lane.b32.xlu1 %v18410_v17, %s18169_s19 }
  0x63   :  { %4611 = vrot.lane.b32.xlu0 %v18314_v8, %s18169_s19  ;;  %4805 = vrot.lane.b32.xlu1 %v18490_v22, %s18169_s19 }
  0x67   :  { %4807 = vrot.lane.b32.xlu0 %v18483_v21, %s18169_s19  ;;  %4809 = vrot.lane.b32.xlu1 %v18501_v24, %s18169_s19 }
  0x6b   :  { %4811 = vrot.lane.b32.xlu0 %v15401_v23, %s18169_s19  ;;  %4803 = vrot.lane.b32.xlu1 %v18478_v20, %s18169_s19 }
  0x6f   :  { %4997 = vrot.lane.b32.xlu0 %v18378_v13, %s18170_s22  ;;  %4999 = vrot.lane.b32.xlu1 %v18366_v12, %s18170_s22 }
  0x73   :  { %5001 = vrot.lane.b32.xlu0 %v18397_v15, %s18170_s22  ;;  %5003 = vrot.lane.b32.xlu1 %v18410_v17, %s18170_s22 }
  0x77   :  { %4995 = vrot.lane.b32.xlu0 %v18314_v8, %s18170_s22  ;;  %6619 = vrot.lane.b32.xlu1 %v18490_v22, %s18170_s22 }
  0x7b   :  { %6623 = vrot.lane.b32.xlu1 %v18501_v24, %s18170_s22  ;;  %6621 = vrot.lane.b32.xlu0 %v18483_v21, %s18170_s22 }
  0x7d   :  { %v544_v25 = vpop.permute.xlu1 %543  ;;  %v540_v26 = vpop.permute.xlu0 %539 }
  0x7f   :  { %6617 = vrot.lane.b32.xlu1 %v18478_v20, %s18170_s22  ;;  %6625 = vrot.lane.b32.xlu0 %v15401_v23, %s18170_s22  ;;  %v18761_v23 = vld [vmem:[%s22060_s1 + $0x70] sm:$0xff] }
  0x81   :  { %v546_v28 = vpop.permute.xlu1 %545  ;;  %v542_v29 = vpop.permute.xlu0 %541 }
  0x82   :  { %v18561_v30 = vsel %vm547_vm2, %v544_v25, %v546_v28  ;;  %v18564_v31 = vsel %vm547_vm2, %v542_v29, %v544_v25  ;;  %v18567_v32 = vsel %vm547_vm2, %v540_v26, %v542_v29  ;;  %v15471_v28 = vld [vmem:[%s22060_s1 + $0x78] sm:$0x3] }
  0x83   :  { %15422 = vmatprep.subr.msk.mxu0 %vm198_vm0, %v18567_v32  ;;  %15426 = vmatprep.subr.msk.mxu1 %vm198_vm0, %v18561_v30 }
  0x84   :  { %15427 = vmatpush1.msk.msra.mxu1 %vm198_vm0, %v18564_v31  ;;  %1877 = vperm.xlu1 %17444, %v179_v39  }
  0x85   :  { %v538_v33 = vpop.permute.xlu0 %537  ;;  %15428 = vmatmul.mubr.msk.f32.vlgmr.msra.gmra.mrb[0].mxu1 %vm191_vm1, %v18558_v27  ;;  %v18577_v34 = vpop.permute.xlu1 %1100  ;;  %15436 = vmatprep.subr.msk.mxu1 %vm198_vm0, %v18397_v15 }
  0x86   :  { %v18582_v35 = vsel %vm547_vm2, %v538_v33, %v540_v26  ;;  %713 = vmatprep.mubr.f32.mxu1 %v18168_v10  ;;  %15437 = vmatpush1.msk.msra.mxu1 %vm198_vm0, %v18366_v12 }
  0x87   :  { %15423 = vmatpush1.msk.msra.mxu0 %vm198_vm0, %v18582_v35  ;;  %15446 = vmatprep.subr.msk.mxu1 %vm198_vm0, %v18501_v24 }
  0x88   :  { %15424 = vmatmul.mubr.msk.f32.vlgmr.msra.gmra.mrb[0].mxu0 %vm191_vm1, %v18558_v27  ;;  %15432 = vmatprep.subr.msk.mxu0 %vm198_vm0, %v18378_v13 }
  0x89   :  { %v1103_v37 = vpop.permute.xlu0 %1102  ;;  %15429 = vmatmul.mubr.msk.f32.gmra.mrb[2].mxu1 %vm191_vm1, %v15421_v36  ;;  %v1105_v38 = vpop.permute.xlu1 %1104  ;;  %636 = vmatprep.mubr.f32.mxu0 %v18168_v10 }
  0x8a   :  { %890 = vmatprep.mubr.f32.mxu1 %v18168_v10  ;;  %15433 = vmatpush1.msk.msra.mxu0 %vm198_vm0, %v18314_v8  ;;  %v18631_v47 = vsel %vm547_vm2, %v18577_v34, %v1103_v37  ;;  %v18662_v55 = vsel %vm547_vm2, %v1103_v37, %v1105_v38 }
  0x8b   :  { %15442 = vmatprep.subr.msk.mxu0 %vm198_vm0, %v18490_v22  ;;  %1872 = vperm.xlu0 %17443, %v178_v42  }
  0x8c   :  { %15425 = vmatmul.mubr.msk.f32.gmra.mrb[2].mxu0 %vm191_vm1, %v15421_v36  ;;  %1890 = vperm.xlu1 %17444, %v180_v48   ;;  %v15481_v36 = vld [vmem:[%s22060_s1 + $0x88] sm:$0x3] }
  0x8d   :  { %v1107_v44 = vpop.permute.xlu0 %1106  ;;  %15438 = vmatmul.mubr.msk.f32.vlgmr.msra.gmra.mrb[0].mxu1 %vm191_vm1, %v18607_v40  ;;  %v1099_v45 = vpop.permute.xlu1 %1098  ;;  %813 = vmatprep.mubr.f32.mxu0 %v18168_v10 }
  0x8e   :  { %v18624_v46 = vsel %vm547_vm2, %v1105_v38, %v1107_v44  ;;  %896 = vmatprep.mubr.f32.mxu1 %v18168_v10  ;;  %15447 = vmatpush1.msk.msra.mxu1 %vm198_vm0, %v18483_v21  ;;  %v18680_v60 = vsel %vm547_vm2, %v1099_v45, %v18577_v34  ;;  %v18723_v10 = vld [vmem:[%s22060_s1 + $0x60] sm:$0xff]  ;;  %v1939_v44 = vld [vmem:[%s22060_s1 + $0x8] sm:$0x3] }
  0x8f   :  { %15456 = vmatprep.subr.msk.mxu1 %vm198_vm0, %v18624_v46  ;;  %1895 = vperm.xlu0 %17443, %v181_v52   ;;  %v18798_v34 = vld [vmem:[%s22060_s1 + $0x80] sm:$0xff]  ;;  %v15509_v52 = vld [vmem:[%s22060_s1 + $0x28] sm:$0x3] }
  0x90   :  { %15434 = vmatmul.mubr.msk.f32.vlgmr.msra.gmra.mrb[0].mxu0 %vm191_vm1, %v18607_v40  ;;  %v18863_v45 = vld [vmem:[%s22060_s1] sm:$0xff] }
  0x91   :  { %v1294_v50 = vpop.permute.xlu0 %1293  ;;  %15439 = vmatmul.mubr.msk.f32.gmra.mrb[2].mxu1 %vm191_vm1, %v15431_v43  ;;  %v1296_v51 = vpop.permute.xlu1 %1295  ;;  %15443 = vmatpush1.msk.msra.mxu0 %vm198_vm0, %v18478_v20 }
  0x92   :  { %819 = vmatprep.mubr.f32.mxu0 %v18651_v53  ;;  %15452 = vmatprep.subr.msk.mxu0 %vm198_vm0, %v18631_v47  ;;  %v18674_v59 = vsel %vm1301_vm3, %v1294_v50, %v1296_v51 }
  0x93   :  { %1073 = vmatprep.mubr.f32.mxu1 %v18651_v53 }
  0x94   :  { %15435 = vmatmul.mubr.msk.f32.gmra.mrb[2].mxu0 %vm191_vm1, %v15431_v43 }
  0x95   :  { %v1298_v56 = vpop.permute.xlu0 %1297  ;;  %15448 = vmatmul.mubr.msk.f32.vlgmr.msra.gmra.mrb[0].mxu1 %vm191_vm1, %v18643_v49  ;;  %v1300_v57 = vpop.permute.xlu1 %1299  ;;  %996 = vmatprep.mubr.f32.mxu0 %v18651_v53 }
  0x96   :  { %15457 = vmatpush1.msk.msra.mxu1 %vm198_vm0, %v18662_v55  ;;  %v18670_v58 = vsel %vm1301_vm3, %v1298_v56, %v1300_v57  ;;  %1079 = vmatprep.mubr.f32.mxu1 %v18651_v53  ;;  %v18696_v0 = vsel %vm1301_vm3, %v1296_v51, %v1298_v56  ;;  %v18903_v56 = vld [vmem:[%s22078_s23 + $0x3c] sm:$0x77] }
  0x97   :  { %15466 = vmatprep.subr.msk.mxu1 %vm198_vm0, %v18670_v58 }
  0x98   :  { %15444 = vmatmul.mubr.msk.f32.vlgmr.msra.gmra.mrb[0].mxu0 %vm191_vm1, %v18643_v49 }
  0x99   :  { %15453 = vmatpush1.msk.msra.mxu0 %vm198_vm0, %v18680_v60  ;;  %v1292_v61 = vpop.permute.xlu0 %1291  ;;  %15449 = vmatmul.mubr.msk.f32.gmra.mrb[2].mxu1 %vm191_vm1, %v15441_v54  ;;  %v1489_v62 = vpop.permute.xlu1 %1488 }
  0x9a   :  { %1002 = vmatprep.mubr.f32.mxu0 %v18651_v53  ;;  %15462 = vmatprep.subr.msk.mxu0 %vm198_vm0, %v18674_v59  ;;  %v18710_v4 = vsel %vm1301_vm3, %v1292_v61, %v1294_v50 }
  0x9b   :  { %1267 = vmatprep.mubr.f32.mxu1 %v18651_v53 }
  0x9c   :  { %15445 = vmatmul.mubr.msk.f32.gmra.mrb[2].mxu0 %vm191_vm1, %v15441_v54  ;;  %v18891_v54 = vld [vmem:[%s22078_s23 + $0x44] sm:$0x77] }
  0x9d   :  { %v1491_v2 = vpop.permute.xlu0 %1490  ;;  %15458 = vmatmul.mubr.msk.f32.vlgmr.msra.gmra.mrb[0].mxu1 %vm191_vm1, %v18690_v63  ;;  %v1493_v3 = vpop.permute.xlu1 %1492  ;;  %1190 = vmatprep.mubr.f32.mxu0 %v18651_v53 }
  0x9e   :  { %15467 = vmatpush1.msk.msra.mxu1 %vm198_vm0, %v18696_v0  ;;  %1273 = vmatprep.mubr.f32.mxu1 %v18651_v53  ;;  %v18715_v5 = vsel %vm1301_vm3, %v1489_v62, %v1491_v2  ;;  %v18731_v12 = vsel %vm1301_vm3, %v1491_v2, %v1493_v3 }
  0xa0   :  { %15454 = vmatmul.mubr.msk.f32.vlgmr.msra.gmra.mrb[0].mxu0 %vm191_vm1, %v18690_v63 }
  0xa1   :  { %15463 = vmatpush1.msk.msra.mxu0 %vm198_vm0, %v18710_v4  ;;  %v1495_v7 = vpop.permute.xlu0 %1494  ;;  %15459 = vmatmul.mubr.msk.f32.gmra.mrb[2].mxu1 %vm191_vm1, %v15451_v1  ;;  %v1487_v8 = vpop.permute.xlu1 %1486 }
  0xa2   :  { %v18726_v11 = vsel %vm1301_vm3, %v1493_v3, %v1495_v7  ;;  %1196 = vmatprep.mubr.f32.mxu0 %v18651_v53  ;;  %1461 = vmatprep.mubr.f32.mxu1 %v18651_v53  ;;  %v18745_v18 = vsel %vm1301_vm3, %v1487_v8, %v1489_v62 }
  0xa3   :  { %15476 = vmatprep.subr.msk.mxu1 %vm198_vm0, %v18726_v11  ;;  %15472 = vmatprep.subr.msk.mxu0 %vm198_vm0, %v18715_v5 }
  0xa4   :  { %15455 = vmatmul.mubr.msk.f32.gmra.mrb[2].mxu0 %vm191_vm1, %v15451_v1 }
  0xa5   :  { %v1682_v16 = vpop.permute.xlu0 %1681  ;;  %15468 = vmatmul.mubr.msk.f32.vlgmr.msra.gmra.mrb[0].mxu1 %vm191_vm1, %v18723_v10  ;;  %v1684_v17 = vpop.permute.xlu1 %1683  ;;  %1384 = vmatprep.mubr.f32.mxu0 %v18651_v53 }
  0xa6   :  { %15477 = vmatpush1.msk.msra.mxu1 %vm198_vm0, %v18731_v12  ;;  %1467 = vmatprep.mubr.f32.mxu1 %v18651_v53  ;;  %v18753_v19 = vsel %vm1689_vm4, %v1682_v16, %v1684_v17 }
  0xa8   :  { %15464 = vmatmul.mubr.msk.f32.vlgmr.msra.gmra.mrb[0].mxu0 %vm191_vm1, %v18723_v10 }
  0xa9   :  { %15473 = vmatpush1.msk.msra.mxu0 %vm198_vm0, %v18745_v18  ;;  %v1686_v20 = vpop.permute.xlu0 %1685  ;;  %15469 = vmatmul.mubr.msk.f32.gmra.mrb[2].mxu1 %vm191_vm1, %v15461_v14  ;;  %v1688_v21 = vpop.permute.xlu1 %1687 }
  0xaa   :  { %v18764_v25 = vsel %vm1689_vm4, %v1686_v20, %v1688_v21  ;;  %1390 = vmatprep.mubr.f32.mxu0 %v18651_v53  ;;  %1655 = vmatprep.mubr.f32.mxu1 %v18651_v53  ;;  %v18769_v26 = vsel %vm1689_vm4, %v1684_v17, %v1686_v20 }
  0xab   :  { %15486 = vmatprep.subr.msk.mxu1 %vm198_vm0, %v18764_v25  ;;  %15482 = vmatprep.subr.msk.mxu0 %vm198_vm0, %v18753_v19 }
  0xac   :  { %15465 = vmatmul.mubr.msk.f32.gmra.mrb[2].mxu0 %vm191_vm1, %v15461_v14  ;;  %v15539_v14 = vld [vmem:[%s22060_s1 + $0x58] sm:$0x3] }
  0xad   :  { %v1680_v29 = vpop.permute.xlu0 %1679  ;;  %15478 = vmatmul.mubr.msk.f32.vlgmr.msra.gmra.mrb[0].mxu1 %vm191_vm1, %v18761_v23  ;;  %1578 = vmatprep.mubr.f32.mxu0 %v18651_v53  ;;  %v2267_v37 = vpop.permute.xlu1 %2266 }
  0xae   :  { %v18783_v33 = vsel %vm1689_vm4, %v1680_v29, %v1682_v16  ;;  %15487 = vmatpush1.msk.msra.mxu1 %vm198_vm0, %v18769_v26  ;;  %1661 = vmatprep.mubr.f32.mxu1 %v18651_v53 }
  0xaf   :  { %15496 = vmatprep.subr.msk.mxu1 %vm198_vm0, %v18561_v30 }
  0xb0   :  { %15474 = vmatmul.mubr.msk.f32.vlgmr.msra.gmra.mrb[0].mxu0 %vm191_vm1, %v18761_v23 }
  0xb1   :  { %15483 = vmatpush1.msk.msra.mxu0 %vm198_vm0, %v18783_v33  ;;  %15479 = vmatmul.mubr.msk.f32.gmra.mrb[2].mxu1 %vm191_vm1, %v15471_v28  ;;  %v2269_v30 = vpop.permute.xlu0 %2268  ;;  %v2271_v38 = vpop.permute.xlu1 %2270 }
  0xb2   :  { %15492 = vmatprep.subr.msk.mxu0 %vm198_vm0, %v18567_v32  ;;  %1584 = vmatprep.mubr.f32.mxu0 %v18651_v53  ;;  %v2275_v39 = vsel %vm547_vm2, %v2267_v37, %v2269_v30  ;;  %v2276_v42 = vsel %vm547_vm2, %v2269_v30, %v2271_v38 }
  0xb3   :  { %1849 = vmatprep.mubr.f32.mxu1 %v18651_v53 }
  0xb4   :  { %15475 = vmatmul.mubr.msk.f32.gmra.mrb[2].mxu0 %vm191_vm1, %v15471_v28 }
  0xb5   :  { %15488 = vmatmul.mubr.msk.f32.vlgmr.msra.gmra.mrb[0].mxu1 %vm191_vm1, %v18798_v34  ;;  %1772 = vmatprep.mubr.f32.mxu0 %v18651_v53  ;;  %v2273_v32 = vpop.permute.xlu0 %2272  ;;  %v2265_v43 = vpop.permute.xlu1 %2264 }
  0xb6   :  { %15497 = vmatpush1.msk.msra.mxu1 %vm198_vm0, %v18564_v31  ;;  %1855 = vmatprep.mubr.f32.mxu1 %v18651_v53  ;;  %v2277_v31 = vsel %vm547_vm2, %v2271_v38, %v2273_v32  ;;  %v2274_v48 = vsel %vm547_vm2, %v2265_v43, %v2267_v37 }
  0xb7   :  { %15504 = vmatprep.subr.msk.mxu1 %vm198_vm0, %v18304_v6  ;;  %v15491_v6 = vld [vmem:[%s22060_s1 + $0x18] sm:$0x3] }
  0xb8   :  { %15484 = vmatmul.mubr.msk.f32.vlgmr.msra.gmra.mrb[0].mxu0 %vm191_vm1, %v18798_v34 }
  0xb9   :  { %15493 = vmatpush1.msk.msra.mxu0 %vm198_vm0, %v18582_v35  ;;  %15489 = vmatmul.mubr.msk.f32.gmra.mrb[2].mxu1 %vm191_vm1, %v15481_v36  ;;  %v18833_v35 = vld [vmem:[%s22060_s1 + $0x10] sm:$0xff]  ;;  %v2800_v50 = vpop.permute.xlu0 %2799  ;;  %v2802_v51 = vpop.permute.xlu1 %2801 }
  0xba   :  { %1778 = vmatprep.mubr.f32.mxu0 %v18651_v53  ;;  %2089 = vmatprep.mubr.f32.mxu1 %v18651_v53  ;;  %v18930_v1 = vsel %vm547_vm2, %v2800_v50, %v2802_v51 }
  0xbb   :  { %15500 = vmatprep.subr.msk.mxu0 %vm198_vm0, %v18318_v9  ;;  %v18126_v9 = vld [vmem:[%s22078_s23 + $0x1c] sm:$0x77] }
  0xbc   :  { %15485 = vmatmul.mubr.msk.f32.gmra.mrb[2].mxu0 %vm191_vm1, %v15481_v36  ;;  %v19037_v36 = vld [vmem:[#allocation2] sm:$0xff] }
  0xbd   :  { %15498 = vmatmul.mubr.msk.f32.vlgmr.msra.gmra.mrb[4].mxu1 %vm191_vm1, %v18833_v35  ;;  %2012 = vmatprep.mubr.f32.mxu0 %v18651_v53  ;;  %v2804_v57 = vpop.permute.xlu0 %2803  ;;  %v2806_v61 = vpop.permute.xlu1 %2805 }
  0xbe   :  { %2095 = vmatprep.mubr.f32.mxu1 %v18651_v53  ;;  %15505 = vmatpush1.msk.msra.mxu1 %vm198_vm0, %v18126_v9  ;;  %v18917_v62 = vsel %vm547_vm2, %v2804_v57, %v2806_v61  ;;  %v18938_v2 = vsel %vm547_vm2, %v2802_v51, %v2804_v57 }
  0xbf   :  { %15514 = vmatprep.subr.msk.mxu1 %vm198_vm0, %v2277_v31 }
  0xc0   :  { %15494 = vmatmul.mubr.msk.f32.vlgmr.msra.gmra.mrb[4].mxu0 %vm191_vm1, %v18833_v35 }
  0xc1   :  { %15499 = vmatmul.mubr.msk.f32.gmra.mrb[6].mxu1 %vm191_vm1, %v15491_v6  ;;  %2018 = vmatprep.mubr.f32.mxu0 %v18651_v53  ;;  %v2798_v3 = vpop.permute.xlu0 %2797 }
  0xc2   :  { %2249 = vmatprep.mubr.f32.mxu1 %v18651_v53  ;;  %15501 = vmatpush1.msk.msra.mxu0 %vm198_vm0, %v18127_v41  ;;  %v18950_v7 = vsel %vm547_vm2, %v2798_v3, %v2800_v50 }
  0xc3   :  { %15510 = vmatprep.subr.msk.mxu0 %vm198_vm0, %v2275_v39 }
  0xc4   :  { %15495 = vmatmul.mubr.msk.f32.gmra.mrb[6].mxu0 %vm191_vm1, %v15491_v6 }
  0xc5   :  { %15506 = vmatmul.mubr.msk.f32.vlgmr.msra.gmra.mrb[4].mxu1 %vm191_vm1, %v18863_v45  ;;  %2172 = vmatprep.mubr.f32.mxu0 %v18651_v53  ;;  %v3334_v8 = vpop.permute.xlu0 %3333 }
  0xc6   :  { %2255 = vmatprep.mubr.f32.mxu1 %v18651_v53  ;;  %15515 = vmatpush1.msk.msra.mxu1 %vm198_vm0, %v2276_v42 }
  0xc7   :  { %15524 = vmatprep.subr.msk.mxu1 %vm198_vm0, %v18501_v24 }
  0xc8   :  { %15502 = vmatmul.mubr.msk.f32.vlgmr.msra.gmra.mrb[4].mxu0 %vm191_vm1, %v18863_v45 }
  0xc9   :  { %15511 = vmatpush1.msk.msra.mxu0 %vm198_vm0, %v2274_v48  ;;  %15507 = vmatmul.mubr.msk.f32.gmra.mrb[6].mxu1 %vm191_vm1, %v1939_v44  ;;  %v3338_v16 = vpop.permute.xlu0 %3337 }
  0xca   :  { %2178 = vmatprep.mubr.f32.mxu0 %v18651_v53  ;;  %2433 = vmatprep.mubr.f32.mxu1 %v18651_v53 }
  0xcb   :  { %15520 = vmatprep.subr.msk.mxu0 %vm198_vm0, %v18490_v22 }
  0xcc   :  { %15503 = vmatmul.mubr.msk.f32.gmra.mrb[6].mxu0 %vm191_vm1, %v1939_v44 }
  0xcd   :  { %15516 = vmatmul.mubr.msk.f32.vlgmr.msra.gmra.mrb[4].mxu1 %vm191_vm1, %v18558_v27  ;;  %2356 = vmatprep.mubr.f32.mxu0 %v18651_v53 }
  0xce   :  { %15525 = vmatpush1.msk.msra.mxu1 %vm198_vm0, %v18891_v54  ;;  %2439 = vmatprep.mubr.f32.mxu1 %v18651_v53 }
  0xcf   :  { %15534 = vmatprep.subr.msk.mxu1 %vm198_vm0, %v18624_v46 }
  0xd0   :  { %15512 = vmatmul.mubr.msk.f32.vlgmr.msra.gmra.mrb[4].mxu0 %vm191_vm1, %v18558_v27  ;;  %v15519_v27 = vld [vmem:[%s22060_s1 + $0x38] sm:$0x3] }
  0xd1   :  { %15521 = vmatpush1.msk.msra.mxu0 %vm198_vm0, %v18903_v56  ;;  %15517 = vmatmul.mubr.msk.f32.gmra.mrb[6].mxu1 %vm191_vm1, %v15509_v52 }
  0xd2   :  { %15530 = vmatprep.subr.msk.mxu0 %vm198_vm0, %v18631_v47  ;;  %2362 = vmatprep.mubr.f32.mxu0 %v18651_v53 }
  0xd3   :  { %2603 = vmatprep.mubr.f32.mxu1 %v18651_v53 }
  0xd4   :  { %15513 = vmatmul.mubr.msk.f32.gmra.mrb[6].mxu0 %vm191_vm1, %v15509_v52 }
  0xd5   :  { %15526 = vmatmul.mubr.msk.f32.vlgmr.msra.gmra.mrb[4].mxu1 %vm191_vm1, %v18607_v40  ;;  %2526 = vmatprep.mubr.f32.mxu0 %v18651_v53 }
  0xd6   :  { %15535 = vmatpush1.msk.msra.mxu1 %vm198_vm0, %v18662_v55  ;;  %2609 = vmatprep.mubr.f32.mxu1 %v18651_v53 }
  0xd7   :  { %15544 = vmatprep.subr.msk.mxu1 %vm198_vm0, %v18917_v62 }
  0xd8   :  { %15522 = vmatmul.mubr.msk.f32.vlgmr.msra.gmra.mrb[4].mxu0 %vm191_vm1, %v18607_v40  ;;  %v15529_v40 = vld [vmem:[%s22060_s1 + $0x48] sm:$0x3] }
  0xd9   :  { %15531 = vmatpush1.msk.msra.mxu0 %vm198_vm0, %v18680_v60  ;;  %15527 = vmatmul.mubr.msk.f32.gmra.mrb[6].mxu1 %vm191_vm1, %v15519_v27 }
  0xda   :  { %2532 = vmatprep.mubr.f32.mxu0 %v18651_v53  ;;  %2773 = vmatprep.mubr.f32.mxu1 %v18651_v53 }
  0xdb   :  { %15540 = vmatprep.subr.msk.mxu0 %vm198_vm0, %v18930_v1 }
  0xdc   :  { %15523 = vmatmul.mubr.msk.f32.gmra.mrb[6].mxu0 %vm191_vm1, %v15519_v27 }
  0xdd   :  { %15536 = vmatmul.mubr.msk.f32.vlgmr.msra.gmra.mrb[4].mxu1 %vm191_vm1, %v18643_v49  ;;  %2696 = vmatprep.mubr.f32.mxu0 %v18651_v53 }
  0xde   :  { %15545 = vmatpush1.msk.msra.mxu1 %vm198_vm0, %v18938_v2  ;;  %2779 = vmatprep.mubr.f32.mxu1 %v18651_v53 }
  0xdf   :  { %15554 = vmatprep.subr.msk.mxu1 %vm198_vm0, %v18726_v11 }
  0xe0   :  { %15532 = vmatmul.mubr.msk.f32.vlgmr.msra.gmra.mrb[4].mxu0 %vm191_vm1, %v18643_v49  ;;  %v3332_v49 = vpop.permute.xlu1 %3331 }
  0xe1   :  { %15541 = vmatpush1.msk.msra.mxu0 %vm198_vm0, %v18950_v7  ;;  %15537 = vmatmul.mubr.msk.f32.gmra.mrb[6].mxu1 %vm191_vm1, %v15529_v40  ;;  %v19005_v21 = vsel %vm1689_vm4, %v3332_v49, %v3334_v8 }
  0xe2   :  { %15550 = vmatprep.subr.msk.mxu0 %vm198_vm0, %v18715_v5  ;;  %2702 = vmatprep.mubr.f32.mxu0 %v18651_v53 }
  0xe3   :  { %2966 = vmatprep.mubr.f32.mxu1 %v18651_v53 }
  0xe4   :  { %15533 = vmatmul.mubr.msk.f32.gmra.mrb[6].mxu0 %vm191_vm1, %v15529_v40  ;;  %v3336_v17 = vpop.permute.xlu1 %3335 }
  0xe5   :  { %15546 = vmatmul.mubr.msk.f32.vlgmr.msra.gmra.mrb[4].mxu1 %vm191_vm1, %v18690_v63  ;;  %2889 = vmatprep.mubr.f32.mxu0 %v18651_v53  ;;  %v18992_v20 = vsel %vm1689_vm4, %v3336_v17, %v3338_v16  ;;  %v19013_v28 = vsel %vm1689_vm4, %v3334_v8, %v3336_v17 }
  0xe6   :  { %15555 = vmatpush1.msk.msra.mxu1 %vm198_vm0, %v18731_v12  ;;  %2972 = vmatprep.mubr.f32.mxu1 %v18651_v53 }
  0xe7   :  { %15564 = vmatprep.subr.msk.mxu1 %vm198_vm0, %v18764_v25 }
  0xe8   :  { %15542 = vmatmul.mubr.msk.f32.vlgmr.msra.gmra.mrb[4].mxu0 %vm191_vm1, %v18690_v63  ;;  %v15549_v63 = vld [vmem:[%s22060_s1 + $0x68] sm:$0x3]  ;;  %v3330_v29 = vpop.permute.xlu1 %3329 }
  0xe9   :  { %15551 = vmatpush1.msk.msra.mxu0 %vm198_vm0, %v18745_v18  ;;  %15547 = vmatmul.mubr.msk.f32.gmra.mrb[6].mxu1 %vm191_vm1, %v15539_v14  ;;  %v19025_v30 = vsel %vm1689_vm4, %v3330_v29, %v3332_v49 }
  0xea   :  { %15560 = vmatprep.subr.msk.mxu0 %vm198_vm0, %v18753_v19  ;;  %2895 = vmatprep.mubr.f32.mxu0 %v18651_v53 }
  0xeb   :  { %3136 = vmatprep.mubr.f32.mxu1 %v18651_v53 }
  0xec   :  { %15543 = vmatmul.mubr.msk.f32.gmra.mrb[6].mxu0 %vm191_vm1, %v15539_v14 }
  0xed   :  { %15556 = vmatmul.mubr.msk.f32.vlgmr.msra.gmra.mrb[4].mxu1 %vm191_vm1, %v18723_v10  ;;  %3059 = vmatprep.mubr.f32.mxu0 %v18651_v53 }
  0xee   :  { %15565 = vmatpush1.msk.msra.mxu1 %vm198_vm0, %v18769_v26  ;;  %3142 = vmatprep.mubr.f32.mxu1 %v18651_v53 }
  0xef   :  { %15574 = vmatprep.subr.msk.mxu1 %vm198_vm0, %v18992_v20 }
  0xf0   :  { %15552 = vmatmul.mubr.msk.f32.vlgmr.msra.gmra.mrb[4].mxu0 %vm191_vm1, %v18723_v10  ;;  %v15559_v10 = vld [vmem:[%s22060_s1 + $0x78] sm:$0x3] }
  0xf1   :  { %15561 = vmatpush1.msk.msra.mxu0 %vm198_vm0, %v18783_v33  ;;  %15557 = vmatmul.mubr.msk.f32.gmra.mrb[6].mxu1 %vm191_vm1, %v15549_v63 }
  0xf2   :  { %3065 = vmatprep.mubr.f32.mxu0 %v18651_v53  ;;  %3306 = vmatprep.mubr.f32.mxu1 %v18651_v53 }
  0xf3   :  { %15570 = vmatprep.subr.msk.mxu0 %vm198_vm0, %v19005_v21 }
  0xf4   :  { %15553 = vmatmul.mubr.msk.f32.gmra.mrb[6].mxu0 %vm191_vm1, %v15549_v63 }
  0xf5   :  { %15566 = vmatmul.mubr.msk.f32.vlgmr.msra.gmra.mrb[4].mxu1 %vm191_vm1, %v18761_v23  ;;  %3229 = vmatprep.mubr.f32.mxu0 %v18651_v53 }
  0xf6   :  { %3312 = vmatprep.mubr.f32.mxu1 %v18651_v53  ;;  %15575 = vmatpush1.msk.msra.mxu1 %vm198_vm0, %v19013_v28  ;;  %v15569_v53 = vld [vmem:[%s22060_s1 + $0x88] sm:$0x3] }
  0xf7   :  { %15584 = vmatprep.subr.msk.mxu1 %vm198_vm0, %v18501_v24 }
  0xf8   :  { %15562 = vmatmul.mubr.msk.f32.vlgmr.msra.gmra.mrb[4].mxu0 %vm191_vm1, %v18761_v23  ;;  %v15579_v23 = vld [vmem:[%s22060_s1 + $0x18] sm:$0x3] }
  0xf9   :  { %15571 = vmatpush1.msk.msra.mxu0 %vm198_vm0, %v19025_v30  ;;  %15567 = vmatmul.mubr.msk.f32.gmra.mrb[6].mxu1 %vm191_vm1, %v15559_v10 }
  0xfa   :  { %3235 = vmatprep.mubr.f32.mxu0 %v19037_v36  ;;  %3498 = vmatprep.mubr.f32.mxu1 %v19037_v36 }
  0xfb   :  { %15580 = vmatprep.subr.msk.mxu0 %vm198_vm0, %v18490_v22 }
  0xfc   :  { %15563 = vmatmul.mubr.msk.f32.gmra.mrb[6].mxu0 %vm191_vm1, %v15559_v10 }
  0xfd   :  { %15576 = vmatmul.mubr.msk.f32.vlgmr.msra.gmra.mrb[4].mxu1 %vm191_vm1, %v18798_v34  ;;  %3421 = vmatprep.mubr.f32.mxu0 %v19037_v36 }
  0xfe   :  { %3504 = vmatprep.mubr.f32.mxu1 %v19037_v36  ;;  %15585 = vmatpush1.msk.msra.mxu1 %vm198_vm0, %v18891_v54 }
  0xff   :  { %15592 = vmatprep.subr.msk.mxu1 %vm198_vm0, %v18397_v15  ;;  %v18132_v15 = vld [vmem:[%s22078_s23 + $0x30] sm:$0x77] }
 0x100   :  { %15572 = vmatmul.mubr.msk.f32.vlgmr.msra.gmra.mrb[4].mxu0 %vm191_vm1, %v18798_v34 }
 0x101   :  { %15577 = vmatmul.mubr.msk.f32.gmra.mrb[6].mxu1 %vm191_vm1, %v15569_v53  ;;  %3427 = vmatprep.mubr.f32.mxu0 %v19037_v36 }
 0x102   :  { %3756 = vmatprep.mubr.f32.mxu1 %v19037_v36  ;;  %15581 = vmatpush1.msk.msra.mxu0 %vm198_vm0, %v18903_v56 }
 0x103   :  { %15588 = vmatprep.subr.msk.mxu0 %vm198_vm0, %v18378_v13 }
 0x104   :  { %15573 = vmatmul.mubr.msk.f32.gmra.mrb[6].mxu0 %vm191_vm1, %v15569_v53 }
 0x105   :  { %15586 = vmatmul.mubr.msk.f32.vlgmr.msra.gmra.mrb[8].mxu1 %vm191_vm1, %v18833_v35  ;;  %3679 = vmatprep.mubr.f32.mxu0 %v19037_v36 }
 0x106   :  { %15593 = vmatpush1.msk.msra.mxu1 %vm198_vm0, %v18132_v15  ;;  %3762 = vmatprep.mubr.f32.mxu1 %v19037_v36 }
 0x107   :  { %15602 = vmatprep.subr.msk.mxu1 %vm198_vm0, %v18624_v46 }
 0x108   :  { %21 = vsyncpa [#allocation10], 0  ;;  %15582 = vmatmul.mubr.msk.f32.vlgmr.msra.gmra.mrb[8].mxu0 %vm191_vm1, %v18833_v35  ;;  %v18133_v13 = vld [vmem:[%s22078_s23 + $0x28] sm:$0x77]  ;;  %v19093_v34 = vpop.permute.xlu0 %4613  ;;  %v19095_v37 = vpop.permute.xlu1 %4615  ;;  %v19173_v42 = vld [vmem:[%s22060_s1 + $0x40] sm:$0xff]  ;;  %s18173_s25 = smov 1  }
 0x109   :  { %15589 = vmatpush1.msk.msra.mxu0 %vm198_vm0, %v18133_v13  ;;  %15587 = vmatmul.mubr.msk.f32.gmra.mrb[10].mxu1 %vm191_vm1, %v15579_v23  ;;  %v3606_v32 = vld [vmem:[%s22060_s1 + $0x8] sm:$0x3]  ;;  %v4622_v48 = vsel %vm1301_vm3, %v19093_v34, %v19095_v37  ;;  %v19205_v61 = vld [vmem:[%s22060_s1 + $0x50] sm:$0xff]  ;;  %v15627_v27 = vld [vmem:[%s22060_s1 + $0x58] sm:$0x3]  ;;  %s18174_s26 = smov 16  }
 0x10a   :  { %15598 = vmatprep.subr.msk.mxu0 %vm198_vm0, %v18631_v47  ;;  %3685 = vmatprep.mubr.f32.mxu0 %v19037_v36  ;;  %v19241_v17 = vld [vmem:[%s22060_s1 + $0x60] sm:$0xff]  ;;  %v15637_v29 = vld [vmem:[%s22060_s1 + $0x68] sm:$0x3]  ;;  %s18177_s21 = smov 110   ;;  %s18178_s24 = smov 96  }
 0x10b   :  { %3916 = vmatprep.mubr.f32.mxu1 %v19037_v36 }
 0x10c   :  { %15583 = vmatmul.mubr.msk.f32.gmra.mrb[10].mxu0 %vm191_vm1, %v15579_v23  ;;  %v4618_v38 = vpop.permute.xlu0 %4617  ;;  %v4620_v6 = vpop.permute.xlu1 %4619  ;;  %v19277_v23 = vld [vmem:[%s22060_s1 + $0x70] sm:$0xff] }
 0x10d   :  { %15594 = vmatmul.mubr.msk.f32.vlgmr.msra.gmra.mrb[8].mxu1 %vm191_vm1, %v18863_v45  ;;  %3839 = vmatprep.mubr.f32.mxu0 %v19037_v36  ;;  %v4624_v41 = vsel %vm1301_vm3, %v4618_v38, %v4620_v6  ;;  %v4623_v50 = vsel %vm1301_vm3, %v19095_v37, %v4618_v38 }
 0x10e   :  { %15603 = vmatpush1.msk.msra.mxu1 %vm198_vm0, %v18662_v55  ;;  %3922 = vmatprep.mubr.f32.mxu1 %v19037_v36 }
 0x10f   :  { %15612 = vmatprep.subr.msk.mxu1 %vm198_vm0, %v18670_v58  ;;  %v19118_v58 = vld [vmem:[%s22060_s1 + $0x20] sm:$0xff] }
 0x110   :  { %15590 = vmatmul.mubr.msk.f32.vlgmr.msra.gmra.mrb[8].mxu0 %vm191_vm1, %v18863_v45  ;;  %v4612_v31 = vpop.permute.xlu0 %4611  ;;  %v19136_v35 = vpop.permute.xlu1 %4805  ;;  %v15617_v45 = vld [vmem:[%s22060_s1 + $0x48] sm:$0x3] }
 0x111   :  { %15599 = vmatpush1.msk.msra.mxu0 %vm198_vm0, %v18680_v60  ;;  %15595 = vmatmul.mubr.msk.f32.gmra.mrb[10].mxu1 %vm191_vm1, %v3606_v32  ;;  %v4621_v3 = vsel %vm1301_vm3, %v4612_v31, %v19093_v34  ;;  %v15647_v34 = vld [vmem:[%s22060_s1 + $0x78] sm:$0x3] }
 0x112   :  { %15608 = vmatprep.subr.msk.mxu0 %vm198_vm0, %v18674_v59  ;;  %3845 = vmatprep.mubr.f32.mxu0 %v19037_v36  ;;  %v15597_v59 = vld [vmem:[%s22060_s1 + $0x28] sm:$0x3] }
 0x113   :  { %4078 = vmatprep.mubr.f32.mxu1 %v19037_v36 }
 0x114   :  { %15591 = vmatmul.mubr.msk.f32.gmra.mrb[10].mxu0 %vm191_vm1, %v3606_v32  ;;  %v4808_v9 = vpop.permute.xlu0 %4807  ;;  %v4810_v39 = vpop.permute.xlu1 %4809 }
 0x115   :  { %15604 = vmatmul.mubr.msk.f32.vlgmr.msra.gmra.mrb[8].mxu1 %vm191_vm1, %v19118_v58  ;;  %4001 = vmatprep.mubr.f32.mxu0 %v19037_v36  ;;  %v19223_v40 = vsel %vm1301_vm3, %v19136_v35, %v4808_v9  ;;  %v19230_v49 = vsel %vm1301_vm3, %v4808_v9, %v4810_v39 }
 0x116   :  { %15613 = vmatpush1.msk.msra.mxu1 %vm198_vm0, %v18696_v0  ;;  %4084 = vmatprep.mubr.f32.mxu1 %v19037_v36  ;;  %v19146_v0 = vld [vmem:[%s22060_s1 + $0x30] sm:$0xff] }
 0x117   :  { %15622 = vmatprep.subr.msk.mxu1 %vm198_vm0, %v18726_v11 }
 0x118   :  { %15600 = vmatmul.mubr.msk.f32.vlgmr.msra.gmra.mrb[8].mxu0 %vm191_vm1, %v19118_v58  ;;  %v4812_v43 = vpop.permute.xlu0 %4811  ;;  %v4804_v44 = vpop.permute.xlu1 %4803 }
 0x119   :  { %15609 = vmatpush1.msk.msra.mxu0 %vm198_vm0, %v18710_v4  ;;  %15605 = vmatmul.mubr.msk.f32.gmra.mrb[10].mxu1 %vm191_vm1, %v15597_v59  ;;  %v15607_v4 = vld [vmem:[%s22060_s1 + $0x38] sm:$0x3]  ;;  %v19200_v57 = vsel %vm1301_vm3, %v4810_v39, %v4812_v43  ;;  %v19248_v63 = vsel %vm1301_vm3, %v4804_v44, %v19136_v35 }
 0x11a   :  { %15618 = vmatprep.subr.msk.mxu0 %vm198_vm0, %v18715_v5  ;;  %4007 = vmatprep.mubr.f32.mxu0 %v19037_v36 }
 0x11b   :  { %4248 = vmatprep.mubr.f32.mxu1 %v19037_v36 }
 0x11c   :  { %15601 = vmatmul.mubr.msk.f32.gmra.mrb[10].mxu0 %vm191_vm1, %v15597_v59  ;;  %v4998_v51 = vpop.permute.xlu0 %4997  ;;  %v5000_v52 = vpop.permute.xlu1 %4999 }
 0x11d   :  { %15614 = vmatmul.mubr.msk.f32.vlgmr.msra.gmra.mrb[8].mxu1 %vm191_vm1, %v19146_v0  ;;  %4171 = vmatprep.mubr.f32.mxu0 %v19037_v36  ;;  %v19261_v10 = vsel %vm1689_vm4, %v4998_v51, %v5000_v52 }
 0x11e   :  { %15623 = vmatpush1.msk.msra.mxu1 %vm198_vm0, %v18731_v12  ;;  %4254 = vmatprep.mubr.f32.mxu1 %v19037_v36 }
 0x11f   :  { %15632 = vmatprep.subr.msk.mxu1 %vm198_vm0, %v18764_v25 }
 0x120   :  { %15610 = vmatmul.mubr.msk.f32.vlgmr.msra.gmra.mrb[8].mxu0 %vm191_vm1, %v19146_v0  ;;  %v5002_v8 = vpop.permute.xlu0 %5001  ;;  %v5004_v14 = vpop.permute.xlu1 %5003 }
 0x121   :  { %15619 = vmatpush1.msk.msra.mxu0 %vm198_vm0, %v18745_v18  ;;  %15615 = vmatmul.mubr.msk.f32.gmra.mrb[10].mxu1 %vm191_vm1, %v15607_v4  ;;  %v19236_v16 = vsel %vm1689_vm4, %v5002_v8, %v5004_v14  ;;  %v19269_v53 = vsel %vm1689_vm4, %v5000_v52, %v5002_v8 }
 0x122   :  { %15628 = vmatprep.subr.msk.mxu0 %vm198_vm0, %v18753_v19  ;;  %4177 = vmatprep.mubr.f32.mxu0 %v19037_v36 }
 0x123   :  { %4418 = vmatprep.mubr.f32.mxu1 %v19037_v36 }
 0x124   :  { %15611 = vmatmul.mubr.msk.f32.gmra.mrb[10].mxu0 %vm191_vm1, %v15607_v4  ;;  %v4996_v15 = vpop.permute.xlu0 %4995  ;;  %v15735_v4 = vld [vmem:[%s22060_s1 + $0x78] sm:$0x3] }
 0x125   :  { %15624 = vmatmul.mubr.msk.f32.vlgmr.msra.gmra.mrb[8].mxu1 %vm191_vm1, %v19173_v42  ;;  %4341 = vmatprep.mubr.f32.mxu0 %v19037_v36  ;;  %v19283_v13 = vsel %vm1689_vm4, %v4996_v15, %v4998_v51 }
 0x126   :  { %15633 = vmatpush1.msk.msra.mxu1 %vm198_vm0, %v18769_v26  ;;  %4424 = vmatprep.mubr.f32.mxu1 %v19037_v36 }
 0x127   :  { %15642 = vmatprep.subr.msk.mxu1 %vm198_vm0, %v4624_v41 }
 0x128   :  { %15620 = vmatmul.mubr.msk.f32.vlgmr.msra.gmra.mrb[8].mxu0 %vm191_vm1, %v19173_v42 }
 0x129   :  { %15629 = vmatpush1.msk.msra.mxu0 %vm198_vm0, %v18783_v33  ;;  %15625 = vmatmul.mubr.msk.f32.gmra.mrb[10].mxu1 %vm191_vm1, %v15617_v45 }
 0x12a   :  { %4347 = vmatprep.mubr.f32.mxu0 %v19037_v36  ;;  %15638 = vmatprep.subr.msk.mxu0 %vm198_vm0, %v4622_v48 }
 0x12b   :  { %4588 = vmatprep.mubr.f32.mxu1 %v19037_v36 }
 0x12c   :  { %15621 = vmatmul.mubr.msk.f32.gmra.mrb[10].mxu0 %vm191_vm1, %v15617_v45 }
 0x12d   :  { %15634 = vmatmul.mubr.msk.f32.vlgmr.msra.gmra.mrb[8].mxu1 %vm191_vm1, %v19205_v61  ;;  %4511 = vmatprep.mubr.f32.mxu0 %v19037_v36 }
 0x12e   :  { %15643 = vmatpush1.msk.msra.mxu1 %vm198_vm0, %v4623_v50  ;;  %4594 = vmatprep.mubr.f32.mxu1 %v19037_v36 }
 0x12f   :  { %15652 = vmatprep.subr.msk.mxu1 %vm198_vm0, %v19200_v57 }
 0x130   :  { %15630 = vmatmul.mubr.msk.f32.vlgmr.msra.gmra.mrb[8].mxu0 %vm191_vm1, %v19205_v61 }
 0x131   :  { %15639 = vmatpush1.msk.msra.mxu0 %vm198_vm0, %v4621_v3  ;;  %15635 = vmatmul.mubr.msk.f32.gmra.mrb[10].mxu1 %vm191_vm1, %v15627_v27 }
 0x132   :  { %4517 = vmatprep.mubr.f32.mxu0 %v19037_v36  ;;  %4780 = vmatprep.mubr.f32.mxu1 %v19037_v36 }
 0x133   :  { %15648 = vmatprep.subr.msk.mxu0 %vm198_vm0, %v19223_v40 }
 0x134   :  { %15631 = vmatmul.mubr.msk.f32.gmra.mrb[10].mxu0 %vm191_vm1, %v15627_v27 }
 0x135   :  { %15644 = vmatmul.mubr.msk.f32.vlgmr.msra.gmra.mrb[8].mxu1 %vm191_vm1, %v19241_v17  ;;  %4703 = vmatprep.mubr.f32.mxu0 %v19037_v36 }
 0x136   :  { %15653 = vmatpush1.msk.msra.mxu1 %vm198_vm0, %v19230_v49  ;;  %4786 = vmatprep.mubr.f32.mxu1 %v19037_v36 }
 0x137   :  { %15662 = vmatprep.subr.msk.mxu1 %vm198_vm0, %v19236_v16 }
 0x138   :  { %15640 = vmatmul.mubr.msk.f32.vlgmr.msra.gmra.mrb[8].mxu0 %vm191_vm1, %v19241_v17 }
 0x139   :  { %15649 = vmatpush1.msk.msra.mxu0 %vm198_vm0, %v19248_v63  ;;  %15645 = vmatmul.mubr.msk.f32.gmra.mrb[10].mxu1 %vm191_vm1, %v15637_v29 }
 0x13a   :  { %4709 = vmatprep.mubr.f32.mxu0 %v19037_v36  ;;  %4972 = vmatprep.mubr.f32.mxu1 %v19037_v36 }
 0x13b   :  { %15658 = vmatprep.subr.msk.mxu0 %vm198_vm0, %v19261_v10 }
 0x13c   :  { %15641 = vmatmul.mubr.msk.f32.gmra.mrb[10].mxu0 %vm191_vm1, %v15637_v29 }
 0x13d   :  { %15654 = vmatmul.mubr.msk.f32.vlgmr.msra.gmra.mrb[8].mxu1 %vm191_vm1, %v19277_v23  ;;  %4895 = vmatprep.mubr.f32.mxu0 %v19037_v36 }
 0x13e   :  { %15663 = vmatpush1.msk.msra.mxu1 %vm198_vm0, %v19269_v53  ;;  %4978 = vmatprep.mubr.f32.mxu1 %v19037_v36 }
 0x13f   :  { %15672 = vmatprep.subr.msk.mxu1 %vm198_vm0, %v18624_v46  ;;  %v18140_v46 = vld [vmem:[%s22060_s1 + $0x80] sm:$0xff] }
 0x140   :  { %15650 = vmatmul.mubr.msk.f32.vlgmr.msra.gmra.mrb[8].mxu0 %vm191_vm1, %v19277_v23 }
 0x141   :  { %15659 = vmatpush1.msk.msra.mxu0 %vm198_vm0, %v19283_v13  ;;  %15655 = vmatmul.mubr.msk.f32.gmra.mrb[10].mxu1 %vm191_vm1, %v15647_v34 }
 0x142   :  { %15668 = vmatprep.subr.msk.mxu0 %vm198_vm0, %v18631_v47  ;;  %4901 = vmatprep.mubr.f32.mxu0 %v19037_v36  ;;  %v15657_v47 = vld [vmem:[%s22060_s1 + $0x88] sm:$0x3] }
 0x143   :  { %5164 = vmatprep.mubr.f32.mxu1 %v19037_v36 }
 0x144   :  { %15651 = vmatmul.mubr.msk.f32.gmra.mrb[10].mxu0 %vm191_vm1, %v15647_v34 }
 0x145   :  { %15664 = vmatmul.mubr.msk.f32.vlgmr.msra.gmra.mrb[8].mxu1 %vm191_vm1, %v18140_v46  ;;  %5087 = vmatprep.mubr.f32.mxu0 %v19037_v36 }
 0x146   :  { %15673 = vmatpush1.msk.msra.mxu1 %vm198_vm0, %v18662_v55  ;;  %5170 = vmatprep.mubr.f32.mxu1 %v19037_v36  ;;  %v15666_v55 = vld [vmem:[%s22060_s1 + $0x10] sm:$0xff] }
 0x147   :  { %15680 = vmatprep.subr.msk.mxu1 %vm198_vm0, %v18501_v24  ;;  %v15667_v24 = vld [vmem:[%s22060_s1 + $0x18] sm:$0x3] }
 0x148   :  { %15660 = vmatmul.mubr.msk.f32.vlgmr.msra.gmra.mrb[8].mxu0 %vm191_vm1, %v18140_v46 }
 0x149   :  { %15669 = vmatpush1.msk.msra.mxu0 %vm198_vm0, %v18680_v60  ;;  %15665 = vmatmul.mubr.msk.f32.gmra.mrb[10].mxu1 %vm191_vm1, %v15657_v47  ;;  %v5272_v60 = vld [vmem:[%s22060_s1 + $0x8] sm:$0x3] }
 0x14a   :  { %5093 = vmatprep.mubr.f32.mxu0 %v19037_v36  ;;  %5422 = vmatprep.mubr.f32.mxu1 %v19037_v36 }
 0x14b   :  { %15676 = vmatprep.subr.msk.mxu0 %vm198_vm0, %v18490_v22  ;;  %v5271_v22 = vld [vmem:[%s22060_s1] sm:$0xff] }
 0x14c   :  { %15661 = vmatmul.mubr.msk.f32.gmra.mrb[10].mxu0 %vm191_vm1, %v15657_v47 }
 0x14d   :  { %15674 = vmatmul.mubr.msk.f32.vlgmr.msra.gmra.mrb[12].mxu1 %vm191_vm1, %v15666_v55  ;;  %5345 = vmatprep.mubr.f32.mxu0 %v19037_v36 }
 0x14e   :  { %15681 = vmatpush1.msk.msra.mxu1 %vm198_vm0, %v18891_v54  ;;  %5428 = vmatprep.mubr.f32.mxu1 %v19037_v36 }
 0x14f   :  { %15690 = vmatprep.subr.msk.mxu1 %vm198_vm0, %v18917_v62 }
 0x150   :  { %15670 = vmatmul.mubr.msk.f32.vlgmr.msra.gmra.mrb[12].mxu0 %vm191_vm1, %v15666_v55 }
 0x151   :  { %15677 = vmatpush1.msk.msra.mxu0 %vm198_vm0, %v18903_v56  ;;  %15675 = vmatmul.mubr.msk.f32.gmra.mrb[14].mxu1 %vm191_vm1, %v15667_v24 }
 0x152   :  { %15686 = vmatprep.subr.msk.mxu0 %vm198_vm0, %v18930_v1  ;;  %5351 = vmatprep.mubr.f32.mxu0 %v19037_v36 }
 0x153   :  { %5582 = vmatprep.mubr.f32.mxu1 %v19037_v36 }
 0x154   :  { %15671 = vmatmul.mubr.msk.f32.gmra.mrb[14].mxu0 %vm191_vm1, %v15667_v24 }
 0x155   :  { %15682 = vmatmul.mubr.msk.f32.vlgmr.msra.gmra.mrb[12].mxu1 %vm191_vm1, %v5271_v22  ;;  %5505 = vmatprep.mubr.f32.mxu0 %v19037_v36 }
 0x156   :  { %15691 = vmatpush1.msk.msra.mxu1 %vm198_vm0, %v18938_v2  ;;  %5588 = vmatprep.mubr.f32.mxu1 %v19037_v36 }
 0x157   :  { %15700 = vmatprep.subr.msk.mxu1 %vm198_vm0, %v18726_v11  ;;  %v15695_v11 = vld [vmem:[%s22060_s1 + $0x38] sm:$0x3] }
 0x158   :  { %15678 = vmatmul.mubr.msk.f32.vlgmr.msra.gmra.mrb[12].mxu0 %vm191_vm1, %v5271_v22 }
 0x159   :  { %15687 = vmatpush1.msk.msra.mxu0 %vm198_vm0, %v18950_v7  ;;  %15683 = vmatmul.mubr.msk.f32.gmra.mrb[14].mxu1 %vm191_vm1, %v5272_v60  ;;  %v15725_v7 = vld [vmem:[%s22060_s1 + $0x68] sm:$0x3] }
 0x15a   :  { %15696 = vmatprep.subr.msk.mxu0 %vm198_vm0, %v18715_v5  ;;  %5511 = vmatprep.mubr.f32.mxu0 %v19037_v36  ;;  %v15685_v5 = vld [vmem:[%s22060_s1 + $0x28] sm:$0x3] }
 0x15b   :  { %5744 = vmatprep.mubr.f32.mxu1 %v19037_v36 }
 0x15c   :  { %15679 = vmatmul.mubr.msk.f32.gmra.mrb[14].mxu0 %vm191_vm1, %v5272_v60 }
 0x15d   :  { %15692 = vmatmul.mubr.msk.f32.vlgmr.msra.gmra.mrb[12].mxu1 %vm191_vm1, %v19118_v58  ;;  %5667 = vmatprep.mubr.f32.mxu0 %v19037_v36 }
 0x15e   :  { %15701 = vmatpush1.msk.msra.mxu1 %vm198_vm0, %v18731_v12  ;;  %5750 = vmatprep.mubr.f32.mxu1 %v19037_v36  ;;  %v15705_v12 = vld [vmem:[%s22060_s1 + $0x48] sm:$0x3] }
 0x15f   :  { %15710 = vmatprep.subr.msk.mxu1 %vm198_vm0, %v18764_v25  ;;  %v134_v25 = vlaneseq }
 0x160   :  { %15688 = vmatmul.mubr.msk.f32.vlgmr.msra.gmra.mrb[12].mxu0 %vm191_vm1, %v19118_v58 }
 0x161   :  { %15697 = vmatpush1.msk.msra.mxu0 %vm198_vm0, %v18745_v18  ;;  %15693 = vmatmul.mubr.msk.f32.gmra.mrb[14].mxu1 %vm191_vm1, %v15685_v5  ;;  %v6620_v18 = vpop.permute.xlu1 %6619  ;;  %v135_v54 = vand.u32 127, %v134_v25 }
 0x162   :  { %15706 = vmatprep.subr.msk.mxu0 %vm198_vm0, %v18753_v19  ;;  %5673 = vmatprep.mubr.f32.mxu0 %v19037_v36  ;;  %v6622_v19 = vpop.permute.xlu0 %6621 }
 0x163   :  { %5914 = vmatprep.mubr.f32.mxu1 %v19037_v36  ;;  %v137_v2 = vadd.s32 256, %v135_v54  ;;  %v139_v6 = vand.u32 255, %v135_v54 }
 0x164   :  { %15689 = vmatmul.mubr.msk.f32.gmra.mrb[14].mxu0 %vm191_vm1, %v15685_v5 }
 0x165   :  { %15702 = vmatmul.mubr.msk.f32.vlgmr.msra.gmra.mrb[12].mxu1 %vm191_vm1, %v19146_v0  ;;  %5837 = vmatprep.mubr.f32.mxu0 %v19037_v36  ;;  %v143_v41 = vshra.s32 %v139_v6, 4  ;;  %v151_v44 = vand.u32 15, %v139_v6 }
 0x166   :  { %15711 = vmatpush1.msk.msra.mxu1 %vm198_vm0, %v18769_v26  ;;  %5920 = vmatprep.mubr.f32.mxu1 %v19037_v36  ;;  %v15715_v26 = vld [vmem:[%s22060_s1 + $0x58] sm:$0x3]  ;;  %v6626_v56 = vpop.permute.xlu0 %6625 }
 0x167   :  { %15720 = vmatprep.subr.msk.mxu1 %vm198_vm0, %v18992_v20  ;;  %v138_v20 = vadd.s32 384, %v135_v54  ;;  %vm147_vm9 = vcmp.lt.s32.totalorder %v143_v41, 15  ;;  %vm155_vm10 = vcmp.lt.s32.totalorder %v151_v44, 15 }
 0x168   :  { %15698 = vmatmul.mubr.msk.f32.vlgmr.msra.gmra.mrb[12].mxu0 %vm191_vm1, %v19146_v0  ;;  %vm19532_vm15 = vmand %vm147_vm9, %vm155_vm10  ;;  %vm6891_vm9 = vcmask 132096   ;;  %vm3592_vm10 = vcmask 1047560  }
 0x169   :  { %15707 = vmatpush1.msk.msra.mxu0 %vm198_vm0, %v18783_v33  ;;  %15703 = vmatmul.mubr.msk.f32.gmra.mrb[14].mxu1 %vm191_vm1, %v15695_v11  ;;  %v6624_v33 = vpop.permute.xlu1 %6623  ;;  %v142_v32 = vand.u32 255, %v138_v20 }
 0x16a   :  { %15716 = vmatprep.subr.msk.mxu0 %vm198_vm0, %v19005_v21  ;;  %5843 = vmatprep.mubr.f32.mxu0 %v19037_v36  ;;  %v6630_v1 = vsel %vm1689_vm4, %v6624_v33, %v6626_v56  ;;  %v6628_v21 = vsel %vm1689_vm4, %v6620_v18, %v6622_v19  ;;  %v6629_v38 = vsel %vm1689_vm4, %v6622_v19, %v6624_v33  ;;  %v19482_v0 = vpop.permute.xlu0 %1872 }
 0x16b   :  { %6084 = vmatprep.mubr.f32.mxu1 %v19037_v36  ;;  %v146_v9 = vshra.s32 %v142_v32, 4  ;;  %v154_v39 = vand.u32 15, %v142_v32 }
 0x16c   :  { %15699 = vmatmul.mubr.msk.f32.gmra.mrb[14].mxu0 %vm191_vm1, %v15695_v11 }
 0x16d   :  { %15712 = vmatmul.mubr.msk.f32.vlgmr.msra.gmra.mrb[12].mxu1 %vm191_vm1, %v19173_v42  ;;  %6007 = vmatprep.mubr.f32.mxu0 %v19037_v36  ;;  %v6618_v62 = vpop.permute.xlu1 %6617  ;;  %vm150_vm7 = vcmp.lt.s32.totalorder %v146_v9, 15  ;;  %vm158_vm8 = vcmp.lt.s32.totalorder %v154_v39, 15 }
 0x16e   :  { %15721 = vmatpush1.msk.msra.mxu1 %vm198_vm0, %v19013_v28  ;;  %6090 = vmatprep.mubr.f32.mxu1 %v19037_v36  ;;  %v136_v28 = vadd.s32 128, %v135_v54  ;;  %v6627_v35 = vsel %vm1689_vm4, %v6618_v62, %v6620_v18  ;;  %v19502_v27 = vpop.permute.xlu0 %1895  ;;  %vm19520_vm14 = vmand %vm150_vm7, %vm158_vm8  ;;  %vm6863_vm7 = vcmask 138240   ;;  %vm6886_vm8 = vcmask 1041544  }
 0x16f   :  { %15730 = vmatprep.subr.msk.mxu1 %vm198_vm0, %v19200_v57  ;;  %v15744_v57 = vld [vmem:[%s22060_s1 + $0x80] sm:$0xff] }
 0x170   :  { %15708 = vmatmul.mubr.msk.f32.vlgmr.msra.gmra.mrb[12].mxu0 %vm191_vm1, %v19173_v42  ;;  %v140_v58 = vand.u32 255, %v136_v28 }
 0x171   :  { %15717 = vmatpush1.msk.msra.mxu0 %vm198_vm0, %v19025_v30  ;;  %15713 = vmatmul.mubr.msk.f32.gmra.mrb[14].mxu1 %vm191_vm1, %v15705_v12  ;;  %v141_v30 = vand.u32 255, %v137_v2  ;;  %v19473_v37 = vpop.permute.xlu1 %1877 }
 0x172   :  { %15726 = vmatprep.subr.msk.mxu0 %vm198_vm0, %v19223_v40  ;;  %6013 = vmatprep.mubr.f32.mxu0 %v19037_v36  ;;  %v144_v45 = vshra.s32 %v140_v58, 4  ;;  %v152_v51 = vand.u32 15, %v140_v58 }
 0x173   :  { %6254 = vmatprep.mubr.f32.mxu1 %v19037_v36  ;;  %v145_v59 = vshra.s32 %v141_v30, 4  ;;  %v153_v31 = vand.u32 15, %v141_v30 }
 0x174   :  { %15709 = vmatmul.mubr.msk.f32.gmra.mrb[14].mxu0 %vm191_vm1, %v15705_v12  ;;  %vm148_vm11 = vcmp.lt.s32.totalorder %v144_v45, 15  ;;  %vm156_vm13 = vcmp.lt.s32.totalorder %v152_v51, 15 }
 0x175   :  { %15722 = vmatmul.mubr.msk.f32.vlgmr.msra.gmra.mrb[12].mxu1 %vm191_vm1, %v19205_v61  ;;  %6177 = vmatprep.mubr.f32.mxu0 %v19037_v36  ;;  %v19491_v43 = vpop.permute.xlu1 %1890  ;;  %vm149_vm5 = vcmp.lt.s32.totalorder %v145_v59, 15  ;;  %vm157_vm6 = vcmp.lt.s32.totalorder %v153_v31, 15 }
 0x176   :  { %15731 = vmatpush1.msk.msra.mxu1 %vm198_vm0, %v19230_v49  ;;  %6260 = vmatprep.mubr.f32.mxu1 %v19037_v36  ;;  %vm19509_vm12 = vmand %vm149_vm5, %vm157_vm6  ;;  %vm65_vm5 = vcmask 517120   ;;  %vm6880_vm6 = vcmask 1047688  }
 0x177   :  { %15740 = vmatprep.subr.msk.mxu1 %vm198_vm0, %v19236_v16  ;;  %66 = vst.msk [vmem:[#allocation2 + $0x48] sm:$0x3] %vm65_vm5, %v19037_v36  ;;  %76 = vst.msk [vmem:[#allocation3 + $0x48] sm:$0x3] %vm65_vm5, %v19037_v36 }
 0x178   :  { %15718 = vmatmul.mubr.msk.f32.vlgmr.msra.gmra.mrb[12].mxu0 %vm191_vm1, %v19205_v61  ;;  %86 = vst.msk [vmem:[#allocation4 + $0x48] sm:$0x3] %vm65_vm5, %v19037_v36  ;;  %vm6921_vm5 = vcmask 1041408  }
 0x179   :  { %15727 = vmatpush1.msk.msra.mxu0 %vm198_vm0, %v19248_v63  ;;  %15723 = vmatmul.mubr.msk.f32.gmra.mrb[14].mxu1 %vm191_vm1, %v15715_v26 }
 0x17a   :  { %15736 = vmatprep.subr.msk.mxu0 %vm198_vm0, %v19261_v10  ;;  %6183 = vmatprep.mubr.f32.mxu0 %v19037_v36 }
 0x17b   :  { %6424 = vmatprep.mubr.f32.mxu1 %v19037_v36 }
 0x17c   :  { %15719 = vmatmul.mubr.msk.f32.gmra.mrb[14].mxu0 %vm191_vm1, %v15715_v26 }
 0x17d   :  { %15732 = vmatmul.mubr.msk.f32.vlgmr.msra.gmra.mrb[12].mxu1 %vm191_vm1, %v19241_v17  ;;  %6347 = vmatprep.mubr.f32.mxu0 %v19037_v36 }
 0x17e   :  { %15741 = vmatpush1.msk.msra.mxu1 %vm198_vm0, %v19269_v53  ;;  %6430 = vmatprep.mubr.f32.mxu1 %v19037_v36 }
 0x17f   :  { %15750 = vmatprep.subr.msk.mxu1 %vm198_vm0, %v6630_v1 }
 0x180   :  { %15728 = vmatmul.mubr.msk.f32.vlgmr.msra.gmra.mrb[12].mxu0 %vm191_vm1, %v19241_v17 }
 0x181   :  { %15737 = vmatpush1.msk.msra.mxu0 %vm198_vm0, %v19283_v13  ;;  %15733 = vmatmul.mubr.msk.f32.gmra.mrb[14].mxu1 %vm191_vm1, %v15725_v7  ;;  %v15745_v13 = vld [vmem:[%s22060_s1 + $0x88] sm:$0x3]  ;;  %s18172_s1 = smov 17  }
 0x182   :  { %6353 = vmatprep.mubr.f32.mxu0 %v19037_v36  ;;  %6594 = vmatprep.mubr.f32.mxu1 %v19037_v36 }
 0x183   :  { %15746 = vmatprep.subr.msk.mxu0 %vm198_vm0, %v6628_v21 }
 0x184   :  { %15729 = vmatmul.mubr.msk.f32.gmra.mrb[14].mxu0 %vm191_vm1, %v15725_v7 }
 0x185   :  { %15742 = vmatmul.mubr.msk.f32.vlgmr.msra.gmra.mrb[12].mxu1 %vm191_vm1, %v19277_v23  ;;  %6517 = vmatprep.mubr.f32.mxu0 %v19037_v36 }
 0x186   :  { %6600 = vmatprep.mubr.f32.mxu1 %v19037_v36  ;;  %15751 = vmatpush1.msk.msra.mxu1 %vm198_vm0, %v6629_v38 }
 0x188   :  { %v1851_v42 = vpop.f32.mrb[0].mxu1  ;;  %15738 = vmatmul.mubr.msk.f32.vlgmr.msra.gmra.mrb[12].mxu0 %vm191_vm1, %v19277_v23 }
 0x189   :  { %v1882_v48 = vmul.f32 %v19482_v0, %v1851_v42  ;;  %15747 = vmatpush1.msk.msra.mxu0 %vm198_vm0, %v6627_v35  ;;  %v1853_v50 = vpop.f32.mrb[1].mxu1  ;;  %15743 = vmatmul.mubr.msk.f32.gmra.mrb[14].mxu1 %vm191_vm1, %v15735_v4  ;;  %vm19544_vm0 = vmand %vm148_vm11, %vm156_vm13  ;;  %vm3575_vm11 = vcmask 7168   ;;  %vm3603_vm13 = vcmask 1024  }
 0x18a   :  { %v1883_v52 = vmul.f32 %v19482_v0, %v1853_v50  ;;  %6523 = vmatprep.mubr.f32.mxu0 %v19037_v36  ;;  %6786 = vmatprep.mubr.f32.mxu1 %v19037_v36 }
 0x18b   :  { %v1774_v61 = vpop.f32.mrb[0].mxu0  ;;  %v1900_v3 = vadd.f32 %v19491_v43, %v1882_v48 }
 0x18c   :  { %v1880_v40 = vmul.f32 %v19482_v0, %v1774_v61  ;;  %v1776_v8 = vpop.f32.mrb[1].mxu0  ;;  %v1857_v14 = vpop.f32.mrb[2].mxu1  ;;  %15739 = vmatmul.mubr.msk.f32.gmra.mrb[14].mxu0 %vm191_vm1, %v15735_v4  ;;  %v1901_v16 = vadd.f32 %v19491_v43, %v1883_v52 }
 0x18d   :  { %v1881_v17 = vmul.f32 %v19482_v0, %v1776_v8  ;;  %v1886_v63 = vmul.f32 %v19473_v37, %v1857_v14  ;;  %v1859_v29 = vpop.f32.mrb[3].mxu1  ;;  %15752 = vmatmul.mubr.msk.f32.vlgmr.msra.gmra.mrb[12].mxu1 %vm191_vm1, %v15744_v57  ;;  %6709 = vmatprep.mubr.f32.mxu0 %v19037_v36  ;;  %v1908_v10 = vmax.f32 %v1900_v3, 0.0 }
 0x18e   :  { %v1898_v15 = vadd.f32 %v19491_v43, %v1880_v40  ;;  %v1887_v23 = vmul.f32 %v19473_v37, %v1859_v29  ;;  %6792 = vmatprep.mubr.f32.mxu1 %v19037_v36  ;;  %v1909_v34 = vmax.f32 %v1901_v16, 0.0 }
 0x18f   :  { %v1899_v47 = vadd.f32 %v19491_v43, %v1881_v17  ;;  %v1780_v55 = vpop.f32.mrb[2].mxu0  ;;  %v1904_v24 = vadd.f32 %v19502_v27, %v1886_v63  ;;  %v19540_v22 = vsel %vm19509_vm12, %v1908_v10, 0.0 }
 0x190   :  { %v1906_v60 = vmax.f32 %v1898_v15, 0.0  ;;  %v1884_v11 = vmul.f32 %v19473_v37, %v1780_v55  ;;  %v1782_v12 = vpop.f32.mrb[3].mxu0  ;;  %15748 = vmatmul.mubr.msk.f32.vlgmr.msra.gmra.mrb[12].mxu0 %vm191_vm1, %v15744_v57  ;;  %v1905_v18 = vadd.f32 %v19502_v27, %v1887_v23  ;;  %v19553_v19 = vsel %vm19520_vm14, %v1909_v34, 0.0 }
 0x191   :  { %v1907_v26 = vmax.f32 %v1899_v47, 0.0  ;;  %v1885_v33 = vmul.f32 %v19473_v37, %v1782_v12  ;;  %15753 = vmatmul.mubr.msk.f32.gmra.mrb[14].mxu1 %vm191_vm1, %v15745_v13  ;;  %6715 = vmatprep.mubr.f32.mxu0 %v19037_v36  ;;  %v1912_v54 = vmax.f32 %v1904_v24, 0.0 }
 0x192   :  { %v1922_v56 = vsel %vm19532_vm15, %v1906_v60, 0.0  ;;  %v1902_v62 = vadd.f32 %v19502_v27, %v1884_v11  ;;  %v1913_v1 = vmax.f32 %v1905_v18, 0.0  ;;  %7075 = vmatprep.mubr.f32.mxu1 %v19037_v36 }
 0x193   :  { %1930 = vst [vmem:[#allocation5] sm:$0xff] %v1922_v56  ;;  %v1923_v2 = vsel %vm19544_vm0, %v1907_v26, 0.0  ;;  %v1903_v7 = vadd.f32 %v19502_v27, %v1885_v33  ;;  %v1928_v20 = vsel %vm19509_vm12, %v1912_v54, 0.0 }
 0x194   :  { %1931 = vst [vmem:[#allocation5 + $0x8] sm:$0xff] %v1923_v2  ;;  %v1910_v21 = vmax.f32 %v1902_v62, 0.0  ;;  %15749 = vmatmul.mubr.msk.f32.gmra.mrb[14].mxu0 %vm191_vm1, %v15745_v13  ;;  %1936 = vst [vmem:[#allocation5 + $0x38] sm:$0x3] %v1928_v20  ;;  %v1929_v28 = vsel %vm19520_vm14, %v1913_v1, 0.0  ;;  %vm59_vm1 = vcmask 523264  }
 0x195   :  { %v1911_v30 = vmax.f32 %v1903_v7, 0.0  ;;  %1937 = vst [vmem:[#allocation5 + $0x40] sm:$0x3] %v1929_v28  ;;  %6998 = vmatprep.mubr.f32.mxu0 %v19037_v36  ;;  %60 = vst.msk [vmem:[#allocation2 + $0x20] sm:$0xff] %vm59_vm1, %v19037_v36 }
 0x196   :  { %v1926_v32 = vsel %vm19532_vm15, %v1910_v21, 0.0  ;;  %101 = vst.msk [vmem:[#allocation6 + $0x20] sm:$0xff] %vm59_vm1, %v19037_v36  ;;  %112 = vst.msk [vmem:[#allocation7 + $0x20] sm:$0xff] %vm59_vm1, %v19037_v36 }
 0x197   :  { %1934 = vst [vmem:[#allocation5 + $0x28] sm:$0x3] %v1926_v32  ;;  %v1927_v38 = vsel %vm19544_vm0, %v1911_v30, 0.0  ;;  %117 = vst.msk [vmem:[#allocation7 + $0x48] sm:$0xff] %vm59_vm1, %v19037_v36 }
 0x198   :  { %1935 = vst [vmem:[#allocation5 + $0x30] sm:$0x3] %v1927_v38  ;;  %71 = vst.msk [vmem:[#allocation3 + $0x20] sm:$0xff] %vm59_vm1, %v19037_v36 }
 0x199   :  { %81 = vst.msk [vmem:[#allocation4 + $0x20] sm:$0xff] %vm59_vm1, %v19037_v36  ;;  %vm5269_vm1 = vcmask 123904  }
 0x1d0   :  { %v19575_v6 = vpop.f32.mrb[4].mxu1 }
 0x1d1   :  { %v19577_v58 = vpop.f32.mrb[5].mxu1  ;;  %v3521_v38 = vmul.f32 %v19575_v6, %v19482_v0 }
 0x1d3   :  { %v3423_v59 = vpop.f32.mrb[4].mxu0  ;;  %v3529_v6 = vadd.f32 %v3521_v38, %v19491_v43 }
 0x1d4   :  { %v3425_v31 = vpop.f32.mrb[5].mxu0  ;;  %v19579_v35 = vpop.f32.mrb[6].mxu1  ;;  %v3519_v2 = vmul.f32 %v3423_v59, %v19482_v0 }
 0x1d5   :  { %v19581_v4 = vpop.f32.mrb[7].mxu1  ;;  %v3520_v28 = vmul.f32 %v3425_v31, %v19482_v0  ;;  %v3522_v31 = vmul.f32 %v19577_v58, %v19482_v0 }
 0x1d6   :  { %v3527_v59 = vadd.f32 %v3519_v2, %v19491_v43 }
 0x1d7   :  { %v19583_v9 = vpop.f32.mrb[6].mxu0  ;;  %v3530_v58 = vadd.f32 %v3522_v31, %v19491_v43 }
 0x1d8   :  { %v19585_v39 = vpop.f32.mrb[7].mxu0 }
 0x218   :  { %v19587_v41 = vpop.f32.mrb[8].mxu1 }
 0x219   :  { %v19589_v42 = vpop.f32.mrb[9].mxu1 }
 0x21b   :  { %v19591_v44 = vpop.f32.mrb[8].mxu0 }
 0x21c   :  { %v19593_v45 = vpop.f32.mrb[9].mxu0  ;;  %v19595_v48 = vpop.f32.mrb[10].mxu1 }
 0x21d   :  { %v19597_v50 = vpop.f32.mrb[11].mxu1 }
 0x21f   :  { %v19599_v51 = vpop.f32.mrb[10].mxu0 }
 0x220   :  { %v19601_v52 = vpop.f32.mrb[11].mxu0 }
 0x260   :  { %v6788_v57 = vpop.f32.mrb[12].mxu1 }
 0x261   :  { %v6809_v61 = vmul.f32 %v6788_v57, %v19482_v0  ;;  %v6790_v3 = vpop.f32.mrb[13].mxu1 }
 0x262   :  { %v6810_v40 = vmul.f32 %v6790_v3, %v19482_v0  ;;  %v3528_v3 = vadd.f32 %v3520_v28, %v19491_v43  ;;  %v5190_v28 = vmul.f32 %v19601_v52, %v19473_v37  ;;  %v5192_v52 = vmul.f32 %v19597_v50, %v19473_v37 }
 0x263   :  { %v6711_v8 = vpop.f32.mrb[12].mxu0  ;;  %v6817_v63 = vadd.f32 %v6809_v61, %v19491_v43 }
 0x264   :  { %v6807_v14 = vmul.f32 %v6711_v8, %v19482_v0  ;;  %v6713_v16 = vpop.f32.mrb[13].mxu0  ;;  %v6794_v17 = vpop.f32.mrb[14].mxu1  ;;  %v6818_v23 = vadd.f32 %v6810_v40, %v19491_v43 }
 0x265   :  { %v6808_v29 = vmul.f32 %v6713_v16, %v19482_v0  ;;  %v6796_v10 = vpop.f32.mrb[15].mxu1  ;;  %v6825_v60 = vmax.f32 %v6817_v63, 0.0  ;;  %v6813_v18 = vmul.f32 %v6794_v17, %v19473_v37  ;;  %v3523_v16 = vmul.f32 %v19583_v9, %v19473_v37 }
 0x266   :  { %v6815_v15 = vadd.f32 %v6807_v14, %v19491_v43  ;;  %v6826_v54 = vmax.f32 %v6818_v23, 0.0  ;;  %v6814_v56 = vmul.f32 %v6796_v10, %v19473_v37  ;;  %v3535_v14 = vmax.f32 %v3527_v59, 0.0 }
 0x267   :  { %v6816_v13 = vadd.f32 %v6808_v29, %v19491_v43  ;;  %v6717_v34 = vpop.f32.mrb[14].mxu0  ;;  %v6821_v7 = vadd.f32 %v6813_v18, %v19502_v27  ;;  %v6833_v21 = vsel %vm19509_vm12, %v6825_v60, 0.0  ;;  %v3536_v63 = vmax.f32 %v3528_v3, 0.0 }
 0x268   :  { %v6823_v47 = vmax.f32 %v6815_v15, 0.0  ;;  %v6811_v55 = vmul.f32 %v6717_v34, %v19473_v37  ;;  %v6719_v24 = vpop.f32.mrb[15].mxu0  ;;  %v6822_v30 = vadd.f32 %v6814_v56, %v19502_v27  ;;  %v6834_v36 = vsel %vm19520_vm14, %v6826_v54, 0.0 }
 0x269   :  { %v6824_v11 = vmax.f32 %v6816_v13, 0.0  ;;  %v6812_v12 = vmul.f32 %v6719_v24, %v19473_v37  ;;  %v6829_v57 = vmax.f32 %v6821_v7, 0.0  ;;  %v3524_v29 = vmul.f32 %v19585_v39, %v19473_v37 }
 0x26a   :  { %v6819_v26 = vadd.f32 %v6811_v55, %v19502_v27  ;;  %v6831_v33 = vsel %vm19532_vm15, %v6823_v47, 0.0  ;;  %v6830_v40 = vmax.f32 %v6822_v30, 0.0  ;;  %v3537_v15 = vmax.f32 %v3529_v6, 0.0 }
 0x26b   :  { %v6820_v62 = vadd.f32 %v6812_v12, %v19502_v27  ;;  %6847 = vrot.lane.b32.xlu1 %v6831_v33, %s18172_s1  ;;  %v6832_v1 = vsel %vm19544_vm0, %v6824_v11, 0.0  ;;  %v6837_v17 = vsel %vm19509_vm12, %v6829_v57, 0.0  ;;  %v3525_v9 = vmul.f32 %v19579_v35, %v19473_v37 }
 0x26c   :  { %6849 = vrot.lane.b32.xlu0 %v6832_v1, %s18172_s1  ;;  %v6827_v20 = vmax.f32 %v6819_v26, 0.0  ;;  %v6838_v10 = vsel %vm19520_vm14, %v6830_v40, 0.0  ;;  %v3531_v23 = vadd.f32 %v3523_v16, %v19502_v27  ;;  %v3543_v13 = vsel %vm19532_vm15, %v3535_v14, 0.0 }
 0x26d   :  { %v6828_v32 = vmax.f32 %v6820_v62, 0.0  ;;  %v3538_v34 = vmax.f32 %v3530_v58, 0.0  ;;  %v3526_v39 = vmul.f32 %v19581_v4, %v19473_v37  ;;  %v3532_v47 = vadd.f32 %v3524_v29, %v19502_v27 }
 0x26e   :  { %v6835_v61 = vsel %vm19532_vm15, %v6827_v20, 0.0  ;;  %v3544_v55 = vsel %vm19544_vm0, %v3536_v63, 0.0  ;;  %v3533_v35 = vadd.f32 %v3525_v9, %v19502_v27  ;;  %v3539_v24 = vmax.f32 %v3531_v23, 0.0 }
 0x26f   :  { %6851 = vrot.lane.b32.xlu1 %v6833_v21, %s18172_s1  ;;  %v6836_v8 = vsel %vm19544_vm0, %v6828_v32, 0.0  ;;  %v5185_v60 = vmul.f32 %v19591_v44, %v19482_v0  ;;  %v3545_v11 = vsel %vm19509_vm12, %v3537_v15, 0.0  ;;  %v3534_v4 = vadd.f32 %v3526_v39, %v19502_v27 }
 0x270   :  { %6853 = vrot.lane.b32.xlu0 %v6834_v36, %s18172_s1  ;;  %v3540_v12 = vmax.f32 %v3532_v47, 0.0  ;;  %v5186_v18 = vmul.f32 %v19593_v45, %v19482_v0  ;;  %v3546_v26 = vsel %vm19520_vm14, %v3538_v34, 0.0  ;;  %v3541_v33 = vmax.f32 %v3533_v35, 0.0 }
 0x271   :  { %v5187_v44 = vmul.f32 %v19587_v41, %v19482_v0  ;;  %v5193_v54 = vadd.f32 %v5185_v60, %v19491_v43  ;;  %v3547_v56 = vsel %vm19532_vm15, %v3539_v24, 0.0  ;;  %v3542_v62 = vmax.f32 %v3534_v4, 0.0 }
 0x272   :  { %v5188_v45 = vmul.f32 %v19589_v42, %v19482_v0  ;;  %v5194_v1 = vadd.f32 %v5186_v18, %v19491_v43  ;;  %v3548_v2 = vsel %vm19544_vm0, %v3540_v12, 0.0  ;;  %v5189_v20 = vmul.f32 %v19599_v51, %v19473_v37 }
 0x273   :  { %6855 = vrot.lane.b32.xlu1 %v6835_v61, %s18172_s1  ;;  %v5195_v41 = vadd.f32 %v5187_v44, %v19491_v43  ;;  %v5201_v7 = vmax.f32 %v5193_v54, 0.0  ;;  %v3549_v21 = vsel %vm19509_vm12, %v3541_v33, 0.0  ;;  %v3550_v30 = vsel %vm19520_vm14, %v3542_v62, 0.0 }
 0x274   :  { %6857 = vrot.lane.b32.xlu0 %v6836_v8, %s18172_s1  ;;  %v5196_v0 = vadd.f32 %v5188_v45, %v19491_v43  ;;  %v5202_v42 = vmax.f32 %v5194_v1, 0.0  ;;  %v5191_v51 = vmul.f32 %v19595_v48, %v19473_v37  ;;  %v5197_v36 = vadd.f32 %v5189_v20, %v19502_v27 }
 0x275   :  { %v5203_v32 = vmax.f32 %v5195_v41, 0.0  ;;  %v5209_v43 = vsel %vm19532_vm15, %v5201_v7, 0.0  ;;  %v5198_v59 = vadd.f32 %v5190_v28, %v19502_v27  ;;  %v5200_v3 = vadd.f32 %v5192_v52, %v19502_v27 }
 0x276   :  { %v5204_v38 = vmax.f32 %v5196_v0, 0.0  ;;  %v5210_v57 = vsel %vm19544_vm0, %v5202_v42, 0.0  ;;  %v5199_v61 = vadd.f32 %v5191_v51, %v19502_v27  ;;  %v5205_v48 = vmax.f32 %v5197_v36, 0.0 }
 0x277   :  { %6859 = vrot.lane.b32.xlu1 %v6837_v17, %s18172_s1  ;;  %v5211_v31 = vsel %vm19509_vm12, %v5203_v32, 0.0  ;;  %v5206_v40 = vmax.f32 %v5198_v59, 0.0  ;;  %v5208_v6 = vmax.f32 %v5200_v3, 0.0 }
 0x278   :  { %6861 = vrot.lane.b32.xlu0 %v6838_v10, %s18172_s1  ;;  %v5212_v37 = vsel %vm19520_vm14, %v5204_v38, 0.0  ;;  %v5207_v50 = vmax.f32 %v5199_v61, 0.0  ;;  %v5213_v8 = vsel %vm19532_vm15, %v5205_v48, 0.0  ;;  %vm5241_vm15 = vcmask 130048   ;;  %s18179_s1 = smov 95  }
 0x279   :  { %v5214_v14 = vsel %vm19544_vm0, %v5206_v40, 0.0  ;;  %v5216_v27 = vsel %vm19520_vm14, %v5208_v6, 0.0  ;;  %vm5258_vm14 = vcmask 1047680   ;;  %vm5264_vm0 = vcmask 1041536  }
 0x27a   :  { %v5215_v16 = vsel %vm19509_vm12, %v5207_v50, 0.0  ;;  %vm3598_vm12 = vcmask 1041416  }
 0x27b   :  { %3559 = vrot.lane.b32.xlu1 %v3543_v13, %s18173_s25 }
 0x27c   :  { %3561 = vrot.lane.b32.xlu0 %v3544_v55, %s18173_s25 }
 0x27f   :  { %3563 = vrot.lane.b32.xlu1 %v3545_v11, %s18173_s25 }
 0x280   :  { %3565 = vrot.lane.b32.xlu0 %v3546_v26, %s18173_s25 }
 0x283   :  { %3567 = vrot.lane.b32.xlu1 %v3547_v56, %s18173_s25 }
 0x284   :  { %3569 = vrot.lane.b32.xlu0 %v3548_v2, %s18173_s25 }
 0x287   :  { %3571 = vrot.lane.b32.xlu1 %v3549_v21, %s18173_s25 }
 0x288   :  { %3573 = vrot.lane.b32.xlu0 %v3550_v30, %s18173_s25 }
 0x28b   :  { %5225 = vrot.lane.b32.xlu1 %v5209_v43, %s18174_s26 }
 0x28c   :  { %5227 = vrot.lane.b32.xlu0 %v5210_v57, %s18174_s26 }
 0x28f   :  { %5229 = vrot.lane.b32.xlu1 %v5211_v31, %s18174_s26 }
 0x290   :  { %5231 = vrot.lane.b32.xlu0 %v5212_v37, %s18174_s26 }
 0x293   :  { %5233 = vrot.lane.b32.xlu1 %v5213_v8, %s18174_s26 }
 0x294   :  { %5235 = vrot.lane.b32.xlu0 %v5214_v14, %s18174_s26 }
 0x297   :  { %5237 = vrot.lane.b32.xlu1 %v5215_v16, %s18174_s26 }
 0x298   :  { %5239 = vrot.lane.b32.xlu0 %v5216_v27, %s18174_s26 }
 0x2dd   :  { %v6848_v17 = vpop.permute.xlu1 %6847 }
 0x2de   :  { %6881 = vst.msk [vmem:[#allocation2] sm:$0xff] %vm6880_vm6, %v6848_v17  ;;  %v6850_v46 = vpop.permute.xlu0 %6849  ;;  %vm18175_vm6 = vmmov 1  }
 0x2df   :  { %v19739_v58 = vsel %vm6863_vm7, %v6848_v17, %v6850_v46 }
 0x2e1   :  { %v6852_v63 = vpop.permute.xlu1 %6851 }
 0x2e2   :  { %v19742_v5 = vsel %vm6863_vm7, %v6850_v46, %v6852_v63  ;;  %v6854_v29 = vpop.permute.xlu0 %6853 }
 0x2e3   :  { %v19745_v49 = vsel %vm6863_vm7, %v6852_v63, %v6854_v29  ;;  %6885 = vst.msk [vmem:[#allocation2 + $0x20] sm:$0xff] %vm6863_vm7, %v6854_v29  ;;  %v19750_v53 = vpack.i.bf16 %v19742_v5, %v19739_v58 }
 0x2e5   :  { %v6856_v10 = vpop.permute.xlu1 %6855  ;;  %17446 = vrot.lane.b32.xlu1 %v19750_v53, %s18167_s30  ;;  %v19780_v41 = vld [vmem:[#allocation2] sm:$0xff] }
 0x2e6   :  { %6887 = vst.msk [vmem:[#allocation2 + $0x28] sm:$0x3] %vm6886_vm8, %v6856_v10  ;;  %v6858_v15 = vpop.permute.xlu0 %6857  ;;  %vm6914_vm8 = vcmask 80896  }
 0x2e7   :  { %v6867_v9 = vsel %vm6863_vm7, %v6856_v10, %v6858_v15 }
 0x2e8   :  { %6888 = vst [vmem:[#allocation2 + $0x30] sm:$0x3] %v6867_v9 }
 0x2e9   :  { %v6860_v23 = vpop.permute.xlu1 %6859 }
 0x2ea   :  { %v6868_v13 = vsel %vm6863_vm7, %v6858_v15, %v6860_v23  ;;  %v6862_v34 = vpop.permute.xlu0 %6861  ;;  %v7267_v39 = vld [vmem:[#allocation2 + $0x20] sm:$0xff] }
 0x2eb   :  { %6889 = vst [vmem:[#allocation2 + $0x38] sm:$0x3] %v6868_v13  ;;  %v6869_v47 = vsel %vm6863_vm7, %v6860_v23, %v6862_v34  ;;  %6892 = vst.msk [vmem:[#allocation2 + $0x48] sm:$0x3] %vm6891_vm9, %v6862_v34  ;;  %v19758_v55 = vpack.i.bf16 %v7267_v39, %v19745_v49  ;;  %vm106_vm9 = vcmask 522240  }
 0x2ec   :  { %6890 = vst [vmem:[#allocation2 + $0x40] sm:$0x3] %v6869_v47  ;;  %vm19818_vm7 = vmpackc.low %vm6921_vm5, %vm18175_vm6  ;;  %vm20791_vm5 = vcmp.lt.s32.totalorder %v134_v25, 256 }
 0x2ed   :  { %v3560_v35 = vpop.permute.xlu1 %3559  ;;  %17451 = vrot.lane.b32.xlu0 %v19758_v55, %s18167_s30  ;;  %v7268_v45 = vld [vmem:[#allocation2 + $0x28] sm:$0x3] }
 0x2ee   :  { %3593 = vst.msk [vmem:[#allocation4] sm:$0xff] %vm3592_vm10, %v3560_v35  ;;  %v3562_v24 = vpop.permute.xlu0 %3561  ;;  %v19784_v20 = vpack.i.bf16 %v7268_v45, %v19780_v41  ;;  %vm8882_vm10 = vcmask 1046528  }
 0x2ef   :  { %v19763_v60 = vsel %vm3575_vm11, %v3560_v35, %v3562_v24  ;;  %v7269_v18 = vld [vmem:[#allocation2 + $0x30] sm:$0x3] }
 0x2f0   :  { %v6900_v34 = vld [vmem:[#allocation2 + $0x30] sm:$0x3] }
 0x2f1   :  { %v3564_v11 = vpop.permute.xlu1 %3563 }
 0x2f2   :  { %v19766_v4 = vsel %vm3575_vm11, %v3562_v24, %v3564_v11  ;;  %v3566_v12 = vpop.permute.xlu0 %3565  ;;  %v7270_v26 = vld [vmem:[#allocation2 + $0x38] sm:$0x3]  ;;  %v7272_v33 = vld [vmem:[#allocation2 + $0x48] sm:$0x3] }
 0x2f3   :  { %v19769_v44 = vsel %vm3575_vm11, %v3564_v11, %v3566_v12  ;;  %3597 = vst.msk [vmem:[#allocation4 + $0x20] sm:$0xff] %vm3575_vm11, %v3566_v12  ;;  %v19772_v54 = vpack.i.bf16 %v7270_v26, %v7269_v18  ;;  %v7271_v56 = vld [vmem:[#allocation2 + $0x40] sm:$0x3]  ;;  %v17470_v21 = vpack.i.bf16 %v19766_v4, %v19763_v60  ;;  %v16805_v11 = vpack.c.bf16 %v6900_v34, %v19739_v58  ;;  %v6899_v26 = vld [vmem:[#allocation2 + $0x28] sm:$0x3] }
 0x2f4   :  { %v19774_v62 = vpack.i.bf16 %v7272_v33, %v7271_v56  ;;  %v6902_v33 = vld [vmem:[#allocation2 + $0x40] sm:$0x3] }
 0x2f5   :  { %v3568_v1 = vpop.permute.xlu1 %3567  ;;  %17456 = vrot.lane.b32.xlu1 %v19772_v54, %s18167_s30  ;;  %v19803_v16 = vld [vmem:[#allocation4] sm:$0xff] }
 0x2f6   :  { %3599 = vst.msk [vmem:[#allocation4 + $0x28] sm:$0x3] %vm3598_vm12, %v3568_v1  ;;  %v3570_v2 = vpop.permute.xlu0 %3569  ;;  %17461 = vrot.lane.b32.xlu0 %v19774_v62, %s18167_s30  ;;  %vm8872_vm12 = vcmask 121856  }
 0x2f7   :  { %v3579_v7 = vsel %vm3575_vm11, %v3568_v1, %v3570_v2  ;;  %v15754_v1 = vld [vmem:[%s22063_s4 + $0x10] sm:$0xff] }
 0x2f8   :  { %3600 = vst [vmem:[#allocation4 + $0x30] sm:$0x3] %v3579_v7 }
 0x2f9   :  { %v3572_v0 = vpop.permute.xlu1 %3571  ;;  %17466 = vrot.lane.b32.xlu1 %v19784_v20, %s18167_s30 }
 0x2fa   :  { %v3580_v42 = vsel %vm3575_vm11, %v3570_v2, %v3572_v0  ;;  %v3574_v28 = vpop.permute.xlu0 %3573  ;;  %17471 = vrot.lane.b32.xlu0 %v17470_v21, %s18167_s30  ;;  %v7880_v30 = vld [vmem:[#allocation4 + $0x20] sm:$0xff] }
 0x2fb   :  { %3601 = vst [vmem:[#allocation4 + $0x38] sm:$0x3] %v3580_v42  ;;  %v3581_v32 = vsel %vm3575_vm11, %v3572_v0, %v3574_v28  ;;  %3604 = vst.msk [vmem:[#allocation4 + $0x48] sm:$0x3] %vm3603_vm13, %v3574_v28  ;;  %v17475_v51 = vpack.i.bf16 %v7880_v30, %v19769_v44  ;;  %v16808_v0 = vpack.c.bf16 %v6899_v26, %v19780_v41  ;;  %v6901_v30 = vld [vmem:[#allocation2 + $0x38] sm:$0x3] }
 0x2fc   :  { %3602 = vst [vmem:[#allocation4 + $0x40] sm:$0x3] %v3581_v32  ;;  %v16811_v42 = vpack.c.bf16 %v6902_v33, %v19745_v49  ;;  %v16814_v49 = vpack.c.bf16 %v6901_v30, %v19742_v5  ;;  %v19852_v41 = vld [vmem:[#allocation8] sm:$0xff]  ;;  %v6893_v5 = vld [vmem:[%s22063_s4] sm:$0xff]  ;;  %vm20151_vm11 = vmpackc.low %vm8882_vm10, %vm18175_vm6  ;;  %vm9264_vm13 = vcmask 1031168  }
 0x2fd   :  { %v5226_v36 = vpop.permute.xlu1 %5225  ;;  %17476 = vrot.lane.b32.xlu1 %v17475_v51, %s18167_s30  ;;  %v7881_v8 = vld [vmem:[#allocation4 + $0x28] sm:$0x3]  ;;  %v15772_v33 = vld [vmem:[%s22063_s4 + $0x20] sm:$0xff]  ;;  %107 = vst.msk [vmem:[#allocation6 + $0x48] sm:$0x7f] %vm106_vm9, %v19852_v41 }
 0x2fe   :  { %5259 = vst.msk [vmem:[#allocation3] sm:$0xff] %vm5258_vm14, %v5226_v36  ;;  %v5228_v43 = vpop.permute.xlu0 %5227  ;;  %v17490_v17 = vpack.i.bf16 %v7881_v8, %v19803_v16  ;;  %vm9958_vm14 = vcmask 900096  }
 0x2ff   :  { %v5242_v38 = vsel %vm5241_vm15, %v5226_v36, %v5228_v43  ;;  %v7882_v61 = vld [vmem:[#allocation4 + $0x30] sm:$0x3] }
 0x301   :  { %v5230_v52 = vpop.permute.xlu1 %5229 }
 0x302   :  { %v19797_v59 = vsel %vm5241_vm15, %v5228_v43, %v5230_v52  ;;  %v5232_v57 = vpop.permute.xlu0 %5231  ;;  %v7883_v48 = vld [vmem:[#allocation4 + $0x38] sm:$0x3]  ;;  %v7885_v31 = vld [vmem:[#allocation4 + $0x48] sm:$0x3] }
 0x303   :  { %v5244_v3 = vsel %vm5241_vm15, %v5230_v52, %v5232_v57  ;;  %5263 = vst.msk [vmem:[#allocation3 + $0x20] sm:$0xff] %vm5241_vm15, %v5232_v57  ;;  %v17480_v40 = vpack.i.bf16 %v7883_v48, %v7882_v61  ;;  %v7884_v37 = vld [vmem:[#allocation4 + $0x40] sm:$0x3]  ;;  %v17510_v9 = vpack.i.bf16 %v19797_v59, %v5242_v38 }
 0x304   :  { %v17485_v50 = vpack.i.bf16 %v7885_v31, %v7884_v37 }
 0x305   :  { %v5234_v6 = vpop.permute.xlu1 %5233  ;;  %17481 = vrot.lane.b32.xlu0 %v17480_v40, %s18167_s30  ;;  %v6906_v47 = vld [vmem:[#allocation3] sm:$0xff] }
 0x306   :  { %5265 = vst.msk [vmem:[#allocation3 + $0x28] sm:$0x3] %vm5264_vm0, %v5234_v6  ;;  %v5236_v14 = vpop.permute.xlu0 %5235  ;;  %17486 = vrot.lane.b32.xlu1 %v17485_v50, %s18167_s30  ;;  %vm10654_vm0 = vcmask 769024  }
 0x307   :  { %v5245_v27 = vsel %vm5241_vm15, %v5234_v6, %v5236_v14 }
 0x308   :  { %5266 = vst [vmem:[#allocation3 + $0x30] sm:$0x3] %v5245_v27 }
 0x309   :  { %v5238_v46 = vpop.permute.xlu1 %5237  ;;  %17491 = vrot.lane.b32.xlu0 %v17490_v17, %s18167_s30 }
 0x30a   :  { %v5246_v63 = vsel %vm5241_vm15, %v5236_v14, %v5238_v46  ;;  %v5240_v29 = vpop.permute.xlu0 %5239  ;;  %17496 = vrot.lane.b32.xlu1 %v19750_v53, %s18169_s19  ;;  %v8322_v24 = vld [vmem:[#allocation3 + $0x20] sm:$0xff] }
 0x30b   :  { %5267 = vst [vmem:[#allocation3 + $0x38] sm:$0x3] %v5246_v63  ;;  %v5247_v10 = vsel %vm5241_vm15, %v5238_v46, %v5240_v29  ;;  %5270 = vst.msk [vmem:[#allocation3 + $0x48] sm:$0x3] %vm5269_vm1, %v5240_v29  ;;  %v17520_v45 = vpack.i.bf16 %v8322_v24, %v5244_v3  ;;  %vm10422_vm15 = vcmask 777216   ;;  %vm122_vm1 = vcmask 519168  }
 0x30c   :  { %5268 = vst [vmem:[#allocation3 + $0x40] sm:$0x3] %v5247_v10 }
 0x30d   :  { %17501 = vrot.lane.b32.xlu0 %v19758_v55, %s18169_s19  ;;  %v6910_v15 = vld [vmem:[#allocation3 + $0x28] sm:$0x3] }
 0x30e   :  { %17506 = vrot.lane.b32.xlu1 %v19784_v20, %s18169_s19  ;;  %v16796_v35 = vpack.c.bf16 %v6910_v15, %v6906_v47  ;;  %v8323_v36 = vld [vmem:[#allocation3 + $0x28] sm:$0x3] }
 0x30f   :  { %v6911_v23 = vld [vmem:[#allocation3 + $0x30] sm:$0x3]  ;;  %v17540_v43 = vpack.i.bf16 %v8323_v36, %v6906_v47  ;;  %v15782_v36 = vld [vmem:[%s22063_s4 + $0x30] sm:$0xff] }
 0x310   :  { %v16793_v39 = vpack.c.bf16 %v6911_v23, %v5242_v38  ;;  %v8324_v28 = vld [vmem:[#allocation3 + $0x30] sm:$0x3]  ;;  %v15755_v38 = vld [vmem:[%s22063_s4 + $0x18] sm:$0x7f] }
 0x311   :  { %17511 = vrot.lane.b32.xlu0 %v17510_v9, %s18169_s19  ;;  %v7501_v9 = vld [vmem:[#allocation4 + $0x40] sm:$0x3] }
 0x312   :  { %16795 = vmatprep.subr.msk.bf16.mxu0 %vm19818_vm7, %v16793_v39  ;;  %17516 = vrot.lane.b32.xlu1 %v19772_v54, %s18169_s19  ;;  %v6912_v12 = vld [vmem:[#allocation3 + $0x38] sm:$0x3]  ;;  %v8327_v21 = vld [vmem:[#allocation3 + $0x48] sm:$0x3] }
 0x313   :  { %16798 = vmatpush1.bf16.msk.msra.mxu0 %vm19818_vm7, %v16796_v35  ;;  %v6913_v18 = vld [vmem:[#allocation3 + $0x40] sm:$0x3]  ;;  %v8325_v2 = vld [vmem:[#allocation3 + $0x38] sm:$0x3]  ;;  %v16802_v58 = vpack.c.bf16 %v6912_v12, %v19797_v59  ;;  %v16835_v12 = vpack.c.bf16 %v7501_v9, %v19769_v44 }
 0x314   :  { %16807 = vmatprep.subr.msk.bf16.mxu0 %vm19818_vm7, %v16805_v11  ;;  %v16799_v56 = vpack.c.bf16 %v6913_v18, %v5244_v3  ;;  %v8326_v7 = vld [vmem:[#allocation3 + $0x40] sm:$0x3]  ;;  %v17530_v32 = vpack.i.bf16 %v8325_v2, %v8324_v28  ;;  %v7500_v18 = vld [vmem:[#allocation4 + $0x38] sm:$0x3]  ;;  %v7690_v2 = vld [vmem:[#allocation5 + $0x30] sm:$0x3] }
 0x315   :  { %17526 = vrot.lane.b32.xlu0 %v19774_v62, %s18169_s19  ;;  %v17535_v51 = vpack.i.bf16 %v8327_v21, %v8326_v7  ;;  %v7499_v35 = vld [vmem:[#allocation4 + $0x30] sm:$0x3]  ;;  %v16838_v44 = vpack.c.bf16 %v7500_v18, %v19766_v4  ;;  %v15773_v4 = vld [vmem:[%s22063_s4 + $0x28] sm:$0x7f]  ;;  %v7686_v21 = vld [vmem:[#allocation5 + $0x8] sm:$0xff] }
 0x316   :  { %16801 = vmatprep.subr.msk.bf16.mxu1 %vm19818_vm7, %v16799_v56  ;;  %17521 = vrot.lane.b32.xlu1 %v17520_v45, %s18169_s19  ;;  %v7692_v56 = vld [vmem:[#allocation5 + $0x40] sm:$0x3]  ;;  %v16829_v45 = vpack.c.bf16 %v7499_v35, %v19763_v60 }
 0x317   :  { %15758 = vmatmul.mubr.msk.f32.vlgmr.msra.gmra.mrb[16].mxu0 %vm6914_vm8, %v15754_v1  ;;  %16804 = vmatpush1.bf16.msk.msra.mxu1 %vm19818_vm7, %v16802_v58  ;;  %v16847_v58 = vpack.c.bf16 %v7692_v56, %v19553_v19  ;;  %v16841_v19 = vpack.c.bf16 %v7690_v2, %v7686_v21 }
 0x318   :  { %16810 = vmatpush1.bf16.msk.msra.mxu0 %vm19818_vm7, %v16808_v0  ;;  %16813 = vmatprep.subr.msk.bf16.mxu1 %vm19818_vm7, %v16811_v42 }
 0x319   :  { %17531 = vrot.lane.b32.xlu0 %v17530_v32, %s18169_s19  ;;  %7004 = vmatprep.mubr.f32.mxu0 %v19852_v41 }
 0x31a   :  { %17536 = vrot.lane.b32.xlu1 %v17535_v51, %s18169_s19  ;;  %15762 = vmatmul.mubr.msk.f32.vlgmr.msra.gmra.mrb[16].mxu1 %vm6914_vm8, %v15754_v1  ;;  %v7498_v1 = vld [vmem:[#allocation4 + $0x28] sm:$0x3] }
 0x31b   :  { %16816 = vmatpush1.bf16.msk.msra.mxu1 %vm19818_vm7, %v16814_v49  ;;  %7081 = vmatprep.mubr.f32.mxu1 %v19852_v41  ;;  %v16832_v60 = vpack.c.bf16 %v7498_v1, %v19803_v16  ;;  %v7691_v16 = vld [vmem:[#allocation5 + $0x38] sm:$0x3]  ;;  %v7689_v49 = vld [vmem:[#allocation5 + $0x28] sm:$0x3]  ;;  %v15802_v1 = vld [vmem:[%s22063_s4 + $0x50] sm:$0xff] }
 0x31c   :  { %15759 = vmatmul.mubr.msk.f32.gmra.mrb[18].mxu0 %vm6914_vm8, %v15755_v38 }
 0x31d   :  { %17541 = vrot.lane.b32.xlu0 %v17540_v43, %s18169_s19  ;;  %7170 = vmatprep.mubr.f32.mxu0 %v19852_v41 }
 0x31e   :  { %17546 = vrot.lane.b32.xlu1 %v19750_v53, %s18170_s22  ;;  %15763 = vmatmul.mubr.msk.f32.gmra.mrb[18].mxu1 %vm6914_vm8, %v15755_v38  ;;  %v6894_v53 = vld [vmem:[%s22063_s4 + $0x8] sm:$0x7f] }
 0x31f   :  { %7247 = vmatprep.mubr.f32.mxu1 %v19852_v41 }
 0x320   :  { %15766 = vmatmul.mubr.msk.f32.vlgmr.msra.gmra.mrb[16].mxu0 %vm6914_vm8, %v6893_v5 }
 0x321   :  { %17551 = vrot.lane.b32.xlu0 %v19758_v55, %s18170_s22  ;;  %7176 = vmatprep.mubr.f32.mxu0 %v19852_v41  ;;  %v8757_v55 = vld [vmem:[%s22064_s5] sm:$0xff] }
 0x322   :  { %17556 = vrot.lane.b32.xlu1 %v19772_v54, %s18170_s22  ;;  %15770 = vmatmul.mubr.msk.f32.vlgmr.msra.gmra.mrb[16].mxu1 %vm6914_vm8, %v6893_v5  ;;  %v8758_v54 = vld [vmem:[%s22064_s5 + $0x8] sm:$0x7f] }
 0x323   :  { %7253 = vmatprep.mubr.f32.mxu1 %v19852_v41 }
 0x324   :  { %15767 = vmatmul.mubr.msk.f32.gmra.mrb[18].mxu0 %vm6914_vm8, %v6894_v53 }
 0x325   :  { %17561 = vrot.lane.b32.xlu0 %v19774_v62, %s18170_s22  ;;  %7393 = vmatprep.mubr.f32.mxu0 %v19852_v41  ;;  %v8777_v62 = vld [vmem:[%s22065_s6] sm:$0xff] }
 0x326   :  { %17566 = vrot.lane.b32.xlu1 %v19784_v20, %s18170_s22  ;;  %15771 = vmatmul.mubr.msk.f32.gmra.mrb[18].mxu1 %vm6914_vm8, %v6894_v53  ;;  %v8778_v20 = vld [vmem:[%s22065_s6 + $0x8] sm:$0x7f] }
 0x327   :  { %7470 = vmatprep.mubr.f32.mxu1 %v19852_v41 }
 0x329   :  { %8761 = vperm.xlu0 %17443, %v8757_v55  }
 0x32a   :  { %8766 = vperm.xlu1 %17444, %v8758_v54   ;;  %v16850_v54 = vpack.c.bf16 %v7691_v16, %v19540_v22  ;;  %v15783_v22 = vld [vmem:[%s22063_s4 + $0x38] sm:$0x7f] }
 0x32d   :  { %8781 = vperm.xlu0 %17443, %v8777_v62   ;;  %v7685_v62 = vld [vmem:[#allocation5] sm:$0xff] }
 0x32e   :  { %8786 = vperm.xlu1 %17444, %v8778_v20  }
 0x357   :  { %v17447_v52 = vpop.permute.xlu1 %17446 }
 0x358   :  { %v17449_v57 = vunpack.i.h.bf16 %v17447_v52  ;;  %v17448_v61 = vunpack.i.l.bf16 %v17447_v52 }
 0x35a   :  { %v7304_v14 = vsel %vm547_vm2, %v17448_v61, %v17449_v57 }
 0x35f   :  { %v17452_v59 = vpop.permute.xlu0 %17451 }
 0x360   :  { %v17453_v48 = vunpack.i.l.bf16 %v17452_v59  ;;  %v17454_v31 = vunpack.i.h.bf16 %v17452_v59  ;;  %v16844_v59 = vpack.c.bf16 %v7689_v49, %v7685_v62 }
 0x362   :  { %v7305_v27 = vsel %vm547_vm2, %v17449_v57, %v17453_v48  ;;  %v7306_v46 = vsel %vm547_vm2, %v17453_v48, %v17454_v31 }
 0x367   :  { %v17457_v3 = vpop.permute.xlu1 %17456 }
 0x368   :  { %v17459_v40 = vunpack.i.h.bf16 %v17457_v3  ;;  %v17458_v37 = vunpack.i.l.bf16 %v17457_v3  ;;  %v17462_v50 = vpop.permute.xlu0 %17461 }
 0x369   :  { %v17464_v8 = vunpack.i.h.bf16 %v17462_v50  ;;  %v17463_v6 = vunpack.i.l.bf16 %v17462_v50 }
 0x36a   :  { %v7308_v17 = vsel %vm547_vm2, %v17458_v37, %v17459_v40 }
 0x36b   :  { %v7309_v63 = vsel %vm547_vm2, %v17459_v40, %v17463_v6  ;;  %v7310_v29 = vsel %vm547_vm2, %v17463_v6, %v17464_v8  ;;  %v17467_v10 = vpop.permute.xlu1 %17466  ;;  %v16817_v15 = vpack.c.bf16 %v7308_v17, %v7304_v14  ;;  %v15792_v14 = vld [vmem:[%s22063_s4 + $0x40] sm:$0xff] }
 0x36c   :  { %v16826_v23 = vpack.c.bf16 %v7309_v63, %v7305_v27  ;;  %v17469_v34 = vunpack.i.h.bf16 %v17467_v10  ;;  %v17468_v39 = vunpack.i.l.bf16 %v17467_v10  ;;  %v16823_v47 = vpack.c.bf16 %v7310_v29, %v7306_v46  ;;  %v17472_v7 = vpop.permute.xlu0 %17471 }
 0x36d   :  { %16819 = vmatprep.subr.msk.bf16.mxu0 %vm19818_vm7, %v16817_v15  ;;  %v17474_v42 = vunpack.i.h.bf16 %v17472_v7  ;;  %v17473_v28 = vunpack.i.l.bf16 %v17472_v7 }
 0x36e   :  { %v7307_v24 = vsel %vm547_vm2, %v17469_v34, %v17458_v37  ;;  %v7303_v11 = vsel %vm547_vm2, %v17468_v39, %v17448_v61  ;;  %16825 = vmatprep.subr.msk.bf16.mxu1 %vm19818_vm7, %v16823_v47  ;;  %v15793_v39 = vld [vmem:[%s22063_s4 + $0x48] sm:$0x7f] }
 0x36f   :  { %v16820_v26 = vpack.c.bf16 %v7307_v24, %v7303_v11  ;;  %16828 = vmatpush1.bf16.msk.msra.mxu1 %vm19818_vm7, %v16826_v23  ;;  %v17477_v0 = vpop.permute.xlu1 %17476  ;;  %v7917_v20 = vsel %vm547_vm2, %v17473_v28, %v17474_v42 }
 0x370   :  { %16837 = vmatprep.subr.msk.bf16.mxu1 %vm19818_vm7, %v16835_v12  ;;  %v17479_v30 = vunpack.i.h.bf16 %v17477_v0  ;;  %v17478_v32 = vunpack.i.l.bf16 %v17477_v0 }
 0x371   :  { %16822 = vmatpush1.bf16.msk.msra.mxu0 %vm19818_vm7, %v16820_v26 }
 0x372   :  { %15780 = vmatmul.mubr.msk.f32.vlgmr.msra.gmra.mrb[16].mxu1 %vm6914_vm8, %v15772_v33  ;;  %16831 = vmatprep.subr.msk.bf16.mxu0 %vm19818_vm7, %v16829_v45  ;;  %v7919_v57 = vsel %vm547_vm2, %v17478_v32, %v17479_v30  ;;  %v7918_v27 = vsel %vm547_vm2, %v17474_v42, %v17478_v32 }
 0x373   :  { %16840 = vmatpush1.bf16.msk.msra.mxu1 %vm19818_vm7, %v16838_v44  ;;  %7476 = vmatprep.mubr.f32.mxu1 %v19852_v41 }
 0x374   :  { %15776 = vmatmul.mubr.msk.f32.vlgmr.msra.gmra.mrb[16].mxu0 %vm6914_vm8, %v15772_v33  ;;  %16849 = vmatprep.subr.msk.bf16.mxu1 %vm19818_vm7, %v16847_v58 }
 0x375   :  { %16834 = vmatpush1.bf16.msk.msra.mxu0 %vm19818_vm7, %v16832_v60  ;;  %7399 = vmatprep.mubr.f32.mxu0 %v19852_v41 }
 0x376   :  { %15781 = vmatmul.mubr.msk.f32.gmra.mrb[18].mxu1 %vm6914_vm8, %v15773_v4  ;;  %16843 = vmatprep.subr.msk.bf16.mxu0 %vm19818_vm7, %v16841_v19 }
 0x377   :  { %v17482_v51 = vpop.permute.xlu0 %17481  ;;  %7661 = vmatprep.mubr.f32.mxu1 %v19852_v41 }
 0x378   :  { %v17484_v43 = vunpack.i.h.bf16 %v17482_v51  ;;  %v17483_v38 = vunpack.i.l.bf16 %v17482_v51  ;;  %v17487_v5 = vpop.permute.xlu1 %17486  ;;  %15777 = vmatmul.mubr.msk.f32.gmra.mrb[18].mxu0 %vm6914_vm8, %v15773_v4 }
 0x379   :  { %v17489_v53 = vunpack.i.h.bf16 %v17487_v5  ;;  %v17488_v55 = vunpack.i.l.bf16 %v17487_v5  ;;  %7584 = vmatprep.mubr.f32.mxu0 %v19852_v41 }
 0x37a   :  { %v7921_v52 = vsel %vm547_vm2, %v17483_v38, %v17484_v43  ;;  %15790 = vmatmul.mubr.msk.f32.vlgmr.msra.gmra.mrb[16].mxu1 %vm6914_vm8, %v15782_v36 }
 0x37b   :  { %v16853_v61 = vpack.c.bf16 %v7921_v52, %v7917_v20  ;;  %v7923_v48 = vsel %vm547_vm2, %v17488_v55, %v17489_v53  ;;  %16852 = vmatpush1.bf16.msk.msra.mxu1 %vm19818_vm7, %v16850_v54  ;;  %v17492_v31 = vpop.permute.xlu0 %17491  ;;  %7667 = vmatprep.mubr.f32.mxu1 %v19852_v41  ;;  %v7922_v8 = vsel %vm547_vm2, %v17484_v43, %v17488_v55  ;;  %v15803_v43 = vld [vmem:[%s22063_s4 + $0x58] sm:$0x7f] }
 0x37c   :  { %v16859_v3 = vpack.c.bf16 %v7923_v48, %v7919_v57  ;;  %v17494_v40 = vunpack.i.h.bf16 %v17492_v31  ;;  %v17493_v37 = vunpack.i.l.bf16 %v17492_v31  ;;  %v17497_v50 = vpop.permute.xlu1 %17496  ;;  %15786 = vmatmul.mubr.msk.f32.vlgmr.msra.gmra.mrb[16].mxu0 %vm6914_vm8, %v15782_v36  ;;  %v16862_v29 = vpack.c.bf16 %v7922_v8, %v7918_v27 }
 0x37d   :  { %16846 = vmatpush1.bf16.msk.msra.mxu0 %vm19818_vm7, %v16844_v59  ;;  %7590 = vmatprep.mubr.f32.mxu0 %v19852_v41  ;;  %v17499_v15 = vunpack.i.h.bf16 %v17497_v50  ;;  %v17498_v9 = vunpack.i.l.bf16 %v17497_v50 }
 0x37e   :  { %16855 = vmatprep.subr.msk.bf16.mxu0 %vm19818_vm7, %v16853_v61  ;;  %15791 = vmatmul.mubr.msk.f32.gmra.mrb[18].mxu1 %vm6914_vm8, %v15783_v22  ;;  %v7916_v17 = vsel %vm547_vm2, %v17493_v37, %v17473_v28  ;;  %v7920_v46 = vsel %vm547_vm2, %v17494_v40, %v17483_v38 }
 0x37f   :  { %16861 = vmatprep.subr.msk.bf16.mxu1 %vm19818_vm7, %v16859_v3  ;;  %v17502_v6 = vpop.permute.xlu0 %17501  ;;  %7852 = vmatprep.mubr.f32.mxu1 %v19852_v41  ;;  %v16856_v10 = vpack.c.bf16 %v7920_v46, %v7916_v17  ;;  %v8128_v26 = vsel %vm1301_vm3, %v17498_v9, %v17499_v15 }
 0x380   :  { %v17507_v63 = vpop.permute.xlu1 %17506  ;;  %15787 = vmatmul.mubr.msk.f32.gmra.mrb[18].mxu0 %vm6914_vm8, %v15783_v22  ;;  %v17503_v23 = vunpack.i.l.bf16 %v17502_v6  ;;  %v17504_v35 = vunpack.i.h.bf16 %v17502_v6  ;;  %v15812_v22 = vld [vmem:[%s22063_s4 + $0x60] sm:$0xff] }
 0x381   :  { %7775 = vmatprep.mubr.f32.mxu0 %v19852_v41  ;;  %v17508_v24 = vunpack.i.l.bf16 %v17507_v63  ;;  %v17509_v18 = vunpack.i.h.bf16 %v17507_v63 }
 0x382   :  { %15800 = vmatmul.mubr.msk.f32.vlgmr.msra.gmra.mrb[16].mxu1 %vm6914_vm8, %v15792_v14  ;;  %v8129_v33 = vsel %vm1301_vm3, %v17499_v15, %v17503_v23  ;;  %v8130_v4 = vsel %vm1301_vm3, %v17503_v23, %v17504_v35 }
 0x383   :  { %16864 = vmatpush1.bf16.msk.msra.mxu1 %vm19818_vm7, %v16862_v29  ;;  %v19988_v34 = vpop.permute.xlu0 %17511  ;;  %7858 = vmatprep.mubr.f32.mxu1 %v19852_v41  ;;  %v8127_v21 = vsel %vm1301_vm3, %v17508_v24, %v17498_v9  ;;  %v15813_v29 = vld [vmem:[%s22063_s4 + $0x68] sm:$0x7f]  ;;  %v15822_v24 = vld [vmem:[%s22063_s4 + $0x70] sm:$0xff] }
 0x384   :  { %v17517_v47 = vpop.permute.xlu1 %17516  ;;  %15796 = vmatmul.mubr.msk.f32.vlgmr.msra.gmra.mrb[16].mxu0 %vm6914_vm8, %v15792_v14  ;;  %v17514_v0 = vunpack.i.h.bf16 %v19988_v34  ;;  %v17513_v19 = vunpack.i.l.bf16 %v19988_v34 }
 0x385   :  { %v17519_v11 = vunpack.i.h.bf16 %v17517_v47  ;;  %v17518_v12 = vunpack.i.l.bf16 %v17517_v47  ;;  %16858 = vmatpush1.bf16.msk.msra.mxu0 %vm19818_vm7, %v16856_v10  ;;  %7781 = vmatprep.mubr.f32.mxu0 %v19852_v41 }
 0x386   :  { %15801 = vmatmul.mubr.msk.f32.gmra.mrb[18].mxu1 %vm6914_vm8, %v15793_v39  ;;  %v8359_v55 = vsel %vm1301_vm3, %v17513_v19, %v17514_v0 }
 0x387   :  { %v8132_v56 = vsel %vm1301_vm3, %v17518_v12, %v17519_v11  ;;  %v17527_v45 = vpop.permute.xlu0 %17526  ;;  %8083 = vmatprep.mubr.f32.mxu1 %v19852_v41  ;;  %v8131_v44 = vsel %vm1301_vm3, %v17509_v18, %v17518_v12 }
 0x388   :  { %v16865_v2 = vpack.c.bf16 %v8132_v56, %v8128_v26  ;;  %v17529_v58 = vunpack.i.h.bf16 %v17527_v45  ;;  %v17528_v7 = vunpack.i.l.bf16 %v17527_v45  ;;  %v17522_v60 = vpop.permute.xlu1 %17521  ;;  %15797 = vmatmul.mubr.msk.f32.gmra.mrb[18].mxu0 %vm6914_vm8, %v15793_v39  ;;  %v16868_v32 = vpack.c.bf16 %v8131_v44, %v8127_v21  ;;  %v15823_v21 = vld [vmem:[%s22063_s4 + $0x78] sm:$0x7f] }
 0x389   :  { %8006 = vmatprep.mubr.f32.mxu0 %v19852_v41  ;;  %v17524_v16 = vunpack.i.h.bf16 %v17522_v60  ;;  %v17523_v30 = vunpack.i.l.bf16 %v17522_v60 }
 0x38a   :  { %v8133_v42 = vsel %vm1301_vm3, %v17519_v11, %v17528_v7  ;;  %v8134_v28 = vsel %vm1301_vm3, %v17528_v7, %v17529_v58  ;;  %15810 = vmatmul.mubr.msk.f32.vlgmr.msra.gmra.mrb[16].mxu1 %vm6914_vm8, %v15802_v1  ;;  %16867 = vmatprep.subr.msk.bf16.mxu0 %vm19818_vm7, %v16865_v2 }
 0x38b   :  { %v16871_v51 = vpack.c.bf16 %v8134_v28, %v8130_v4  ;;  %v16874_v36 = vpack.c.bf16 %v8133_v42, %v8129_v33  ;;  %v17532_v49 = vpop.permute.xlu0 %17531  ;;  %8089 = vmatprep.mubr.f32.mxu1 %v19852_v41  ;;  %v8360_v20 = vsel %vm1301_vm3, %v17514_v0, %v17523_v30  ;;  %v8361_v52 = vsel %vm1301_vm3, %v17523_v30, %v17524_v16  ;;  %v15833_v42 = vld [vmem:[%s22063_s4 + $0x88] sm:$0x7f] }
 0x38c   :  { %v17534_v38 = vunpack.i.h.bf16 %v17532_v49  ;;  %v17533_v5 = vunpack.i.l.bf16 %v17532_v49  ;;  %v17537_v53 = vpop.permute.xlu1 %17536  ;;  %15806 = vmatmul.mubr.msk.f32.vlgmr.msra.gmra.mrb[16].mxu0 %vm6914_vm8, %v15802_v1 }
 0x38d   :  { %v17539_v54 = vunpack.i.h.bf16 %v17537_v53  ;;  %v17538_v62 = vunpack.i.l.bf16 %v17537_v53  ;;  %16870 = vmatpush1.bf16.msk.msra.mxu0 %vm19818_vm7, %v16868_v32  ;;  %16873 = vmatprep.subr.msk.bf16.mxu1 %vm19818_vm7, %v16871_v51 }
 0x38e   :  { %v8363_v59 = vsel %vm1301_vm3, %v17533_v5, %v17534_v38  ;;  %15811 = vmatmul.mubr.msk.f32.gmra.mrb[18].mxu1 %vm6914_vm8, %v15803_v43  ;;  %8012 = vmatprep.mubr.f32.mxu0 %v19852_v41 }
 0x38f   :  { %v16877_v57 = vpack.c.bf16 %v8363_v59, %v8359_v55  ;;  %v8364_v61 = vsel %vm1301_vm3, %v17534_v38, %v17538_v62  ;;  %v8365_v48 = vsel %vm1301_vm3, %v17538_v62, %v17539_v54  ;;  %16876 = vmatpush1.bf16.msk.msra.mxu1 %vm19818_vm7, %v16874_v36  ;;  %v17542_v31 = vpop.permute.xlu0 %17541  ;;  %8294 = vmatprep.mubr.f32.mxu1 %v19852_v41 }
 0x390   :  { %v16883_v3 = vpack.c.bf16 %v8365_v48, %v8361_v52  ;;  %v16886_v40 = vpack.c.bf16 %v8364_v61, %v8360_v20  ;;  %v17544_v37 = vunpack.i.h.bf16 %v17542_v31  ;;  %v17543_v50 = vunpack.i.l.bf16 %v17542_v31  ;;  %v17547_v8 = vpop.permute.xlu1 %17546  ;;  %15807 = vmatmul.mubr.msk.f32.gmra.mrb[18].mxu0 %vm6914_vm8, %v15803_v43 }
 0x391   :  { %16879 = vmatprep.subr.msk.bf16.mxu0 %vm19818_vm7, %v16877_v57  ;;  %8217 = vmatprep.mubr.f32.mxu0 %v19852_v41  ;;  %v17549_v17 = vunpack.i.h.bf16 %v17547_v8  ;;  %v17548_v46 = vunpack.i.l.bf16 %v17547_v8  ;;  %v8828_v57 = vld [vmem:[#allocation6 + $0x20] sm:$0xff] }
 0x392   :  { %v8358_v6 = vsel %vm1301_vm3, %v17543_v50, %v17513_v19  ;;  %v8362_v14 = vsel %vm1301_vm3, %v17544_v37, %v17533_v5  ;;  %15820 = vmatmul.mubr.msk.f32.vlgmr.msra.gmra.mrb[16].mxu1 %vm6914_vm8, %v15812_v22  ;;  %16885 = vmatprep.subr.msk.bf16.mxu1 %vm19818_vm7, %v16883_v3  ;;  %v15832_v19 = vld [vmem:[%s22063_s4 + $0x80] sm:$0xff]  ;;  %s18176_s4 = smov 126  }
 0x393   :  { %v16880_v27 = vpack.c.bf16 %v8362_v14, %v8358_v6  ;;  %v17552_v63 = vpop.permute.xlu0 %17551  ;;  %16888 = vmatpush1.bf16.msk.msra.mxu1 %vm19818_vm7, %v16886_v40  ;;  %8300 = vmatprep.mubr.f32.mxu1 %v19852_v41  ;;  %v8570_v39 = vsel %vm1689_vm4, %v17548_v46, %v17549_v17 }
 0x394   :  { %v17557_v10 = vpop.permute.xlu1 %17556  ;;  %15816 = vmatmul.mubr.msk.f32.vlgmr.msra.gmra.mrb[16].mxu0 %vm6914_vm8, %v15812_v22  ;;  %v17553_v15 = vunpack.i.l.bf16 %v17552_v63  ;;  %v17554_v34 = vunpack.i.h.bf16 %v17552_v63 }
 0x395   :  { %v17559_v9 = vunpack.i.h.bf16 %v17557_v10  ;;  %v17558_v23 = vunpack.i.l.bf16 %v17557_v10  ;;  %16882 = vmatpush1.bf16.msk.msra.mxu0 %vm19818_vm7, %v16880_v27  ;;  %8223 = vmatprep.mubr.f32.mxu0 %v19852_v41 }
 0x396   :  { %15821 = vmatmul.mubr.msk.f32.gmra.mrb[18].mxu1 %vm6914_vm8, %v15813_v29  ;;  %v8571_v33 = vsel %vm1689_vm4, %v17549_v17, %v17553_v15  ;;  %v8572_v1 = vsel %vm1689_vm4, %v17553_v15, %v17554_v34  ;;  %v8829_v34 = vld [vmem:[#allocation6 + $0x48] sm:$0x7f] }
 0x397   :  { %v8574_v47 = vsel %vm1689_vm4, %v17558_v23, %v17559_v9  ;;  %v17562_v35 = vpop.permute.xlu0 %17561  ;;  %8525 = vmatprep.mubr.f32.mxu1 %v19852_v41 }
 0x398   :  { %v16889_v11 = vpack.c.bf16 %v8574_v47, %v8570_v39  ;;  %v17564_v12 = vunpack.i.h.bf16 %v17562_v35  ;;  %v17563_v18 = vunpack.i.l.bf16 %v17562_v35  ;;  %v17567_v26 = vpop.permute.xlu1 %17566  ;;  %15817 = vmatmul.mubr.msk.f32.gmra.mrb[18].mxu0 %vm6914_vm8, %v15813_v29 }
 0x399   :  { %v17569_v56 = vunpack.i.h.bf16 %v17567_v26  ;;  %v17568_v45 = vunpack.i.l.bf16 %v17567_v26  ;;  %8448 = vmatprep.mubr.f32.mxu0 %v19852_v41 }
 0x39a   :  { %v8575_v44 = vsel %vm1689_vm4, %v17559_v9, %v17563_v18  ;;  %v8576_v2 = vsel %vm1689_vm4, %v17563_v18, %v17564_v12  ;;  %15830 = vmatmul.mubr.msk.f32.vlgmr.msra.gmra.mrb[16].mxu1 %vm6914_vm8, %v15822_v24  ;;  %16891 = vmatprep.subr.msk.bf16.mxu0 %vm19818_vm7, %v16889_v11 }
 0x39b   :  { %v16895_v58 = vpack.c.bf16 %v8576_v2, %v8572_v1  ;;  %v16898_v7 = vpack.c.bf16 %v8575_v44, %v8571_v33  ;;  %v8569_v60 = vsel %vm1689_vm4, %v17568_v45, %v17548_v46  ;;  %v8573_v4 = vsel %vm1689_vm4, %v17569_v56, %v17558_v23  ;;  %8531 = vmatprep.mubr.f32.mxu1 %v19852_v41  ;;  %v10892_v1 = vld [vmem:[%s22068_s9] sm:$0xff] }
 0x39c   :  { %v16892_v0 = vpack.c.bf16 %v8573_v4, %v8569_v60  ;;  %15826 = vmatmul.mubr.msk.f32.vlgmr.msra.gmra.mrb[16].mxu0 %vm6914_vm8, %v15822_v24  ;;  %v10862_v44 = vld [vmem:[%s22067_s8] sm:$0xff] }
 0x39d   :  { %16897 = vmatprep.subr.msk.bf16.mxu1 %vm19818_vm7, %v16895_v58  ;;  %8454 = vmatprep.mubr.f32.mxu0 %v19852_v41 }
 0x39e   :  { %15831 = vmatmul.mubr.msk.f32.gmra.mrb[18].mxu1 %vm6914_vm8, %v15823_v21  ;;  %16894 = vmatpush1.bf16.msk.msra.mxu0 %vm19818_vm7, %v16892_v0 }
 0x39f   :  { %16900 = vmatpush1.bf16.msk.msra.mxu1 %vm19818_vm7, %v16898_v7  ;;  %8736 = vmatprep.mubr.f32.mxu1 %v19852_v41 }
 0x3a0   :  { %15827 = vmatmul.mubr.msk.f32.gmra.mrb[18].mxu0 %vm6914_vm8, %v15823_v21 }
 0x3a1   :  { %8659 = vmatprep.mubr.f32.mxu0 %v19852_v41 }
 0x3a2   :  { %15840 = vmatmul.mubr.msk.f32.vlgmr.msra.gmra.mrb[16].mxu1 %vm6914_vm8, %v15832_v19 }
 0x3a3   :  { %8742 = vmatprep.mubr.f32.mxu1 %v19852_v41 }
 0x3a4   :  { %15836 = vmatmul.mubr.msk.f32.vlgmr.msra.gmra.mrb[16].mxu0 %vm6914_vm8, %v15832_v19 }
 0x3a5   :  { %8665 = vmatprep.mubr.f32.mxu0 %v19852_v41 }
 0x3a6   :  { %15841 = vmatmul.mubr.msk.f32.gmra.mrb[18].mxu1 %vm6914_vm8, %v15833_v42 }
 0x3a7   :  { %9038 = vmatprep.mubr.f32.mxu1 %v19852_v41 }
 0x3a8   :  { %15837 = vmatmul.mubr.msk.f32.gmra.mrb[18].mxu0 %vm6914_vm8, %v15833_v42  ;;  %v8762_v13 = vpop.permute.xlu0 %8761 }
 0x3a9   :  { %8955 = vmatprep.mubr.f32.mxu0 %v19852_v41  ;;  %v8767_v28 = vpop.permute.xlu1 %8766 }
 0x3ac   :  { %v8782_v51 = vpop.permute.xlu0 %8781 }
 0x3ad   :  { %v8787_v61 = vpop.permute.xlu1 %8786 }
 0x475   :  { %v8738_v16 = vpop.f32.mrb[16].mxu1 }
 0x476   :  { %v8771_v30 = vmul.f32 %v8762_v13, %v8738_v16  ;;  %v8740_v32 = vpop.f32.mrb[17].mxu1 }
 0x477   :  { %v8772_v36 = vmul.f32 %v8762_v13, %v8740_v32  ;;  %v8661_v49 = vpop.f32.mrb[16].mxu0 }
 0x478   :  { %v8791_v43 = vadd.f32 %v8782_v51, %v8771_v30  ;;  %v8769_v38 = vmul.f32 %v8762_v13, %v8661_v49  ;;  %v8663_v5 = vpop.f32.mrb[17].mxu0 }
 0x479   :  { %v8792_v53 = vadd.f32 %v8782_v51, %v8772_v36  ;;  %v8770_v55 = vmul.f32 %v8762_v13, %v8663_v5  ;;  %v8744_v54 = vpop.f32.mrb[18].mxu1 }
 0x47a   :  { %v8799_v62 = vmax.f32 %v8791_v43, 0.0  ;;  %v8789_v20 = vadd.f32 %v8782_v51, %v8769_v38  ;;  %v8775_v52 = vmul.f32 %v8767_v28, %v8744_v54  ;;  %v8746_v59 = vpop.f32.mrb[19].mxu1 }
 0x47b   :  { %v8800_v48 = vmax.f32 %v8792_v53, 0.0  ;;  %v8790_v31 = vadd.f32 %v8782_v51, %v8770_v55  ;;  %v8776_v22 = vmul.f32 %v8767_v28, %v8746_v59  ;;  %v8667_v3 = vpop.f32.mrb[18].mxu0  ;;  %v15943_v51 = vld [vmem:[%s22066_s7 + $0xc0] sm:$0xff] }
 0x47c   :  { %v8797_v40 = vmax.f32 %v8789_v20, 0.0  ;;  %v8795_v37 = vadd.f32 %v8787_v61, %v8775_v52  ;;  %v8773_v50 = vmul.f32 %v8767_v28, %v8667_v3  ;;  %v8669_v8 = vpop.f32.mrb[19].mxu0 }
 0x47d   :  { %v8798_v6 = vmax.f32 %v8790_v31, 0.0  ;;  %v8796_v14 = vadd.f32 %v8787_v61, %v8776_v22  ;;  %v8774_v27 = vmul.f32 %v8767_v28, %v8669_v8  ;;  %v20109_v17 = vpack.i.bf16 %v8828_v57, %v8800_v48  ;;  %v15842_v57 = vld [vmem:[%s22066_s7 + $0x18] sm:$0xff] }
 0x47e   :  { %v8803_v46 = vmax.f32 %v8795_v37, 0.0  ;;  %v8793_v63 = vadd.f32 %v8787_v61, %v8773_v50 }
 0x47f   :  { %v8804_v29 = vmax.f32 %v8796_v14, 0.0  ;;  %v8794_v10 = vadd.f32 %v8787_v61, %v8774_v27  ;;  %17576 = vrot.lane.b32.xlu1 %v20109_v17, %s18167_s30  ;;  %v17570_v15 = vpack.i.bf16 %v8799_v62, %v8798_v6  ;;  %v15843_v14 = vld [vmem:[%s22066_s7 + $0x20] sm:$0xff] }
 0x480   :  { %8811 = vst [vmem:[#allocation6 + $0x38] sm:$0x7f] %v8803_v46  ;;  %v8801_v9 = vmax.f32 %v8793_v63, 0.0 }
 0x481   :  { %8812 = vst [vmem:[#allocation6 + $0x40] sm:$0x7f] %v8804_v29  ;;  %v8802_v23 = vmax.f32 %v8794_v10, 0.0  ;;  %17571 = vrot.lane.b32.xlu0 %v17570_v15, %s18167_s30 }
 0x482   :  { %8809 = vst [vmem:[#allocation6 + $0x28] sm:$0x7f] %v8801_v9 }
 0x483   :  { %8810 = vst [vmem:[#allocation6 + $0x30] sm:$0x7f] %v8802_v23  ;;  %v15844_v23 = vld [vmem:[%s22066_s7 + $0x28] sm:$0xf] }
 0x487   :  { %v8822_v39 = vld [vmem:[#allocation6 + $0x38] sm:$0x7f] }
 0x488   :  { %v8823_v47 = vld [vmem:[#allocation6 + $0x40] sm:$0x7f]  ;;  %v20114_v35 = vpack.c.bf16 %v8822_v39, %v8799_v62 }
 0x489   :  { %v17585_v24 = vpack.i.bf16 %v8829_v34, %v8823_v47  ;;  %v8820_v18 = vld [vmem:[#allocation6 + $0x28] sm:$0x7f]  ;;  %v20118_v26 = vpack.c.bf16 %v8823_v47, %v8800_v48 }
 0x48a   :  { %v8821_v11 = vld [vmem:[#allocation6 + $0x30] sm:$0x7f]  ;;  %v20122_v56 = vpack.c.bf16 %v8820_v18, %v8797_v40  ;;  %v17590_v45 = vpack.i.bf16 %v8820_v18, %v8797_v40 }
 0x48b   :  { %17586 = vrot.lane.b32.xlu1 %v17585_v24, %s18167_s30  ;;  %v17580_v12 = vpack.i.bf16 %v8822_v39, %v8821_v11  ;;  %v20120_v33 = vpack.c.bf16 %v8821_v11, %v8798_v6 }
 0x48d   :  { %17581 = vrot.lane.b32.xlu0 %v17580_v12, %s18167_s30 }
 0x48f   :  { %17596 = vrot.lane.b32.xlu1 %v17570_v15, %s18176_s4 }
 0x491   :  { %17591 = vrot.lane.b32.xlu0 %v17590_v45, %s18167_s30 }
 0x493   :  { %17606 = vrot.lane.b32.xlu1 %v17580_v12, %s18176_s4 }
 0x495   :  { %17601 = vrot.lane.b32.xlu0 %v20109_v17, %s18176_s4 }
 0x497   :  { %17616 = vrot.lane.b32.xlu1 %v17590_v45, %s18176_s4 }
 0x499   :  { %17611 = vrot.lane.b32.xlu0 %v17585_v24, %s18176_s4 }
 0x49b   :  { %17626 = vrot.lane.b32.xlu1 %v20109_v17, %s18169_s19 }
 0x49d   :  { %17621 = vrot.lane.b32.xlu0 %v17570_v15, %s18169_s19 }
 0x49f   :  { %17636 = vrot.lane.b32.xlu1 %v17585_v24, %s18169_s19 }
 0x4a1   :  { %17631 = vrot.lane.b32.xlu0 %v17580_v12, %s18169_s19 }
 0x4a3   :  { %17646 = vrot.lane.b32.xlu1 %v17570_v15, %s18170_s22 }
 0x4a5   :  { %17641 = vrot.lane.b32.xlu0 %v17590_v45, %s18169_s19 }
 0x4a7   :  { %17656 = vrot.lane.b32.xlu1 %v17580_v12, %s18170_s22 }
 0x4a9   :  { %17651 = vrot.lane.b32.xlu0 %v20109_v17, %s18170_s22 }
 0x4ab   :  { %17666 = vrot.lane.b32.xlu1 %v17590_v45, %s18170_s22 }
 0x4ad   :  { %17661 = vrot.lane.b32.xlu0 %v17585_v24, %s18170_s22  ;;  %s18180_s22 = smov 94  }
 0x4af   :  { %17676 = vrot.lane.b32.xlu1 %v20109_v17, %s18177_s21 }
 0x4b1   :  { %17671 = vrot.lane.b32.xlu0 %v17570_v15, %s18177_s21 }
 0x4b3   :  { %17686 = vrot.lane.b32.xlu1 %v17585_v24, %s18177_s21 }
 0x4b5   :  { %17681 = vrot.lane.b32.xlu0 %v17580_v12, %s18177_s21 }
 0x4b7   :  { %17696 = vrot.lane.b32.xlu1 %v17570_v15, %s18178_s24 }
 0x4b9   :  { %17691 = vrot.lane.b32.xlu0 %v17590_v45, %s18177_s21 }
 0x4bb   :  { %17706 = vrot.lane.b32.xlu1 %v17580_v12, %s18178_s24 }
 0x4bd   :  { %17701 = vrot.lane.b32.xlu0 %v20109_v17, %s18178_s24 }
 0x4bf   :  { %17716 = vrot.lane.b32.xlu1 %v17590_v45, %s18178_s24 }
 0x4c1   :  { %17711 = vrot.lane.b32.xlu0 %v17585_v24, %s18178_s24 }
 0x4c3   :  { %17726 = vrot.lane.b32.xlu1 %v20109_v17, %s18179_s1 }
 0x4c5   :  { %17721 = vrot.lane.b32.xlu0 %v17570_v15, %s18179_s1 }
 0x4c7   :  { %17736 = vrot.lane.b32.xlu1 %v17585_v24, %s18179_s1 }
 0x4c9   :  { %17731 = vrot.lane.b32.xlu0 %v17580_v12, %s18179_s1 }
 0x4cb   :  { %17746 = vrot.lane.b32.xlu1 %v17570_v15, %s18180_s22 }
 0x4cd   :  { %17741 = vrot.lane.b32.xlu0 %v17590_v45, %s18179_s1 }
 0x4cf   :  { %17756 = vrot.lane.b32.xlu1 %v17580_v12, %s18180_s22 }
 0x4d1   :  { %17751 = vrot.lane.b32.xlu0 %v20109_v17, %s18180_s22 }
 0x4d3   :  { %17766 = vrot.lane.b32.xlu1 %v17590_v45, %s18180_s22  ;;  %v8813_v45 = vld [vmem:[%s22066_s7] sm:$0xff] }
 0x4d5   :  { %17761 = vrot.lane.b32.xlu0 %v17585_v24, %s18180_s22 }
 0x4d7   :  { %10897 = vperm.xlu1 %17444, %v10892_v1  }
 0x4d9   :  { %10867 = vperm.xlu0 %17443, %v10862_v44  }
 0x4f1   :  { %v17577_v2 = vpop.permute.xlu1 %17576 }
 0x4f2   :  { %v17579_v7 = vunpack.i.h.bf16 %v17577_v2  ;;  %v17578_v60 = vunpack.i.l.bf16 %v17577_v2 }
 0x4f3   :  { %v17572_v58 = vpop.permute.xlu0 %17571 }
 0x4f4   :  { %v17574_v21 = vunpack.i.h.bf16 %v17572_v58  ;;  %v17573_v0 = vunpack.i.l.bf16 %v17572_v58  ;;  %v8863_v28 = vsel %vm547_vm2, %v17578_v60, %v17579_v7 }
 0x4f6   :  { %v8862_v43 = vsel %vm547_vm2, %v17574_v21, %v17578_v60  ;;  %v8861_v38 = vsel %vm547_vm2, %v17573_v0, %v17574_v21 }
 0x4fd   :  { %v17587_v4 = vpop.permute.xlu1 %17586 }
 0x4fe   :  { %v17589_v19 = vunpack.i.h.bf16 %v17587_v4  ;;  %v17588_v42 = vunpack.i.l.bf16 %v17587_v4 }
 0x4ff   :  { %v17582_v13 = vpop.permute.xlu0 %17581 }
 0x500   :  { %v8867_v16 = vsel %vm547_vm2, %v17588_v42, %v17589_v19  ;;  %v17584_v30 = vunpack.i.h.bf16 %v17582_v13  ;;  %v17583_v32 = vunpack.i.l.bf16 %v17582_v13 }
 0x501   :  { %v16907_v36 = vpack.c.bf16 %v8867_v16, %v8863_v28  ;;  %v20155_v49 = vpop.permute.xlu1 %17596  ;;  %v20235_v16 = vld [vmem:[#allocation8] sm:$0xff] }
 0x502   :  { %v8866_v5 = vsel %vm547_vm2, %v17584_v30, %v17588_v42  ;;  %v8865_v53 = vsel %vm547_vm2, %v17583_v32, %v17584_v30  ;;  %v17599_v3 = vunpack.i.h.bf16 %v20155_v49  ;;  %v17598_v40 = vunpack.i.l.bf16 %v20155_v49  ;;  %v8814_v30 = vld [vmem:[%s22066_s7 + $0x8] sm:$0xff]  ;;  %123 = vst.msk [vmem:[#allocation7 + $0x70] sm:$0xf] %vm122_vm1, %v20235_v16 }
 0x503   :  { %v16910_v55 = vpack.c.bf16 %v8866_v5, %v8862_v43  ;;  %v16901_v54 = vpack.c.bf16 %v8865_v53, %v8861_v38  ;;  %16909 = vmatprep.subr.msk.bf16.mxu1 %vm20151_vm11, %v16907_v36  ;;  %v17592_v62 = vpop.permute.xlu0 %17591  ;;  %v8815_v53 = vld [vmem:[%s22066_s7 + $0x10] sm:$0xf] }
 0x504   :  { %v17594_v20 = vunpack.i.h.bf16 %v17592_v62  ;;  %v17593_v52 = vunpack.i.l.bf16 %v17592_v62  ;;  %v9266_v46 = vsel %vm9264_vm13, %v17598_v40, %v17599_v3 }
 0x505   :  { %v17607_v59 = vpop.permute.xlu1 %17606  ;;  %16903 = vmatprep.subr.msk.bf16.mxu0 %vm20151_vm11, %v16901_v54  ;;  %16912 = vmatpush1.bf16.msk.msra.mxu1 %vm20151_vm11, %v16910_v55 }
 0x506   :  { %v8860_v61 = vsel %vm547_vm2, %v17593_v52, %v17573_v0  ;;  %v8864_v48 = vsel %vm547_vm2, %v17594_v20, %v17583_v32  ;;  %v17609_v31 = vunpack.i.h.bf16 %v17607_v59  ;;  %v17608_v22 = vunpack.i.l.bf16 %v17607_v59  ;;  %16921 = vmatprep.subr.msk.bf16.mxu1 %vm20151_vm11, %v20118_v26 }
 0x507   :  { %v16904_v37 = vpack.c.bf16 %v8864_v48, %v8860_v61  ;;  %v17602_v50 = vpop.permute.xlu0 %17601  ;;  %v15865_v61 = vld [vmem:[%s22066_s7 + $0x30] sm:$0xff] }
 0x508   :  { %15852 = vmatmul.mubr.msk.f32.vlgmr.msra.gmra.mrb[20].mxu1 %vm8872_vm12, %v15842_v57  ;;  %v9270_v8 = vsel %vm9264_vm13, %v17608_v22, %v17609_v31  ;;  %v17604_v27 = vunpack.i.h.bf16 %v17602_v50  ;;  %v17603_v17 = vunpack.i.l.bf16 %v17602_v50 }
 0x509   :  { %v17617_v6 = vpop.permute.xlu1 %17616  ;;  %16906 = vmatpush1.bf16.msk.msra.mxu0 %vm20151_vm11, %v16904_v37  ;;  %16924 = vmatpush1.bf16.msk.msra.mxu1 %vm20151_vm11, %v20114_v35  ;;  %v16925_v29 = vpack.c.bf16 %v9270_v8, %v9266_v46 }
 0x50a   :  { %16915 = vmatprep.subr.msk.bf16.mxu0 %vm20151_vm11, %v20120_v33  ;;  %9044 = vmatprep.mubr.f32.mxu1 %v19852_v41  ;;  %v9268_v34 = vsel %vm9264_vm13, %v17603_v17, %v17604_v27  ;;  %v17619_v47 = vunpack.i.h.bf16 %v17617_v6  ;;  %v17618_v35 = vunpack.i.l.bf16 %v17617_v6  ;;  %v9267_v33 = vsel %vm9264_vm13, %v17599_v3, %v17603_v17 }
 0x50b   :  { %v17612_v63 = vpop.permute.xlu0 %17611 }
 0x50c   :  { %v17614_v10 = vunpack.i.h.bf16 %v17612_v63  ;;  %v17613_v15 = vunpack.i.l.bf16 %v17612_v63  ;;  %15847 = vmatmul.mubr.msk.f32.vlgmr.msra.gmra.mrb[20].mxu0 %vm8872_vm12, %v15842_v57  ;;  %15853 = vmatmul.mubr.msk.f32.gmra.mrb[22].mxu1 %vm8872_vm12, %v15843_v14  ;;  %v9265_v7 = vsel %vm9264_vm13, %v17618_v35, %v17598_v40  ;;  %v9269_v60 = vsel %vm9264_vm13, %v17619_v47, %v17608_v22  ;;  %v15866_v63 = vld [vmem:[%s22066_s7 + $0x38] sm:$0xff]  ;;  %v15867_v35 = vld [vmem:[%s22066_s7 + $0x40] sm:$0xf] }
 0x50d   :  { %v20194_v9 = vpop.permute.xlu1 %17626  ;;  %16918 = vmatpush1.bf16.msk.msra.mxu0 %vm20151_vm11, %v20122_v56  ;;  %8961 = vmatprep.mubr.f32.mxu0 %v19852_v41  ;;  %v16928_v49 = vpack.c.bf16 %v9269_v60, %v9265_v7  ;;  %v15878_v7 = vld [vmem:[%s22066_s7 + $0x48] sm:$0xff] }
 0x50e   :  { %v9272_v39 = vsel %vm9264_vm13, %v17613_v15, %v17614_v10  ;;  %16927 = vmatprep.subr.msk.bf16.mxu0 %vm20151_vm11, %v16925_v29  ;;  %9050 = vmatprep.mubr.f32.mxu1 %v19852_v41  ;;  %v9271_v12 = vsel %vm9264_vm13, %v17609_v31, %v17613_v15  ;;  %v17629_v18 = vunpack.i.h.bf16 %v20194_v9  ;;  %v17628_v26 = vunpack.i.l.bf16 %v20194_v9 }
 0x50f   :  { %v16931_v24 = vpack.c.bf16 %v9272_v39, %v9268_v34  ;;  %v20208_v11 = vpop.permute.xlu0 %17621  ;;  %v16934_v4 = vpack.c.bf16 %v9271_v12, %v9267_v33 }
 0x510   :  { %15848 = vmatmul.mubr.msk.f32.gmra.mrb[22].mxu0 %vm8872_vm12, %v15843_v14  ;;  %15854 = vmatmul.mubr.msk.f32.gmra.mrb[24].mxu1 %vm8872_vm12, %v15844_v23  ;;  %v17624_v1 = vunpack.i.h.bf16 %v20208_v11  ;;  %v17623_v44 = vunpack.i.l.bf16 %v20208_v11  ;;  %v9499_v0 = vsel %vm1301_vm3, %v17628_v26, %v17629_v18 }
 0x511   :  { %v17637_v56 = vpop.permute.xlu1 %17636  ;;  %16933 = vmatprep.subr.msk.bf16.mxu1 %vm20151_vm11, %v16931_v24  ;;  %8967 = vmatprep.mubr.f32.mxu0 %v19852_v41 }
 0x512   :  { %v17639_v2 = vunpack.i.h.bf16 %v17637_v56  ;;  %v17638_v58 = vunpack.i.l.bf16 %v17637_v56  ;;  %9221 = vmatprep.mubr.f32.mxu1 %v19852_v41  ;;  %v9497_v32 = vsel %vm1301_vm3, %v17623_v44, %v17624_v1  ;;  %v9498_v48 = vsel %vm1301_vm3, %v17624_v1, %v17628_v26 }
 0x513   :  { %v17632_v21 = vpop.permute.xlu0 %17631 }
 0x514   :  { %v9503_v19 = vsel %vm1301_vm3, %v17638_v58, %v17639_v2  ;;  %v17634_v42 = vunpack.i.h.bf16 %v17632_v21  ;;  %v17633_v13 = vunpack.i.l.bf16 %v17632_v21  ;;  %15849 = vmatmul.mubr.msk.f32.gmra.mrb[24].mxu0 %vm8872_vm12, %v15844_v23  ;;  %15862 = vmatmul.mubr.msk.f32.vlgmr.msra.gmra.mrb[20].mxu1 %vm8872_vm12, %v8813_v45 }
 0x515   :  { %v16943_v28 = vpack.c.bf16 %v9503_v19, %v9499_v0  ;;  %16936 = vmatpush1.bf16.msk.msra.mxu1 %vm20151_vm11, %v16934_v4  ;;  %v20233_v41 = vpop.permute.xlu1 %17646  ;;  %9138 = vmatprep.mubr.f32.mxu0 %v20235_v16 }
 0x516   :  { %v9501_v36 = vsel %vm1301_vm3, %v17633_v13, %v17634_v42  ;;  %9227 = vmatprep.mubr.f32.mxu1 %v20235_v16  ;;  %v9502_v54 = vsel %vm1301_vm3, %v17634_v42, %v17638_v58  ;;  %v17649_v40 = vunpack.i.h.bf16 %v20233_v41  ;;  %v17648_v37 = vunpack.i.l.bf16 %v20233_v41 }
 0x517   :  { %v16937_v43 = vpack.c.bf16 %v9501_v36, %v9497_v32  ;;  %v17642_v38 = vpop.permute.xlu0 %17641  ;;  %16945 = vmatprep.subr.msk.bf16.mxu1 %vm20151_vm11, %v16943_v28  ;;  %v16946_v3 = vpack.c.bf16 %v9502_v54, %v9498_v48  ;;  %v15879_v36 = vld [vmem:[%s22066_s7 + $0x50] sm:$0xff] }
 0x518   :  { %15857 = vmatmul.mubr.msk.f32.vlgmr.msra.gmra.mrb[20].mxu0 %vm8872_vm12, %v8813_v45  ;;  %15863 = vmatmul.mubr.msk.f32.gmra.mrb[22].mxu1 %vm8872_vm12, %v8814_v30  ;;  %v17644_v62 = vunpack.i.h.bf16 %v17642_v38  ;;  %v17643_v20 = vunpack.i.l.bf16 %v17642_v38  ;;  %v9728_v15 = vsel %vm1689_vm4, %v17648_v37, %v17649_v40 }
 0x519   :  { %16930 = vmatpush1.bf16.msk.msra.mxu0 %vm20151_vm11, %v16928_v49  ;;  %v20250_v5 = vpop.permute.xlu1 %17656  ;;  %9144 = vmatprep.mubr.f32.mxu0 %v20235_v16 }
 0x51a   :  { %16939 = vmatprep.subr.msk.bf16.mxu0 %vm20151_vm11, %v16937_v43  ;;  %9233 = vmatprep.mubr.f32.mxu1 %v20235_v16  ;;  %v17659_v52 = vunpack.i.h.bf16 %v20250_v5  ;;  %v17658_v59 = vunpack.i.l.bf16 %v20250_v5  ;;  %v9496_v8 = vsel %vm1301_vm3, %v17643_v20, %v17623_v44  ;;  %v9500_v6 = vsel %vm1301_vm3, %v17644_v62, %v17633_v13 }
 0x51b   :  { %v20259_v55 = vpop.permute.xlu0 %17651  ;;  %v16940_v9 = vpack.c.bf16 %v9500_v6, %v9496_v8 }
 0x51c   :  { %15858 = vmatmul.mubr.msk.f32.gmra.mrb[22].mxu0 %vm8872_vm12, %v8814_v30  ;;  %15864 = vmatmul.mubr.msk.f32.gmra.mrb[24].mxu1 %vm8872_vm12, %v8815_v53  ;;  %v17654_v31 = vunpack.i.h.bf16 %v20259_v55  ;;  %v17653_v22 = vunpack.i.l.bf16 %v20259_v55  ;;  %v9732_v17 = vsel %vm1689_vm4, %v17658_v59, %v17659_v52  ;;  %v15880_v55 = vld [vmem:[%s22066_s7 + $0x58] sm:$0xf] }
 0x51d   :  { %v20266_v57 = vpop.permute.xlu1 %17666  ;;  %9150 = vmatprep.mubr.f32.mxu0 %v20235_v16  ;;  %9441 = vmatprep.mubr.f32.mxu1 %v20235_v16  ;;  %v16949_v39 = vpack.c.bf16 %v9732_v17, %v9728_v15  ;;  %v15892_v15 = vld [vmem:[%s22066_s7 + $0x68] sm:$0xff] }
 0x51e   :  { %v9730_v29 = vsel %vm1689_vm4, %v17653_v22, %v17654_v31  ;;  %v17669_v33 = vunpack.i.h.bf16 %v20266_v57  ;;  %v17668_v56 = vunpack.i.l.bf16 %v20266_v57  ;;  %v9729_v60 = vsel %vm1689_vm4, %v17649_v40, %v17653_v22  ;;  %v15891_v40 = vld [vmem:[%s22066_s7 + $0x60] sm:$0xff] }
 0x51f   :  { %v17662_v50 = vpop.permute.xlu0 %17661 }
 0x520   :  { %v17664_v14 = vunpack.i.h.bf16 %v17662_v50  ;;  %v17663_v27 = vunpack.i.l.bf16 %v17662_v50  ;;  %15859 = vmatmul.mubr.msk.f32.gmra.mrb[24].mxu0 %vm8872_vm12, %v8815_v53  ;;  %15875 = vmatmul.mubr.msk.f32.vlgmr.msra.gmra.mrb[20].mxu1 %vm8872_vm12, %v15865_v61  ;;  %v9727_v13 = vsel %vm1689_vm4, %v17668_v56, %v17648_v37  ;;  %v9731_v28 = vsel %vm1689_vm4, %v17669_v33, %v17658_v59 }
 0x521   :  { %16948 = vmatpush1.bf16.msk.msra.mxu1 %vm20151_vm11, %v16946_v3  ;;  %v20287_v46 = vpop.permute.xlu1 %17676  ;;  %9358 = vmatprep.mubr.f32.mxu0 %v20235_v16  ;;  %v16952_v49 = vpack.c.bf16 %v9731_v28, %v9727_v13 }
 0x522   :  { %v9734_v10 = vsel %vm1689_vm4, %v17663_v27, %v17664_v14  ;;  %9447 = vmatprep.mubr.f32.mxu1 %v20235_v16  ;;  %v17679_v12 = vunpack.i.h.bf16 %v20287_v46  ;;  %v17678_v18 = vunpack.i.l.bf16 %v20287_v46  ;;  %v9733_v45 = vsel %vm1689_vm4, %v17659_v52, %v17663_v27 }
 0x523   :  { %v16955_v23 = vpack.c.bf16 %v9734_v10, %v9730_v29  ;;  %v20297_v34 = vpop.permute.xlu0 %17671  ;;  %v16958_v4 = vpack.c.bf16 %v9733_v45, %v9729_v60  ;;  %vm10190_vm4 = vcmask 785408  }
 0x524   :  { %15870 = vmatmul.mubr.msk.f32.vlgmr.msra.gmra.mrb[20].mxu0 %vm8872_vm12, %v15865_v61  ;;  %15876 = vmatmul.mubr.msk.f32.gmra.mrb[22].mxu1 %vm8872_vm12, %v15866_v63  ;;  %v9962_v21 = vsel %vm9958_vm14, %v17678_v18, %v17679_v12  ;;  %v17674_v0 = vunpack.i.h.bf16 %v20297_v34  ;;  %v17673_v19 = vunpack.i.l.bf16 %v20297_v34 }
 0x525   :  { %16942 = vmatpush1.bf16.msk.msra.mxu0 %vm20151_vm11, %v16940_v9  ;;  %v17687_v47 = vpop.permute.xlu1 %17686  ;;  %16957 = vmatprep.subr.msk.bf16.mxu1 %vm20151_vm11, %v16955_v23 }
 0x526   :  { %v17689_v24 = vunpack.i.h.bf16 %v17687_v47  ;;  %v17688_v11 = vunpack.i.l.bf16 %v17687_v47  ;;  %16951 = vmatprep.subr.msk.bf16.mxu0 %vm20151_vm11, %v16949_v39  ;;  %9364 = vmatprep.mubr.f32.mxu0 %v20235_v16  ;;  %v9960_v43 = vsel %vm9958_vm14, %v17673_v19, %v17674_v0  ;;  %v9961_v37 = vsel %vm9958_vm14, %v17674_v0, %v17678_v18 }
 0x527   :  { %v20313_v26 = vpop.permute.xlu0 %17681  ;;  %9453 = vmatprep.mubr.f32.mxu1 %v20235_v16 }
 0x528   :  { %15871 = vmatmul.mubr.msk.f32.gmra.mrb[22].mxu0 %vm8872_vm12, %v15866_v63  ;;  %15877 = vmatmul.mubr.msk.f32.gmra.mrb[24].mxu1 %vm8872_vm12, %v15867_v35  ;;  %v9966_v1 = vsel %vm9958_vm14, %v17688_v11, %v17689_v24  ;;  %v17684_v44 = vunpack.i.h.bf16 %v20313_v26  ;;  %v17683_v2 = vunpack.i.l.bf16 %v20313_v26 }
 0x529   :  { %v20324_v58 = vpop.permute.xlu1 %17696  ;;  %9370 = vmatprep.mubr.f32.mxu0 %v20235_v16  ;;  %9672 = vmatprep.mubr.f32.mxu1 %v20235_v16  ;;  %v16967_v41 = vpack.c.bf16 %v9966_v1, %v9962_v21 }
 0x52a   :  { %v9964_v30 = vsel %vm9958_vm14, %v17683_v2, %v17684_v44  ;;  %v9965_v20 = vsel %vm9958_vm14, %v17684_v44, %v17688_v11  ;;  %v17699_v14 = vunpack.i.h.bf16 %v20324_v58  ;;  %v17698_v27 = vunpack.i.l.bf16 %v20324_v58  ;;  %v15893_v11 = vld [vmem:[%s22066_s7 + $0x70] sm:$0xf]  ;;  %v15904_v58 = vld [vmem:[%s22066_s7 + $0x78] sm:$0xff] }
 0x52b   :  { %v17692_v42 = vpop.permute.xlu0 %17691  ;;  %v16961_v5 = vpack.c.bf16 %v9964_v30, %v9960_v43  ;;  %v16970_v6 = vpack.c.bf16 %v9965_v20, %v9961_v37 }
 0x52c   :  { %15872 = vmatmul.mubr.msk.f32.gmra.mrb[24].mxu0 %vm8872_vm12, %v15867_v35  ;;  %15888 = vmatmul.mubr.msk.f32.vlgmr.msra.gmra.mrb[20].mxu1 %vm8872_vm12, %v15878_v7  ;;  %v17694_v59 = vunpack.i.h.bf16 %v17692_v42  ;;  %v17693_v57 = vunpack.i.l.bf16 %v17692_v42  ;;  %v10192_v23 = vsel %vm10190_vm4, %v17698_v27, %v17699_v14 }
 0x52d   :  { %16960 = vmatpush1.bf16.msk.msra.mxu1 %vm20151_vm11, %v16958_v4  ;;  %v20346_v32 = vpop.permute.xlu1 %17706  ;;  %9589 = vmatprep.mubr.f32.mxu0 %v20235_v16 }
 0x52e   :  { %16969 = vmatprep.subr.msk.bf16.mxu1 %vm20151_vm11, %v16967_v41  ;;  %9678 = vmatprep.mubr.f32.mxu1 %v20235_v16  ;;  %v17709_v31 = vunpack.i.h.bf16 %v20346_v32  ;;  %v17708_v22 = vunpack.i.l.bf16 %v20346_v32  ;;  %v9959_v29 = vsel %vm9958_vm14, %v17693_v57, %v17673_v19  ;;  %v9963_v46 = vsel %vm9958_vm14, %v17694_v59, %v17683_v2  ;;  %v15905_v32 = vld [vmem:[%s22066_s7 + $0x80] sm:$0xff] }
 0x52f   :  { %v20356_v38 = vpop.permute.xlu0 %17701  ;;  %v16964_v34 = vpack.c.bf16 %v9963_v46, %v9959_v29 }
 0x530   :  { %15883 = vmatmul.mubr.msk.f32.vlgmr.msra.gmra.mrb[20].mxu0 %vm8872_vm12, %v15878_v7  ;;  %15889 = vmatmul.mubr.msk.f32.gmra.mrb[22].mxu1 %vm8872_vm12, %v15879_v36  ;;  %v17704_v54 = vunpack.i.h.bf16 %v20356_v38  ;;  %v17703_v62 = vunpack.i.l.bf16 %v20356_v38  ;;  %v10196_v10 = vsel %vm10190_vm4, %v17708_v22, %v17709_v31 }
 0x531   :  { %16954 = vmatpush1.bf16.msk.msra.mxu0 %vm20151_vm11, %v16952_v49  ;;  %v20362_v53 = vpop.permute.xlu1 %17716  ;;  %9595 = vmatprep.mubr.f32.mxu0 %v20235_v16  ;;  %v16973_v47 = vpack.c.bf16 %v10196_v10, %v10192_v23 }
 0x532   :  { %16963 = vmatprep.subr.msk.bf16.mxu0 %vm20151_vm11, %v16961_v5  ;;  %9684 = vmatprep.mubr.f32.mxu1 %v20235_v16  ;;  %v10194_v50 = vsel %vm10190_vm4, %v17703_v62, %v17704_v54  ;;  %v17719_v33 = vunpack.i.h.bf16 %v20362_v53  ;;  %v17718_v56 = vunpack.i.l.bf16 %v20362_v53  ;;  %v10193_v7 = vsel %vm10190_vm4, %v17699_v14, %v17703_v62 }
 0x533   :  { %v17712_v52 = vpop.permute.xlu0 %17711 }
 0x534   :  { %v17714_v61 = vunpack.i.h.bf16 %v17712_v52  ;;  %v17713_v48 = vunpack.i.l.bf16 %v17712_v52  ;;  %15884 = vmatmul.mubr.msk.f32.gmra.mrb[22].mxu0 %vm8872_vm12, %v15879_v36  ;;  %15890 = vmatmul.mubr.msk.f32.gmra.mrb[24].mxu1 %vm8872_vm12, %v15880_v55  ;;  %v10191_v42 = vsel %vm10190_vm4, %v17718_v56, %v17698_v27  ;;  %v10195_v13 = vsel %vm10190_vm4, %v17719_v33, %v17708_v22  ;;  %v15917_v22 = vld [vmem:[%s22066_s7 + $0x90] sm:$0xff]  ;;  %v15932_v33 = vld [vmem:[%s22066_s7 + $0xb8] sm:$0xf]  ;;  %v15944_v56 = vld [vmem:[%s22066_s7 + $0xc8] sm:$0xff] }
 0x535   :  { %v20378_v3 = vpop.permute.xlu1 %17726  ;;  %9601 = vmatprep.mubr.f32.mxu0 %v20235_v16  ;;  %9903 = vmatprep.mubr.f32.mxu1 %v20235_v16  ;;  %v16976_v36 = vpack.c.bf16 %v10195_v13, %v10191_v42 }
 0x536   :  { %v10198_v8 = vsel %vm10190_vm4, %v17713_v48, %v17714_v61  ;;  %v17729_v12 = vunpack.i.h.bf16 %v20378_v3  ;;  %v17728_v18 = vunpack.i.l.bf16 %v20378_v3  ;;  %v10197_v45 = vsel %vm10190_vm4, %v17709_v31, %v17713_v48 }
 0x537   :  { %v16979_v17 = vpack.c.bf16 %v10198_v8, %v10194_v50  ;;  %v20394_v63 = vpop.permute.xlu0 %17721  ;;  %v16982_v60 = vpack.c.bf16 %v10197_v45, %v10193_v7  ;;  %v15945_v45 = vld [vmem:[%s22066_s7 + $0xd0] sm:$0xf] }
 0x538   :  { %15885 = vmatmul.mubr.msk.f32.gmra.mrb[24].mxu0 %vm8872_vm12, %v15880_v55  ;;  %15901 = vmatmul.mubr.msk.f32.vlgmr.msra.gmra.mrb[20].mxu1 %vm8872_vm12, %v15891_v40  ;;  %v10426_v4 = vsel %vm10422_vm15, %v17728_v18, %v17729_v12  ;;  %v17724_v21 = vunpack.i.h.bf16 %v20394_v63  ;;  %v17723_v0 = vunpack.i.l.bf16 %v20394_v63  ;;  %v15906_v55 = vld [vmem:[%s22066_s7 + $0x88] sm:$0xf]  ;;  %v15918_v63 = vld [vmem:[%s22066_s7 + $0x98] sm:$0xff] }
 0x539   :  { %16972 = vmatpush1.bf16.msk.msra.mxu1 %vm20151_vm11, %v16970_v6  ;;  %9820 = vmatprep.mubr.f32.mxu0 %v20235_v16  ;;  %v20407_v9 = vpop.permute.xlu1 %17736 }
 0x53a   :  { %16981 = vmatprep.subr.msk.bf16.mxu1 %vm20151_vm11, %v16979_v17  ;;  %9909 = vmatprep.mubr.f32.mxu1 %v20235_v16  ;;  %v17739_v35 = vunpack.i.h.bf16 %v20407_v9  ;;  %v17738_v24 = vunpack.i.l.bf16 %v20407_v9  ;;  %v10424_v49 = vsel %vm10422_vm15, %v17723_v0, %v17724_v21  ;;  %v10425_v3 = vsel %vm10422_vm15, %v17724_v21, %v17728_v18  ;;  %v15919_v9 = vld [vmem:[%s22066_s7 + $0xa0] sm:$0xf]  ;;  %v15931_v18 = vld [vmem:[%s22066_s7 + $0xb0] sm:$0xff] }
 0x53b   :  { %v20413_v39 = vpop.permute.xlu0 %17731 }
 0x53c   :  { %15896 = vmatmul.mubr.msk.f32.vlgmr.msra.gmra.mrb[20].mxu0 %vm8872_vm12, %v15891_v40  ;;  %15902 = vmatmul.mubr.msk.f32.gmra.mrb[22].mxu1 %vm8872_vm12, %v15892_v15  ;;  %v10430_v1 = vsel %vm10422_vm15, %v17738_v24, %v17739_v35  ;;  %v17734_v44 = vunpack.i.h.bf16 %v20413_v39  ;;  %v17733_v2 = vunpack.i.l.bf16 %v20413_v39 }
 0x53d   :  { %16966 = vmatpush1.bf16.msk.msra.mxu0 %vm20151_vm11, %v16964_v34  ;;  %9826 = vmatprep.mubr.f32.mxu0 %v20235_v16  ;;  %v16991_v28 = vpack.c.bf16 %v10430_v1, %v10426_v4  ;;  %v20455_v41 = vpop.permute.xlu1 %17746 }
 0x53e   :  { %16975 = vmatprep.subr.msk.bf16.mxu0 %vm20151_vm11, %v16973_v47  ;;  %9915 = vmatprep.mubr.f32.mxu1 %v20235_v16  ;;  %v10428_v30 = vsel %vm10422_vm15, %v17733_v2, %v17734_v44  ;;  %v10429_v52 = vsel %vm10422_vm15, %v17734_v44, %v17738_v24  ;;  %v17749_v37 = vunpack.i.h.bf16 %v20455_v41  ;;  %v17748_v50 = vunpack.i.l.bf16 %v20455_v41  ;;  %v15930_v47 = vld [vmem:[%s22066_s7 + $0xa8] sm:$0xff] }
 0x53f   :  { %v20430_v26 = vpop.permute.xlu0 %17741  ;;  %v16985_v38 = vpack.c.bf16 %v10428_v30, %v10424_v49  ;;  %v16994_v40 = vpack.c.bf16 %v10429_v52, %v10425_v3  ;;  %v10958_v52 = vld [vmem:[#allocation7 + $0x20] sm:$0xff]  ;;  %v17782_v3 = vld [vmem:[%s22069_s10 + $0x48] sm:$0xff]  }
 0x540   :  { %15897 = vmatmul.mubr.msk.f32.gmra.mrb[22].mxu0 %vm8872_vm12, %v15892_v15  ;;  %15903 = vmatmul.mubr.msk.f32.gmra.mrb[24].mxu1 %vm8872_vm12, %v15893_v11  ;;  %v17744_v59 = vunpack.i.h.bf16 %v20430_v26  ;;  %v17743_v57 = vunpack.i.l.bf16 %v20430_v26  ;;  %v10656_v29 = vsel %vm10654_vm0, %v17748_v50, %v17749_v37 }
 0x541   :  { %9832 = vmatprep.mubr.f32.mxu0 %v20235_v16  ;;  %10135 = vmatprep.mubr.f32.mxu1 %v20235_v16  ;;  %v17757_v54 = vpop.permute.xlu1 %17756 }
 0x542   :  { %v17759_v61 = vunpack.i.h.bf16 %v17757_v54  ;;  %v17758_v48 = vunpack.i.l.bf16 %v17757_v54  ;;  %v10423_v6 = vsel %vm10422_vm15, %v17743_v57, %v17723_v0  ;;  %v10427_v14 = vsel %vm10422_vm15, %v17744_v59, %v17733_v2  ;;  %v10863_v59 = vld [vmem:[%s22067_s8 + $0x8] sm:$0xff] }
 0x543   :  { %v20451_v19 = vpop.permute.xlu0 %17751  ;;  %v16988_v46 = vpack.c.bf16 %v10427_v14, %v10423_v6  ;;  %v10893_v57 = vld [vmem:[%s22068_s9 + $0x8] sm:$0xff] }
 0x544   :  { %15898 = vmatmul.mubr.msk.f32.gmra.mrb[24].mxu0 %vm8872_vm12, %v15893_v11  ;;  %15914 = vmatmul.mubr.msk.f32.vlgmr.msra.gmra.mrb[20].mxu1 %vm8872_vm12, %v15904_v58  ;;  %v17754_v62 = vunpack.i.h.bf16 %v20451_v19  ;;  %v17753_v20 = vunpack.i.l.bf16 %v20451_v19  ;;  %v10660_v17 = vsel %vm10654_vm0, %v17758_v48, %v17759_v61  ;;  %v17785_v14 = vld [vmem:[%s22069_s10 + $0x88] sm:$0xff]  }
 0x545   :  { %16984 = vmatpush1.bf16.msk.msra.mxu1 %vm20151_vm11, %v16982_v60  ;;  %10052 = vmatprep.mubr.f32.mxu0 %v20235_v16  ;;  %v16997_v10 = vpack.c.bf16 %v10660_v17, %v10656_v29  ;;  %v17767_v15 = vpop.permute.xlu1 %17766  ;;  %v17786_v17 = vld [vmem:[%s22069_s10 + $0x50] sm:$0xff]  }
 0x546   :  { %16993 = vmatprep.subr.msk.bf16.mxu1 %vm20151_vm11, %v16991_v28  ;;  %10141 = vmatprep.mubr.f32.mxu1 %v20235_v16  ;;  %v10658_v8 = vsel %vm10654_vm0, %v17753_v20, %v17754_v62  ;;  %v17769_v23 = vunpack.i.h.bf16 %v17767_v15  ;;  %v17768_v34 = vunpack.i.l.bf16 %v17767_v15  ;;  %v10657_v35 = vsel %vm10654_vm0, %v17749_v37, %v17753_v20  ;;  %v17783_v37 = vld [vmem:[%s22069_s10 + $0x8] sm:$0xff]   ;;  %v17787_v29 = vld [vmem:[%s22069_s10 + $0x10] sm:$0xff]  }
 0x547   :  { %v17762_v43 = vpop.permute.xlu0 %17761  ;;  %v17788_v15 = vld [vmem:[%s22069_s10 + $0xd0] sm:$0xff]  }
 0x548   :  { %15909 = vmatmul.mubr.msk.f32.vlgmr.msra.gmra.mrb[20].mxu0 %vm8872_vm12, %v15904_v58  ;;  %15915 = vmatmul.mubr.msk.f32.gmra.mrb[22].mxu1 %vm8872_vm12, %v15905_v32  ;;  %v17764_v5 = vunpack.i.h.bf16 %v17762_v43  ;;  %v17763_v53 = vunpack.i.l.bf16 %v17762_v43  ;;  %v10655_v11 = vsel %vm10654_vm0, %v17768_v34, %v17748_v50  ;;  %v10659_v12 = vsel %vm10654_vm0, %v17769_v23, %v17758_v48  ;;  %v17779_v48 = vld [vmem:[%s22069_s10] sm:$0xff]   ;;  %v17789_v34 = vld [vmem:[%s22069_s10 + $0x90] sm:$0xff]  }
 0x549   :  { %16978 = vmatpush1.bf16.msk.msra.mxu0 %vm20151_vm11, %v16976_v36  ;;  %10058 = vmatprep.mubr.f32.mxu0 %v20235_v16  ;;  %v17000_v26 = vpack.c.bf16 %v10659_v12, %v10655_v11  ;;  %v17792_v12 = vld [vmem:[%s22069_s10 + $0xd8] sm:$0xff]  }
 0x54a   :  { %16987 = vmatprep.subr.msk.bf16.mxu0 %vm20151_vm11, %v16985_v38  ;;  %10147 = vmatprep.mubr.f32.mxu1 %v20235_v16  ;;  %v10662_v31 = vsel %vm10654_vm0, %v17763_v53, %v17764_v5  ;;  %v10661_v39 = vsel %vm10654_vm0, %v17759_v61, %v17763_v53  ;;  %v17778_v61 = vld [vmem:[%s22069_s10 + $0x40] sm:$0xff]  }
 0x54b   :  { %v17003_v27 = vpack.c.bf16 %v10662_v31, %v10658_v8  ;;  %v17006_v24 = vpack.c.bf16 %v10661_v39, %v10657_v35  ;;  %v17780_v31 = vld [vmem:[%s22069_s10 + $0xc0] sm:$0xff]   ;;  %v17784_v8 = vld [vmem:[%s22069_s10 + $0xc8] sm:$0xff]  }
 0x54c   :  { %15910 = vmatmul.mubr.msk.f32.gmra.mrb[22].mxu0 %vm8872_vm12, %v15905_v32  ;;  %15916 = vmatmul.mubr.msk.f32.gmra.mrb[24].mxu1 %vm8872_vm12, %v15906_v55 }
 0x54d   :  { %10064 = vmatprep.mubr.f32.mxu0 %v20235_v16  ;;  %10367 = vmatprep.mubr.f32.mxu1 %v20235_v16 }
 0x550   :  { %15911 = vmatmul.mubr.msk.f32.gmra.mrb[24].mxu0 %vm8872_vm12, %v15906_v55  ;;  %15927 = vmatmul.mubr.msk.f32.vlgmr.msra.gmra.mrb[20].mxu1 %vm8872_vm12, %v15917_v22 }
 0x551   :  { %16996 = vmatpush1.bf16.msk.msra.mxu1 %vm20151_vm11, %v16994_v40  ;;  %10284 = vmatprep.mubr.f32.mxu0 %v20235_v16 }
 0x552   :  { %17005 = vmatprep.subr.msk.bf16.mxu1 %vm20151_vm11, %v17003_v27  ;;  %10373 = vmatprep.mubr.f32.mxu1 %v20235_v16 }
 0x554   :  { %15922 = vmatmul.mubr.msk.f32.vlgmr.msra.gmra.mrb[20].mxu0 %vm8872_vm12, %v15917_v22  ;;  %15928 = vmatmul.mubr.msk.f32.gmra.mrb[22].mxu1 %vm8872_vm12, %v15918_v63  ;;  %v17781_v22 = vld [vmem:[%s22069_s10 + $0x80] sm:$0xff]  }
 0x555   :  { %16990 = vmatpush1.bf16.msk.msra.mxu0 %vm20151_vm11, %v16988_v46  ;;  %10290 = vmatprep.mubr.f32.mxu0 %v20235_v16 }
 0x556   :  { %16999 = vmatprep.subr.msk.bf16.mxu0 %vm20151_vm11, %v16997_v10  ;;  %10379 = vmatprep.mubr.f32.mxu1 %v20235_v16  ;;  %v10898_v7 = vpop.permute.xlu1 %10897 }
 0x558   :  { %15923 = vmatmul.mubr.msk.f32.gmra.mrb[22].mxu0 %vm8872_vm12, %v15918_v63  ;;  %15929 = vmatmul.mubr.msk.f32.gmra.mrb[24].mxu1 %vm8872_vm12, %v15919_v9  ;;  %v10868_v1 = vpop.permute.xlu0 %10867 }
 0x559   :  { %10296 = vmatprep.mubr.f32.mxu0 %v20235_v16  ;;  %10599 = vmatprep.mubr.f32.mxu1 %v20235_v16 }
 0x55c   :  { %15924 = vmatmul.mubr.msk.f32.gmra.mrb[24].mxu0 %vm8872_vm12, %v15919_v9  ;;  %15940 = vmatmul.mubr.msk.f32.vlgmr.msra.gmra.mrb[20].mxu1 %vm8872_vm12, %v15930_v47 }
 0x55d   :  { %17008 = vmatpush1.bf16.msk.msra.mxu1 %vm20151_vm11, %v17006_v24  ;;  %10516 = vmatprep.mubr.f32.mxu0 %v20235_v16  ;;  %v17791_v24 = vld [vmem:[%s22069_s10 + $0x18] sm:$0xff]  }
 0x55e   :  { %10605 = vmatprep.mubr.f32.mxu1 %v20235_v16  ;;  %16317 = vmatprep.subr.bf16.mxu1 %v17780_v31 }
 0x560   :  { %15935 = vmatmul.mubr.msk.f32.vlgmr.msra.gmra.mrb[20].mxu0 %vm8872_vm12, %v15930_v47  ;;  %15941 = vmatmul.mubr.msk.f32.gmra.mrb[22].mxu1 %vm8872_vm12, %v15931_v18  ;;  %v17790_v47 = vld [vmem:[%s22069_s10 + $0x58] sm:$0xff]  }
 0x561   :  { %17002 = vmatpush1.bf16.msk.msra.mxu0 %vm20151_vm11, %v17000_v26  ;;  %10522 = vmatprep.mubr.f32.mxu0 %v20235_v16  ;;  %v17793_v26 = vld [vmem:[%s22069_s10 + $0x98] sm:$0xff]  }
 0x562   :  { %10611 = vmatprep.mubr.f32.mxu1 %v20235_v16  ;;  %16295 = vmatprep.subr.bf16.mxu0 %v17778_v61 }
 0x564   :  { %15936 = vmatmul.mubr.msk.f32.gmra.mrb[22].mxu0 %vm8872_vm12, %v15931_v18  ;;  %15942 = vmatmul.mubr.msk.f32.gmra.mrb[24].mxu1 %vm8872_vm12, %v15932_v33 }
 0x565   :  { %10528 = vmatprep.mubr.f32.mxu0 %v20235_v16  ;;  %10831 = vmatprep.mubr.f32.mxu1 %v20235_v16 }
 0x568   :  { %15937 = vmatmul.mubr.msk.f32.gmra.mrb[24].mxu0 %vm8872_vm12, %v15932_v33  ;;  %15953 = vmatmul.mubr.msk.f32.vlgmr.msra.gmra.mrb[20].mxu1 %vm8872_vm12, %v15943_v51 }
 0x569   :  { %10748 = vmatprep.mubr.f32.mxu0 %v20235_v16  ;;  %10837 = vmatprep.mubr.f32.mxu1 %v20235_v16 }
 0x56a   :  { %16318 = vmatpush3.bf16.msra.mxu1 %v17781_v22  ;;  %v17813_v22 = vld [vmem:[%s22069_s10 + $0x1c0] sm:$0xff]  }
 0x56b   :  { %16319 = vmatprep.subr.bf16.mxu1 %v17784_v8 }
 0x56c   :  { %15948 = vmatmul.mubr.msk.f32.vlgmr.msra.gmra.mrb[20].mxu0 %vm8872_vm12, %v15943_v51  ;;  %15954 = vmatmul.mubr.msk.f32.gmra.mrb[22].mxu1 %vm8872_vm12, %v15944_v56  ;;  %v17794_v51 = vld [vmem:[%s22069_s10 + $0x60] sm:$0xff]  }
 0x56d   :  { %10754 = vmatprep.mubr.f32.mxu0 %v20235_v16  ;;  %10843 = vmatprep.mubr.f32.mxu1 %v20235_v16 }
 0x56e   :  { %16296 = vmatpush3.bf16.msra.mxu0 %v17779_v48  ;;  %16320 = vmatpush3.bf16.msra.mxu1 %v17785_v14 }
 0x56f   :  { %16297 = vmatprep.subr.bf16.mxu0 %v17782_v3  ;;  %16321 = vmatprep.subr.bf16.mxu1 %v17788_v15  ;;  %v20766_v3 = vld [vmem:[#allocation7 + $0x48] sm:$0xff] }
 0x570   :  { %15949 = vmatmul.mubr.msk.f32.gmra.mrb[22].mxu0 %vm8872_vm12, %v15944_v56  ;;  %15955 = vmatmul.mubr.msk.f32.gmra.mrb[24].mxu1 %vm8872_vm12, %v15945_v45  ;;  %v17795_v56 = vld [vmem:[%s22069_s10 + $0x20] sm:$0xff]  }
 0x571   :  { %10760 = vmatprep.mubr.f32.mxu0 %v20235_v16 }
 0x572   :  { %16298 = vmatpush3.bf16.msra.mxu0 %v17783_v37  ;;  %16322 = vmatpush3.bf16.msra.mxu1 %v17789_v34  ;;  %v10894_v37 = vld [vmem:[%s22068_s9 + $0x10] sm:$0xf] }
 0x573   :  { %16299 = vmatprep.subr.bf16.mxu0 %v17786_v17  ;;  %16323 = vmatprep.subr.bf16.mxu1 %v17792_v12  ;;  %v11136_v17 = vshrl.u32 %v134_v25, 7 }
 0x574   :  { %15950 = vmatmul.mubr.msk.f32.gmra.mrb[24].mxu0 %vm8872_vm12, %v15945_v45  ;;  %v17796_v45 = vld [vmem:[%s22069_s10 + $0xe0] sm:$0xff]  }
 0x576   :  { %16300 = vmatpush3.bf16.msra.mxu0 %v17787_v29  ;;  %16324 = vmatpush3.bf16.msra.mxu1 %v17793_v26 }
 0x577   :  { %16301 = vmatprep.subr.bf16.mxu0 %v17790_v47  ;;  %16325 = vmatprep.subr.bf16.mxu1 %v17796_v45 }
 0x57a   :  { %16302 = vmatpush3.bf16.msra.mxu0 %v17791_v24 }
 0x57b   :  { %16303 = vmatprep.subr.bf16.mxu0 %v17794_v51 }
 0x57e   :  { %16304 = vmatpush3.bf16.msra.mxu0 %v17795_v56 }
 0x63b   :  { %v10833_v44 = vpop.f32.mrb[20].mxu1 }
 0x63c   :  { %v10882_v2 = vmul.f32 %v10868_v1, %v10833_v44  ;;  %v10835_v58 = vpop.f32.mrb[21].mxu1  ;;  %v17798_v44 = vld [vmem:[%s22069_s10 + $0x68] sm:$0xff]  }
 0x63d   :  { %v10883_v60 = vmul.f32 %v10868_v1, %v10835_v58  ;;  %v17800_v58 = vld [vmem:[%s22069_s10 + $0xe8] sm:$0xff]   ;;  %16305 = vmatprep.subr.bf16.mxu0 %v17798_v44 }
 0x63e   :  { %v20578_v4 = vadd.f32 %v10898_v7, %v10882_v2  ;;  %v17799_v2 = vld [vmem:[%s22069_s10 + $0x28] sm:$0xff]  }
 0x63f   :  { %v20580_v21 = vadd.f32 %v10898_v7, %v10883_v60  ;;  %v10750_v0 = vpop.f32.mrb[20].mxu0  ;;  %v20582_v19 = vpop.f32.mrb[22].mxu1  ;;  %v17801_v60 = vld [vmem:[%s22069_s10 + $0xa8] sm:$0xff]   ;;  %16306 = vmatpush3.bf16.msra.mxu0 %v17799_v2 }
 0x640   :  { %v10924_v42 = vmax.f32 %v20578_v4, 0.0  ;;  %v10880_v13 = vmul.f32 %v10868_v1, %v10750_v0  ;;  %v10752_v28 = vpop.f32.mrb[21].mxu0  ;;  %v20585_v41 = vpop.f32.mrb[23].mxu1  ;;  %v17804_v4 = vld [vmem:[%s22069_s10 + $0xf0] sm:$0xff]   ;;  %v17806_v0 = vld [vmem:[%s22069_s10 + $0x78] sm:$0xff]  }
 0x641   :  { %v10925_v30 = vmax.f32 %v20580_v21, 0.0  ;;  %v10881_v32 = vmul.f32 %v10868_v1, %v10752_v28  ;;  %v17797_v1 = vld [vmem:[%s22069_s10 + $0xa0] sm:$0xff]   ;;  %v17803_v21 = vld [vmem:[%s22069_s10 + $0x30] sm:$0xff]  }
 0x642   :  { %v10910_v36 = vadd.f32 %v10898_v7, %v10880_v13  ;;  %16326 = vmatpush3.bf16.msra.mxu1 %v17797_v1  ;;  %v17808_v13 = vld [vmem:[%s22069_s10 + $0xf8] sm:$0xff]  }
 0x643   :  { %v10911_v49 = vadd.f32 %v10898_v7, %v10881_v32  ;;  %v20588_v43 = vpop.f32.mrb[22].mxu0  ;;  %v20590_v38 = vpop.f32.mrb[24].mxu1  ;;  %v17802_v7 = vld [vmem:[%s22069_s10 + $0x70] sm:$0xff]   ;;  %16327 = vmatprep.subr.bf16.mxu1 %v17800_v58 }
 0x644   :  { %v10922_v5 = vmax.f32 %v10910_v36, 0.0  ;;  %v20592_v53 = vpop.f32.mrb[23].mxu0  ;;  %v20594_v55 = vpop.f32.mrb[25].mxu1  ;;  %16307 = vmatprep.subr.bf16.mxu0 %v17802_v7 }
 0x645   :  { %v10923_v54 = vmax.f32 %v10911_v49, 0.0  ;;  %16308 = vmatpush3.bf16.msra.mxu0 %v17803_v21 }
 0x646   :  { %10976 = vrot.lane.b32.xlu0 %v10922_v5, %s18167_s30  ;;  %16328 = vmatpush3.bf16.msra.mxu1 %v17801_v60 }
 0x647   :  { %v20597_v62 = vpop.f32.mrb[24].mxu0  ;;  %10978 = vrot.lane.b32.xlu1 %v10923_v54, %s18167_s30  ;;  %16329 = vmatprep.subr.bf16.mxu1 %v17804_v4 }
 0x648   :  { %v20600_v20 = vpop.f32.mrb[25].mxu0  ;;  %16309 = vmatprep.subr.bf16.mxu0 %v17806_v0  ;;  %v18182_v0 = vmov 1983009808  }
 0x64a   :  { %10980 = vrot.lane.b32.xlu0 %v10924_v42, %s18167_s30 }
 0x64b   :  { %10982 = vrot.lane.b32.xlu1 %v10925_v30, %s18167_s30 }
 0x64e   :  { %10984 = vrot.lane.b32.xlu0 %v10958_v52, %s18167_s30 }
 0x64f   :  { %10872 = vperm.xlu1 %17444, %v10863_v59  }
 0x652   :  { %10902 = vperm.xlu0 %17443, %v10893_v57  }
 0x6b8   :  { %v10977_v40 = vpop.permute.xlu0 %10976 }
 0x6b9   :  { %v10979_v50 = vpop.permute.xlu1 %10978 }
 0x6ba   :  { %v11006_v6 = vsel %vm547_vm2, %v10977_v40, %v10979_v50  ;;  %v10864_v40 = vld [vmem:[%s22067_s8 + $0x10] sm:$0xf] }
 0x6bb   :  { %v20638_v27 = vmax.f32 %v10922_v5, %v11006_v6 }
 0x6bc   :  { %v10981_v63 = vpop.permute.xlu0 %10980 }
 0x6bd   :  { %v11007_v46 = vsel %vm547_vm2, %v10979_v50, %v10981_v63  ;;  %11063 = vrot.lane.b32.xlu1 %v20638_v27, %s18169_s19  ;;  %v10983_v10 = vpop.permute.xlu1 %10982  ;;  %v18181_v50 = vmov 1966171168  }
 0x6be   :  { %v20652_v9 = vmax.f32 %v10923_v54, %v11007_v46  ;;  %v11008_v23 = vsel %vm547_vm2, %v10981_v63, %v10983_v10  ;;  %v17809_v54 = vld [vmem:[%s22069_s10 + $0xb8] sm:$0xff]   ;;  %v11133_v8 = vunpack.c.l.s4 %v18181_v50 }
 0x6bf   :  { %v20658_v39 = vmax.f32 %v10924_v42, %v11008_v23  ;;  %v17805_v42 = vld [vmem:[%s22069_s10 + $0xb0] sm:$0xff]  }
 0x6c0   :  { %v10985_v35 = vpop.permute.xlu0 %10984  ;;  %11065 = vrot.lane.b32.xlu0 %v20652_v9, %s18169_s19  ;;  %16330 = vmatpush3.bf16.msra.mxu1 %v17805_v42  ;;  %v11134_v14 = vunpack.c.0.s8 %v11133_v8  ;;  %v11536_v42 = vunpack.c.l.s4 %v18182_v0  ;;  %v17819_v0 = vld [vmem:[%s22069_s10 + $0x188] sm:$0xff]  }
 0x6c1   :  { %v11009_v11 = vsel %vm547_vm2, %v10983_v10, %v10985_v35  ;;  %11067 = vrot.lane.b32.xlu1 %v20658_v39, %s18169_s19  ;;  %v11045_v33 = vmax.f32 %v10958_v52, %v10985_v35  ;;  %16331 = vmatprep.subr.bf16.mxu1 %v17808_v13 }
 0x6c2   :  { %v20676_v18 = vmax.f32 %v10925_v30, %v11009_v11  ;;  %v17807_v30 = vld [vmem:[%s22069_s10 + $0x38] sm:$0xff]   ;;  %v20781_v23 = vsub.s32 %v11134_v14, %v11136_v17 }
 0x6c3   :  { %16310 = vmatpush3.bf16.msra.mxu0 %v17807_v30 }
 0x6c4   :  { %11069 = vrot.lane.b32.xlu0 %v20676_v18, %s18169_s19  ;;  %16332 = vmatpush3.bf16.msra.mxu1 %v17809_v54 }
 0x6c5   :  { %11071 = vrot.lane.b32.xlu1 %v11045_v33, %s18169_s19  ;;  %16361 = vmatprep.subr.bf16.mxu1 %v17813_v22  ;;  %v11537_v22 = vunpack.c.0.s8 %v11536_v42  ;;  %v17823_v42 = vld [vmem:[%s22069_s10 + $0x190] sm:$0xff]  }
 0x6c7   :  { %v20837_v50 = vsub.s32 %v11537_v22, %v11136_v17 }
 0x6ce   :  { %v10873_v28 = vpop.permute.xlu1 %10872 }
 0x6cf   :  { %v10884_v32 = vmul.f32 %v10873_v28, %v20588_v43  ;;  %v10885_v36 = vmul.f32 %v10873_v28, %v20592_v53  ;;  %v10886_v49 = vmul.f32 %v10873_v28, %v20582_v19  ;;  %v10887_v5 = vmul.f32 %v10873_v28, %v20585_v41  ;;  %v17810_v19 = vld [vmem:[%s22069_s10 + $0x140] sm:$0xff]  }
 0x6d0   :  { %16339 = vmatprep.subr.bf16.mxu0 %v17810_v19 }
 0x6d1   :  { %v10903_v52 = vpop.permute.xlu0 %10902 }
 0x6d2   :  { %v20736_v59 = vadd.f32 %v10903_v52, %v10884_v32  ;;  %v20738_v57 = vadd.f32 %v10903_v52, %v10885_v36  ;;  %v20740_v61 = vadd.f32 %v10903_v52, %v10886_v49  ;;  %v20742_v43 = vadd.f32 %v10903_v52, %v10887_v5 }
 0x6d4   :  { %v10926_v41 = vmax.f32 %v20736_v59, 0.0  ;;  %v10927_v53 = vmax.f32 %v20738_v57, 0.0  ;;  %v10928_v48 = vmax.f32 %v20740_v61, 0.0  ;;  %v10929_v31 = vmax.f32 %v20742_v43, 0.0  ;;  %v17822_v43 = vld [vmem:[%s22069_s10 + $0x1d0] sm:$0xff]  }
 0x6d6   :  { %10986 = vrot.lane.b32.xlu0 %v10926_v41, %s18167_s30  ;;  %10988 = vrot.lane.b32.xlu1 %v10927_v53, %s18167_s30 }
 0x6da   :  { %10990 = vrot.lane.b32.xlu0 %v10928_v48, %s18167_s30  ;;  %10992 = vrot.lane.b32.xlu1 %v10929_v31, %s18167_s30 }
 0x6de   :  { %10994 = vrot.lane.b32.xlu0 %v20766_v3, %s18167_s30  ;;  %10877 = vperm.xlu1 %17444, %v10864_v40  }
 0x6e2   :  { %10907 = vperm.xlu0 %17443, %v10894_v37  }
 0x72f   :  { %v11064_v6 = vpop.permute.xlu1 %11063 }
 0x732   :  { %v11066_v63 = vpop.permute.xlu0 %11065 }
 0x733   :  { %v11093_v29 = vsel %vm1301_vm3, %v11064_v6, %v11066_v63  ;;  %v11068_v46 = vpop.permute.xlu1 %11067 }
 0x734   :  { %v11117_v10 = vmax.f32 %v20638_v27, %v11093_v29  ;;  %v11094_v15 = vsel %vm1301_vm3, %v11066_v63, %v11068_v46 }
 0x735   :  { %v11118_v34 = vmax.f32 %v20652_v9, %v11094_v15 }
 0x736   :  { %v11070_v47 = vpop.permute.xlu0 %11069 }
 0x737   :  { %v11131_v35 = vcombine.low %v11117_v10, %v11118_v34  ;;  %v11171_v24 = vcombine.high %v11117_v10, %v11118_v34  ;;  %v11095_v11 = vsel %vm1301_vm3, %v11068_v46, %v11070_v47  ;;  %v11072_v12 = vpop.permute.xlu1 %11071 }
 0x738   :  { %v11119_v26 = vmax.f32 %v20658_v39, %v11095_v11  ;;  %v11096_v33 = vsel %vm1301_vm3, %v11070_v47, %v11072_v12 }
 0x739   :  { %v11138_v51 = vrot.slane %v11131_v35, %v20781_v23  ;;  %v11178_v27 = vrot.slane %v11171_v24, %v20781_v23  ;;  %v11120_v56 = vmax.f32 %v20676_v18, %v11096_v33 }
 0x73b   :  { %v11145_v9 = vrot.slane %v11138_v51, %v20781_v23  ;;  %v11152_v1 = vcombine.high %v11138_v51, %v11138_v51  ;;  %v11185_v44 = vrot.slane %v11178_v27, %v20781_v23  ;;  %v11189_v2 = vcombine.high %v11178_v27, %v11178_v27  ;;  %v17811_v51 = vld [vmem:[%s22069_s10 + $0x100] sm:$0xff]  }
 0x73c   :  { %v11325_v39 = vcombine.low %v11119_v26, %v11120_v56  ;;  %v11362_v58 = vcombine.high %v11119_v26, %v11120_v56 }
 0x73d   :  { %11151 = vst.msk [vmem:[#allocation8] ss:$2 sm:$0x3] %vm20791_vm5, %v11145_v9  ;;  %v11159_v7 = vrot.slane %v11152_v1, %v20781_v23  ;;  %v11163_v60 = vcombine.high %v11145_v9, %v11145_v9  ;;  %11188 = vst.msk [vmem:[#allocation8 + $0x10] ss:$2 sm:$0x3] %vm20791_vm5, %v11185_v44  ;;  %v11196_v25 = vrot.slane %v11189_v2, %v20781_v23 }
 0x73e   :  { %v11200_v18 = vcombine.high %v11185_v44, %v11185_v44  ;;  %v11332_v4 = vrot.slane %v11325_v39, %v20781_v23  ;;  %v11369_v21 = vrot.slane %v11362_v58, %v20781_v23  ;;  %v17814_v44 = vld [vmem:[%s22069_s10 + $0x180] sm:$0xff]   ;;  %v17815_v2 = vld [vmem:[%s22069_s10 + $0x148] sm:$0xff]  }
 0x73f   :  { %11162 = vst.msk [vmem:[#allocation8 + $0x4] ss:$2 sm:$0x3] %vm20791_vm5, %v11159_v7  ;;  %11166 = vst.msk [vmem:[#allocation8 + $0x8] ss:$2 sm:$0x3] %vm20791_vm5, %v11163_v60  ;;  %v11167_v13 = vcombine.high %v11159_v7, %v11159_v7  ;;  %v11204_v28 = vcombine.high %v11196_v25, %v11196_v25 }
 0x740   :  { %11199 = vst.msk [vmem:[#allocation8 + $0x14] ss:$2 sm:$0x3] %vm20791_vm5, %v11196_v25  ;;  %11203 = vst.msk [vmem:[#allocation8 + $0x18] ss:$2 sm:$0x3] %vm20791_vm5, %v11200_v18  ;;  %v11339_v30 = vrot.slane %v11332_v4, %v20781_v23  ;;  %v11343_v32 = vcombine.high %v11332_v4, %v11332_v4  ;;  %v11376_v36 = vrot.slane %v11369_v21, %v20781_v23 }
 0x741   :  { %v11380_v49 = vcombine.high %v11369_v21, %v11369_v21  ;;  %11170 = vst.msk [vmem:[#allocation8 + $0xc] ss:$2 sm:$0x3] %vm20791_vm5, %v11167_v13  ;;  %11207 = vst.msk [vmem:[#allocation8 + $0x1c] ss:$2 sm:$0x3] %vm20791_vm5, %v11204_v28 }
 0x742   :  { %11342 = vst.msk [vmem:[#allocation8 + $0x1] ss:$2 sm:$0x3] %vm20791_vm5, %v11339_v30  ;;  %v11350_v5 = vrot.slane %v11343_v32, %v20781_v23  ;;  %v11354_v54 = vcombine.high %v11339_v30, %v11339_v30  ;;  %11379 = vst.msk [vmem:[#allocation8 + $0x11] ss:$2 sm:$0x3] %vm20791_vm5, %v11376_v36  ;;  %v11391_v19 = vcombine.high %v11376_v36, %v11376_v36 }
 0x743   :  { %v11387_v52 = vrot.slane %v11380_v49, %v20781_v23  ;;  %v17818_v7 = vld [vmem:[%s22069_s10 + $0x1c8] sm:$0xff]   ;;  %v17820_v21 = vld [vmem:[%s22069_s10 + $0x150] sm:$0xff]   ;;  %v17826_v13 = vld [vmem:[%s22069_s10 + $0x1d8] sm:$0xff]  }
 0x744   :  { %11353 = vst.msk [vmem:[#allocation8 + $0x5] ss:$2 sm:$0x3] %vm20791_vm5, %v11350_v5  ;;  %11357 = vst.msk [vmem:[#allocation8 + $0x9] ss:$2 sm:$0x3] %vm20791_vm5, %v11354_v54  ;;  %v11358_v40 = vcombine.high %v11350_v5, %v11350_v5 }
 0x745   :  { %11390 = vst.msk [vmem:[#allocation8 + $0x15] ss:$2 sm:$0x3] %vm20791_vm5, %v11387_v52  ;;  %11394 = vst.msk [vmem:[#allocation8 + $0x19] ss:$2 sm:$0x3] %vm20791_vm5, %v11391_v19  ;;  %v11395_v37 = vcombine.high %v11387_v52, %v11387_v52 }
 0x746   :  { %11361 = vst.msk [vmem:[#allocation8 + $0xd] ss:$2 sm:$0x3] %vm20791_vm5, %v11358_v40  ;;  %v17817_v60 = vld [vmem:[%s22069_s10 + $0x108] sm:$0xff]   ;;  %v17825_v28 = vld [vmem:[%s22069_s10 + $0x118] sm:$0xff]   ;;  %v17828_v30 = vld [vmem:[%s22069_s10 + $0x160] sm:$0xff]  }
 0x747   :  { %11398 = vst.msk [vmem:[#allocation8 + $0x1d] ss:$2 sm:$0x3] %vm20791_vm5, %v11395_v37  ;;  %v17827_v36 = vld [vmem:[%s22069_s10 + $0x198] sm:$0xff]   ;;  %v17830_v49 = vld [vmem:[%s22069_s10 + $0x1e0] sm:$0xff]   ;;  %v17832_v40 = vld [vmem:[%s22069_s10 + $0x168] sm:$0xff]  }
 0x748   :  { %v10987_v8 = vpop.permute.xlu0 %10986  ;;  %v10989_v6 = vpop.permute.xlu1 %10988  ;;  %v17829_v5 = vld [vmem:[%s22069_s10 + $0x120] sm:$0xff]  }
 0x749   :  { %v11010_v14 = vsel %vm547_vm2, %v10987_v8, %v10989_v6  ;;  %v17831_v8 = vld [vmem:[%s22069_s10 + $0x1a0] sm:$0xff]  }
 0x74a   :  { %v20842_v63 = vmax.f32 %v10926_v41, %v11010_v14 }
 0x74b   :  { %v11514_v29 = vld [vmem:[#allocation8] sm:$0xff] }
 0x74c   :  { %v11541_v46 = vrot.slane %v11514_v29, %v20837_v50  ;;  %v11534_v10 = vcombine.high %v11514_v29, %v11514_v29  ;;  %v10991_v15 = vpop.permute.xlu0 %10990  ;;  %11073 = vrot.lane.b32.xlu1 %v20842_v63, %s18169_s19  ;;  %v10993_v34 = vpop.permute.xlu1 %10992 }
 0x74d   :  { %v11515_v47 = vld [vmem:[#allocation8 + $0x8] sm:$0xff]  ;;  %v11011_v17 = vsel %vm547_vm2, %v10989_v6, %v10991_v15  ;;  %v11012_v35 = vsel %vm547_vm2, %v10991_v15, %v10993_v34 }
 0x74e   :  { %v11549_v24 = vcombine.high %v11541_v46, %v11541_v46  ;;  %v11548_v11 = vrot.slane %v11534_v10, %v20837_v50  ;;  %v20851_v59 = vrot.slane %v11515_v47, %v20837_v50  ;;  %v20855_v41 = vmax.f32 %v10927_v53, %v11011_v17  ;;  %v17835_v17 = vld [vmem:[%s22069_s10 + $0x1a8] sm:$0xff]  }
 0x74f   :  { %v20859_v12 = vmax.f32 %v10928_v48, %v11012_v35  ;;  %v11551_v26 = vcombine.high %v11515_v47, %v11515_v47  ;;  %v11744_v1 = vpack.c.bf16 %v11541_v46, %v11541_v46  ;;  %v11516_v47 = vld [vmem:[#allocation8 + $0x10] sm:$0xff]  ;;  %v17838_v35 = vld [vmem:[%s22069_s10 + $0x1f0] sm:$0xff]  }
 0x750   :  { %v11745_v33 = vpack.c.bf16 %v11549_v24, %v11549_v24  ;;  %v11550_v27 = vcombine.high %v11548_v11, %v11548_v11  ;;  %v11566_v56 = vcombine.high %v20851_v59, %v20851_v59  ;;  %v10995_v9 = vpop.permute.xlu0 %10994  ;;  %11075 = vrot.lane.b32.xlu0 %v20855_v41, %s18169_s19  ;;  %v11746_v39 = vpack.c.bf16 %v11548_v11, %v11548_v11  ;;  %v17837_v24 = vld [vmem:[%s22069_s10 + $0x130] sm:$0xff]  }
 0x751   :  { %v20867_v57 = vrot.slane %v11551_v26, %v20837_v50  ;;  %v11013_v53 = vsel %vm547_vm2, %v10993_v34, %v10995_v9  ;;  %11077 = vrot.lane.b32.xlu1 %v20859_v12, %s18169_s19  ;;  %v11046_v4 = vmax.f32 %v20766_v3, %v10995_v9  ;;  %v17824_v3 = vld [vmem:[%s22069_s10 + $0x158] sm:$0xff]   ;;  %v17836_v34 = vld [vmem:[%s22069_s10 + $0x170] sm:$0xff]   ;;  %v11568_v11 = vcombine.high %v11516_v47, %v11516_v47 }
 0x752   :  { %14383 = vmatprep.mubr.bf16.mxu0 %v11745_v33  ;;  %v11747_v61 = vpack.c.bf16 %v11550_v27, %v11550_v27  ;;  %v11749_v48 = vpack.c.bf16 %v11566_v56, %v11566_v56  ;;  %v20890_v25 = vmax.f32 %v10929_v31, %v11013_v53  ;;  %v17821_v31 = vld [vmem:[%s22069_s10 + $0x110] sm:$0xff]   ;;  %v17840_v26 = vld [vmem:[%s22069_s10 + $0x178] sm:$0xff]  }
 0x753   :  { %14384 = vmatmul.mubr.bf16.vlgmr.msra.gmra.mrb[28].mxu0 %v11744_v1  ;;  %v11567_v58 = vcombine.high %v20867_v57, %v20867_v57  ;;  %v17839_v33 = vld [vmem:[%s22069_s10 + $0x1b0] sm:$0xff]   ;;  %v17842_v27 = vld [vmem:[%s22069_s10 + $0x1f8] sm:$0xff]   ;;  %v20976_v9 = vrot.slane %v11568_v11, %v20837_v50  ;;  %v17844_v1 = vld [vmem:[%s22069_s10 + $0x240] sm:$0xff]  }
 0x754   :  { %16340 = vmatpush3.bf16.msra.mxu0 %v17811_v51  ;;  %14423 = vmatprep.mubr.bf16.mxu1 %v11747_v61  ;;  %v20967_v51 = vrot.slane %v11516_v47, %v20837_v50  ;;  %v17841_v56 = vld [vmem:[%s22069_s10 + $0x138] sm:$0xff]  }
 0x755   :  { %14463 = vmatprep.mubr.bf16.mxu0 %v11749_v48  ;;  %14424 = vmatmul.mubr.bf16.vlgmr.msra.gmra.mrb[28].mxu1 %v11746_v39  ;;  %v11751_v18 = vpack.c.bf16 %v11567_v58, %v11567_v58  ;;  %v17843_v48 = vld [vmem:[%s22069_s10 + $0x1b8] sm:$0xff]   ;;  %v17845_v39 = vld [vmem:[%s22069_s10 + $0x200] sm:$0xff]   ;;  %v11584_v58 = vcombine.high %v20976_v9, %v20976_v9 }
 0x756   :  { %16362 = vmatpush3.bf16.msra.mxu1 %v17814_v44  ;;  %16341 = vmatprep.subr.bf16.mxu0 %v17815_v2  ;;  %v11583_v44 = vcombine.high %v20967_v51, %v20967_v51  ;;  %v17846_v2 = vld [vmem:[%s22069_s10 + $0x2c0] sm:$0xff]   ;;  %v17874_v47 = vld [vmem:[%s22069_s10 + $0x238] sm:$0xff]  }
 0x757   :  { %14503 = vmatprep.mubr.bf16.mxu1 %v11751_v18  ;;  %16363 = vmatprep.subr.bf16.mxu1 %v17818_v7  ;;  %v11748_v7 = vpack.c.bf16 %v20851_v59, %v20851_v59  ;;  %v11750_v59 = vpack.c.bf16 %v20867_v57, %v20867_v57  ;;  %v17852_v57 = vld [vmem:[%s22069_s10 + $0x288] sm:$0xff]  }
 0x758   :  { %16342 = vmatpush3.bf16.msra.mxu0 %v17817_v60  ;;  %11079 = vrot.lane.b32.xlu0 %v20890_v25, %s18169_s19  ;;  %v17849_v60 = vld [vmem:[%s22069_s10 + $0x248] sm:$0xff]  }
 0x759   :  { %16343 = vmatprep.subr.bf16.mxu0 %v17820_v21  ;;  %11081 = vrot.lane.b32.xlu1 %v11046_v4, %s18169_s19  ;;  %v11753_v4 = vpack.c.bf16 %v11583_v44, %v11583_v44  ;;  %v17847_v21 = vld [vmem:[%s22069_s10 + $0x280] sm:$0xff]  }
 0x75a   :  { %16364 = vmatpush3.bf16.msra.mxu1 %v17819_v0  ;;  %v17851_v0 = vld [vmem:[%s22069_s10 + $0x2c8] sm:$0xff]   ;;  %v17880_v44 = vld [vmem:[%s22069_s10 + $0x380] sm:$0xff]  }
 0x75b   :  { %16365 = vmatprep.subr.bf16.mxu1 %v17822_v43  ;;  %v11755_v43 = vpack.c.bf16 %v11584_v58, %v11584_v58  ;;  %v17883_v58 = vld [vmem:[%s22069_s10 + $0x308] sm:$0xff]  }
 0x75c   :  { %16344 = vmatpush3.bf16.msra.mxu0 %v17821_v31  ;;  %v17850_v31 = vld [vmem:[%s22069_s10 + $0x208] sm:$0xff]  }
 0x75d   :  { %16345 = vmatprep.subr.bf16.mxu0 %v17824_v3  ;;  %v10878_v32 = vpop.permute.xlu1 %10877  ;;  %v17853_v3 = vld [vmem:[%s22069_s10 + $0x250] sm:$0xff]  }
 0x75e   :  { %16366 = vmatpush3.bf16.msra.mxu1 %v17823_v42  ;;  %v10888_v54 = vmul.f32 %v10878_v32, %v20597_v62  ;;  %v10889_v52 = vmul.f32 %v10878_v32, %v20600_v20  ;;  %v10890_v19 = vmul.f32 %v10878_v32, %v20590_v38  ;;  %v10891_v22 = vmul.f32 %v10878_v32, %v20594_v55  ;;  %v17834_v38 = vld [vmem:[%s22069_s10 + $0x1e8] sm:$0xff]   ;;  %v21025_v42 = vld [vmem:[#allocation7 + $0x70] sm:$0xf]  ;;  %v17857_v32 = vld [vmem:[%s22069_s10 + $0x258] sm:$0xff]  }
 0x75f   :  { %16367 = vmatprep.subr.bf16.mxu1 %v17826_v13  ;;  %v17833_v55 = vld [vmem:[%s22069_s10 + $0x128] sm:$0xff]  }
 0x760   :  { %16346 = vmatpush3.bf16.msra.mxu0 %v17825_v28  ;;  %v17855_v28 = vld [vmem:[%s22069_s10 + $0x2d0] sm:$0xff]  }
 0x761   :  { %16347 = vmatprep.subr.bf16.mxu0 %v17828_v30  ;;  %v10908_v37 = vpop.permute.xlu0 %10907  ;;  %v17854_v30 = vld [vmem:[%s22069_s10 + $0x210] sm:$0xff]  }
 0x762   :  { %16368 = vmatpush3.bf16.msra.mxu1 %v17827_v36  ;;  %v10918_v6 = vadd.f32 %v10908_v37, %v10888_v54  ;;  %v10919_v14 = vadd.f32 %v10908_v37, %v10889_v52  ;;  %v10920_v62 = vadd.f32 %v10908_v37, %v10890_v19  ;;  %v10921_v29 = vadd.f32 %v10908_v37, %v10891_v22  ;;  %v17856_v36 = vld [vmem:[%s22069_s10 + $0x290] sm:$0xff]   ;;  %v17861_v54 = vld [vmem:[%s22069_s10 + $0x260] sm:$0xff]   ;;  %v17860_v52 = vld [vmem:[%s22069_s10 + $0x298] sm:$0xff]  }
 0x763   :  { %16369 = vmatprep.subr.bf16.mxu1 %v17830_v49  ;;  %v17859_v49 = vld [vmem:[%s22069_s10 + $0x2d8] sm:$0xff]   ;;  %v17863_v19 = vld [vmem:[%s22069_s10 + $0x2e0] sm:$0xff]  }
 0x764   :  { %16348 = vmatpush3.bf16.msra.mxu0 %v17829_v5  ;;  %v10930_v20 = vmax.f32 %v10918_v6, 0.0  ;;  %v10931_v46 = vmax.f32 %v10919_v14, 0.0  ;;  %v10932_v10 = vmax.f32 %v10920_v62, 0.0  ;;  %v10933_v15 = vmax.f32 %v10921_v29, 0.0  ;;  %v17858_v5 = vld [vmem:[%s22069_s10 + $0x218] sm:$0xff]   ;;  %v17862_v22 = vld [vmem:[%s22069_s10 + $0x220] sm:$0xff]  }
 0x765   :  { %16349 = vmatprep.subr.bf16.mxu0 %v17832_v40  ;;  %v17865_v40 = vld [vmem:[%s22069_s10 + $0x268] sm:$0xff]   ;;  %v17864_v37 = vld [vmem:[%s22069_s10 + $0x2a0] sm:$0xff]   ;;  %v17869_v14 = vld [vmem:[%s22069_s10 + $0x270] sm:$0xff]  }
 0x766   :  { %16370 = vmatpush3.bf16.msra.mxu1 %v17831_v8  ;;  %10942 = vst [vmem:[#allocation7 + $0x50] sm:$0xf] %v10930_v20  ;;  %10943 = vst [vmem:[#allocation7 + $0x58] sm:$0xf] %v10931_v46  ;;  %v17867_v8 = vld [vmem:[%s22069_s10 + $0x2e8] sm:$0xff]   ;;  %v11517_v62 = vld [vmem:[#allocation8 + $0x18] sm:$0xff] }
 0x767   :  { %10944 = vst [vmem:[#allocation7 + $0x60] sm:$0xf] %v10932_v10  ;;  %10945 = vst [vmem:[#allocation7 + $0x68] sm:$0xf] %v10933_v15  ;;  %16371 = vmatprep.subr.bf16.mxu1 %v17834_v38  ;;  %v17866_v6 = vld [vmem:[%s22069_s10 + $0x228] sm:$0xff]   ;;  %v17871_v38 = vld [vmem:[%s22069_s10 + $0x2f0] sm:$0xff]   ;;  %v11585_v20 = vcombine.high %v11517_v62, %v11517_v62  ;;  %v21097_v15 = vrot.slane %v11517_v62, %v20837_v50 }
 0x768   :  { %16350 = vmatpush3.bf16.msra.mxu0 %v17833_v55  ;;  %v17868_v29 = vld [vmem:[%s22069_s10 + $0x2a8] sm:$0xff]   ;;  %v17870_v55 = vld [vmem:[%s22069_s10 + $0x230] sm:$0xff]   ;;  %v17873_v46 = vld [vmem:[%s22069_s10 + $0x278] sm:$0xff]  }
 0x769   :  { %16351 = vmatprep.subr.bf16.mxu0 %v17836_v34  ;;  %v17872_v10 = vld [vmem:[%s22069_s10 + $0x2b0] sm:$0xff]   ;;  %v17875_v34 = vld [vmem:[%s22069_s10 + $0x2f8] sm:$0xff]   ;;  %v11600_v11 = vcombine.high %v21097_v15, %v21097_v15  ;;  %v17912_v62 = vld [vmem:[%s22069_s10 + $0x4c0] sm:$0xff]  }
 0x76a   :  { %16372 = vmatpush3.bf16.msra.mxu1 %v17835_v17  ;;  %v21106_v17 = vrot.slane %v11585_v20, %v20837_v50  ;;  %v17913_v20 = vld [vmem:[%s22069_s10 + $0x480] sm:$0xff]  }
 0x76b   :  { %16373 = vmatprep.subr.bf16.mxu1 %v17838_v35  ;;  %v17877_v35 = vld [vmem:[%s22069_s10 + $0x340] sm:$0xff]  }
 0x76c   :  { %16352 = vmatpush3.bf16.msra.mxu0 %v17837_v24  ;;  %v17876_v24 = vld [vmem:[%s22069_s10 + $0x2b8] sm:$0xff]  }
 0x76d   :  { %16353 = vmatprep.subr.bf16.mxu0 %v17840_v26  ;;  %v20981_v53 = vld [vmem:[#allocation7 + $0x50] sm:$0xf]  ;;  %v20983_v61 = vld [vmem:[#allocation7 + $0x58] sm:$0xf] }
 0x76e   :  { %16374 = vmatpush3.bf16.msra.mxu1 %v17839_v33  ;;  %10996 = vrot.lane.b32.xlu0 %v20981_v53, %s18167_s30  ;;  %v21007_v18 = vld [vmem:[#allocation7 + $0x60] sm:$0xf]  ;;  %v21030_v13 = vld [vmem:[#allocation7 + $0x68] sm:$0xf]  ;;  %v17879_v26 = vld [vmem:[%s22069_s10 + $0x3c0] sm:$0xff]  }
 0x76f   :  { %16375 = vmatprep.subr.bf16.mxu1 %v17842_v27  ;;  %10998 = vrot.lane.b32.xlu1 %v20983_v61, %s18167_s30  ;;  %v17878_v33 = vld [vmem:[%s22069_s10 + $0x300] sm:$0xff]   ;;  %v11601_v27 = vcombine.high %v21106_v17, %v21106_v17 }
 0x770   :  { %16354 = vmatpush3.bf16.msra.mxu0 %v17841_v56  ;;  %v11752_v56 = vpack.c.bf16 %v20967_v51, %v20967_v51  ;;  %v17884_v51 = vld [vmem:[%s22069_s10 + $0x3c8] sm:$0xff]  }
 0x771   :  { %16383 = vmatprep.subr.bf16.mxu0 %v17844_v1  ;;  %v17882_v1 = vld [vmem:[%s22069_s10 + $0x348] sm:$0xff]  }
 0x772   :  { %16376 = vmatpush3.bf16.msra.mxu1 %v17843_v48  ;;  %11000 = vrot.lane.b32.xlu0 %v21007_v18, %s18167_s30  ;;  %v11757_v48 = vpack.c.bf16 %v11600_v11, %v11600_v11  ;;  %v17921_v11 = vld [vmem:[%s22069_s10 + $0x490] sm:$0xff]  }
 0x773   :  { %14464 = vmatmul.mubr.bf16.vlgmr.msra.gmra.mrb[32].mxu0 %v11748_v7  ;;  %16405 = vmatprep.subr.bf16.mxu1 %v17846_v2  ;;  %v11754_v2 = vpack.c.bf16 %v20976_v9, %v20976_v9  ;;  %v17886_v7 = vld [vmem:[%s22069_s10 + $0x350] sm:$0xff]   ;;  %v17885_v9 = vld [vmem:[%s22069_s10 + $0x388] sm:$0xff]  }
 0x774   :  { %16384 = vmatpush3.bf16.msra.mxu0 %v17845_v39  ;;  %14543 = vmatprep.mubr.bf16.mxu0 %v11753_v4  ;;  %v11759_v39 = vpack.c.bf16 %v11601_v27, %v11601_v27  ;;  %v17887_v4 = vld [vmem:[%s22069_s10 + $0x310] sm:$0xff]   ;;  %v17926_v27 = vld [vmem:[%s22069_s10 + $0x460] sm:$0xff]  }
 0x775   :  { %14504 = vmatmul.mubr.bf16.vlgmr.msra.gmra.mrb[32].mxu1 %v11750_v59  ;;  %16385 = vmatprep.subr.bf16.mxu0 %v17849_v60  ;;  %v17888_v60 = vld [vmem:[%s22069_s10 + $0x3d0] sm:$0xff]  }
 0x776   :  { %16406 = vmatpush3.bf16.msra.mxu1 %v17847_v21  ;;  %14583 = vmatprep.mubr.bf16.mxu1 %v11755_v43  ;;  %v17890_v21 = vld [vmem:[%s22069_s10 + $0x358] sm:$0xff]   ;;  %v17889_v59 = vld [vmem:[%s22069_s10 + $0x390] sm:$0xff]  }
 0x777   :  { %16407 = vmatprep.subr.bf16.mxu1 %v17851_v0  ;;  %11002 = vrot.lane.b32.xlu1 %v21030_v13, %s18167_s30  ;;  %v17892_v0 = vld [vmem:[%s22069_s10 + $0x3d8] sm:$0xff]  }
 0x778   :  { %16386 = vmatpush3.bf16.msra.mxu0 %v17850_v31  ;;  %11004 = vrot.lane.b32.xlu0 %v21025_v42, %s18167_s30  ;;  %v17891_v43 = vld [vmem:[%s22069_s10 + $0x318] sm:$0xff]   ;;  %v17894_v31 = vld [vmem:[%s22069_s10 + $0x360] sm:$0xff]  }
 0x779   :  { %16387 = vmatprep.subr.bf16.mxu0 %v17853_v3  ;;  %v17893_v3 = vld [vmem:[%s22069_s10 + $0x398] sm:$0xff]  }
 0x77a   :  { %16408 = vmatpush3.bf16.msra.mxu1 %v17852_v57  ;;  %v17896_v57 = vld [vmem:[%s22069_s10 + $0x3e0] sm:$0xff]  }
 0x77b   :  { %16409 = vmatprep.subr.bf16.mxu1 %v17855_v28  ;;  %v17895_v28 = vld [vmem:[%s22069_s10 + $0x320] sm:$0xff]  }
 0x77c   :  { %16388 = vmatpush3.bf16.msra.mxu0 %v17854_v30  ;;  %v17898_v30 = vld [vmem:[%s22069_s10 + $0x368] sm:$0xff]  }
 0x77d   :  { %16389 = vmatprep.subr.bf16.mxu0 %v17857_v32  ;;  %v17897_v32 = vld [vmem:[%s22069_s10 + $0x3a0] sm:$0xff]  }
 0x77e   :  { %16410 = vmatpush3.bf16.msra.mxu1 %v17856_v36  ;;  %v17900_v36 = vld [vmem:[%s22069_s10 + $0x3e8] sm:$0xff]  }
 0x77f   :  { %16411 = vmatprep.subr.bf16.mxu1 %v17859_v49  ;;  %v17899_v49 = vld [vmem:[%s22069_s10 + $0x328] sm:$0xff]  }
 0x780   :  { %16390 = vmatpush3.bf16.msra.mxu0 %v17858_v5  ;;  %v17902_v5 = vld [vmem:[%s22069_s10 + $0x370] sm:$0xff]  }
 0x781   :  { %16391 = vmatprep.subr.bf16.mxu0 %v17861_v54  ;;  %v17901_v54 = vld [vmem:[%s22069_s10 + $0x3a8] sm:$0xff]  }
 0x782   :  { %16412 = vmatpush3.bf16.msra.mxu1 %v17860_v52  ;;  %v17904_v52 = vld [vmem:[%s22069_s10 + $0x3f0] sm:$0xff]  }
 0x783   :  { %16413 = vmatprep.subr.bf16.mxu1 %v17863_v19  ;;  %v17903_v19 = vld [vmem:[%s22069_s10 + $0x330] sm:$0xff]  }
 0x784   :  { %16392 = vmatpush3.bf16.msra.mxu0 %v17862_v22  ;;  %v17906_v22 = vld [vmem:[%s22069_s10 + $0x378] sm:$0xff]  }
 0x785   :  { %16393 = vmatprep.subr.bf16.mxu0 %v17865_v40  ;;  %v17905_v40 = vld [vmem:[%s22069_s10 + $0x3b0] sm:$0xff]  }
 0x786   :  { %16414 = vmatpush3.bf16.msra.mxu1 %v17864_v37  ;;  %v17908_v37 = vld [vmem:[%s22069_s10 + $0x3f8] sm:$0xff]  }
 0x787   :  { %16415 = vmatprep.subr.bf16.mxu1 %v17867_v8  ;;  %v17907_v8 = vld [vmem:[%s22069_s10 + $0x338] sm:$0xff]  }
 0x788   :  { %16394 = vmatpush3.bf16.msra.mxu0 %v17866_v6  ;;  %v17910_v6 = vld [vmem:[%s22069_s10 + $0x440] sm:$0xff]  }
 0x789   :  { %16395 = vmatprep.subr.bf16.mxu0 %v17869_v14  ;;  %v17909_v14 = vld [vmem:[%s22069_s10 + $0x3b8] sm:$0xff]  }
 0x78a   :  { %16416 = vmatpush3.bf16.msra.mxu1 %v17868_v29  ;;  %v17911_v29 = vld [vmem:[%s22069_s10 + $0x400] sm:$0xff]  }
 0x78b   :  { %16417 = vmatprep.subr.bf16.mxu1 %v17871_v38  ;;  %v11756_v38 = vpack.c.bf16 %v21097_v15, %v21097_v15  ;;  %v17915_v15 = vld [vmem:[%s22069_s10 + $0x408] sm:$0xff]  }
 0x78c   :  { %16396 = vmatpush3.bf16.msra.mxu0 %v17870_v55  ;;  %v17914_v55 = vld [vmem:[%s22069_s10 + $0x448] sm:$0xff]  }
 0x78d   :  { %16397 = vmatprep.subr.bf16.mxu0 %v17873_v46  ;;  %v11758_v46 = vpack.c.bf16 %v21106_v17, %v21106_v17  ;;  %v17920_v17 = vld [vmem:[%s22069_s10 + $0x4d0] sm:$0xff]  }
 0x78e   :  { %16418 = vmatpush3.bf16.msra.mxu1 %v17872_v10  ;;  %v17916_v10 = vld [vmem:[%s22069_s10 + $0x4c8] sm:$0xff]  }
 0x78f   :  { %16419 = vmatprep.subr.bf16.mxu1 %v17875_v34  ;;  %v17918_v34 = vld [vmem:[%s22069_s10 + $0x450] sm:$0xff]  }
 0x790   :  { %16398 = vmatpush3.bf16.msra.mxu0 %v17874_v47  ;;  %v17917_v47 = vld [vmem:[%s22069_s10 + $0x488] sm:$0xff]  }
 0x791   :  { %16427 = vmatprep.subr.bf16.mxu0 %v17877_v35  ;;  %v17919_v35 = vld [vmem:[%s22069_s10 + $0x410] sm:$0xff]  }
 0x792   :  { %16420 = vmatpush3.bf16.msra.mxu1 %v17876_v24  ;;  %v17922_v24 = vld [vmem:[%s22069_s10 + $0x458] sm:$0xff]  }
 0x793   :  { %14544 = vmatmul.mubr.bf16.vlgmr.msra.gmra.mrb[36].mxu0 %v11752_v56  ;;  %16449 = vmatprep.subr.bf16.mxu1 %v17879_v26  ;;  %v17924_v26 = vld [vmem:[%s22069_s10 + $0x4d8] sm:$0xff]  }
 0x794   :  { %16428 = vmatpush3.bf16.msra.mxu0 %v17878_v33  ;;  %14623 = vmatprep.mubr.bf16.mxu0 %v11757_v48  ;;  %v17923_v33 = vld [vmem:[%s22069_s10 + $0x418] sm:$0xff]   ;;  %v17928_v48 = vld [vmem:[%s22069_s10 + $0x4e0] sm:$0xff]  }
 0x795   :  { %14584 = vmatmul.mubr.bf16.vlgmr.msra.gmra.mrb[36].mxu1 %v11754_v2  ;;  %16429 = vmatprep.subr.bf16.mxu0 %v17882_v1  ;;  %v17925_v1 = vld [vmem:[%s22069_s10 + $0x498] sm:$0xff]   ;;  %v17930_v2 = vld [vmem:[%s22069_s10 + $0x468] sm:$0xff]  }
 0x796   :  { %16450 = vmatpush3.bf16.msra.mxu1 %v17880_v44  ;;  %14663 = vmatprep.mubr.bf16.mxu1 %v11759_v39  ;;  %v17927_v44 = vld [vmem:[%s22069_s10 + $0x420] sm:$0xff]  }
 0x797   :  { %16451 = vmatprep.subr.bf16.mxu1 %v17884_v51  ;;  %v17929_v51 = vld [vmem:[%s22069_s10 + $0x4a0] sm:$0xff]  }
 0x798   :  { %16430 = vmatpush3.bf16.msra.mxu0 %v17883_v58 }
 0x799   :  { %16431 = vmatprep.subr.bf16.mxu0 %v17886_v7  ;;  %v17932_v7 = vld [vmem:[%s22069_s10 + $0x4e8] sm:$0xff]  }
 0x79a   :  { %16452 = vmatpush3.bf16.msra.mxu1 %v17885_v9 }
 0x79b   :  { %16453 = vmatprep.subr.bf16.mxu1 %v17888_v60 }
 0x79c   :  { %16432 = vmatpush3.bf16.msra.mxu0 %v17887_v4  ;;  %v17931_v4 = vld [vmem:[%s22069_s10 + $0x428] sm:$0xff]  }
 0x79d   :  { %16433 = vmatprep.subr.bf16.mxu0 %v17890_v21 }
 0x79e   :  { %16454 = vmatpush3.bf16.msra.mxu1 %v17889_v59 }
 0x79f   :  { %16455 = vmatprep.subr.bf16.mxu1 %v17892_v0  ;;  %v17934_v0 = vld [vmem:[%s22069_s10 + $0x470] sm:$0xff]  }
 0x7a0   :  { %16434 = vmatpush3.bf16.msra.mxu0 %v17891_v43  ;;  %v17933_v43 = vld [vmem:[%s22069_s10 + $0x4a8] sm:$0xff]  }
 0x7a1   :  { %16435 = vmatprep.subr.bf16.mxu0 %v17894_v31 }
 0x7a2   :  { %16456 = vmatpush3.bf16.msra.mxu1 %v17893_v3 }
 0x7a3   :  { %16457 = vmatprep.subr.bf16.mxu1 %v17896_v57  ;;  %v17936_v57 = vld [vmem:[%s22069_s10 + $0x4f0] sm:$0xff]  }
 0x7a4   :  { %16436 = vmatpush3.bf16.msra.mxu0 %v17895_v28 }
 0x7a5   :  { %16437 = vmatprep.subr.bf16.mxu0 %v17898_v30  ;;  %v17938_v30 = vld [vmem:[%s22069_s10 + $0x478] sm:$0xff]  }
 0x7a6   :  { %16458 = vmatpush3.bf16.msra.mxu1 %v17897_v32 }
 0x7a7   :  { %16459 = vmatprep.subr.bf16.mxu1 %v17900_v36  ;;  %v17937_v36 = vld [vmem:[%s22069_s10 + $0x4b0] sm:$0xff]  }
 0x7a8   :  { %16438 = vmatpush3.bf16.msra.mxu0 %v17899_v49 }
 0x7a9   :  { %16439 = vmatprep.subr.bf16.mxu0 %v17902_v5 }
 0x7aa   :  { %16460 = vmatpush3.bf16.msra.mxu1 %v17901_v54 }
 0x7ab   :  { %16461 = vmatprep.subr.bf16.mxu1 %v17904_v52 }
 0x7ac   :  { %16440 = vmatpush3.bf16.msra.mxu0 %v17903_v19 }
 0x7ad   :  { %16441 = vmatprep.subr.bf16.mxu0 %v17906_v22  ;;  %v17940_v22 = vld [vmem:[%s22069_s10 + $0x4f8] sm:$0xff]  }
 0x7ae   :  { %16462 = vmatpush3.bf16.msra.mxu1 %v17905_v40 }
 0x7af   :  { %16463 = vmatprep.subr.bf16.mxu1 %v17908_v37 }
 0x7b0   :  { %16442 = vmatpush3.bf16.msra.mxu0 %v17907_v8  ;;  %v17939_v8 = vld [vmem:[%s22069_s10 + $0x438] sm:$0xff]  }
 0x7b1   :  { %16471 = vmatprep.subr.bf16.mxu0 %v17910_v6 }
 0x7b2   :  { %16464 = vmatpush3.bf16.msra.mxu1 %v17909_v14 }
 0x7b3   :  { %14624 = vmatmul.mubr.bf16.vlgmr.msra.gmra.mrb[40].mxu0 %v11756_v38  ;;  %16493 = vmatprep.subr.bf16.mxu1 %v17912_v62  ;;  %v17942_v38 = vld [vmem:[%s22069_s10 + $0x540] sm:$0xff]  }
 0x7b4   :  { %16472 = vmatpush3.bf16.msra.mxu0 %v17911_v29 }
 0x7b5   :  { %14664 = vmatmul.mubr.bf16.vlgmr.msra.gmra.mrb[40].mxu1 %v11758_v46  ;;  %16473 = vmatprep.subr.bf16.mxu0 %v17914_v55  ;;  %v17941_v46 = vld [vmem:[%s22069_s10 + $0x4b8] sm:$0xff]  }
 0x7b6   :  { %16494 = vmatpush3.bf16.msra.mxu1 %v17913_v20 }
 0x7b7   :  { %16495 = vmatprep.subr.bf16.mxu1 %v17916_v10 }
 0x7b8   :  { %16474 = vmatpush3.bf16.msra.mxu0 %v17915_v15 }
 0x7b9   :  { %16475 = vmatprep.subr.bf16.mxu0 %v17918_v34 }
 0x7ba   :  { %16496 = vmatpush3.bf16.msra.mxu1 %v17917_v47 }
 0x7bb   :  { %16497 = vmatprep.subr.bf16.mxu1 %v17920_v17 }
 0x7bc   :  { %16476 = vmatpush3.bf16.msra.mxu0 %v17919_v35 }
 0x7bd   :  { %16477 = vmatprep.subr.bf16.mxu0 %v17922_v24 }
 0x7be   :  { %v11074_v56 = vpop.permute.xlu1 %11073  ;;  %16498 = vmatpush3.bf16.msra.mxu1 %v17921_v11 }
 0x7bf   :  { %16499 = vmatprep.subr.bf16.mxu1 %v17924_v26 }
 0x7c0   :  { %16478 = vmatpush3.bf16.msra.mxu0 %v17923_v33 }
 0x7c1   :  { %16479 = vmatprep.subr.bf16.mxu0 %v17926_v27 }
 0x7c2   :  { %16500 = vmatpush3.bf16.msra.mxu1 %v17925_v1  ;;  %v11076_v39 = vpop.permute.xlu0 %11075 }
 0x7c3   :  { %v11078_v58 = vpop.permute.xlu1 %11077  ;;  %16501 = vmatprep.subr.bf16.mxu1 %v17928_v48  ;;  %v11097_v9 = vsel %vm1301_vm3, %v11074_v56, %v11076_v39 }
 0x7c4   :  { %v11098_v60 = vsel %vm1301_vm3, %v11076_v39, %v11078_v58  ;;  %16480 = vmatpush3.bf16.msra.mxu0 %v17927_v44  ;;  %v11121_v21 = vmax.f32 %v20842_v63, %v11097_v9  ;;  %v17935_v63 = vld [vmem:[%s22069_s10 + $0x430] sm:$0xff]  }
 0x7c5   :  { %v11122_v59 = vmax.f32 %v20855_v41, %v11098_v60  ;;  %16481 = vmatprep.subr.bf16.mxu0 %v17930_v2 }
 0x7c6   :  { %16502 = vmatpush3.bf16.msra.mxu1 %v17929_v51 }
 0x7c7   :  { %v11210_v31 = vcombine.low %v11121_v21, %v11122_v59  ;;  %v11247_v3 = vcombine.high %v11121_v21, %v11122_v59  ;;  %16503 = vmatprep.subr.bf16.mxu1 %v17932_v7 }
 0x7c8   :  { %16482 = vmatpush3.bf16.msra.mxu0 %v17931_v4 }
 0x7c9   :  { %v11217_v41 = vrot.slane %v11210_v31, %v20781_v23  ;;  %v11254_v28 = vrot.slane %v11247_v3, %v20781_v23  ;;  %16483 = vmatprep.subr.bf16.mxu0 %v17934_v0  ;;  %v17943_v3 = vld [vmem:[%s22069_s10 + $0x500] sm:$0xff]  }
 0x7ca   :  { %v11080_v32 = vpop.permute.xlu0 %11079  ;;  %16504 = vmatpush3.bf16.msra.mxu1 %v17933_v43 }
 0x7cb   :  { %v11224_v49 = vrot.slane %v11217_v41, %v20781_v23  ;;  %v11228_v5 = vcombine.high %v11217_v41, %v11217_v41  ;;  %v11261_v54 = vrot.slane %v11254_v28, %v20781_v23  ;;  %v11265_v52 = vcombine.high %v11254_v28, %v11254_v28  ;;  %v11082_v19 = vpop.permute.xlu1 %11081  ;;  %16505 = vmatprep.subr.bf16.mxu1 %v17936_v57 }
 0x7cc   :  { %v11099_v40 = vsel %vm1301_vm3, %v11078_v58, %v11080_v32  ;;  %v11100_v37 = vsel %vm1301_vm3, %v11080_v32, %v11082_v19  ;;  %16484 = vmatpush3.bf16.msra.mxu0 %v17935_v63  ;;  %v17950_v19 = vld [vmem:[%s22069_s10 + $0x5c8] sm:$0xff]  }
 0x7cd   :  { %11227 = vst.msk [vmem:[#allocation8 + $0x20] ss:$2 sm:$0x3] %vm20791_vm5, %v11224_v49  ;;  %v11235_v6 = vrot.slane %v11228_v5, %v20781_v23  ;;  %v11239_v14 = vcombine.high %v11224_v49, %v11224_v49  ;;  %11264 = vst.msk [vmem:[#allocation8 + $0x30] ss:$2 sm:$0x3] %vm20791_vm5, %v11261_v54  ;;  %v11272_v62 = vrot.slane %v11265_v52, %v20781_v23  ;;  %16485 = vmatprep.subr.bf16.mxu0 %v17938_v30 }
 0x7ce   :  { %v11276_v29 = vcombine.high %v11261_v54, %v11261_v54  ;;  %v11123_v55 = vmax.f32 %v20859_v12, %v11099_v40  ;;  %v11124_v20 = vmax.f32 %v20890_v25, %v11100_v37  ;;  %16506 = vmatpush3.bf16.msra.mxu1 %v17937_v36  ;;  %v17945_v25 = vld [vmem:[%s22069_s10 + $0x5c0] sm:$0xff]   ;;  %v17947_v49 = vld [vmem:[%s22069_s10 + $0x548] sm:$0xff]  }
 0x7cf   :  { %11238 = vst.msk [vmem:[#allocation8 + $0x24] ss:$2 sm:$0x3] %vm20791_vm5, %v11235_v6  ;;  %11242 = vst.msk [vmem:[#allocation8 + $0x28] ss:$2 sm:$0x3] %vm20791_vm5, %v11239_v14  ;;  %v11243_v10 = vcombine.high %v11235_v6, %v11235_v6  ;;  %v11280_v12 = vcombine.high %v11272_v62, %v11272_v62  ;;  %16507 = vmatprep.subr.bf16.mxu1 %v17940_v22 }
 0x7d0   :  { %11275 = vst.msk [vmem:[#allocation8 + $0x34] ss:$2 sm:$0x3] %vm20791_vm5, %v11272_v62  ;;  %11279 = vst.msk [vmem:[#allocation8 + $0x38] ss:$2 sm:$0x3] %vm20791_vm5, %v11276_v29  ;;  %v11401_v15 = vcombine.low %v11123_v55, %v11124_v20  ;;  %v11438_v34 = vcombine.high %v11123_v55, %v11124_v20  ;;  %16486 = vmatpush3.bf16.msra.mxu0 %v17939_v8 }
 0x7d1   :  { %11246 = vst.msk [vmem:[#allocation8 + $0x2c] ss:$2 sm:$0x3] %vm20791_vm5, %v11243_v10  ;;  %11283 = vst.msk [vmem:[#allocation8 + $0x3c] ss:$2 sm:$0x3] %vm20791_vm5, %v11280_v12  ;;  %16515 = vmatprep.subr.bf16.mxu0 %v17942_v38 }
 0x7d2   :  { %v11408_v47 = vrot.slane %v11401_v15, %v20781_v23  ;;  %v11445_v17 = vrot.slane %v11438_v34, %v20781_v23  ;;  %16508 = vmatpush3.bf16.msra.mxu1 %v17941_v46  ;;  %v17946_v36 = vld [vmem:[%s22069_s10 + $0x580] sm:$0xff]   ;;  %v17949_v40 = vld [vmem:[%s22069_s10 + $0x508] sm:$0xff]   ;;  %v17952_v6 = vld [vmem:[%s22069_s10 + $0x550] sm:$0xff]  }
 0x7d3   :  { %16537 = vmatprep.subr.bf16.mxu1 %v17945_v25  ;;  %v17954_v55 = vld [vmem:[%s22069_s10 + $0x5d0] sm:$0xff]   ;;  %v17956_v10 = vld [vmem:[%s22069_s10 + $0x558] sm:$0xff]   ;;  %v17960_v25 = vld [vmem:[%s22069_s10 + $0x560] sm:$0xff]  }
 0x7d4   :  { %v11415_v35 = vrot.slane %v11408_v47, %v20781_v23  ;;  %v11419_v24 = vcombine.high %v11408_v47, %v11408_v47  ;;  %v11452_v11 = vrot.slane %v11445_v17, %v20781_v23  ;;  %v11456_v26 = vcombine.high %v11445_v17, %v11445_v17  ;;  %v17953_v46 = vld [vmem:[%s22069_s10 + $0x510] sm:$0xff]   ;;  %v17958_v12 = vld [vmem:[%s22069_s10 + $0x5d8] sm:$0xff]   ;;  %v17962_v34 = vld [vmem:[%s22069_s10 + $0x5e0] sm:$0xff]  }
 0x7d5   :  { %v17959_v15 = vld [vmem:[%s22069_s10 + $0x598] sm:$0xff]   ;;  %v17961_v47 = vld [vmem:[%s22069_s10 + $0x520] sm:$0xff]   ;;  %v17964_v17 = vld [vmem:[%s22069_s10 + $0x568] sm:$0xff]  }
 0x7d6   :  { %11418 = vst.msk [vmem:[#allocation8 + $0x21] ss:$2 sm:$0x3] %vm20791_vm5, %v11415_v35  ;;  %v11426_v33 = vrot.slane %v11419_v24, %v20781_v23  ;;  %v11430_v27 = vcombine.high %v11415_v35, %v11415_v35  ;;  %11455 = vst.msk [vmem:[#allocation8 + $0x31] ss:$2 sm:$0x3] %vm20791_vm5, %v11452_v11  ;;  %v11463_v56 = vrot.slane %v11456_v26, %v20781_v23 }
 0x7d7   :  { %v11467_v1 = vcombine.high %v11452_v11, %v11452_v11  ;;  %v17963_v35 = vld [vmem:[%s22069_s10 + $0x5a0] sm:$0xff]   ;;  %v17966_v24 = vld [vmem:[%s22069_s10 + $0x5e8] sm:$0xff]   ;;  %v17968_v26 = vld [vmem:[%s22069_s10 + $0x570] sm:$0xff]  }
 0x7d8   :  { %11429 = vst.msk [vmem:[#allocation8 + $0x25] ss:$2 sm:$0x3] %vm20791_vm5, %v11426_v33  ;;  %11433 = vst.msk [vmem:[#allocation8 + $0x29] ss:$2 sm:$0x3] %vm20791_vm5, %v11430_v27  ;;  %v11434_v48 = vcombine.high %v11426_v33, %v11426_v33  ;;  %v11471_v44 = vcombine.high %v11463_v56, %v11463_v56 }
 0x7d9   :  { %11466 = vst.msk [vmem:[#allocation8 + $0x35] ss:$2 sm:$0x3] %vm20791_vm5, %v11463_v56  ;;  %11470 = vst.msk [vmem:[#allocation8 + $0x39] ss:$2 sm:$0x3] %vm20791_vm5, %v11467_v1 }
 0x7da   :  { %11437 = vst.msk [vmem:[#allocation8 + $0x2d] ss:$2 sm:$0x3] %vm20791_vm5, %v11434_v48  ;;  %11474 = vst.msk [vmem:[#allocation8 + $0x3d] ss:$2 sm:$0x3] %vm20791_vm5, %v11471_v44 }
 0x7db   :  { %v17965_v11 = vld [vmem:[%s22069_s10 + $0x528] sm:$0xff]   ;;  %v17970_v56 = vld [vmem:[%s22069_s10 + $0x5f0] sm:$0xff]   ;;  %v17972_v44 = vld [vmem:[%s22069_s10 + $0x578] sm:$0xff]  }
 0x7dc   :  { %v17967_v27 = vld [vmem:[%s22069_s10 + $0x5a8] sm:$0xff]   ;;  %v17969_v1 = vld [vmem:[%s22069_s10 + $0x530] sm:$0xff]  }
 0x7df   :  { %v11518_v2 = vld [vmem:[#allocation8 + $0x20] sm:$0xff] }
 0x7e0   :  { %v11609_v51 = vrot.slane %v11518_v2, %v20837_v50  ;;  %v10997_v39 = vpop.permute.xlu0 %10996  ;;  %v11602_v58 = vcombine.high %v11518_v2, %v11518_v2  ;;  %v11520_v33 = vld [vmem:[#allocation8 + $0x30] sm:$0xff]  ;;  %v17971_v2 = vld [vmem:[%s22069_s10 + $0x5b0] sm:$0xff]  }
 0x7e1   :  { %v10999_v7 = vpop.permute.xlu1 %10998  ;;  %v11519_v9 = vld [vmem:[#allocation8 + $0x28] sm:$0xff]  ;;  %v11636_v48 = vcombine.high %v11520_v33, %v11520_v33 }
 0x7e2   :  { %v11617_v60 = vcombine.high %v11609_v51, %v11609_v51  ;;  %v11014_v4 = vsel %vm547_vm2, %v10997_v39, %v10999_v7  ;;  %v11616_v21 = vrot.slane %v11602_v58, %v20837_v50  ;;  %v21380_v0 = vrot.slane %v11519_v9, %v20837_v50  ;;  %v17974_v39 = vld [vmem:[%s22069_s10 + $0x5f8] sm:$0xff]  }
 0x7e3   :  { %v21377_v59 = vmax.f32 %v20981_v53, %v11014_v4  ;;  %v11619_v43 = vcombine.high %v11519_v9, %v11519_v9  ;;  %v11760_v41 = vpack.c.bf16 %v11609_v51, %v11609_v51  ;;  %v21493_v51 = vrot.slane %v11520_v33, %v20837_v50  ;;  %v17973_v58 = vld [vmem:[%s22069_s10 + $0x538] sm:$0xff]   ;;  %v17976_v9 = vld [vmem:[%s22069_s10 + $0x640] sm:$0xff]  }
 0x7e4   :  { %v11761_v31 = vpack.c.bf16 %v11617_v60, %v11617_v60  ;;  %v11618_v57 = vcombine.high %v11616_v21, %v11616_v21  ;;  %v11001_v63 = vpop.permute.xlu0 %11000  ;;  %v11634_v28 = vcombine.high %v21380_v0, %v21380_v0  ;;  %v11762_v54 = vpack.c.bf16 %v11616_v21, %v11616_v21  ;;  %v17975_v60 = vld [vmem:[%s22069_s10 + $0x5b8] sm:$0xff]   ;;  %v17978_v21 = vld [vmem:[%s22069_s10 + $0x6c0] sm:$0xff]  }
 0x7e5   :  { %v21388_v30 = vrot.slane %v11619_v43, %v20837_v50  ;;  %v11015_v53 = vsel %vm547_vm2, %v10999_v7, %v11001_v63  ;;  %11083 = vrot.lane.b32.xlu1 %v21377_v59, %s18169_s19  ;;  %v21502_v7 = vrot.slane %v11636_v48, %v20837_v50  ;;  %v11651_v4 = vcombine.high %v21493_v51, %v21493_v51  ;;  %v17977_v43 = vld [vmem:[%s22069_s10 + $0x600] sm:$0xff]   ;;  %v18014_v48 = vld [vmem:[%s22069_s10 + $0x748] sm:$0xff]  }
 0x7e6   :  { %14703 = vmatprep.mubr.bf16.mxu0 %v11761_v31  ;;  %v11763_v32 = vpack.c.bf16 %v11618_v57, %v11618_v57  ;;  %v11765_v5 = vpack.c.bf16 %v11634_v28, %v11634_v28  ;;  %v21405_v22 = vmax.f32 %v20983_v61, %v11015_v53  ;;  %v17951_v61 = vld [vmem:[%s22069_s10 + $0x588] sm:$0xff]   ;;  %v18011_v33 = vld [vmem:[%s22069_s10 + $0x7c0] sm:$0xff]  }
 0x7e7   :  { %14704 = vmatmul.mubr.bf16.vlgmr.msra.gmra.mrb[44].mxu0 %v11760_v41  ;;  %v11635_v52 = vcombine.high %v21388_v30, %v21388_v30  ;;  %v11652_v31 = vcombine.high %v21502_v7, %v21502_v7  ;;  %v17981_v57 = vld [vmem:[%s22069_s10 + $0x648] sm:$0xff]   ;;  %v17979_v41 = vld [vmem:[%s22069_s10 + $0x680] sm:$0xff]   ;;  %v11766_v28 = vpack.c.bf16 %v21388_v30, %v21388_v30 }
 0x7e8   :  { %16516 = vmatpush3.bf16.msra.mxu0 %v17943_v3  ;;  %14743 = vmatprep.mubr.bf16.mxu1 %v11763_v32  ;;  %v11764_v3 = vpack.c.bf16 %v21380_v0, %v21380_v0  ;;  %v17983_v0 = vld [vmem:[%s22069_s10 + $0x6c8] sm:$0xff]  }
 0x7e9   :  { %14783 = vmatprep.mubr.bf16.mxu0 %v11765_v5  ;;  %14744 = vmatmul.mubr.bf16.vlgmr.msra.gmra.mrb[44].mxu1 %v11762_v54  ;;  %v11767_v37 = vpack.c.bf16 %v11635_v52, %v11635_v52  ;;  %v11003_v8 = vpop.permute.xlu1 %11002  ;;  %v11771_v53 = vpack.c.bf16 %v11652_v31, %v11652_v31  ;;  %v17982_v32 = vld [vmem:[%s22069_s10 + $0x608] sm:$0xff]   ;;  %v17986_v5 = vld [vmem:[%s22069_s10 + $0x610] sm:$0xff]   ;;  %v17989_v54 = vld [vmem:[%s22069_s10 + $0x658] sm:$0xff]  }
 0x7ea   :  { %16538 = vmatpush3.bf16.msra.mxu1 %v17946_v36  ;;  %16517 = vmatprep.subr.bf16.mxu0 %v17947_v49  ;;  %v11016_v14 = vsel %vm547_vm2, %v11001_v63, %v11003_v8  ;;  %v11005_v62 = vpop.permute.xlu0 %11004  ;;  %v11769_v63 = vpack.c.bf16 %v11651_v4, %v11651_v4  ;;  %v17985_v36 = vld [vmem:[%s22069_s10 + $0x650] sm:$0xff]   ;;  %v17984_v30 = vld [vmem:[%s22069_s10 + $0x688] sm:$0xff]  }
 0x7eb   :  { %14823 = vmatprep.mubr.bf16.mxu1 %v11767_v37  ;;  %v21418_v29 = vmax.f32 %v21007_v18, %v11016_v14  ;;  %16539 = vmatprep.subr.bf16.mxu1 %v17950_v19  ;;  %v11017_v38 = vsel %vm547_vm2, %v11003_v8, %v11005_v62  ;;  %v11047_v18 = vmax.f32 %v21025_v42, %v11005_v62  ;;  %v17957_v42 = vld [vmem:[%s22069_s10 + $0x518] sm:$0xff]   ;;  %v17987_v49 = vld [vmem:[%s22069_s10 + $0x6d0] sm:$0xff]   ;;  %v17993_v37 = vld [vmem:[%s22069_s10 + $0x660] sm:$0xff]   ;;  %vm18183_vm2 = vmmov 0  }
 0x7ec   :  { %16518 = vmatpush3.bf16.msra.mxu0 %v17949_v40  ;;  %v21425_v20 = vmax.f32 %v21030_v13, %v11017_v38  ;;  %11085 = vrot.lane.b32.xlu0 %v21405_v22, %s18169_s19  ;;  %v17955_v13 = vld [vmem:[%s22069_s10 + $0x590] sm:$0xff]   ;;  %v17991_v19 = vld [vmem:[%s22069_s10 + $0x6d8] sm:$0xff]   ;;  %v17994_v14 = vld [vmem:[%s22069_s10 + $0x620] sm:$0xff]  }
 0x7ed   :  { %16519 = vmatprep.subr.bf16.mxu0 %v17952_v6  ;;  %11087 = vrot.lane.b32.xlu1 %v21418_v29, %s18169_s19  ;;  %v17988_v52 = vld [vmem:[%s22069_s10 + $0x690] sm:$0xff]   ;;  %v17990_v40 = vld [vmem:[%s22069_s10 + $0x618] sm:$0xff]   ;;  %v17995_v6 = vld [vmem:[%s22069_s10 + $0x6e0] sm:$0xff]  }
 0x7ee   :  { %16540 = vmatpush3.bf16.msra.mxu1 %v17951_v61  ;;  %v17992_v8 = vld [vmem:[%s22069_s10 + $0x698] sm:$0xff]   ;;  %v17997_v61 = vld [vmem:[%s22069_s10 + $0x668] sm:$0xff]   ;;  %v17996_v62 = vld [vmem:[%s22069_s10 + $0x6a0] sm:$0xff]  }
 0x7ef   :  { %16541 = vmatprep.subr.bf16.mxu1 %v17954_v55  ;;  %v17999_v38 = vld [vmem:[%s22069_s10 + $0x6e8] sm:$0xff]  }
 0x7f0   :  { %16520 = vmatpush3.bf16.msra.mxu0 %v17953_v46  ;;  %11089 = vrot.lane.b32.xlu0 %v21425_v20, %s18169_s19  ;;  %v17998_v55 = vld [vmem:[%s22069_s10 + $0x628] sm:$0xff]   ;;  %v18001_v46 = vld [vmem:[%s22069_s10 + $0x670] sm:$0xff]  }
 0x7f1   :  { %16521 = vmatprep.subr.bf16.mxu0 %v17956_v10  ;;  %11091 = vrot.lane.b32.xlu1 %v11047_v18, %s18169_s19  ;;  %v11521_v18 = vld [vmem:[#allocation8 + $0x38] sm:$0xff]  ;;  %v18000_v10 = vld [vmem:[%s22069_s10 + $0x6a8] sm:$0xff]  }
 0x7f2   :  { %16542 = vmatpush3.bf16.msra.mxu1 %v17955_v13  ;;  %v18003_v13 = vld [vmem:[%s22069_s10 + $0x6f0] sm:$0xff]  }
 0x7f3   :  { %16543 = vmatprep.subr.bf16.mxu1 %v17958_v12  ;;  %v18002_v12 = vld [vmem:[%s22069_s10 + $0x630] sm:$0xff]  }
 0x7f4   :  { %16522 = vmatpush3.bf16.msra.mxu0 %v17957_v42  ;;  %v11653_v42 = vcombine.high %v11521_v18, %v11521_v18 }
 0x7f5   :  { %16523 = vmatprep.subr.bf16.mxu0 %v17960_v25  ;;  %v18005_v25 = vld [vmem:[%s22069_s10 + $0x678] sm:$0xff]  }
 0x7f6   :  { %16544 = vmatpush3.bf16.msra.mxu1 %v17959_v15  ;;  %v18004_v15 = vld [vmem:[%s22069_s10 + $0x6b0] sm:$0xff]  }
 0x7f7   :  { %16545 = vmatprep.subr.bf16.mxu1 %v17962_v34  ;;  %v21603_v34 = vrot.slane %v11521_v18, %v20837_v50  ;;  %v18036_v18 = vld [vmem:[%s22069_s10 + $0x7f0] sm:$0xff]  }
 0x7f8   :  { %16524 = vmatpush3.bf16.msra.mxu0 %v17961_v47  ;;  %v18007_v47 = vld [vmem:[%s22069_s10 + $0x6f8] sm:$0xff]  }
 0x7f9   :  { %16525 = vmatprep.subr.bf16.mxu0 %v17964_v17  ;;  %v18006_v17 = vld [vmem:[%s22069_s10 + $0x638] sm:$0xff]  }
 0x7fa   :  { %16546 = vmatpush3.bf16.msra.mxu1 %v17963_v35  ;;  %v21612_v35 = vrot.slane %v11653_v42, %v20837_v50  ;;  %v18040_v42 = vld [vmem:[%s22069_s10 + $0x7f8] sm:$0xff]  }
 0x7fb   :  { %16547 = vmatprep.subr.bf16.mxu1 %v17966_v24  ;;  %v18009_v24 = vld [vmem:[%s22069_s10 + $0x740] sm:$0xff]  }
 0x7fc   :  { %16526 = vmatpush3.bf16.msra.mxu0 %v17965_v11  ;;  %v18008_v11 = vld [vmem:[%s22069_s10 + $0x6b8] sm:$0xff]  }
 0x7fd   :  { %16527 = vmatprep.subr.bf16.mxu0 %v17968_v26  ;;  %v11668_v26 = vcombine.high %v21603_v34, %v21603_v34 }
 0x7fe   :  { %16548 = vmatpush3.bf16.msra.mxu1 %v17967_v27  ;;  %v18010_v27 = vld [vmem:[%s22069_s10 + $0x700] sm:$0xff]  }
 0x7ff   :  { %16549 = vmatprep.subr.bf16.mxu1 %v17970_v56  ;;  %v11669_v56 = vcombine.high %v21612_v35, %v21612_v35 }
 0x800   :  { %16528 = vmatpush3.bf16.msra.mxu0 %v17969_v1  ;;  %v11768_v1 = vpack.c.bf16 %v21493_v51, %v21493_v51  ;;  %v11770_v51 = vpack.c.bf16 %v21502_v7, %v21502_v7  ;;  %v18018_v7 = vld [vmem:[%s22069_s10 + $0x750] sm:$0xff]  }
 0x801   :  { %16529 = vmatprep.subr.bf16.mxu0 %v17972_v44  ;;  %v11775_v31 = vpack.c.bf16 %v11669_v56, %v11669_v56 }
 0x802   :  { %16550 = vmatpush3.bf16.msra.mxu1 %v17971_v2  ;;  %v11773_v2 = vpack.c.bf16 %v11668_v26, %v11668_v26  ;;  %v18046_v26 = vld [vmem:[%s22069_s10 + $0x848] sm:$0xff]  }
 0x803   :  { %16551 = vmatprep.subr.bf16.mxu1 %v17974_v39  ;;  %v18012_v39 = vld [vmem:[%s22069_s10 + $0x780] sm:$0xff]  }
 0x804   :  { %16530 = vmatpush3.bf16.msra.mxu0 %v17973_v58  ;;  %v15956_v58 = vld [vmem:[%s22070_s11] ss:$0 sm:$0xff] }
 0x805   :  { %16559 = vmatprep.subr.bf16.mxu0 %v17976_v9 }
 0x806   :  { %16552 = vmatpush3.bf16.msra.mxu1 %v17975_v60  ;;  %v18016_v60 = vld [vmem:[%s22069_s10 + $0x7c8] sm:$0xff]  }
 0x807   :  { %14784 = vmatmul.mubr.bf16.vlgmr.msra.gmra.mrb[48].mxu0 %v11764_v3  ;;  %16581 = vmatprep.subr.bf16.mxu1 %v17978_v21  ;;  %v18015_v3 = vld [vmem:[%s22069_s10 + $0x708] sm:$0xff]  }
 0x808   :  { %16560 = vmatpush3.bf16.msra.mxu0 %v17977_v43  ;;  %14863 = vmatprep.mubr.bf16.mxu0 %v11769_v63 }
 0x809   :  { %14824 = vmatmul.mubr.bf16.vlgmr.msra.gmra.mrb[48].mxu1 %v11766_v28  ;;  %16561 = vmatprep.subr.bf16.mxu0 %v17981_v57 }
 0x80a   :  { %16582 = vmatpush3.bf16.msra.mxu1 %v17979_v41  ;;  %14903 = vmatprep.mubr.bf16.mxu1 %v11771_v53  ;;  %v18017_v53 = vld [vmem:[%s22069_s10 + $0x788] sm:$0xff]  }
 0x80b   :  { %16583 = vmatprep.subr.bf16.mxu1 %v17983_v0 }
 0x80c   :  { %16562 = vmatpush3.bf16.msra.mxu0 %v17982_v32 }
 0x80d   :  { %16563 = vmatprep.subr.bf16.mxu0 %v17985_v36  ;;  %v18020_v36 = vld [vmem:[%s22069_s10 + $0x7d0] sm:$0xff]  }
 0x80e   :  { %16584 = vmatpush3.bf16.msra.mxu1 %v17984_v30 }
 0x80f   :  { %16585 = vmatprep.subr.bf16.mxu1 %v17987_v49  ;;  %v18019_v49 = vld [vmem:[%s22069_s10 + $0x710] sm:$0xff]  }
 0x810   :  { %16564 = vmatpush3.bf16.msra.mxu0 %v17986_v5  ;;  %v18022_v5 = vld [vmem:[%s22069_s10 + $0x758] sm:$0xff]  }
 0x811   :  { %16565 = vmatprep.subr.bf16.mxu0 %v17989_v54  ;;  %v18021_v54 = vld [vmem:[%s22069_s10 + $0x790] sm:$0xff]  }
 0x812   :  { %16586 = vmatpush3.bf16.msra.mxu1 %v17988_v52  ;;  %v18024_v52 = vld [vmem:[%s22069_s10 + $0x7d8] sm:$0xff]  }
 0x813   :  { %16587 = vmatprep.subr.bf16.mxu1 %v17991_v19  ;;  %v18023_v19 = vld [vmem:[%s22069_s10 + $0x718] sm:$0xff]  }
 0x814   :  { %16566 = vmatpush3.bf16.msra.mxu0 %v17990_v40  ;;  %v18026_v40 = vld [vmem:[%s22069_s10 + $0x760] sm:$0xff]  }
 0x815   :  { %16567 = vmatprep.subr.bf16.mxu0 %v17993_v37  ;;  %v18025_v37 = vld [vmem:[%s22069_s10 + $0x798] sm:$0xff]  }
 0x816   :  { %16588 = vmatpush3.bf16.msra.mxu1 %v17992_v8  ;;  %v18028_v8 = vld [vmem:[%s22069_s10 + $0x7e0] sm:$0xff]  }
 0x817   :  { %16589 = vmatprep.subr.bf16.mxu1 %v17995_v6  ;;  %v18027_v6 = vld [vmem:[%s22069_s10 + $0x720] sm:$0xff]  }
 0x818   :  { %16568 = vmatpush3.bf16.msra.mxu0 %v17994_v14  ;;  %v18030_v14 = vld [vmem:[%s22069_s10 + $0x768] sm:$0xff]  }
 0x819   :  { %16569 = vmatprep.subr.bf16.mxu0 %v17997_v61  ;;  %v18029_v61 = vld [vmem:[%s22069_s10 + $0x7a0] sm:$0xff]  }
 0x81a   :  { %16590 = vmatpush3.bf16.msra.mxu1 %v17996_v62  ;;  %v18032_v62 = vld [vmem:[%s22069_s10 + $0x7e8] sm:$0xff]  }
 0x81b   :  { %16591 = vmatprep.subr.bf16.mxu1 %v17999_v38  ;;  %v18031_v38 = vld [vmem:[%s22069_s10 + $0x728] sm:$0xff]  }
 0x81c   :  { %16570 = vmatpush3.bf16.msra.mxu0 %v17998_v55  ;;  %v18034_v55 = vld [vmem:[%s22069_s10 + $0x770] sm:$0xff]  }
 0x81d   :  { %16571 = vmatprep.subr.bf16.mxu0 %v18001_v46  ;;  %v18033_v46 = vld [vmem:[%s22069_s10 + $0x7a8] sm:$0xff]  }
 0x81e   :  { %16592 = vmatpush3.bf16.msra.mxu1 %v18000_v10  ;;  %v18035_v10 = vld [vmem:[%s22069_s10 + $0x730] sm:$0xff]  }
 0x81f   :  { %16593 = vmatprep.subr.bf16.mxu1 %v18003_v13  ;;  %v18038_v13 = vld [vmem:[%s22069_s10 + $0x778] sm:$0xff]  }
 0x820   :  { %16572 = vmatpush3.bf16.msra.mxu0 %v18002_v12  ;;  %v18037_v12 = vld [vmem:[%s22069_s10 + $0x7b0] sm:$0xff]  }
 0x821   :  { %16573 = vmatprep.subr.bf16.mxu0 %v18005_v25  ;;  %v18039_v25 = vld [vmem:[%s22069_s10 + $0x738] sm:$0xff]  }
 0x822   :  { %16594 = vmatpush3.bf16.msra.mxu1 %v18004_v15  ;;  %v18042_v15 = vld [vmem:[%s22069_s10 + $0x840] sm:$0xff]  }
 0x823   :  { %16595 = vmatprep.subr.bf16.mxu1 %v18007_v47  ;;  %v18041_v47 = vld [vmem:[%s22069_s10 + $0x7b8] sm:$0xff]  }
 0x824   :  { %16574 = vmatpush3.bf16.msra.mxu0 %v18006_v17  ;;  %v18044_v17 = vld [vmem:[%s22069_s10 + $0x8c0] sm:$0xff]  }
 0x825   :  { %16603 = vmatprep.subr.bf16.mxu0 %v18009_v24  ;;  %v18043_v24 = vld [vmem:[%s22069_s10 + $0x800] sm:$0xff]  }
 0x826   :  { %v16311_v44 = vpop.f32.mrb[28].mxu0  ;;  %16596 = vmatpush3.bf16.msra.mxu1 %v18008_v11  ;;  %v11772_v11 = vpack.c.bf16 %v21603_v34, %v21603_v34  ;;  %v18048_v34 = vld [vmem:[%s22069_s10 + $0x8c8] sm:$0xff]  }
 0x827   :  { %v16312_v9 = vpop.f32.mrb[29].mxu0  ;;  %14864 = vmatmul.mubr.bf16.vlgmr.msra.gmra.mrb[52].mxu0 %v11768_v1  ;;  %16625 = vmatprep.subr.bf16.mxu1 %v18011_v33  ;;  %v11774_v1 = vpack.c.bf16 %v21612_v35, %v21612_v35  ;;  %v18050_v35 = vld [vmem:[%s22069_s10 + $0x850] sm:$0xff]  }
 0x828   :  { %v16313_v4 = vadd.f32 %v16312_v9, %v16311_v44  ;;  %v16314_v21 = vpop.f32.mrb[30].mxu0  ;;  %v16333_v43 = vpop.f32.mrb[28].mxu1  ;;  %16604 = vmatpush3.bf16.msra.mxu0 %v18010_v27  ;;  %14943 = vmatprep.mubr.bf16.mxu0 %v11773_v2  ;;  %v18045_v27 = vld [vmem:[%s22069_s10 + $0x880] sm:$0xff]  }
 0x829   :  { %v16315_v57 = vpop.f32.mrb[31].mxu0  ;;  %v16334_v63 = vpop.f32.mrb[29].mxu1  ;;  %14904 = vmatmul.mubr.bf16.vlgmr.msra.gmra.mrb[52].mxu1 %v11770_v51  ;;  %16605 = vmatprep.subr.bf16.mxu0 %v18014_v48  ;;  %v18049_v21 = vld [vmem:[%s22069_s10 + $0x888] sm:$0xff]  }
 0x82a   :  { %v14386_v41 = vadd.f32 %v16313_v4, %v15956_v58  ;;  %v16335_v28 = vadd.f32 %v16334_v63, %v16333_v43  ;;  %v16336_v0 = vpop.f32.mrb[30].mxu1  ;;  %16626 = vmatpush3.bf16.msra.mxu1 %v18012_v39  ;;  %14983 = vmatprep.mubr.bf16.mxu1 %v11775_v31  ;;  %v18047_v39 = vld [vmem:[%s22069_s10 + $0x808] sm:$0xff]   ;;  %v18052_v31 = vld [vmem:[%s22069_s10 + $0x8d0] sm:$0xff]   ;;  %v18054_v63 = vld [vmem:[%s22069_s10 + $0x858] sm:$0xff]  }
 0x82b   :  { %v16337_v32 = vpop.f32.mrb[31].mxu1  ;;  %16627 = vmatprep.subr.bf16.mxu1 %v18016_v60  ;;  %v18051_v57 = vld [vmem:[%s22069_s10 + $0x810] sm:$0xff]   ;;  %v18058_v0 = vld [vmem:[%s22069_s10 + $0x860] sm:$0xff]  }
 0x82c   :  { %v21658_v30 = vadd.f32 %v16335_v28, %v14386_v41  ;;  %16606 = vmatpush3.bf16.msra.mxu0 %v18015_v3  ;;  %v18056_v41 = vld [vmem:[%s22069_s10 + $0x8d8] sm:$0xff]   ;;  %v18060_v32 = vld [vmem:[%s22069_s10 + $0x8e0] sm:$0xff]  }
 0x82d   :  { %16607 = vmatprep.subr.bf16.mxu0 %v18018_v7  ;;  %v18053_v7 = vld [vmem:[%s22069_s10 + $0x890] sm:$0xff]   ;;  %v18055_v28 = vld [vmem:[%s22069_s10 + $0x818] sm:$0xff]  }
 0x82e   :  { %16628 = vmatpush3.bf16.msra.mxu1 %v18017_v53  ;;  %v18057_v53 = vld [vmem:[%s22069_s10 + $0x898] sm:$0xff]  }
 0x82f   :  { %16629 = vmatprep.subr.bf16.mxu1 %v18020_v36  ;;  %v18059_v36 = vld [vmem:[%s22069_s10 + $0x820] sm:$0xff]  }
 0x830   :  { %16608 = vmatpush3.bf16.msra.mxu0 %v18019_v49  ;;  %v18061_v49 = vld [vmem:[%s22069_s10 + $0x8a0] sm:$0xff]  }
 0x831   :  { %16609 = vmatprep.subr.bf16.mxu0 %v18022_v5  ;;  %v18064_v5 = vld [vmem:[%s22069_s10 + $0x8e8] sm:$0xff]  }
 0x832   :  { %16630 = vmatpush3.bf16.msra.mxu1 %v18021_v54  ;;  %v18063_v54 = vld [vmem:[%s22069_s10 + $0x828] sm:$0xff]  }
 0x833   :  { %16631 = vmatprep.subr.bf16.mxu1 %v18024_v52 }
 0x834   :  { %16610 = vmatpush3.bf16.msra.mxu0 %v18023_v19  ;;  %v18066_v19 = vld [vmem:[%s22069_s10 + $0x870] sm:$0xff]  }
 0x835   :  { %16611 = vmatprep.subr.bf16.mxu0 %v18026_v40  ;;  %v18065_v40 = vld [vmem:[%s22069_s10 + $0x8a8] sm:$0xff]  }
 0x836   :  { %16632 = vmatpush3.bf16.msra.mxu1 %v18025_v37  ;;  %v18068_v37 = vld [vmem:[%s22069_s10 + $0x8f0] sm:$0xff]  }
 0x837   :  { %16633 = vmatprep.subr.bf16.mxu1 %v18028_v8  ;;  %v18067_v8 = vld [vmem:[%s22069_s10 + $0x830] sm:$0xff]  }
 0x838   :  { %16612 = vmatpush3.bf16.msra.mxu0 %v18027_v6  ;;  %v18070_v6 = vld [vmem:[%s22069_s10 + $0x878] sm:$0xff]  }
 0x839   :  { %16613 = vmatprep.subr.bf16.mxu0 %v18030_v14 }
 0x83a   :  { %16634 = vmatpush3.bf16.msra.mxu1 %v18029_v61  ;;  %v18069_v61 = vld [vmem:[%s22069_s10 + $0x8b0] sm:$0xff]  }
 0x83b   :  { %16635 = vmatprep.subr.bf16.mxu1 %v18032_v62 }
 0x83c   :  { %16614 = vmatpush3.bf16.msra.mxu0 %v18031_v38 }
 0x83d   :  { %16615 = vmatprep.subr.bf16.mxu0 %v18034_v55  ;;  %v18072_v55 = vld [vmem:[%s22069_s10 + $0x8f8] sm:$0xff]  }
 0x83e   :  { %16636 = vmatpush3.bf16.msra.mxu1 %v18033_v46 }
 0x83f   :  { %16637 = vmatprep.subr.bf16.mxu1 %v18036_v18 }
 0x840   :  { %16616 = vmatpush3.bf16.msra.mxu0 %v18035_v10  ;;  %v18071_v10 = vld [vmem:[%s22069_s10 + $0x838] sm:$0xff]  }
 0x841   :  { %16617 = vmatprep.subr.bf16.mxu0 %v18038_v13 }
 0x842   :  { %16638 = vmatpush3.bf16.msra.mxu1 %v18037_v12  ;;  %v18074_v12 = vld [vmem:[%s22069_s10 + $0x940] sm:$0xff]  }
 0x843   :  { %16639 = vmatprep.subr.bf16.mxu1 %v18040_v42 }
 0x844   :  { %16618 = vmatpush3.bf16.msra.mxu0 %v18039_v25 }
 0x845   :  { %16647 = vmatprep.subr.bf16.mxu0 %v18042_v15 }
 0x846   :  { %v16355_v33 = vpop.f32.mrb[32].mxu0  ;;  %16640 = vmatpush3.bf16.msra.mxu1 %v18041_v47 }
 0x847   :  { %v16356_v56 = vpop.f32.mrb[33].mxu0  ;;  %14944 = vmatmul.mubr.bf16.vlgmr.msra.gmra.mrb[56].mxu0 %v11772_v11  ;;  %16669 = vmatprep.subr.bf16.mxu1 %v18044_v17 }
 0x848   :  { %v16357_v48 = vadd.f32 %v16356_v56, %v16355_v33  ;;  %v16358_v44 = vpop.f32.mrb[34].mxu0  ;;  %v16377_v2 = vpop.f32.mrb[32].mxu1  ;;  %16648 = vmatpush3.bf16.msra.mxu0 %v18043_v24 }
 0x849   :  { %v16359_v58 = vpop.f32.mrb[35].mxu0  ;;  %v16378_v9 = vpop.f32.mrb[33].mxu1  ;;  %14984 = vmatmul.mubr.bf16.vlgmr.msra.gmra.mrb[56].mxu1 %v11774_v1  ;;  %16649 = vmatprep.subr.bf16.mxu0 %v18046_v26 }
 0x84a   :  { %v14466_v51 = vadd.f32 %v16357_v48, %v21658_v30  ;;  %v16379_v60 = vadd.f32 %v16378_v9, %v16377_v2  ;;  %v16380_v4 = vpop.f32.mrb[34].mxu1  ;;  %16670 = vmatpush3.bf16.msra.mxu1 %v18045_v27  ;;  %v18062_v30 = vld [vmem:[%s22069_s10 + $0x868] sm:$0xff]  }
 0x84b   :  { %v16381_v43 = vpop.f32.mrb[35].mxu1  ;;  %16671 = vmatprep.subr.bf16.mxu1 %v18048_v34 }
 0x84c   :  { %v21761_v3 = vadd.f32 %v16379_v60, %v14466_v51  ;;  %16650 = vmatpush3.bf16.msra.mxu0 %v18047_v39 }
 0x84d   :  { %16651 = vmatprep.subr.bf16.mxu0 %v18050_v35 }
 0x84e   :  { %16672 = vmatpush3.bf16.msra.mxu1 %v18049_v21 }
 0x84f   :  { %16673 = vmatprep.subr.bf16.mxu1 %v18052_v31 }
 0x850   :  { %16652 = vmatpush3.bf16.msra.mxu0 %v18051_v57 }
 0x851   :  { %16653 = vmatprep.subr.bf16.mxu0 %v18054_v63 }
 0x852   :  { %16674 = vmatpush3.bf16.msra.mxu1 %v18053_v7 }
 0x853   :  { %16675 = vmatprep.subr.bf16.mxu1 %v18056_v41 }
 0x854   :  { %16654 = vmatpush3.bf16.msra.mxu0 %v18055_v28 }
 0x855   :  { %16655 = vmatprep.subr.bf16.mxu0 %v18058_v0 }
 0x856   :  { %16676 = vmatpush3.bf16.msra.mxu1 %v18057_v53 }
 0x857   :  { %16677 = vmatprep.subr.bf16.mxu1 %v18060_v32  ;;  %v11084_v52 = vpop.permute.xlu1 %11083 }
 0x858   :  { %16656 = vmatpush3.bf16.msra.mxu0 %v18059_v36 }
 0x859   :  { %16657 = vmatprep.subr.bf16.mxu0 %v18062_v30 }
 0x85a   :  { %16678 = vmatpush3.bf16.msra.mxu1 %v18061_v49 }
 0x85b   :  { %16679 = vmatprep.subr.bf16.mxu1 %v18064_v5  ;;  %v18075_v5 = vld [vmem:[%s22069_s10 + $0x900] sm:$0xff]  }
 0x85c   :  { %16658 = vmatpush3.bf16.msra.mxu0 %v18063_v54 }
 0x85d   :  { %16659 = vmatprep.subr.bf16.mxu0 %v18066_v19 }
 0x85e   :  { %v11086_v14 = vpop.permute.xlu0 %11085  ;;  %16680 = vmatpush3.bf16.msra.mxu1 %v18065_v40 }
 0x85f   :  { %v11101_v62 = vsel %vm1301_vm3, %v11084_v52, %v11086_v14  ;;  %v11088_v38 = vpop.permute.xlu1 %11087  ;;  %16681 = vmatprep.subr.bf16.mxu1 %v18068_v37 }
 0x860   :  { %v11125_v46 = vmax.f32 %v21377_v59, %v11101_v62  ;;  %v11102_v18 = vsel %vm1301_vm3, %v11086_v14, %v11088_v38  ;;  %16660 = vmatpush3.bf16.msra.mxu0 %v18067_v8  ;;  %v18073_v59 = vld [vmem:[%s22069_s10 + $0x8b8] sm:$0xff]   ;;  %v18078_v8 = vld [vmem:[%s22069_s10 + $0x980] sm:$0xff]   ;;  %v18081_v62 = vld [vmem:[%s22069_s10 + $0x908] sm:$0xff]  }
 0x861   :  { %v11126_v13 = vmax.f32 %v21405_v22, %v11102_v18  ;;  %16661 = vmatprep.subr.bf16.mxu0 %v18070_v6  ;;  %v18077_v22 = vld [vmem:[%s22069_s10 + $0x9c0] sm:$0xff]   ;;  %v18079_v6 = vld [vmem:[%s22069_s10 + $0x948] sm:$0xff]   ;;  %v18086_v18 = vld [vmem:[%s22069_s10 + $0x9d0] sm:$0xff]  }
 0x862   :  { %v11090_v42 = vpop.permute.xlu0 %11089  ;;  %16682 = vmatpush3.bf16.msra.mxu1 %v18069_v61 }
 0x863   :  { %v11286_v25 = vcombine.low %v11125_v46, %v11126_v13  ;;  %v11103_v15 = vsel %vm1301_vm3, %v11088_v38, %v11090_v42  ;;  %v11092_v47 = vpop.permute.xlu1 %11091  ;;  %16683 = vmatprep.subr.bf16.mxu1 %v18072_v55  ;;  %v18084_v55 = vld [vmem:[%s22069_s10 + $0x950] sm:$0xff]   ;;  %v18083_v46 = vld [vmem:[%s22069_s10 + $0x988] sm:$0xff]   ;;  %v18088_v13 = vld [vmem:[%s22069_s10 + $0x958] sm:$0xff]  }
 0x864   :  { %v11127_v17 = vmax.f32 %v21418_v29, %v11103_v15  ;;  %v11104_v24 = vsel %vm1301_vm3, %v11090_v42, %v11092_v47  ;;  %16662 = vmatpush3.bf16.msra.mxu0 %v18071_v10  ;;  %v18085_v10 = vld [vmem:[%s22069_s10 + $0x910] sm:$0xff]   ;;  %v18089_v15 = vld [vmem:[%s22069_s10 + $0x918] sm:$0xff]   ;;  %vm15377_vm3 = vcmask 9216  }
 0x865   :  { %v11293_v11 = vrot.slane %v11286_v25, %v20781_v23  ;;  %v11128_v26 = vmax.f32 %v21425_v20, %v11104_v24  ;;  %16691 = vmatprep.subr.bf16.mxu0 %v18074_v12  ;;  %v18087_v12 = vld [vmem:[%s22069_s10 + $0x990] sm:$0xff]   ;;  %v18092_v24 = vld [vmem:[%s22069_s10 + $0x960] sm:$0xff]  }
 0x866   :  { %v16399_v33 = vpop.f32.mrb[36].mxu0  ;;  %16684 = vmatpush3.bf16.msra.mxu1 %v18073_v59  ;;  %v18090_v59 = vld [vmem:[%s22069_s10 + $0x9d8] sm:$0xff]  }
 0x867   :  { %v11300_v27 = vrot.slane %v11293_v11, %v20781_v23  ;;  %v11304_v56 = vcombine.high %v11293_v11, %v11293_v11  ;;  %v16400_v1 = vpop.f32.mrb[37].mxu0  ;;  %v11477_v34 = vcombine.low %v11127_v17, %v11128_v26  ;;  %16713 = vmatprep.subr.bf16.mxu1 %v18077_v22 }
 0x868   :  { %v16401_v48 = vadd.f32 %v16400_v1, %v16399_v33  ;;  %v16402_v44 = vpop.f32.mrb[38].mxu0  ;;  %v16421_v2 = vpop.f32.mrb[36].mxu1  ;;  %v18091_v33 = vld [vmem:[%s22069_s10 + $0x998] sm:$0xff]  }
 0x869   :  { %11303 = vst.msk [vmem:[#allocation8 + $0x40] ss:$2 sm:$0x3] %vm20791_vm5, %v11300_v27  ;;  %v11311_v29 = vrot.slane %v11304_v56, %v20781_v23  ;;  %v11315_v39 = vcombine.high %v11300_v27, %v11300_v27  ;;  %v11484_v20 = vrot.slane %v11477_v34, %v20781_v23  ;;  %v16403_v58 = vpop.f32.mrb[39].mxu0  ;;  %v16422_v9 = vpop.f32.mrb[37].mxu1  ;;  %v18094_v34 = vld [vmem:[%s22069_s10 + $0x9e0] sm:$0xff]  }
 0x86a   :  { %v14546_v35 = vadd.f32 %v16401_v48, %v21761_v3  ;;  %v16423_v51 = vadd.f32 %v16422_v9, %v16421_v2  ;;  %v16424_v60 = vpop.f32.mrb[38].mxu1  ;;  %v18093_v44 = vld [vmem:[%s22069_s10 + $0x920] sm:$0xff]   ;;  %v18097_v58 = vld [vmem:[%s22069_s10 + $0x928] sm:$0xff]   ;;  %v18100_v9 = vld [vmem:[%s22069_s10 + $0x970] sm:$0xff]  }
 0x86b   :  { %11314 = vst.msk [vmem:[#allocation8 + $0x44] ss:$2 sm:$0x3] %vm20791_vm5, %v11311_v29  ;;  %11318 = vst.msk [vmem:[#allocation8 + $0x48] ss:$2 sm:$0x3] %vm20791_vm5, %v11315_v39  ;;  %v11319_v4 = vcombine.high %v11311_v29, %v11311_v29  ;;  %v11491_v21 = vrot.slane %v11484_v20, %v20781_v23  ;;  %v11495_v43 = vcombine.high %v11484_v20, %v11484_v20 }
 0x86c   :  { %v16425_v31 = vpop.f32.mrb[39].mxu1  ;;  %v21855_v57 = vadd.f32 %v16423_v51, %v14546_v35  ;;  %v18096_v29 = vld [vmem:[%s22069_s10 + $0x968] sm:$0xff]   ;;  %v18095_v39 = vld [vmem:[%s22069_s10 + $0x9a0] sm:$0xff]   ;;  %v18102_v51 = vld [vmem:[%s22069_s10 + $0x9f0] sm:$0xff]  }
 0x86d   :  { %11322 = vst.msk [vmem:[#allocation8 + $0x4c] ss:$2 sm:$0x3] %vm20791_vm5, %v11319_v4  ;;  %11494 = vst.msk [vmem:[#allocation8 + $0x41] ss:$2 sm:$0x3] %vm20791_vm5, %v11491_v21  ;;  %v11502_v3 = vrot.slane %v11495_v43, %v20781_v23  ;;  %v11506_v63 = vcombine.high %v11491_v21, %v11491_v21 }
 0x86e   :  { %v18098_v20 = vld [vmem:[%s22069_s10 + $0x9e8] sm:$0xff]   ;;  %v18101_v60 = vld [vmem:[%s22069_s10 + $0x930] sm:$0xff]   ;;  %v18104_v4 = vld [vmem:[%s22069_s10 + $0x978] sm:$0xff]  }
 0x86f   :  { %11505 = vst.msk [vmem:[#allocation8 + $0x45] ss:$2 sm:$0x3] %vm20791_vm5, %v11502_v3  ;;  %11509 = vst.msk [vmem:[#allocation8 + $0x49] ss:$2 sm:$0x3] %vm20791_vm5, %v11506_v63  ;;  %v11510_v7 = vcombine.high %v11502_v3, %v11502_v3 }
 0x870   :  { %v18099_v35 = vld [vmem:[%s22069_s10 + $0x9a8] sm:$0xff]   ;;  %v18103_v21 = vld [vmem:[%s22069_s10 + $0x9b0] sm:$0xff]   ;;  %v18106_v43 = vld [vmem:[%s22069_s10 + $0x9f8] sm:$0xff]  }
 0x871   :  { %11513 = vst.msk [vmem:[#allocation8 + $0x4d] ss:$2 sm:$0x3] %vm20791_vm5, %v11510_v7  ;;  %v18105_v31 = vld [vmem:[%s22069_s10 + $0x938] sm:$0xff]  }
 0x876   :  { %v11522_v41 = vld [vmem:[#allocation8 + $0x40] sm:$0xff] }
 0x877   :  { %v11677_v28 = vrot.slane %v11522_v41, %v20837_v50  ;;  %v11670_v0 = vcombine.high %v11522_v41, %v11522_v41 }
 0x878   :  { %v11523_v53 = vld [vmem:[#allocation8 + $0x48] sm:$0xff] }
 0x879   :  { %v11685_v32 = vcombine.high %v11677_v28, %v11677_v28  ;;  %v11684_v36 = vrot.slane %v11670_v0, %v20837_v50  ;;  %v21871_v23 = vrot.slane %v11523_v53, %v20837_v50  ;;  %v11687_v30 = vcombine.high %v11523_v53, %v11523_v53 }
 0x87a   :  { %v11776_v52 = vpack.c.bf16 %v11677_v28, %v11677_v28 }
 0x87b   :  { %v11777_v49 = vpack.c.bf16 %v11685_v32, %v11685_v32  ;;  %v11686_v54 = vcombine.high %v11684_v36, %v11684_v36  ;;  %v11702_v45 = vcombine.high %v21871_v23, %v21871_v23  ;;  %v21879_v19 = vrot.slane %v11687_v30, %v20837_v50  ;;  %v18082_v50 = vld [vmem:[%s22069_s10 + $0x9c8] sm:$0xff]  }
 0x87c   :  { %v11778_v14 = vpack.c.bf16 %v11684_v36, %v11684_v36  ;;  %v11780_v3 = vpack.c.bf16 %v21871_v23, %v21871_v23 }
 0x87d   :  { %15023 = vmatprep.mubr.bf16.mxu0 %v11777_v49  ;;  %v11779_v40 = vpack.c.bf16 %v11686_v54, %v11686_v54  ;;  %v11781_v37 = vpack.c.bf16 %v11702_v45, %v11702_v45  ;;  %v11703_v61 = vcombine.high %v21879_v19, %v21879_v19  ;;  %v11782_v63 = vpack.c.bf16 %v21879_v19, %v21879_v19  ;;  %v18108_v45 = vld [vmem:[%s22071_s12] sm:$0xff]  }
 0x87e   :  { %15024 = vmatmul.mubr.bf16.vlgmr.msra.gmra.mrb[60].mxu0 %v11776_v52  ;;  %v18109_v52 = vld [vmem:[%s22071_s12 + $0x8] sm:$0xff]  }
 0x87f   :  { %16692 = vmatpush3.bf16.msra.mxu0 %v18075_v5  ;;  %15063 = vmatprep.mubr.bf16.mxu1 %v11779_v40  ;;  %v11783_v38 = vpack.c.bf16 %v11703_v61, %v11703_v61 }
 0x880   :  { %15103 = vmatprep.mubr.bf16.mxu0 %v11781_v37  ;;  %15064 = vmatmul.mubr.bf16.vlgmr.msra.gmra.mrb[60].mxu1 %v11778_v14 }
 0x881   :  { %16714 = vmatpush3.bf16.msra.mxu1 %v18078_v8  ;;  %16693 = vmatprep.subr.bf16.mxu0 %v18079_v6 }
 0x882   :  { %15143 = vmatprep.mubr.bf16.mxu1 %v11783_v38  ;;  %16715 = vmatprep.subr.bf16.mxu1 %v18082_v50  ;;  %v18110_v50 = vld [vmem:[%s22071_s12 + $0x10] sm:$0xff]  }
 0x883   :  { %16694 = vmatpush3.bf16.msra.mxu0 %v18081_v62 }
 0x884   :  { %16695 = vmatprep.subr.bf16.mxu0 %v18084_v55 }
 0x885   :  { %16716 = vmatpush3.bf16.msra.mxu1 %v18083_v46 }
 0x886   :  { %v16443_v42 = vpop.f32.mrb[40].mxu0  ;;  %16717 = vmatprep.subr.bf16.mxu1 %v18086_v18 }
 0x887   :  { %v16444_v25 = vpop.f32.mrb[41].mxu0  ;;  %16696 = vmatpush3.bf16.msra.mxu0 %v18085_v10  ;;  %v18111_v10 = vld [vmem:[%s22071_s12 + $0x18] sm:$0xff]  }
 0x888   :  { %v16445_v47 = vadd.f32 %v16444_v25, %v16443_v42  ;;  %v16446_v22 = vpop.f32.mrb[42].mxu0  ;;  %v16465_v17 = vpop.f32.mrb[40].mxu1  ;;  %16697 = vmatprep.subr.bf16.mxu0 %v18088_v13  ;;  %v18112_v13 = vld [vmem:[%s22071_s12 + $0x20] sm:$0xff]   ;;  %v18114_v25 = vld [vmem:[%s22071_s12 + $0x30] sm:$0xff]  }
 0x889   :  { %v16447_v11 = vpop.f32.mrb[43].mxu0  ;;  %v16466_v26 = vpop.f32.mrb[41].mxu1  ;;  %16718 = vmatpush3.bf16.msra.mxu1 %v18087_v12  ;;  %v18113_v12 = vld [vmem:[%s22071_s12 + $0x28] sm:$0xff]  }
 0x88a   :  { %v14626_v27 = vadd.f32 %v16445_v47, %v21855_v57  ;;  %v16467_v56 = vadd.f32 %v16466_v26, %v16465_v17  ;;  %v16468_v1 = vpop.f32.mrb[42].mxu1  ;;  %16719 = vmatprep.subr.bf16.mxu1 %v18090_v59  ;;  %v18107_v57 = vld [vmem:[%s22069_s10 + $0x9b8] sm:$0xff]   ;;  %v18116_v26 = vld [vmem:[%s22073_s14] sm:$0xff]  }
 0x88b   :  { %v16469_v48 = vpop.f32.mrb[43].mxu1  ;;  %16698 = vmatpush3.bf16.msra.mxu0 %v18089_v15  ;;  %v18115_v11 = vld [vmem:[%s22071_s12 + $0x38] sm:$0xff]  }
 0x88c   :  { %v14666_v2 = vadd.f32 %v16467_v56, %v14626_v27  ;;  %16699 = vmatprep.subr.bf16.mxu0 %v18092_v24 }
 0x88d   :  { %16720 = vmatpush3.bf16.msra.mxu1 %v18091_v33 }
 0x88e   :  { %16721 = vmatprep.subr.bf16.mxu1 %v18094_v34  ;;  %v18117_v34 = vld [vmem:[%s22073_s14 + $0x8] sm:$0xff]  }
 0x88f   :  { %16700 = vmatpush3.bf16.msra.mxu0 %v18093_v44  ;;  %v18118_v44 = vld [vmem:[%s22073_s14 + $0x10] sm:$0xff]  }
 0x890   :  { %16701 = vmatprep.subr.bf16.mxu0 %v18096_v29  ;;  %v18120_v29 = vld [vmem:[%s22073_s14 + $0x20] sm:$0xff]  }
 0x891   :  { %16722 = vmatpush3.bf16.msra.mxu1 %v18095_v39  ;;  %v18121_v39 = vld [vmem:[%s22073_s14 + $0x28] sm:$0xff]  }
 0x892   :  { %16723 = vmatprep.subr.bf16.mxu1 %v18098_v20 }
 0x893   :  { %16702 = vmatpush3.bf16.msra.mxu0 %v18097_v58 }
 0x894   :  { %16703 = vmatprep.subr.bf16.mxu0 %v18100_v9 }
 0x895   :  { %16724 = vmatpush3.bf16.msra.mxu1 %v18099_v35 }
 0x896   :  { %16725 = vmatprep.subr.bf16.mxu1 %v18102_v51 }
 0x897   :  { %16704 = vmatpush3.bf16.msra.mxu0 %v18101_v60 }
 0x898   :  { %16705 = vmatprep.subr.bf16.mxu0 %v18104_v4 }
 0x899   :  { %16726 = vmatpush3.bf16.msra.mxu1 %v18103_v21 }
 0x89a   :  { %16727 = vmatprep.subr.bf16.mxu1 %v18106_v43 }
 0x89b   :  { %16706 = vmatpush3.bf16.msra.mxu0 %v18105_v31 }
 0x89c   :  { %16753 = vmatprep.subr.bf16.mxu0 %v20235_v16 }
 0x89d   :  { %16728 = vmatpush3.bf16.msra.mxu1 %v18107_v57 }
 0x89e   :  { %15104 = vmatmul.mubr.bf16.vlgmr.msra.gmra.mrb[64].mxu0 %v11780_v3  ;;  %16773 = vmatprep.subr.bf16.mxu1 %v20235_v16 }
 0x89f   :  { %16754 = vmatpush3.bf16.msra.mxu0 %v18108_v45  ;;  %16769 = vmatprep.mubr.msk.bf16.mxu0 %vm18183_vm2, %v20235_v16 }
 0x8a0   :  { %15144 = vmatmul.mubr.bf16.vlgmr.msra.gmra.mrb[64].mxu1 %v11782_v63  ;;  %16755 = vmatprep.subr.bf16.mxu0 %v20235_v16 }
 0x8a1   :  { %16789 = vmatprep.mubr.msk.bf16.mxu1 %vm18183_vm2, %v20235_v16  ;;  %16774 = vmatpush3.bf16.msra.mxu1 %v18116_v26 }
 0x8a2   :  { %16775 = vmatprep.subr.bf16.mxu1 %v20235_v16 }
 0x8a3   :  { %16756 = vmatpush3.bf16.msra.mxu0 %v18109_v52 }
 0x8a4   :  { %16757 = vmatprep.subr.bf16.mxu0 %v20235_v16 }
 0x8a5   :  { %16776 = vmatpush3.bf16.msra.mxu1 %v18117_v34 }
 0x8a6   :  { %16777 = vmatprep.subr.bf16.mxu1 %v20235_v16 }
 0x8a7   :  { %16758 = vmatpush3.bf16.msra.mxu0 %v18110_v50 }
 0x8a8   :  { %16759 = vmatprep.subr.bf16.mxu0 %v20235_v16 }
 0x8a9   :  { %16778 = vmatpush3.bf16.msra.mxu1 %v18118_v44 }
 0x8aa   :  { %16779 = vmatprep.subr.bf16.mxu1 %v20235_v16 }
 0x8ab   :  { %16760 = vmatpush3.bf16.msra.mxu0 %v18111_v10  ;;  %v16277_v10 = vld [vmem:[%s22072_s13] ss:$0 sm:$0xff] }
 0x8ac   :  { %16761 = vmatprep.subr.bf16.mxu0 %v20235_v16 }
 0x8af   :  { %16762 = vmatpush3.bf16.msra.mxu0 %v18112_v13 }
 0x8b0   :  { %16763 = vmatprep.subr.bf16.mxu0 %v20235_v16 }
 0x8b3   :  { %16764 = vmatpush3.bf16.msra.mxu0 %v18113_v12 }
 0x8b4   :  { %16765 = vmatprep.subr.bf16.mxu0 %v20235_v16 }
 0x8b7   :  { %16766 = vmatpush3.bf16.msra.mxu0 %v18114_v25 }
 0x8b8   :  { %16767 = vmatprep.subr.bf16.mxu0 %v20235_v16 }
 0x8ba   :  { %v16487_v7 = vpop.f32.mrb[44].mxu0 }
 0x8bb   :  { %v16488_v41 = vpop.f32.mrb[45].mxu0  ;;  %16768 = vmatpush3.bf16.msra.mxu0 %v18115_v11 }
 0x8bc   :  { %v16489_v28 = vadd.f32 %v16488_v41, %v16487_v7  ;;  %v16490_v0 = vpop.f32.mrb[46].mxu0  ;;  %v16509_v53 = vpop.f32.mrb[44].mxu1 }
 0x8bd   :  { %v16491_v32 = vpop.f32.mrb[47].mxu0  ;;  %v16510_v36 = vpop.f32.mrb[45].mxu1 }
 0x8be   :  { %v14706_v30 = vadd.f32 %v16489_v28, %v14666_v2  ;;  %v16511_v49 = vadd.f32 %v16510_v36, %v16509_v53  ;;  %v16512_v23 = vpop.f32.mrb[46].mxu1  ;;  %v18119_v2 = vld [vmem:[%s22073_s14 + $0x18] sm:$0xff]  }
 0x8bf   :  { %v16513_v5 = vpop.f32.mrb[47].mxu1  ;;  %16780 = vmatpush3.bf16.msra.mxu1 %v18119_v2 }
 0x8c0   :  { %v14746_v54 = vadd.f32 %v16511_v49, %v14706_v30  ;;  %16781 = vmatprep.subr.bf16.mxu1 %v20235_v16 }
 0x8c3   :  { %16782 = vmatpush3.bf16.msra.mxu1 %v18120_v29 }
 0x8c4   :  { %16783 = vmatprep.subr.bf16.mxu1 %v20235_v16 }
 0x8c7   :  { %16784 = vmatpush3.bf16.msra.mxu1 %v18121_v39 }
 0x8c8   :  { %16785 = vmatprep.subr.bf16.mxu1 %v20235_v16 }
 0x8da   :  { %v16531_v19 = vpop.f32.mrb[48].mxu0 }
 0x8db   :  { %v16532_v40 = vpop.f32.mrb[49].mxu0 }
 0x8dc   :  { %v16533_v37 = vadd.f32 %v16532_v40, %v16531_v19  ;;  %v16534_v8 = vpop.f32.mrb[50].mxu0  ;;  %v16553_v6 = vpop.f32.mrb[48].mxu1 }
 0x8dd   :  { %v16535_v14 = vpop.f32.mrb[51].mxu0  ;;  %v16554_v61 = vpop.f32.mrb[49].mxu1 }
 0x8de   :  { %v14786_v62 = vadd.f32 %v16533_v37, %v14746_v54  ;;  %v16555_v38 = vadd.f32 %v16554_v61, %v16553_v6  ;;  %v16556_v55 = vpop.f32.mrb[50].mxu1 }
 0x8df   :  { %v16557_v46 = vpop.f32.mrb[51].mxu1 }
 0x8e0   :  { %v14826_v18 = vadd.f32 %v16555_v38, %v14786_v62  ;;  %v18122_v46 = vld [vmem:[%s22073_s14 + $0x30] sm:$0xff]  }
 0x8e1   :  { %16786 = vmatpush3.bf16.msra.mxu1 %v18122_v46 }
 0x8e2   :  { %16787 = vmatprep.subr.bf16.mxu1 %v20235_v16 }
 0x8fa   :  { %v16575_v42 = vpop.f32.mrb[52].mxu0 }
 0x8fb   :  { %v16576_v59 = vpop.f32.mrb[53].mxu0 }
 0x8fc   :  { %v16577_v15 = vadd.f32 %v16576_v59, %v16575_v42  ;;  %v16578_v47 = vpop.f32.mrb[54].mxu0  ;;  %v16597_v22 = vpop.f32.mrb[52].mxu1 }
 0x8fd   :  { %v16579_v17 = vpop.f32.mrb[55].mxu0  ;;  %v16598_v24 = vpop.f32.mrb[53].mxu1 }
 0x8fe   :  { %v14866_v33 = vadd.f32 %v16577_v15, %v14826_v18  ;;  %v16599_v27 = vadd.f32 %v16598_v24, %v16597_v22  ;;  %v16600_v56 = vpop.f32.mrb[54].mxu1  ;;  %v18123_v18 = vld [vmem:[%s22073_s14 + $0x38] sm:$0xff]   ;;  %v16286_v22 = vld [vmem:[%s22074_s15] ss:$0 sm:$0xff]  ;;  %s18184_s14 = smov [#allocation9]  }
 0x8ff   :  { %v16601_v1 = vpop.f32.mrb[55].mxu1  ;;  %16788 = vmatpush3.bf16.msra.mxu1 %v18123_v18  ;;  %s15385_s28 = sshll.u32 %s18184_s14, 4  ;;  %s15386_s28 = int_to_ptr.vmem [resolvable:$true] %s15385_s28 }
 0x900   :  { %v14906_v48 = vadd.f32 %v16599_v27, %v14866_v33  ;;  %s18143_s13 = scalar_lea.vmem %s15386_s28, 32  ;;  %p18148_p1 = scmp.lt.s32.totalorder %s15386_s28, %s15386_s28 }
 0x901   :  { %p18144_p0 = scmp.ne.s32.totalorder %s15386_s28, %s18143_s13  ;;  %p18149_p2 = scmp.lt.s32.totalorder %s18143_s13, %s18143_s13 }
 0x903   :  { %p18150_p3 = por %p18149_p2, %p18148_p1 }
 0x905   :  { %p18151_p4 = pnand %p18150_p3, %p18144_p0 }
 0x91a   :  { %v16619_v20 = vpop.f32.mrb[56].mxu0 }
 0x91b   :  { %v16620_v58 = vpop.f32.mrb[57].mxu0 }
 0x91c   :  { %v16621_v9 = vadd.f32 %v16620_v58, %v16619_v20  ;;  %v16622_v35 = vpop.f32.mrb[58].mxu0  ;;  %v16641_v51 = vpop.f32.mrb[56].mxu1 }
 0x91d   :  { %v16623_v60 = vpop.f32.mrb[59].mxu0  ;;  %v16642_v4 = vpop.f32.mrb[57].mxu1 }
 0x91e   :  { %v14946_v21 = vadd.f32 %v16621_v9, %v14906_v48  ;;  %v16643_v43 = vadd.f32 %v16642_v4, %v16641_v51  ;;  %v16644_v31 = vpop.f32.mrb[58].mxu1 }
 0x91f   :  { %v16645_v57 = vpop.f32.mrb[59].mxu1 }
 0x920   :  { %v14986_v3 = vadd.f32 %v16643_v43, %v14946_v21 }
 0x951   :  { %v16663_v63 = vpop.f32.mrb[60].mxu0 }
 0x952   :  { %v16664_v7 = vpop.f32.mrb[61].mxu0 }
 0x953   :  { %v16665_v41 = vadd.f32 %v16664_v7, %v16663_v63  ;;  %v16666_v28 = vpop.f32.mrb[62].mxu0  ;;  %v16685_v0 = vpop.f32.mrb[60].mxu1 }
 0x954   :  { %v16667_v53 = vpop.f32.mrb[63].mxu0  ;;  %v16686_v32 = vpop.f32.mrb[61].mxu1 }
 0x955   :  { %v15026_v36 = vadd.f32 %v16665_v41, %v14986_v3  ;;  %v16687_v30 = vadd.f32 %v16686_v32, %v16685_v0  ;;  %v16688_v49 = vpop.f32.mrb[62].mxu1 }
 0x956   :  { %v16689_v23 = vpop.f32.mrb[63].mxu1 }
 0x957   :  { %v15066_v5 = vadd.f32 %v16687_v30, %v15026_v36 }
 0x971   :  { %v16707_v54 = vpop.f32.mrb[64].mxu0 }
 0x972   :  { %v16708_v45 = vpop.f32.mrb[65].mxu0 }
 0x973   :  { %v16709_v52 = vadd.f32 %v16708_v45, %v16707_v54  ;;  %v16710_v19 = vpop.f32.mrb[66].mxu0  ;;  %v16729_v40 = vpop.f32.mrb[64].mxu1 }
 0x974   :  { %v16711_v37 = vpop.f32.mrb[67].mxu0  ;;  %v16730_v8 = vpop.f32.mrb[65].mxu1 }
 0x975   :  { %v15106_v6 = vadd.f32 %v16709_v52, %v15066_v5  ;;  %v16731_v14 = vadd.f32 %v16730_v8, %v16729_v40  ;;  %v16732_v61 = vpop.f32.mrb[66].mxu1 }
 0x976   :  { %v16733_v50 = vpop.f32.mrb[67].mxu1 }
 0x977   :  { %v15146_v62 = vadd.f32 %v16731_v14, %v15106_v6 }
 0x979   :  { %v15151_v38 = vmax.f32 %v15146_v62, 0.0 }
 0x97b   :  { %v15152_v55 = vpack.c.bf16 %v15151_v38, %v15151_v38 }
 0x97d   :  { %16770 = vmatmul.mubr.bf16.vlgmr.msra.gmra.mrb[68].mxu0 %v15152_v55 }
 0xa50   :  { %v15258_v13 = vpop.f32.mrb[68].mxu0 }
 0xa51   :  { %v15259_v12 = vadd.f32 %v16277_v10, %v15258_v13  ;;  %v16771_v42 = vpop.f32.mrb[69].mxu0 }
 0xa52   :  { %v15261_v59 = vpop.f32.mrb[70].mxu0 }
 0xa53   :  { %v15264_v25 = vmax.f32 %v15259_v12, 0.0  ;;  %v16772_v15 = vpop.f32.mrb[71].mxu0 }
 0xa55   :  { %v15265_v47 = vpack.c.bf16 %v15264_v25, %v15264_v25 }
 0xa57   :  { %16790 = vmatmul.mubr.bf16.vlgmr.msra.gmra.mrb[68].mxu1 %v15265_v47 }
 0xb2a   :  { %v15371_v16 = vpop.f32.mrb[68].mxu1 }
 0xb2b   :  { %v15372_v17 = vadd.f32 %v16286_v22, %v15371_v16  ;;  %v16791_v24 = vpop.f32.mrb[69].mxu1 }
 0xb2c   :  { %v15374_v11 = vpop.f32.mrb[70].mxu1 }
 0xb2d   :  { %v16792_v26 = vpop.f32.mrb[71].mxu1  ;;  %15378 = vst.msk [vmem:[#allocation9] sm:$0x3] %vm15377_vm3, %v15372_v17 }
 0xb2e   :  { %18154 = shalt.err (!%p18151_p4)
}
 0xb2f   :  { %s18155_s15 = scalar_lea.hbm %s22075_s16, 32 }
 0xb30   :  { %p18156_p5 = scmp.ne.s32.totalorder %s22075_s16, %s18155_s15  ;;  %p18159_p6 = scmp.lt.u32.totalorder %s18155_s15, %s22075_s16 }
 0xb32   :  { %p18161_p7 = pnand %p18159_p6, %p18156_p5 }
 0xb34   :  { %18164 = shalt.err (!%p18161_p7)
}
 0xb35   :  { %15388 = dma.vmem_to_hbm [thread:$0]  %s15386_s28, 32, %s22075_s16, [#allocation10]  }
 0xb36   :  { %18165 = dma.done.wait [#allocation10], 32  }
 0xb37   :  { %18166 = vsyncadd [#allocation10], 4294967264 }
 0xb38   :  { %15392 = vsyncpa [#allocation10], 1 }

</bundles_post_ra>
